<compile_context>
chip_gen: v7x
topology: tpu7x:2x2x1
jax: 0.10.0
libtpu: 0.0.40
codegen_flags: <defaults>
</compile_context>

<pallas_src>
import functools
import math

import jax
import jax.numpy as jnp
from jax.experimental import pallas as pl
from jax.experimental.pallas import tpu as pltpu


_DTYPE = jnp.bfloat16      # activation / matmul dtype (f32 accumulation on MXU)
_LN_EPS = 1e-12            # BERT LayerNorm eps

# Abramowitz & Stegun 7.1.26 erf polynomial constants (|err| ~1.5e-7 in f32)
_ERF_P = 0.3275911
_ERF_A1 = 0.254829592
_ERF_A2 = -0.284496736
_ERF_A3 = 1.421413741
_ERF_A4 = -1.453152027
_ERF_A5 = 1.061405429
_INV_SQRT2 = 0.7071067811865476

# q @ k^T: contract the last dim of both operands (no explicit transpose op)
_NT_DIMS = (((1,), (1,)), ((), ()))


# ----------------------------- in-kernel helpers ----------------------------

def _layernorm(x, gamma, beta, eps):
    mu = jnp.mean(x, axis=-1, keepdims=True)
    var = jnp.mean((x - mu) ** 2, axis=-1, keepdims=True)
    return (x - mu) * jax.lax.rsqrt(var + eps) * gamma + beta


def _gelu_erf(x_f32):
    """Exact (erf-form) GELU. Polynomial evaluated in bf16: the result feeds a
    bf16 matmul anyway, and bf16 VALUs (v6e/v7x) process 2x elements per vreg;
    on v5e Mosaic extends to f32 internally, so this is never worse."""
    xb = x_f32.astype(_DTYPE)
    xs = xb * _INV_SQRT2
    ax = jnp.abs(xs)
    t = 1.0 / (1.0 + _ERF_P * ax)
    poly = t * (_ERF_A1 + t * (_ERF_A2 + t * (_ERF_A3 + t * (_ERF_A4 + t * _ERF_A5))))
    erf = 1.0 - poly * jnp.exp(-ax * ax)
    erf = jnp.where(xs < 0, -erf, erf)
    return 0.5 * xb * (1.0 + erf)                      # bf16


# ----------------------------- Pallas kernels -------------------------------

def _emb_ln_kernel(word_ref, pt_ref, g_ref, b_ref, o_ref, *, eps):
    # (word + pos + type) sum fused with the embedding LayerNorm (f32 stats).
    x = word_ref[...] + pt_ref[...]
    o_ref[...] = _layernorm(x, g_ref[...], b_ref[...], eps).astype(o_ref.dtype)


def _encoder_layer_kernel(x_ref, bias_ref, wqkv_ref, bqkv_ref, wo_ref, bo_ref,
                          g1_ref, b1_ref, wi_ref, bi_ref, wf_ref, bf_ref,
                          g2_ref, b2_ref, o_ref, qkv_s, ctx_s,
                          *, n_heads, scale, eps):
    """One full BERT encoder layer for one batch element, entirely in VMEM."""
    x = x_ref[...]                                     # (S, H) bf16, also the residual
    seq, hidden = x.shape
    dh = hidden // n_heads

    # ---- fused Q|K|V projection: one (S,H) x (H,3H) MXU pass into VMEM scratch
    qkv_s[...] = (jnp.dot(x, wqkv_ref[...], preferred_element_type=jnp.float32)
                  + bqkv_ref[...]).astype(qkv_s.dtype)

    bias = bias_ref[0]                                 # (1, S) f32 additive mask bias

    # ---- per-head attention (static unroll). Heads are 32-lane column slices of
    #      the (S, 3H) scratch; context is written back in (S, H) layout directly,
    #      so no transposes / head-minor layouts ever exist.
    for hd in range(n_heads):
        lo = hd * dh
        q = qkv_s[:, lo:lo + dh]                       # (S, dh) bf16
        k = qkv_s[:, hidden + lo:hidden + lo + dh]
        v = qkv_s[:, 2 * hidden + lo:2 * hidden + lo + dh]
        s = jax.lax.dot_general(q, k, _NT_DIMS,
                                preferred_element_type=jnp.float32) * scale + bias
        # max-subtraction keeps the denominator >= 1 even for a fully-masked row
        s = s - jnp.max(s, axis=-1, keepdims=True)
        p = jnp.exp(s)
        p = p * pl.reciprocal(jnp.sum(p, axis=-1, keepdims=True), approx=True)
        ctx_s[:, lo:lo + dh] = jnp.dot(
            p.astype(v.dtype), v, preferred_element_type=jnp.float32
        ).astype(ctx_s.dtype)

    # ---- attention out-projection + residual + LayerNorm (residual never leaves VMEM)
    y = (jnp.dot(ctx_s[...], wo_ref[...], preferred_element_type=jnp.float32)
         + bo_ref[...] + x.astype(jnp.float32))
    h1 = _layernorm(y, g1_ref[...], b1_ref[...], eps)  # f32 (S, H)

    # ---- FFN up-proj + exact GELU + down-proj + residual + LayerNorm
    u = (jnp.dot(h1.astype(x.dtype), wi_ref[...], preferred_element_type=jnp.float32)
         + bi_ref[...])
    a = _gelu_erf(u)                                   # bf16 (S, I)
    z = (jnp.dot(a, wf_ref[...], preferred_element_type=jnp.float32)
         + bf_ref[...] + h1)
    o_ref[...] = _layernorm(z, g2_ref[...], b2_ref[...], eps).astype(o_ref.dtype)


def _pooler_head_kernel(cls_ref, wp_ref, bp_ref, wo_ref, bo_ref, o_ref):
    # BERT pooler tanh(W x + b) fused with the 3-class classifier head.
    pooled = jnp.tanh(
        jnp.dot(cls_ref[...], wp_ref[...], preferred_element_type=jnp.float32)
        + bp_ref[...])
    o_ref[...] = (jnp.dot(pooled.astype(wo_ref.dtype), wo_ref[...],
                          preferred_element_type=jnp.float32)
                  + bo_ref[...]).astype(o_ref.dtype)


# ----------------------------- kernel wrappers -------------------------------

_PAR = pltpu.CompilerParams(dimension_semantics=("parallel",))


def embed_layernorm(word, pos_type, gamma, beta, batch, seq, hidden):
    return pl.pallas_call(
        functools.partial(_emb_ln_kernel, eps=_LN_EPS),
        out_shape=jax.ShapeDtypeStruct((batch * seq, hidden), _DTYPE),
        grid=(batch,),
        in_specs=[pl.BlockSpec((seq, hidden), lambda b: (b, 0)),
                  pl.BlockSpec((seq, hidden), lambda b: (0, 0)),
                  pl.BlockSpec((1, hidden), lambda b: (0, 0)),
                  pl.BlockSpec((1, hidden), lambda b: (0, 0))],
        out_specs=pl.BlockSpec((seq, hidden), lambda b: (b, 0)),
        compiler_params=_PAR,
    )(word, pos_type, gamma, beta)


def encoder_layer(hidden_act, bias, lyr, batch, seq, hidden, n_heads, inter):
    kern = functools.partial(_encoder_layer_kernel, n_heads=n_heads,
                             scale=1.0 / math.sqrt(hidden // n_heads), eps=_LN_EPS)
    rep = lambda r, c: pl.BlockSpec((r, c), lambda b: (0, 0))   # weights: fetched once
    return pl.pallas_call(
        kern,
        out_shape=jax.ShapeDtypeStruct((batch * seq, hidden), _DTYPE),
        grid=(batch,),                                  # even #steps -> 2/2 on v7x megacore
        in_specs=[
            pl.BlockSpec((seq, hidden), lambda b: (b, 0)),      # hidden state (per batch elt)
            pl.BlockSpec((1, 1, seq), lambda b: (b, 0, 0)),     # mask bias
            rep(hidden, 3 * hidden), rep(1, 3 * hidden),        # wqkv, bqkv
            rep(hidden, hidden), rep(1, hidden),                # wo, bo
            rep(1, hidden), rep(1, hidden),                     # attn LN gamma, beta
            rep(hidden, inter), rep(1, inter),                  # wi, bi
            rep(inter, hidden), rep(1, hidden),                 # wf, bf
            rep(1, hidden), rep(1, hidden),                     # ffn LN gamma, beta
        ],
        out_specs=pl.BlockSpec((seq, hidden), lambda b: (b, 0)),
        scratch_shapes=[pltpu.VMEM((seq, 3 * hidden), _DTYPE),  # fused QKV
                        pltpu.VMEM((seq, hidden), _DTYPE)],     # attention context
        compiler_params=_PAR,
    )(hidden_act, bias,
      lyr["wqkv"], lyr["bqkv"], lyr["wo"], lyr["bo"],
      lyr["attn_ln_g"], lyr["attn_ln_b"],
      lyr["wi"], lyr["bi"], lyr["wf"], lyr["bf"],
      lyr["ffn_ln_g"], lyr["ffn_ln_b"])


def pooler_head(cls_tok, wp, bp, wo, bo):
    batch, hidden = cls_tok.shape
    c = wo.shape[1]
    return pl.pallas_call(
        _pooler_head_kernel,
        out_shape=jax.ShapeDtypeStruct((batch, c), jnp.float32),
        grid=(1,),
        in_specs=[pl.BlockSpec((batch, hidden), lambda i: (0, 0)),
                  pl.BlockSpec((hidden, hidden), lambda i: (0, 0)),
                  pl.BlockSpec((1, hidden), lambda i: (0, 0)),
                  pl.BlockSpec((hidden, c), lambda i: (0, 0)),
                  pl.BlockSpec((1, c), lambda i: (0, 0))],
        out_specs=pl.BlockSpec((batch, c), lambda i: (0, 0)),
    )(cls_tok, wp, bp, wo, bo)


# ----------------------------- model definition -----------------------------

CFG = dict(vocab_size=1000, hidden=128, n_layers=2, n_heads=4,
           intermediate=512, max_pos=128, type_vocab=2, n_classes=3)


def init_params(key):
    """Synthetic BERT weights. Matmul weights stored in bf16 ONCE (no per-forward
    casts, half the weight HBM traffic); biases / LN params kept f32 and already
    shaped (1, N) for lane-dense in-kernel broadcasts."""
    h, inter = CFG["hidden"], CFG["intermediate"]
    keys = iter(jax.random.split(key, 64))

    def w(shape, dtype=_DTYPE):
        return (0.02 * jax.random.normal(next(keys), shape, dtype=jnp.float32)).astype(dtype)

    zeros = lambda s: jnp.zeros(s, jnp.float32)
    ones = lambda s: jnp.ones(s, jnp.float32)

    params = {
        "word_emb": w((CFG["vocab_size"], h), jnp.float32),
        "pos_emb": w((CFG["max_pos"], h), jnp.float32),
        "type_emb": w((CFG["type_vocab"], h), jnp.float32),
        "emb_ln_g": ones((1, h)), "emb_ln_b": zeros((1, h)),
        "layers": [],
        "pooler_w": w((h, h)), "pooler_b": zeros((1, h)),
        "out_w": w((h, CFG["n_classes"])), "out_b": zeros((1, CFG["n_classes"])),
    }
    for _ in range(CFG["n_layers"]):
        params["layers"].append({
            # fused q|k|v projection weight (columns ordered [q | k | v]),
            # mathematically identical to BERT's three separate nn.Linear layers.
            "wqkv": w((h, 3 * h)), "bqkv": zeros((1, 3 * h)),
            "wo": w((h, h)), "bo": zeros((1, h)),
            "attn_ln_g": ones((1, h)), "attn_ln_b": zeros((1, h)),
            "wi": w((h, inter)), "bi": zeros((1, inter)),
            "wf": w((inter, h)), "bf": zeros((1, h)),
            "ffn_ln_g": ones((1, h)), "ffn_ln_b": zeros((1, h)),
        })
    return params


def sentiment_classifier_forward(params, input_ids, attention_mask):
    """Equivalent of SentimentClassifier.forward(input_ids, attention_mask) in eval
    mode (all dropouts, incl. the p=0.3 head dropout, are identity)."""
    batch, seq = input_ids.shape
    h = CFG["hidden"]

    # --- BERT embeddings: XLA gathers, then fused (sum + LayerNorm) Pallas kernel ---
    word = jnp.take(params["word_emb"], input_ids, axis=0).reshape(batch * seq, h)
    pos_type = params["pos_emb"][:seq] + params["type_emb"][0][None, :]   # token_type_ids = 0
    hidden = embed_layernorm(word, pos_type, params["emb_ln_g"], params["emb_ln_b"],
                             batch, seq, h)

    # additive attention-mask bias, computed once per forward (shared across heads/layers)
    bias = ((1.0 - attention_mask.astype(jnp.float32)) * -1e9).reshape(batch, 1, seq)

    # --- BERT encoder: ONE fused Pallas kernel per layer; hidden stays (B*S, H) bf16,
    #     no reshapes/transposes between pallas_calls ---
    for lyr in params["layers"]:
        hidden = encoder_layer(hidden, bias, lyr, batch, seq, h,
                               CFG["n_heads"], CFG["intermediate"])

    # --- BERT pooler + SentimentClassifier head (dropout = identity in eval) ---
    cls_tok = hidden.reshape(batch, seq, h)[:, 0, :]                      # (B, H)
    return pooler_head(cls_tok, params["pooler_w"], params["pooler_b"],
                       params["out_w"], params["out_b"])                  # (B, n_classes)


# ---------------------------------- main ------------------------------------

if __name__ == "__main__":
    key = jax.random.PRNGKey(0)
    pkey, ikey = jax.random.split(key)
    params = init_params(pkey)

    B, S = 4, 128
    input_ids = jax.random.randint(ikey, (B, S), 0, CFG["vocab_size"], dtype=jnp.int32)
    lengths = jnp.array([S, (3 * S) // 4, S // 2, S // 4], dtype=jnp.int32)
    attention_mask = (jnp.arange(S)[None, :] < lengths[:, None]).astype(jnp.int32)

    logits = jax.jit(sentiment_classifier_forward)(params, input_ids, attention_mask)
    logits = jax.block_until_ready(logits)
    assert logits.shape == (B, CFG["n_classes"])
    assert bool(jnp.all(jnp.isfinite(logits)))
    print("KERNEL_OK")
</pallas_src>

<mosaic_0001>
module attributes {stable_mosaic.version = 11 : i64} {
  func.func @_emb_ln_kernel(%arg0: i32, %arg1: memref<128x128xf32, #tpu.memory_space<vmem>>, %arg2: memref<128x128xf32, #tpu.memory_space<vmem>>, %arg3: memref<1x128xf32, #tpu.memory_space<vmem>>, %arg4: memref<1x128xf32, #tpu.memory_space<vmem>>, %arg5: memref<128x128xbf16, #tpu.memory_space<vmem>>) attributes {dimension_semantics = [#tpu.dimension_semantics<parallel>], iteration_bounds = array<i64: 4>, scalar_prefetch = 0 : i64, scratch_operands = 0 : i64, tpu.core_type = #tpu.core_type<tc>, window_params = [{transform_indices = @transform_0, window_bounds = array<i64: 128, 128>}, {pipeline_mode = #tpu.pipeline_mode<synchronous>, transform_indices = @transform_1, window_bounds = array<i64: 128, 128>}, {pipeline_mode = #tpu.pipeline_mode<synchronous>, transform_indices = @transform_2, window_bounds = array<i64: 1, 128>}, {pipeline_mode = #tpu.pipeline_mode<synchronous>, transform_indices = @transform_3, window_bounds = array<i64: 1, 128>}, {transform_indices = @transform_4, window_bounds = array<i64: 128, 128>}]} {
    %c0 = arith.constant 0 : index
    %c0_0 = arith.constant 0 : index
    %0 = vector.load %arg1[%c0, %c0_0] : memref<128x128xf32, #tpu.memory_space<vmem>>, vector<128x128xf32>
    %c0_1 = arith.constant 0 : index
    %c0_2 = arith.constant 0 : index
    %1 = vector.load %arg2[%c0_1, %c0_2] : memref<128x128xf32, #tpu.memory_space<vmem>>, vector<128x128xf32>
    %2 = arith.addf %0, %1 : vector<128x128xf32>
    %c0_3 = arith.constant 0 : index
    %c0_4 = arith.constant 0 : index
    %3 = vector.load %arg3[%c0_3, %c0_4] : memref<1x128xf32, #tpu.memory_space<vmem>>, vector<1x128xf32>
    %c0_5 = arith.constant 0 : index
    %c0_6 = arith.constant 0 : index
    %4 = vector.load %arg4[%c0_5, %c0_6] : memref<1x128xf32, #tpu.memory_space<vmem>>, vector<1x128xf32>
    %cst = arith.constant dense<0.000000e+00> : vector<128xf32>
    %5 = vector.multi_reduction <add>, %2, %cst [1] : vector<128x128xf32> to vector<128xf32>
    %6 = vector.shape_cast %5 : vector<128xf32> to vector<128x1xf32>
    %cst_7 = arith.constant 1.280000e+02 : f32
    %7 = vector.broadcast %cst_7 : f32 to vector<128x1xf32>
    %8 = arith.divf %6, %7 : vector<128x1xf32>
    %9 = vector.broadcast %8 : vector<128x1xf32> to vector<128x128xf32>
    %10 = arith.subf %2, %9 : vector<128x128xf32>
    %11 = arith.mulf %10, %10 : vector<128x128xf32>
    %cst_8 = arith.constant dense<0.000000e+00> : vector<128xf32>
    %12 = vector.multi_reduction <add>, %11, %cst_8 [1] : vector<128x128xf32> to vector<128xf32>
    %13 = vector.shape_cast %12 : vector<128xf32> to vector<128x1xf32>
    %cst_9 = arith.constant 1.280000e+02 : f32
    %14 = vector.broadcast %cst_9 : f32 to vector<128x1xf32>
    %15 = arith.divf %13, %14 : vector<128x1xf32>
    %16 = vector.broadcast %8 : vector<128x1xf32> to vector<128x128xf32>
    %17 = arith.subf %2, %16 : vector<128x128xf32>
    %cst_10 = arith.constant 9.99999996E-13 : f32
    %18 = vector.broadcast %cst_10 : f32 to vector<128x1xf32>
    %19 = arith.addf %15, %18 : vector<128x1xf32>
    %20 = math.rsqrt %19 : vector<128x1xf32>
    %21 = vector.broadcast %20 : vector<128x1xf32> to vector<128x128xf32>
    %22 = arith.mulf %17, %21 : vector<128x128xf32>
    %23 = vector.broadcast %3 : vector<1x128xf32> to vector<128x128xf32>
    %24 = arith.mulf %22, %23 : vector<128x128xf32>
    %25 = vector.broadcast %4 : vector<1x128xf32> to vector<128x128xf32>
    %26 = arith.addf %24, %25 : vector<128x128xf32>
    %27 = arith.truncf %26 : vector<128x128xf32> to vector<128x128xbf16>
    %c0_11 = arith.constant 0 : index
    %c0_12 = arith.constant 0 : index
    %28 = vector.load %arg5[%c0_11, %c0_12] : memref<128x128xbf16, #tpu.memory_space<vmem>>, vector<128x128xbf16>
    tpu.vector_store %arg5[%c0_11, %c0_12], %27 {strides = array<i32>} : memref<128x128xbf16, #tpu.memory_space<vmem>>, vector<128x128xbf16>,
    return
  }
  func.func @transform_0(%arg0: i32) -> (i32, i32) {
    %c0_i32 = arith.constant 0 : i32
    %c0_i32_0 = arith.constant 0 : i32
    return %arg0, %c0_i32 : i32, i32
  }
  func.func @transform_1(%arg0: i32) -> (i32, i32) {
    %c0_i32 = arith.constant 0 : i32
    %c0_i32_0 = arith.constant 0 : i32
    %c0_i32_1 = arith.constant 0 : i32
    return %c0_i32, %c0_i32_0 : i32, i32
  }
  func.func @transform_2(%arg0: i32) -> (i32, i32) {
    %c0_i32 = arith.constant 0 : i32
    %c0_i32_0 = arith.constant 0 : i32
    %c0_i32_1 = arith.constant 0 : i32
    return %c0_i32, %c0_i32_0 : i32, i32
  }
  func.func @transform_3(%arg0: i32) -> (i32, i32) {
    %c0_i32 = arith.constant 0 : i32
    %c0_i32_0 = arith.constant 0 : i32
    %c0_i32_1 = arith.constant 0 : i32
    return %c0_i32, %c0_i32_0 : i32, i32
  }
  func.func @transform_4(%arg0: i32) -> (i32, i32) {
    %c0_i32 = arith.constant 0 : i32
    %c0_i32_0 = arith.constant 0 : i32
    return %arg0, %c0_i32 : i32, i32
  }
}

module attributes {stable_mosaic.version = 11 : i64} {
  func.func @_encoder_layer_kernel(%arg0: i32, %arg1: memref<128x128xbf16, #tpu.memory_space<vmem>>, %arg2: memref<1x1x128xf32, #tpu.memory_space<vmem>>, %arg3: memref<128x384xbf16, #tpu.memory_space<vmem>>, %arg4: memref<1x384xf32, #tpu.memory_space<vmem>>, %arg5: memref<128x128xbf16, #tpu.memory_space<vmem>>, %arg6: memref<1x128xf32, #tpu.memory_space<vmem>>, %arg7: memref<1x128xf32, #tpu.memory_space<vmem>>, %arg8: memref<1x128xf32, #tpu.memory_space<vmem>>, %arg9: memref<128x512xbf16, #tpu.memory_space<vmem>>, %arg10: memref<1x512xf32, #tpu.memory_space<vmem>>, %arg11: memref<512x128xbf16, #tpu.memory_space<vmem>>, %arg12: memref<1x128xf32, #tpu.memory_space<vmem>>, %arg13: memref<1x128xf32, #tpu.memory_space<vmem>>, %arg14: memref<1x128xf32, #tpu.memory_space<vmem>>, %arg15: memref<128x128xbf16, #tpu.memory_space<vmem>>, %arg16: memref<128x384xbf16, #tpu.memory_space<vmem>>, %arg17: memref<128x128xbf16, #tpu.memory_space<vmem>>) attributes {dimension_semantics = [#tpu.dimension_semantics<parallel>], iteration_bounds = array<i64: 4>, scalar_prefetch = 0 : i64, scratch_operands = 2 : i64, tpu.core_type = #tpu.core_type<tc>, window_params = [{transform_indices = @transform_0, window_bounds = array<i64: 128, 128>}, {transform_indices = @transform_1, window_bounds = array<i64: 1, 1, 128>}, {pipeline_mode = #tpu.pipeline_mode<synchronous>, transform_indices = @transform_2, window_bounds = array<i64: 128, 384>}, {pipeline_mode = #tpu.pipeline_mode<synchronous>, transform_indices = @transform_3, window_bounds = array<i64: 1, 384>}, {pipeline_mode = #tpu.pipeline_mode<synchronous>, transform_indices = @transform_4, window_bounds = array<i64: 128, 128>}, {pipeline_mode = #tpu.pipeline_mode<synchronous>, transform_indices = @transform_5, window_bounds = array<i64: 1, 128>}, {pipeline_mode = #tpu.pipeline_mode<synchronous>, transform_indices = @transform_6, window_bounds = array<i64: 1, 128>}, {pipeline_mode = #tpu.pipeline_mode<synchronous>, transform_indices = @transform_7, window_bounds = array<i64: 1, 128>}, {pipeline_mode = #tpu.pipeline_mode<synchronous>, transform_indices = @transform_8, window_bounds = array<i64: 128, 512>}, {pipeline_mode = #tpu.pipeline_mode<synchronous>, transform_indices = @transform_9, window_bounds = array<i64: 1, 512>}, {pipeline_mode = #tpu.pipeline_mode<synchronous>, transform_indices = @transform_10, window_bounds = array<i64: 512, 128>}, {pipeline_mode = #tpu.pipeline_mode<synchronous>, transform_indices = @transform_11, window_bounds = array<i64: 1, 128>}, {pipeline_mode = #tpu.pipeline_mode<synchronous>, transform_indices = @transform_12, window_bounds = array<i64: 1, 128>}, {pipeline_mode = #tpu.pipeline_mode<synchronous>, transform_indices = @transform_13, window_bounds = array<i64: 1, 128>}, {transform_indices = @transform_14, window_bounds = array<i64: 128, 128>}]} {
    %c0 = arith.constant 0 : index
    %c0_0 = arith.constant 0 : index
    %0 = vector.load %arg1[%c0, %c0_0] : memref<128x128xbf16, #tpu.memory_space<vmem>>, vector<128x128xbf16>
    %c0_1 = arith.constant 0 : index
    %c0_2 = arith.constant 0 : index
    %1 = vector.load %arg3[%c0_1, %c0_2] : memref<128x384xbf16, #tpu.memory_space<vmem>>, vector<128x384xbf16>
    %cst = arith.constant dense<0.000000e+00> : vector<128x384xf32>
    %2 = tpu.matmul %0, %1, %cst {dimension_numbers = #tpu.dot_dimension_numbers<[1], [0], [0], [1], [0, 0, 1, 1], [], []>} : vector<128x128xbf16>, vector<128x384xbf16>, vector<128x384xf32> -> vector<128x384xf32>
    %c0_3 = arith.constant 0 : index
    %c0_4 = arith.constant 0 : index
    %3 = vector.load %arg4[%c0_3, %c0_4] : memref<1x384xf32, #tpu.memory_space<vmem>>, vector<1x384xf32>
    %4 = vector.broadcast %3 : vector<1x384xf32> to vector<128x384xf32>
    %5 = arith.addf %2, %4 : vector<128x384xf32>
    %6 = arith.truncf %5 : vector<128x384xf32> to vector<128x384xbf16>
    %c0_5 = arith.constant 0 : index
    %c0_6 = arith.constant 0 : index
    %7 = vector.load %arg16[%c0_5, %c0_6] : memref<128x384xbf16, #tpu.memory_space<vmem>>, vector<128x384xbf16>
    tpu.vector_store %arg16[%c0_5, %c0_6], %6 {strides = array<i32>} : memref<128x384xbf16, #tpu.memory_space<vmem>>, vector<128x384xbf16>,
    %c0_7 = arith.constant 0 : index
    %c0_8 = arith.constant 0 : index
    %c0_9 = arith.constant 0 : index
    %8 = vector.load %arg2[%c0_7, %c0_8, %c0_9] : memref<1x1x128xf32, #tpu.memory_space<vmem>>, vector<1x1x128xf32>
    %9 = vector.shape_cast %8 : vector<1x1x128xf32> to vector<1x128xf32>
    %c0_10 = arith.constant 0 : index
    %c0_11 = arith.constant 0 : index
    %10 = vector.load %arg16[%c0_10, %c0_11] : memref<128x384xbf16, #tpu.memory_space<vmem>>, vector<128x32xbf16>
    %c0_12 = arith.constant 0 : index
    %c128 = arith.constant 128 : index
    %11 = vector.load %arg16[%c0_12, %c128] : memref<128x384xbf16, #tpu.memory_space<vmem>>, vector<128x32xbf16>
    %c0_13 = arith.constant 0 : index
    %c256 = arith.constant 256 : index
    %12 = vector.load %arg16[%c0_13, %c256] : memref<128x384xbf16, #tpu.memory_space<vmem>>, vector<128x32xbf16>
    %cst_14 = arith.constant dense<0.000000e+00> : vector<128x128xf32>
    %13 = tpu.matmul %10, %11, %cst_14 {dimension_numbers = #tpu.dot_dimension_numbers<[1], [1], [0], [0], [0, 0, 1, 0], [], []>} : vector<128x32xbf16>, vector<128x32xbf16>, vector<128x128xf32> -> vector<128x128xf32>
    %cst_15 = arith.constant 0.176776692 : f32
    %14 = vector.broadcast %cst_15 : f32 to vector<128x128xf32>
    %15 = arith.mulf %13, %14 : vector<128x128xf32>
    %16 = vector.broadcast %9 : vector<1x128xf32> to vector<128x128xf32>
    %17 = arith.addf %15, %16 : vector<128x128xf32>
    %cst_16 = arith.constant dense<0xFF800000> : vector<128xf32>
    %18 = vector.multi_reduction <maximumf>, %17, %cst_16 [1] : vector<128x128xf32> to vector<128xf32>
    %19 = vector.shape_cast %18 : vector<128xf32> to vector<128x1xf32>
    %20 = vector.broadcast %19 : vector<128x1xf32> to vector<128x128xf32>
    %21 = arith.subf %17, %20 : vector<128x128xf32>
    %22 = math.exp %21 : vector<128x128xf32>
    %cst_17 = arith.constant dense<0.000000e+00> : vector<128xf32>
    %23 = vector.multi_reduction <add>, %22, %cst_17 [1] : vector<128x128xf32> to vector<128xf32>
    %24 = vector.shape_cast %23 : vector<128xf32> to vector<128x1xf32>
    %25 = tpu.reciprocal %24 {approx = true} : vector<128x1xf32> -> vector<128x1xf32>
    %26 = vector.broadcast %25 : vector<128x1xf32> to vector<128x128xf32>
    %27 = arith.mulf %22, %26 : vector<128x128xf32>
    %28 = arith.truncf %27 : vector<128x128xf32> to vector<128x128xbf16>
    %cst_18 = arith.constant dense<0.000000e+00> : vector<128x32xf32>
    %29 = tpu.matmul %28, %12, %cst_18 {dimension_numbers = #tpu.dot_dimension_numbers<[1], [0], [0], [1], [0, 0, 1, 1], [], []>} : vector<128x128xbf16>, vector<128x32xbf16>, vector<128x32xf32> -> vector<128x32xf32>
    %30 = arith.truncf %29 : vector<128x32xf32> to vector<128x32xbf16>
    %c0_19 = arith.constant 0 : index
    %c0_20 = arith.constant 0 : index
    %31 = vector.load %arg17[%c0_19, %c0_20] : memref<128x128xbf16, #tpu.memory_space<vmem>>, vector<128x32xbf16>
    tpu.vector_store %arg17[%c0_19, %c0_20], %30 {strides = array<i32>} : memref<128x128xbf16, #tpu.memory_space<vmem>>, vector<128x32xbf16>,
    %c0_21 = arith.constant 0 : index
    %c32 = arith.constant 32 : index
    %32 = vector.load %arg16[%c0_21, %c32] : memref<128x384xbf16, #tpu.memory_space<vmem>>, vector<128x32xbf16>
    %c0_22 = arith.constant 0 : index
    %c160 = arith.constant 160 : index
    %33 = vector.load %arg16[%c0_22, %c160] : memref<128x384xbf16, #tpu.memory_space<vmem>>, vector<128x32xbf16>
    %c0_23 = arith.constant 0 : index
    %c288 = arith.constant 288 : index
    %34 = vector.load %arg16[%c0_23, %c288] : memref<128x384xbf16, #tpu.memory_space<vmem>>, vector<128x32xbf16>
    %cst_24 = arith.constant dense<0.000000e+00> : vector<128x128xf32>
    %35 = tpu.matmul %32, %33, %cst_24 {dimension_numbers = #tpu.dot_dimension_numbers<[1], [1], [0], [0], [0, 0, 1, 0], [], []>} : vector<128x32xbf16>, vector<128x32xbf16>, vector<128x128xf32> -> vector<128x128xf32>
    %cst_25 = arith.constant 0.176776692 : f32
    %36 = vector.broadcast %cst_25 : f32 to vector<128x128xf32>
    %37 = arith.mulf %35, %36 : vector<128x128xf32>
    %38 = vector.broadcast %9 : vector<1x128xf32> to vector<128x128xf32>
    %39 = arith.addf %37, %38 : vector<128x128xf32>
    %cst_26 = arith.constant dense<0xFF800000> : vector<128xf32>
    %40 = vector.multi_reduction <maximumf>, %39, %cst_26 [1] : vector<128x128xf32> to vector<128xf32>
    %41 = vector.shape_cast %40 : vector<128xf32> to vector<128x1xf32>
    %42 = vector.broadcast %41 : vector<128x1xf32> to vector<128x128xf32>
    %43 = arith.subf %39, %42 : vector<128x128xf32>
    %44 = math.exp %43 : vector<128x128xf32>
    %cst_27 = arith.constant dense<0.000000e+00> : vector<128xf32>
    %45 = vector.multi_reduction <add>, %44, %cst_27 [1] : vector<128x128xf32> to vector<128xf32>
    %46 = vector.shape_cast %45 : vector<128xf32> to vector<128x1xf32>
    %47 = tpu.reciprocal %46 {approx = true} : vector<128x1xf32> -> vector<128x1xf32>
    %48 = vector.broadcast %47 : vector<128x1xf32> to vector<128x128xf32>
    %49 = arith.mulf %44, %48 : vector<128x128xf32>
    %50 = arith.truncf %49 : vector<128x128xf32> to vector<128x128xbf16>
    %cst_28 = arith.constant dense<0.000000e+00> : vector<128x32xf32>
    %51 = tpu.matmul %50, %34, %cst_28 {dimension_numbers = #tpu.dot_dimension_numbers<[1], [0], [0], [1], [0, 0, 1, 1], [], []>} : vector<128x128xbf16>, vector<128x32xbf16>, vector<128x32xf32> -> vector<128x32xf32>
    %52 = arith.truncf %51 : vector<128x32xf32> to vector<128x32xbf16>
    %c0_29 = arith.constant 0 : index
    %c32_30 = arith.constant 32 : index
    %53 = vector.load %arg17[%c0_29, %c32_30] : memref<128x128xbf16, #tpu.memory_space<vmem>>, vector<128x32xbf16>
    tpu.vector_store %arg17[%c0_29, %c32_30], %52 {strides = array<i32>} : memref<128x128xbf16, #tpu.memory_space<vmem>>, vector<128x32xbf16>,
    %c0_31 = arith.constant 0 : index
    %c64 = arith.constant 64 : index
    %54 = vector.load %arg16[%c0_31, %c64] : memref<128x384xbf16, #tpu.memory_space<vmem>>, vector<128x32xbf16>
    %c0_32 = arith.constant 0 : index
    %c192 = arith.constant 192 : index
    %55 = vector.load %arg16[%c0_32, %c192] : memref<128x384xbf16, #tpu.memory_space<vmem>>, vector<128x32xbf16>
    %c0_33 = arith.constant 0 : index
    %c320 = arith.constant 320 : index
    %56 = vector.load %arg16[%c0_33, %c320] : memref<128x384xbf16, #tpu.memory_space<vmem>>, vector<128x32xbf16>
    %cst_34 = arith.constant dense<0.000000e+00> : vector<128x128xf32>
    %57 = tpu.matmul %54, %55, %cst_34 {dimension_numbers = #tpu.dot_dimension_numbers<[1], [1], [0], [0], [0, 0, 1, 0], [], []>} : vector<128x32xbf16>, vector<128x32xbf16>, vector<128x128xf32> -> vector<128x128xf32>
    %cst_35 = arith.constant 0.176776692 : f32
    %58 = vector.broadcast %cst_35 : f32 to vector<128x128xf32>
    %59 = arith.mulf %57, %58 : vector<128x128xf32>
    %60 = vector.broadcast %9 : vector<1x128xf32> to vector<128x128xf32>
    %61 = arith.addf %59, %60 : vector<128x128xf32>
    %cst_36 = arith.constant dense<0xFF800000> : vector<128xf32>
    %62 = vector.multi_reduction <maximumf>, %61, %cst_36 [1] : vector<128x128xf32> to vector<128xf32>
    %63 = vector.shape_cast %62 : vector<128xf32> to vector<128x1xf32>
    %64 = vector.broadcast %63 : vector<128x1xf32> to vector<128x128xf32>
    %65 = arith.subf %61, %64 : vector<128x128xf32>
    %66 = math.exp %65 : vector<128x128xf32>
    %cst_37 = arith.constant dense<0.000000e+00> : vector<128xf32>
    %67 = vector.multi_reduction <add>, %66, %cst_37 [1] : vector<128x128xf32> to vector<128xf32>
    %68 = vector.shape_cast %67 : vector<128xf32> to vector<128x1xf32>
    %69 = tpu.reciprocal %68 {approx = true} : vector<128x1xf32> -> vector<128x1xf32>
    %70 = vector.broadcast %69 : vector<128x1xf32> to vector<128x128xf32>
    %71 = arith.mulf %66, %70 : vector<128x128xf32>
    %72 = arith.truncf %71 : vector<128x128xf32> to vector<128x128xbf16>
    %cst_38 = arith.constant dense<0.000000e+00> : vector<128x32xf32>
    %73 = tpu.matmul %72, %56, %cst_38 {dimension_numbers = #tpu.dot_dimension_numbers<[1], [0], [0], [1], [0, 0, 1, 1], [], []>} : vector<128x128xbf16>, vector<128x32xbf16>, vector<128x32xf32> -> vector<128x32xf32>
    %74 = arith.truncf %73 : vector<128x32xf32> to vector<128x32xbf16>
    %c0_39 = arith.constant 0 : index
    %c64_40 = arith.constant 64 : index
    %75 = vector.load %arg17[%c0_39, %c64_40] : memref<128x128xbf16, #tpu.memory_space<vmem>>, vector<128x32xbf16>
    tpu.vector_store %arg17[%c0_39, %c64_40], %74 {strides = array<i32>} : memref<128x128xbf16, #tpu.memory_space<vmem>>, vector<128x32xbf16>,
    %c0_41 = arith.constant 0 : index
    %c96 = arith.constant 96 : index
    %76 = vector.load %arg16[%c0_41, %c96] : memref<128x384xbf16, #tpu.memory_space<vmem>>, vector<128x32xbf16>
    %c0_42 = arith.constant 0 : index
    %c224 = arith.constant 224 : index
    %77 = vector.load %arg16[%c0_42, %c224] : memref<128x384xbf16, #tpu.memory_space<vmem>>, vector<128x32xbf16>
    %c0_43 = arith.constant 0 : index
    %c352 = arith.constant 352 : index
    %78 = vector.load %arg16[%c0_43, %c352] : memref<128x384xbf16, #tpu.memory_space<vmem>>, vector<128x32xbf16>
    %cst_44 = arith.constant dense<0.000000e+00> : vector<128x128xf32>
    %79 = tpu.matmul %76, %77, %cst_44 {dimension_numbers = #tpu.dot_dimension_numbers<[1], [1], [0], [0], [0, 0, 1, 0], [], []>} : vector<128x32xbf16>, vector<128x32xbf16>, vector<128x128xf32> -> vector<128x128xf32>
    %cst_45 = arith.constant 0.176776692 : f32
    %80 = vector.broadcast %cst_45 : f32 to vector<128x128xf32>
    %81 = arith.mulf %79, %80 : vector<128x128xf32>
    %82 = vector.broadcast %9 : vector<1x128xf32> to vector<128x128xf32>
    %83 = arith.addf %81, %82 : vector<128x128xf32>
    %cst_46 = arith.constant dense<0xFF800000> : vector<128xf32>
    %84 = vector.multi_reduction <maximumf>, %83, %cst_46 [1] : vector<128x128xf32> to vector<128xf32>
    %85 = vector.shape_cast %84 : vector<128xf32> to vector<128x1xf32>
    %86 = vector.broadcast %85 : vector<128x1xf32> to vector<128x128xf32>
    %87 = arith.subf %83, %86 : vector<128x128xf32>
    %88 = math.exp %87 : vector<128x128xf32>
    %cst_47 = arith.constant dense<0.000000e+00> : vector<128xf32>
    %89 = vector.multi_reduction <add>, %88, %cst_47 [1] : vector<128x128xf32> to vector<128xf32>
    %90 = vector.shape_cast %89 : vector<128xf32> to vector<128x1xf32>
    %91 = tpu.reciprocal %90 {approx = true} : vector<128x1xf32> -> vector<128x1xf32>
    %92 = vector.broadcast %91 : vector<128x1xf32> to vector<128x128xf32>
    %93 = arith.mulf %88, %92 : vector<128x128xf32>
    %94 = arith.truncf %93 : vector<128x128xf32> to vector<128x128xbf16>
    %cst_48 = arith.constant dense<0.000000e+00> : vector<128x32xf32>
    %95 = tpu.matmul %94, %78, %cst_48 {dimension_numbers = #tpu.dot_dimension_numbers<[1], [0], [0], [1], [0, 0, 1, 1], [], []>} : vector<128x128xbf16>, vector<128x32xbf16>, vector<128x32xf32> -> vector<128x32xf32>
    %96 = arith.truncf %95 : vector<128x32xf32> to vector<128x32xbf16>
    %c0_49 = arith.constant 0 : index
    %c96_50 = arith.constant 96 : index
    %97 = vector.load %arg17[%c0_49, %c96_50] : memref<128x128xbf16, #tpu.memory_space<vmem>>, vector<128x32xbf16>
    tpu.vector_store %arg17[%c0_49, %c96_50], %96 {strides = array<i32>} : memref<128x128xbf16, #tpu.memory_space<vmem>>, vector<128x32xbf16>,
    %c0_51 = arith.constant 0 : index
    %c0_52 = arith.constant 0 : index
    %98 = vector.load %arg17[%c0_51, %c0_52] : memref<128x128xbf16, #tpu.memory_space<vmem>>, vector<128x128xbf16>
    %c0_53 = arith.constant 0 : index
    %c0_54 = arith.constant 0 : index
    %99 = vector.load %arg5[%c0_53, %c0_54] : memref<128x128xbf16, #tpu.memory_space<vmem>>, vector<128x128xbf16>
    %cst_55 = arith.constant dense<0.000000e+00> : vector<128x128xf32>
    %100 = tpu.matmul %98, %99, %cst_55 {dimension_numbers = #tpu.dot_dimension_numbers<[1], [0], [0], [1], [0, 0, 1, 1], [], []>} : vector<128x128xbf16>, vector<128x128xbf16>, vector<128x128xf32> -> vector<128x128xf32>
    %c0_56 = arith.constant 0 : index
    %c0_57 = arith.constant 0 : index
    %101 = vector.load %arg6[%c0_56, %c0_57] : memref<1x128xf32, #tpu.memory_space<vmem>>, vector<1x128xf32>
    %102 = vector.broadcast %101 : vector<1x128xf32> to vector<128x128xf32>
    %103 = arith.addf %100, %102 : vector<128x128xf32>
    %104 = arith.extf %0 : vector<128x128xbf16> to vector<128x128xf32>
    %105 = arith.addf %103, %104 : vector<128x128xf32>
    %c0_58 = arith.constant 0 : index
    %c0_59 = arith.constant 0 : index
    %106 = vector.load %arg7[%c0_58, %c0_59] : memref<1x128xf32, #tpu.memory_space<vmem>>, vector<1x128xf32>
    %c0_60 = arith.constant 0 : index
    %c0_61 = arith.constant 0 : index
    %107 = vector.load %arg8[%c0_60, %c0_61] : memref<1x128xf32, #tpu.memory_space<vmem>>, vector<1x128xf32>
    %cst_62 = arith.constant dense<0.000000e+00> : vector<128xf32>
    %108 = vector.multi_reduction <add>, %105, %cst_62 [1] : vector<128x128xf32> to vector<128xf32>
    %109 = vector.shape_cast %108 : vector<128xf32> to vector<128x1xf32>
    %cst_63 = arith.constant 1.280000e+02 : f32
    %110 = vector.broadcast %cst_63 : f32 to vector<128x1xf32>
    %111 = arith.divf %109, %110 : vector<128x1xf32>
    %112 = vector.broadcast %111 : vector<128x1xf32> to vector<128x128xf32>
    %113 = arith.subf %105, %112 : vector<128x128xf32>
    %114 = arith.mulf %113, %113 : vector<128x128xf32>
    %cst_64 = arith.constant dense<0.000000e+00> : vector<128xf32>
    %115 = vector.multi_reduction <add>, %114, %cst_64 [1] : vector<128x128xf32> to vector<128xf32>
    %116 = vector.shape_cast %115 : vector<128xf32> to vector<128x1xf32>
    %cst_65 = arith.constant 1.280000e+02 : f32
    %117 = vector.broadcast %cst_65 : f32 to vector<128x1xf32>
    %118 = arith.divf %116, %117 : vector<128x1xf32>
    %119 = vector.broadcast %111 : vector<128x1xf32> to vector<128x128xf32>
    %120 = arith.subf %105, %119 : vector<128x128xf32>
    %cst_66 = arith.constant 9.99999996E-13 : f32
    %121 = vector.broadcast %cst_66 : f32 to vector<128x1xf32>
    %122 = arith.addf %118, %121 : vector<128x1xf32>
    %123 = math.rsqrt %122 : vector<128x1xf32>
    %124 = vector.broadcast %123 : vector<128x1xf32> to vector<128x128xf32>
    %125 = arith.mulf %120, %124 : vector<128x128xf32>
    %126 = vector.broadcast %106 : vector<1x128xf32> to vector<128x128xf32>
    %127 = arith.mulf %125, %126 : vector<128x128xf32>
    %128 = vector.broadcast %107 : vector<1x128xf32> to vector<128x128xf32>
    %129 = arith.addf %127, %128 : vector<128x128xf32>
    %130 = arith.truncf %129 : vector<128x128xf32> to vector<128x128xbf16>
    %c0_67 = arith.constant 0 : index
    %c0_68 = arith.constant 0 : index
    %131 = vector.load %arg9[%c0_67, %c0_68] : memref<128x512xbf16, #tpu.memory_space<vmem>>, vector<128x512xbf16>
    %cst_69 = arith.constant dense<0.000000e+00> : vector<128x512xf32>
    %132 = tpu.matmul %130, %131, %cst_69 {dimension_numbers = #tpu.dot_dimension_numbers<[1], [0], [0], [1], [0, 0, 1, 1], [], []>} : vector<128x128xbf16>, vector<128x512xbf16>, vector<128x512xf32> -> vector<128x512xf32>
    %c0_70 = arith.constant 0 : index
    %c0_71 = arith.constant 0 : index
    %133 = vector.load %arg10[%c0_70, %c0_71] : memref<1x512xf32, #tpu.memory_space<vmem>>, vector<1x512xf32>
    %134 = vector.broadcast %133 : vector<1x512xf32> to vector<128x512xf32>
    %135 = arith.addf %132, %134 : vector<128x512xf32>
    %136 = arith.truncf %135 : vector<128x512xf32> to vector<128x512xbf16>
    %cst_72 = arith.constant 7.070310e-01 : bf16
    %137 = vector.broadcast %cst_72 : bf16 to vector<128x512xbf16>
    %138 = arith.mulf %136, %137 : vector<128x512xbf16>
    %139 = math.absf %138 : vector<128x512xbf16>
    %cst_73 = arith.constant 3.281250e-01 : bf16
    %140 = vector.broadcast %cst_73 : bf16 to vector<128x512xbf16>
    %141 = arith.mulf %140, %139 : vector<128x512xbf16>
    %cst_74 = arith.constant 1.000000e+00 : bf16
    %142 = vector.broadcast %cst_74 : bf16 to vector<128x512xbf16>
    %143 = arith.addf %142, %141 : vector<128x512xbf16>
    %cst_75 = arith.constant 1.000000e+00 : bf16
    %144 = vector.broadcast %cst_75 : bf16 to vector<128x512xbf16>
    %145 = arith.divf %144, %143 : vector<128x512xbf16>
    %cst_76 = arith.constant 1.062500e+00 : bf16
    %146 = vector.broadcast %cst_76 : bf16 to vector<128x512xbf16>
    %147 = arith.mulf %145, %146 : vector<128x512xbf16>
    %cst_77 = arith.constant -1.453130e+00 : bf16
    %148 = vector.broadcast %cst_77 : bf16 to vector<128x512xbf16>
    %149 = arith.addf %148, %147 : vector<128x512xbf16>
    %150 = arith.mulf %145, %149 : vector<128x512xbf16>
    %cst_78 = arith.constant 1.421880e+00 : bf16
    %151 = vector.broadcast %cst_78 : bf16 to vector<128x512xbf16>
    %152 = arith.addf %151, %150 : vector<128x512xbf16>
    %153 = arith.mulf %145, %152 : vector<128x512xbf16>
    %cst_79 = arith.constant -2.851560e-01 : bf16
    %154 = vector.broadcast %cst_79 : bf16 to vector<128x512xbf16>
    %155 = arith.addf %154, %153 : vector<128x512xbf16>
    %156 = arith.mulf %145, %155 : vector<128x512xbf16>
    %cst_80 = arith.constant 2.539060e-01 : bf16
    %157 = vector.broadcast %cst_80 : bf16 to vector<128x512xbf16>
    %158 = arith.addf %157, %156 : vector<128x512xbf16>
    %159 = arith.mulf %145, %158 : vector<128x512xbf16>
    %cst_81 = arith.constant 0.000000e+00 : bf16
    %160 = vector.broadcast %cst_81 : bf16 to vector<128x512xbf16>
    %161 = arith.subf %160, %139 : vector<128x512xbf16>
    %162 = arith.mulf %161, %139 : vector<128x512xbf16>
    %163 = math.exp %162 : vector<128x512xbf16>
    %164 = arith.mulf %159, %163 : vector<128x512xbf16>
    %cst_82 = arith.constant 1.000000e+00 : bf16
    %165 = vector.broadcast %cst_82 : bf16 to vector<128x512xbf16>
    %166 = arith.subf %165, %164 : vector<128x512xbf16>
    %cst_83 = arith.constant 0.000000e+00 : bf16
    %167 = vector.broadcast %cst_83 : bf16 to vector<128x512xbf16>
    %168 = arith.cmpf olt, %138, %167 : vector<128x512xbf16>
    %cst_84 = arith.constant 0.000000e+00 : bf16
    %169 = vector.broadcast %cst_84 : bf16 to vector<128x512xbf16>
    %170 = arith.subf %169, %166 : vector<128x512xbf16>
    %171 = arith.select %168, %170, %166 : vector<128x512xi1>, vector<128x512xbf16>
    %cst_85 = arith.constant 5.000000e-01 : bf16
    %172 = vector.broadcast %cst_85 : bf16 to vector<128x512xbf16>
    %173 = arith.mulf %172, %136 : vector<128x512xbf16>
    %cst_86 = arith.constant 1.000000e+00 : bf16
    %174 = vector.broadcast %cst_86 : bf16 to vector<128x512xbf16>
    %175 = arith.addf %174, %171 : vector<128x512xbf16>
    %176 = arith.mulf %173, %175 : vector<128x512xbf16>
    %c0_87 = arith.constant 0 : index
    %c0_88 = arith.constant 0 : index
    %177 = vector.load %arg11[%c0_87, %c0_88] : memref<512x128xbf16, #tpu.memory_space<vmem>>, vector<512x128xbf16>
    %cst_89 = arith.constant dense<0.000000e+00> : vector<128x128xf32>
    %178 = tpu.matmul %176, %177, %cst_89 {dimension_numbers = #tpu.dot_dimension_numbers<[1], [0], [0], [1], [0, 0, 1, 1], [], []>} : vector<128x512xbf16>, vector<512x128xbf16>, vector<128x128xf32> -> vector<128x128xf32>
    %c0_90 = arith.constant 0 : index
    %c0_91 = arith.constant 0 : index
    %179 = vector.load %arg12[%c0_90, %c0_91] : memref<1x128xf32, #tpu.memory_space<vmem>>, vector<1x128xf32>
    %180 = vector.broadcast %179 : vector<1x128xf32> to vector<128x128xf32>
    %181 = arith.addf %178, %180 : vector<128x128xf32>
    %182 = arith.addf %181, %129 : vector<128x128xf32>
    %c0_92 = arith.constant 0 : index
    %c0_93 = arith.constant 0 : index
    %183 = vector.load %arg13[%c0_92, %c0_93] : memref<1x128xf32, #tpu.memory_space<vmem>>, vector<1x128xf32>
    %c0_94 = arith.constant 0 : index
    %c0_95 = arith.constant 0 : index
    %184 = vector.load %arg14[%c0_94, %c0_95] : memref<1x128xf32, #tpu.memory_space<vmem>>, vector<1x128xf32>
    %cst_96 = arith.constant dense<0.000000e+00> : vector<128xf32>
    %185 = vector.multi_reduction <add>, %182, %cst_96 [1] : vector<128x128xf32> to vector<128xf32>
    %186 = vector.shape_cast %185 : vector<128xf32> to vector<128x1xf32>
    %cst_97 = arith.constant 1.280000e+02 : f32
    %187 = vector.broadcast %cst_97 : f32 to vector<128x1xf32>
    %188 = arith.divf %186, %187 : vector<128x1xf32>
    %189 = vector.broadcast %188 : vector<128x1xf32> to vector<128x128xf32>
    %190 = arith.subf %182, %189 : vector<128x128xf32>
    %191 = arith.mulf %190, %190 : vector<128x128xf32>
    %cst_98 = arith.constant dense<0.000000e+00> : vector<128xf32>
    %192 = vector.multi_reduction <add>, %191, %cst_98 [1] : vector<128x128xf32> to vector<128xf32>
    %193 = vector.shape_cast %192 : vector<128xf32> to vector<128x1xf32>
    %cst_99 = arith.constant 1.280000e+02 : f32
    %194 = vector.broadcast %cst_99 : f32 to vector<128x1xf32>
    %195 = arith.divf %193, %194 : vector<128x1xf32>
    %196 = vector.broadcast %188 : vector<128x1xf32> to vector<128x128xf32>
    %197 = arith.subf %182, %196 : vector<128x128xf32>
    %cst_100 = arith.constant 9.99999996E-13 : f32
    %198 = vector.broadcast %cst_100 : f32 to vector<128x1xf32>
    %199 = arith.addf %195, %198 : vector<128x1xf32>
    %200 = math.rsqrt %199 : vector<128x1xf32>
    %201 = vector.broadcast %200 : vector<128x1xf32> to vector<128x128xf32>
    %202 = arith.mulf %197, %201 : vector<128x128xf32>
    %203 = vector.broadcast %183 : vector<1x128xf32> to vector<128x128xf32>
    %204 = arith.mulf %202, %203 : vector<128x128xf32>
    %205 = vector.broadcast %184 : vector<1x128xf32> to vector<128x128xf32>
    %206 = arith.addf %204, %205 : vector<128x128xf32>
    %207 = arith.truncf %206 : vector<128x128xf32> to vector<128x128xbf16>
    %c0_101 = arith.constant 0 : index
    %c0_102 = arith.constant 0 : index
    %208 = vector.load %arg15[%c0_101, %c0_102] : memref<128x128xbf16, #tpu.memory_space<vmem>>, vector<128x128xbf16>
    tpu.vector_store %arg15[%c0_101, %c0_102], %207 {strides = array<i32>} : memref<128x128xbf16, #tpu.memory_space<vmem>>, vector<128x128xbf16>,
    return
  }
  func.func @transform_0(%arg0: i32) -> (i32, i32) {
    %c0_i32 = arith.constant 0 : i32
    %c0_i32_0 = arith.constant 0 : i32
    return %arg0, %c0_i32 : i32, i32
  }
  func.func @transform_1(%arg0: i32) -> (i32, i32, i32) {
    %c0_i32 = arith.constant 0 : i32
    %c0_i32_0 = arith.constant 0 : i32
    %c0_i32_1 = arith.constant 0 : i32
    return %arg0, %c0_i32, %c0_i32_0 : i32, i32, i32
  }
  func.func @transform_2(%arg0: i32) -> (i32, i32) {
    %c0_i32 = arith.constant 0 : i32
    %c0_i32_0 = arith.constant 0 : i32
    %c0_i32_1 = arith.constant 0 : i32
    return %c0_i32, %c0_i32_0 : i32, i32
  }
  func.func @transform_3(%arg0: i32) -> (i32, i32) {
    %c0_i32 = arith.constant 0 : i32
    %c0_i32_0 = arith.constant 0 : i32
    %c0_i32_1 = arith.constant 0 : i32
    return %c0_i32, %c0_i32_0 : i32, i32
  }
  func.func @transform_4(%arg0: i32) -> (i32, i32) {
    %c0_i32 = arith.constant 0 : i32
    %c0_i32_0 = arith.constant 0 : i32
    %c0_i32_1 = arith.constant 0 : i32
    return %c0_i32, %c0_i32_0 : i32, i32
  }
  func.func @transform_5(%arg0: i32) -> (i32, i32) {
    %c0_i32 = arith.constant 0 : i32
    %c0_i32_0 = arith.constant 0 : i32
    %c0_i32_1 = arith.constant 0 : i32
    return %c0_i32, %c0_i32_0 : i32, i32
  }
  func.func @transform_6(%arg0: i32) -> (i32, i32) {
    %c0_i32 = arith.constant 0 : i32
    %c0_i32_0 = arith.constant 0 : i32
    %c0_i32_1 = arith.constant 0 : i32
    return %c0_i32, %c0_i32_0 : i32, i32
  }
  func.func @transform_7(%arg0: i32) -> (i32, i32) {
    %c0_i32 = arith.constant 0 : i32
    %c0_i32_0 = arith.constant 0 : i32
    %c0_i32_1 = arith.constant 0 : i32
    return %c0_i32, %c0_i32_0 : i32, i32
  }
  func.func @transform_8(%arg0: i32) -> (i32, i32) {
    %c0_i32 = arith.constant 0 : i32
    %c0_i32_0 = arith.constant 0 : i32
    %c0_i32_1 = arith.constant 0 : i32
    return %c0_i32, %c0_i32_0 : i32, i32
  }
  func.func @transform_9(%arg0: i32) -> (i32, i32) {
    %c0_i32 = arith.constant 0 : i32
    %c0_i32_0 = arith.constant 0 : i32
    %c0_i32_1 = arith.constant 0 : i32
    return %c0_i32, %c0_i32_0 : i32, i32
  }
  func.func @transform_10(%arg0: i32) -> (i32, i32) {
    %c0_i32 = arith.constant 0 : i32
    %c0_i32_0 = arith.constant 0 : i32
    %c0_i32_1 = arith.constant 0 : i32
    return %c0_i32, %c0_i32_0 : i32, i32
  }
  func.func @transform_11(%arg0: i32) -> (i32, i32) {
    %c0_i32 = arith.constant 0 : i32
    %c0_i32_0 = arith.constant 0 : i32
    %c0_i32_1 = arith.constant 0 : i32
    return %c0_i32, %c0_i32_0 : i32, i32
  }
  func.func @transform_12(%arg0: i32) -> (i32, i32) {
    %c0_i32 = arith.constant 0 : i32
    %c0_i32_0 = arith.constant 0 : i32
    %c0_i32_1 = arith.constant 0 : i32
    return %c0_i32, %c0_i32_0 : i32, i32
  }
  func.func @transform_13(%arg0: i32) -> (i32, i32) {
    %c0_i32 = arith.constant 0 : i32
    %c0_i32_0 = arith.constant 0 : i32
    %c0_i32_1 = arith.constant 0 : i32
    return %c0_i32, %c0_i32_0 : i32, i32
  }
  func.func @transform_14(%arg0: i32) -> (i32, i32) {
    %c0_i32 = arith.constant 0 : i32
    %c0_i32_0 = arith.constant 0 : i32
    return %arg0, %c0_i32 : i32, i32
  }
}

module attributes {stable_mosaic.version = 11 : i64} {
  func.func @_pooler_head_kernel(%arg0: i32, %arg1: memref<4x128xbf16, #tpu.memory_space<vmem>>, %arg2: memref<128x128xbf16, #tpu.memory_space<vmem>>, %arg3: memref<1x128xf32, #tpu.memory_space<vmem>>, %arg4: memref<128x3xbf16, #tpu.memory_space<vmem>>, %arg5: memref<1x3xf32, #tpu.memory_space<vmem>>, %arg6: memref<4x3xf32, #tpu.memory_space<vmem>>) attributes {dimension_semantics = [#tpu.dimension_semantics<arbitrary>], iteration_bounds = array<i64: 1>, scalar_prefetch = 0 : i64, scratch_operands = 0 : i64, tpu.core_type = #tpu.core_type<tc>, window_params = [{pipeline_mode = #tpu.pipeline_mode<synchronous>, transform_indices = @transform_0, window_bounds = array<i64: 4, 128>}, {pipeline_mode = #tpu.pipeline_mode<synchronous>, transform_indices = @transform_1, window_bounds = array<i64: 128, 128>}, {pipeline_mode = #tpu.pipeline_mode<synchronous>, transform_indices = @transform_2, window_bounds = array<i64: 1, 128>}, {pipeline_mode = #tpu.pipeline_mode<synchronous>, transform_indices = @transform_3, window_bounds = array<i64: 128, 3>}, {pipeline_mode = #tpu.pipeline_mode<synchronous>, transform_indices = @transform_4, window_bounds = array<i64: 1, 3>}, {pipeline_mode = #tpu.pipeline_mode<synchronous>, transform_indices = @transform_5, window_bounds = array<i64: 4, 3>}]} {
    %c0 = arith.constant 0 : index
    %c0_0 = arith.constant 0 : index
    %0 = vector.load %arg1[%c0, %c0_0] : memref<4x128xbf16, #tpu.memory_space<vmem>>, vector<4x128xbf16>
    %c0_1 = arith.constant 0 : index
    %c0_2 = arith.constant 0 : index
    %1 = vector.load %arg2[%c0_1, %c0_2] : memref<128x128xbf16, #tpu.memory_space<vmem>>, vector<128x128xbf16>
    %cst = arith.constant dense<0.000000e+00> : vector<4x128xf32>
    %2 = tpu.matmul %0, %1, %cst {dimension_numbers = #tpu.dot_dimension_numbers<[1], [0], [0], [1], [0, 0, 1, 1], [], []>} : vector<4x128xbf16>, vector<128x128xbf16>, vector<4x128xf32> -> vector<4x128xf32>
    %c0_3 = arith.constant 0 : index
    %c0_4 = arith.constant 0 : index
    %3 = vector.load %arg3[%c0_3, %c0_4] : memref<1x128xf32, #tpu.memory_space<vmem>>, vector<1x128xf32>
    %4 = vector.broadcast %3 : vector<1x128xf32> to vector<4x128xf32>
    %5 = arith.addf %2, %4 : vector<4x128xf32>
    %6 = math.tanh %5 : vector<4x128xf32>
    %7 = arith.truncf %6 : vector<4x128xf32> to vector<4x128xbf16>
    %c0_5 = arith.constant 0 : index
    %c0_6 = arith.constant 0 : index
    %8 = vector.load %arg4[%c0_5, %c0_6] : memref<128x3xbf16, #tpu.memory_space<vmem>>, vector<128x3xbf16>
    %cst_7 = arith.constant dense<0.000000e+00> : vector<4x3xf32>
    %9 = tpu.matmul %7, %8, %cst_7 {dimension_numbers = #tpu.dot_dimension_numbers<[1], [0], [0], [1], [0, 0, 1, 1], [], []>} : vector<4x128xbf16>, vector<128x3xbf16>, vector<4x3xf32> -> vector<4x3xf32>
    %c0_8 = arith.constant 0 : index
    %c0_9 = arith.constant 0 : index
    %10 = vector.load %arg5[%c0_8, %c0_9] : memref<1x3xf32, #tpu.memory_space<vmem>>, vector<1x3xf32>
    %11 = vector.broadcast %10 : vector<1x3xf32> to vector<4x3xf32>
    %12 = arith.addf %9, %11 : vector<4x3xf32>
    %c0_10 = arith.constant 0 : index
    %c0_11 = arith.constant 0 : index
    %13 = vector.load %arg6[%c0_10, %c0_11] : memref<4x3xf32, #tpu.memory_space<vmem>>, vector<4x3xf32>
    tpu.vector_store %arg6[%c0_10, %c0_11], %12 {strides = array<i32>} : memref<4x3xf32, #tpu.memory_space<vmem>>, vector<4x3xf32>,
    return
  }
  func.func @transform_0(%arg0: i32) -> (i32, i32) {
    %c0_i32 = arith.constant 0 : i32
    %c0_i32_0 = arith.constant 0 : i32
    %c0_i32_1 = arith.constant 0 : i32
    return %c0_i32, %c0_i32_0 : i32, i32
  }
  func.func @transform_1(%arg0: i32) -> (i32, i32) {
    %c0_i32 = arith.constant 0 : i32
    %c0_i32_0 = arith.constant 0 : i32
    %c0_i32_1 = arith.constant 0 : i32
    return %c0_i32, %c0_i32_0 : i32, i32
  }
  func.func @transform_2(%arg0: i32) -> (i32, i32) {
    %c0_i32 = arith.constant 0 : i32
    %c0_i32_0 = arith.constant 0 : i32
    %c0_i32_1 = arith.constant 0 : i32
    return %c0_i32, %c0_i32_0 : i32, i32
  }
  func.func @transform_3(%arg0: i32) -> (i32, i32) {
    %c0_i32 = arith.constant 0 : i32
    %c0_i32_0 = arith.constant 0 : i32
    %c0_i32_1 = arith.constant 0 : i32
    return %c0_i32, %c0_i32_0 : i32, i32
  }
  func.func @transform_4(%arg0: i32) -> (i32, i32) {
    %c0_i32 = arith.constant 0 : i32
    %c0_i32_0 = arith.constant 0 : i32
    %c0_i32_1 = arith.constant 0 : i32
    return %c0_i32, %c0_i32_0 : i32, i32
  }
  func.func @transform_5(%arg0: i32) -> (i32, i32) {
    %c0_i32 = arith.constant 0 : i32
    %c0_i32_0 = arith.constant 0 : i32
    %c0_i32_1 = arith.constant 0 : i32
    return %c0_i32, %c0_i32_0 : i32, i32
  }
}

</mosaic_0001>

<bundles_post_ra>
// kernel: sentiment_classifier_forward.4
= control target key start
LH: loop header
LB: loop body
LE: loop exit
PB: predicated region body
PF: predicated region fallthrough
CT: control target
= control target key end

     0   :  { %s773_s15 = smov 0   ;;  %s1048_s0 = inlined_call_operand.vmem [shape: f32[512,128], index: 0, kind: input, shape index: {}]   ;;  %s1049_s1 = inlined_call_operand.vmem [shape: f32[128,128], index: 1, kind: input, shape index: {}]   ;;  %s1050_s2 = inlined_call_operand.vmem [shape: f32[1,128], index: 2, kind: input, shape index: {}]   ;;  %s1051_s3 = inlined_call_operand.vmem [shape: f32[1,128], index: 3, kind: input, shape index: {}]   ;;  %s1052_s4 = inlined_call_operand.vmem [shape: bf16[512,128], index: 4, kind: output, shape index: {}]  }
   0x1 LB: > { %s608_s16 = sadd.s32 4294967295, %s746_s15   ;;  %p612_p0 = scmp.ge.s32.totalorder %s746_s15, 1  ;;  %s746_s15 = sphi %s773_s15, %s14_s15  }
   0x2   : > { %p163_p1 = scmp.lt.s32.totalorder %s746_s15, 5 }
   0x4   : > { %p164_p2 = pnand %p612_p0, %p163_p1 }
   0x5   : > { %s613_s17 = sshll.u32 (!%p164_p2), %s608_s16, 4  ;;  %v217_v0 = vld [vmem:[%s1049_s1] sm:$0xff] (!%p164_p2)  ;;  %v219_v1 = vld [vmem:[%s1049_s1 + $0x10] sm:$0xff] (!%p164_p2)  ;;  %v218_v2 = vld [vmem:[%s1049_s1 + $0x8] sm:$0xff] (!%p164_p2) }
   0x6   : > { %167 = sbr.rel (%p164_p2) target bundleno = 365 (0x16d), region = 36  ;;  %p190_p3 = scmp.lt.s32.totalorder (!%p164_p2), %s613_s17, 63  ;;  %v220_v3 = vld [vmem:[%s1049_s1 + $0x18] sm:$0xff] (!%p164_p2)  ;;  %v221_v12 = vld [vmem:[%s1049_s1 + $0x20] sm:$0xff] (!%p164_p2)  ;;  %v222_v15 = vld [vmem:[%s1049_s1 + $0x28] sm:$0xff] (!%p164_p2) }
   0x7   : > { %v223_v18 = vld [vmem:[%s1049_s1 + $0x30] sm:$0xff] (!%p164_p2)  ;;  %v224_v21 = vld [vmem:[%s1049_s1 + $0x38] sm:$0xff] (!%p164_p2)  ;;  %v225_v24 = vld [vmem:[%s1049_s1 + $0x40] sm:$0xff] (!%p164_p2) }
   0x8   : > { %v226_v27 = vld [vmem:[%s1049_s1 + $0x48] sm:$0xff] (!%p164_p2)  ;;  %v227_v30 = vld [vmem:[%s1049_s1 + $0x50] sm:$0xff] (!%p164_p2)  ;;  %v228_v33 = vld [vmem:[%s1049_s1 + $0x58] sm:$0xff] (!%p164_p2) }
   0x9   : > { %v229_v36 = vld [vmem:[%s1049_s1 + $0x60] sm:$0xff] (!%p164_p2)  ;;  %v230_v39 = vld [vmem:[%s1049_s1 + $0x68] sm:$0xff] (!%p164_p2)  ;;  %v231_v42 = vld [vmem:[%s1049_s1 + $0x70] sm:$0xff] (!%p164_p2) }
   0xa   : > { %v232_v45 = vld [vmem:[%s1049_s1 + $0x78] sm:$0xff] (!%p164_p2) }
   0xd   : > { %s1054_s17 = smov (!%p190_p3, %s613_s17), 63 }
   0xe   : > { %s614_s18 = sshll.u32 %s1054_s17, 3  ;;  %s616_s8 = sshll.u32 %s1054_s17, 2 }
   0xf   : > { %s793_s25 = scalar_lea.vmem %s1048_s0, %s614_s18  ;;  %s996_s17 = scalar_lea.vmem %s1052_s4, %s616_s8 }
  0x10   : > { %v201_v4 = vld [vmem:[%s793_s25] sm:$0xff]  ;;  %v203_v5 = vld [vmem:[%s793_s25 + $0x10] sm:$0xff]  ;;  %v202_v6 = vld [vmem:[%s793_s25 + $0x8] sm:$0xff] }
  0x11   : > { %v233_v7 = vadd.f32 %v217_v0, %v201_v4  ;;  %v235_v8 = vadd.f32 %v219_v1, %v203_v5  ;;  %v204_v9 = vld [vmem:[%s793_s25 + $0x18] sm:$0xff]  ;;  %v805_v10 = vadd.f32 %v218_v2, %v202_v6  ;;  %v205_v13 = vld [vmem:[%s793_s25 + $0x20] sm:$0xff]  ;;  %v206_v14 = vld [vmem:[%s793_s25 + $0x28] sm:$0xff] }
  0x12   : > { %v807_v11 = vadd.f32 %v220_v3, %v204_v9  ;;  %v819_v16 = vadd.f32 %v221_v12, %v205_v13  ;;  %v821_v17 = vadd.f32 %v222_v15, %v206_v14  ;;  %v207_v19 = vld [vmem:[%s793_s25 + $0x30] sm:$0xff]  ;;  %v208_v20 = vld [vmem:[%s793_s25 + $0x38] sm:$0xff]  ;;  %v209_v25 = vld [vmem:[%s793_s25 + $0x40] sm:$0xff] }
  0x13   : > { %251 = vadd.xlane.f32.xlu0 %v233_v7  ;;  %255 = vadd.xlane.f32.xlu1 %v235_v8  ;;  %v833_v22 = vadd.f32 %v223_v18, %v207_v19  ;;  %v835_v23 = vadd.f32 %v224_v21, %v208_v20  ;;  %v210_v26 = vld [vmem:[%s793_s25 + $0x48] sm:$0xff]  ;;  %v847_v28 = vadd.f32 %v225_v24, %v209_v25  ;;  %v211_v31 = vld [vmem:[%s793_s25 + $0x50] sm:$0xff]  ;;  %v212_v32 = vld [vmem:[%s793_s25 + $0x58] sm:$0xff] }
  0x14   : > { %v849_v29 = vadd.f32 %v226_v27, %v210_v26  ;;  %v861_v34 = vadd.f32 %v227_v30, %v211_v31  ;;  %v863_v35 = vadd.f32 %v228_v33, %v212_v32  ;;  %v213_v37 = vld [vmem:[%s793_s25 + $0x60] sm:$0xff]  ;;  %v214_v38 = vld [vmem:[%s793_s25 + $0x68] sm:$0xff]  ;;  %v215_v43 = vld [vmem:[%s793_s25 + $0x70] sm:$0xff] }
  0x15   : > { %v875_v40 = vadd.f32 %v229_v36, %v213_v37  ;;  %v877_v41 = vadd.f32 %v230_v39, %v214_v38  ;;  %v216_v44 = vld [vmem:[%s793_s25 + $0x78] sm:$0xff]  ;;  %v889_v46 = vadd.f32 %v231_v42, %v215_v43 }
  0x16   : > { %v891_v47 = vadd.f32 %v232_v45, %v216_v44 }
  0x17   : > { %253 = vadd.xlane.f32.xlu0 %v805_v10  ;;  %257 = vadd.xlane.f32.xlu1 %v807_v11 }
  0x1b   : > { %259 = vadd.xlane.f32.xlu0 %v819_v16  ;;  %261 = vadd.xlane.f32.xlu1 %v821_v17 }
  0x1f   : > { %263 = vadd.xlane.f32.xlu0 %v833_v22  ;;  %265 = vadd.xlane.f32.xlu1 %v835_v23 }
  0x23   : > { %267 = vadd.xlane.f32.xlu0 %v847_v28  ;;  %269 = vadd.xlane.f32.xlu1 %v849_v29 }
  0x27   : > { %271 = vadd.xlane.f32.xlu0 %v861_v34  ;;  %273 = vadd.xlane.f32.xlu1 %v863_v35 }
  0x2b   : > { %275 = vadd.xlane.f32.xlu0 %v875_v40  ;;  %277 = vadd.xlane.f32.xlu1 %v877_v41 }
  0x2f   : > { %279 = vadd.xlane.f32.xlu0 %v889_v46  ;;  %281 = vadd.xlane.f32.xlu1 %v891_v47 }
  0xa0   : > { %v252_v48 = vpop.xlane.xlu0 %251  ;;  %v256_v49 = vpop.xlane.xlu1 %255 }
  0xa1   : > { %v284_v50 = vmul.f32 0.0078125, %v252_v48  ;;  %v286_v51 = vmul.f32 0.0078125, %v256_v49 }
  0xa3   : > { %v895_v52 = vsub.f32 %v233_v7, %v284_v50  ;;  %v897_v53 = vsub.f32 %v235_v8, %v286_v51 }
  0xa4   : > { %v254_v54 = vpop.xlane.xlu0 %253  ;;  %v258_v55 = vpop.xlane.xlu1 %257 }
  0xa5   : > { %v285_v56 = vmul.f32 0.0078125, %v254_v54  ;;  %v316_v57 = vmul.f32 %v895_v52, %v895_v52  ;;  %v287_v58 = vmul.f32 0.0078125, %v258_v55  ;;  %v318_v61 = vmul.f32 %v897_v53, %v897_v53 }
  0xa7   : > { %v902_v59 = vsub.f32 %v805_v10, %v285_v56  ;;  %332 = vadd.xlane.f32.xlu0 %v316_v57  ;;  %v905_v60 = vsub.f32 %v807_v11, %v287_v58 }
  0xa8   : > { %v260_v62 = vpop.xlane.xlu0 %259  ;;  %v262_v63 = vpop.xlane.xlu1 %261 }
  0xa9   : > { %v288_v0 = vmul.f32 0.0078125, %v260_v62  ;;  %v317_v1 = vmul.f32 %v902_v59, %v902_v59  ;;  %v289_v2 = vmul.f32 0.0078125, %v262_v63  ;;  %v319_v5 = vmul.f32 %v905_v60, %v905_v60 }
  0xab   : > { %v912_v3 = vsub.f32 %v819_v16, %v288_v0  ;;  %336 = vadd.xlane.f32.xlu0 %v318_v61  ;;  %334 = vadd.xlane.f32.xlu1 %v317_v1  ;;  %v915_v4 = vsub.f32 %v821_v17, %v289_v2 }
  0xac   : > { %v264_v6 = vpop.xlane.xlu0 %263  ;;  %v266_v7 = vpop.xlane.xlu1 %265 }
  0xad   : > { %v290_v8 = vmul.f32 0.0078125, %v264_v6  ;;  %v320_v9 = vmul.f32 %v912_v3, %v912_v3  ;;  %v291_v10 = vmul.f32 0.0078125, %v266_v7  ;;  %v321_v13 = vmul.f32 %v915_v4, %v915_v4 }
  0xaf   : > { %v922_v11 = vsub.f32 %v833_v22, %v290_v8  ;;  %338 = vadd.xlane.f32.xlu1 %v319_v5  ;;  %340 = vadd.xlane.f32.xlu0 %v320_v9  ;;  %v925_v12 = vsub.f32 %v835_v23, %v291_v10 }
  0xb0   : > { %v268_v14 = vpop.xlane.xlu0 %267  ;;  %v270_v15 = vpop.xlane.xlu1 %269 }
  0xb1   : > { %v292_v16 = vmul.f32 0.0078125, %v268_v14  ;;  %v322_v17 = vmul.f32 %v922_v11, %v922_v11  ;;  %v293_v18 = vmul.f32 0.0078125, %v270_v15  ;;  %v323_v21 = vmul.f32 %v925_v12, %v925_v12 }
  0xb3   : > { %v932_v19 = vsub.f32 %v847_v28, %v292_v16  ;;  %342 = vadd.xlane.f32.xlu1 %v321_v13  ;;  %344 = vadd.xlane.f32.xlu0 %v322_v17  ;;  %v935_v20 = vsub.f32 %v849_v29, %v293_v18  ;;  %v977_v17 = vld [vmem:[%s1050_s2] ss:$0 sm:$0xff] }
  0xb4   : > { %v272_v22 = vpop.xlane.xlu0 %271  ;;  %v274_v23 = vpop.xlane.xlu1 %273 }
  0xb5   : > { %v294_v24 = vmul.f32 0.0078125, %v272_v22  ;;  %v324_v25 = vmul.f32 %v932_v19, %v932_v19  ;;  %v295_v26 = vmul.f32 0.0078125, %v274_v23  ;;  %v325_v29 = vmul.f32 %v935_v20, %v935_v20 }
  0xb7   : > { %v942_v27 = vsub.f32 %v861_v34, %v294_v24  ;;  %346 = vadd.xlane.f32.xlu1 %v323_v21  ;;  %348 = vadd.xlane.f32.xlu0 %v324_v25  ;;  %v945_v28 = vsub.f32 %v863_v35, %v295_v26 }
  0xb8   : > { %v276_v30 = vpop.xlane.xlu0 %275  ;;  %v278_v31 = vpop.xlane.xlu1 %277 }
  0xb9   : > { %v296_v32 = vmul.f32 0.0078125, %v276_v30  ;;  %v326_v33 = vmul.f32 %v942_v27, %v942_v27  ;;  %v297_v36 = vmul.f32 0.0078125, %v278_v31  ;;  %v327_v35 = vmul.f32 %v945_v28, %v945_v28  ;;  %v984_v31 = vld [vmem:[%s1051_s3] ss:$0 sm:$0xff] }
  0xbb   : > { %v952_v37 = vsub.f32 %v875_v40, %v296_v32  ;;  %350 = vadd.xlane.f32.xlu1 %v325_v29  ;;  %352 = vadd.xlane.f32.xlu0 %v326_v33  ;;  %v955_v34 = vsub.f32 %v877_v41, %v297_v36 }
  0xbc   : > { %v280_v38 = vpop.xlane.xlu0 %279  ;;  %v282_v39 = vpop.xlane.xlu1 %281 }
  0xbd   : > { %v298_v42 = vmul.f32 0.0078125, %v280_v38  ;;  %v328_v43 = vmul.f32 %v952_v37, %v952_v37  ;;  %v299_v44 = vmul.f32 0.0078125, %v282_v39  ;;  %v329_v41 = vmul.f32 %v955_v34, %v955_v34 }
  0xbf   : > { %v962_v45 = vsub.f32 %v889_v46, %v298_v42  ;;  %354 = vadd.xlane.f32.xlu1 %v327_v35  ;;  %356 = vadd.xlane.f32.xlu0 %v328_v43  ;;  %v965_v40 = vsub.f32 %v891_v47, %v299_v44 }
  0xc1   : > { %v330_v48 = vmul.f32 %v962_v45, %v962_v45  ;;  %v331_v49 = vmul.f32 %v965_v40, %v965_v40 }
  0xc3   : > { %358 = vadd.xlane.f32.xlu1 %v329_v41  ;;  %360 = vadd.xlane.f32.xlu0 %v330_v48 }
  0xc7   : > { %362 = vadd.xlane.f32.xlu1 %v331_v49 }
 0x134   : > { %v333_v50 = vpop.xlane.xlu0 %332 }
 0x135   : > { %v364_v46 = vmul.f32 0.0078125, %v333_v50 }
 0x137   : > { %v380_v51 = vadd.f32 1e-12, %v364_v46 }
 0x138   : > { %v335_v54 = vpop.xlane.xlu1 %334  ;;  %v337_v55 = vpop.xlane.xlu0 %336 }
 0x139   : > { %708 = vrsqrt.f32 %v380_v51  ;;  %v365_v47 = vmul.f32 0.0078125, %v335_v54  ;;  %v366_v56 = vmul.f32 0.0078125, %v337_v55 }
 0x13b   : > { %v381_v57 = vadd.f32 1e-12, %v365_v47  ;;  %v382_v58 = vadd.f32 1e-12, %v366_v56 }
 0x13c   : > { %v339_v61 = vpop.xlane.xlu1 %338  ;;  %v341_v62 = vpop.xlane.xlu0 %340 }
 0x13d   : > { %710 = vrsqrt.f32 %v381_v57  ;;  %v367_v63 = vmul.f32 0.0078125, %v339_v61  ;;  %v368_v0 = vmul.f32 0.0078125, %v341_v62 }
 0x13e   : > { %712 = vrsqrt.f32 %v382_v58 }
 0x13f   : > { %v383_v1 = vadd.f32 1e-12, %v367_v63  ;;  %v384_v2 = vadd.f32 1e-12, %v368_v0 }
 0x140   : > { %v343_v5 = vpop.xlane.xlu1 %342  ;;  %v345_v6 = vpop.xlane.xlu0 %344 }
 0x141   : > { %714 = vrsqrt.f32 %v383_v1  ;;  %v369_v7 = vmul.f32 0.0078125, %v343_v5  ;;  %v370_v8 = vmul.f32 0.0078125, %v345_v6 }
 0x142   : > { %716 = vrsqrt.f32 %v384_v2 }
 0x143   : > { %v709_v9 = vpop.eup %708  ;;  %v385_v10 = vadd.f32 1e-12, %v369_v7  ;;  %v386_v13 = vadd.f32 1e-12, %v370_v8 }
 0x144   : > { %v412_v14 = vmul.f32 %v709_v9, %v895_v52  ;;  %v347_v15 = vpop.xlane.xlu1 %346  ;;  %v349_v16 = vpop.xlane.xlu0 %348 }
 0x145   : > { %718 = vrsqrt.f32 %v385_v10  ;;  %v371_v18 = vmul.f32 0.0078125, %v347_v15  ;;  %v372_v21 = vmul.f32 0.0078125, %v349_v16 }
 0x146   : > { %720 = vrsqrt.f32 %v386_v13  ;;  %v434_v26 = vmul.f32 %v977_v17, %v412_v14 }
 0x147   : > { %v711_v22 = vpop.eup %710  ;;  %v387_v23 = vadd.f32 1e-12, %v371_v18  ;;  %v388_v24 = vadd.f32 1e-12, %v372_v21 }
 0x148   : > { %v713_v25 = vpop.eup %712  ;;  %v413_v52 = vmul.f32 %v711_v22, %v902_v59  ;;  %v351_v29 = vpop.xlane.xlu1 %350  ;;  %v456_v43 = vadd.f32 %v984_v31, %v434_v26 }
 0x149   : > { %v353_v30 = vpop.xlane.xlu0 %352  ;;  %v414_v32 = vmul.f32 %v713_v25, %v897_v53  ;;  %722 = vrsqrt.f32 %v387_v23  ;;  %v373_v33 = vmul.f32 0.0078125, %v351_v29 }
 0x14a   : > { %v374_v36 = vmul.f32 0.0078125, %v353_v30  ;;  %v435_v35 = vmul.f32 %v977_v17, %v413_v52  ;;  %724 = vrsqrt.f32 %v388_v24 }
 0x14b   : > { %v715_v38 = vpop.eup %714  ;;  %v389_v39 = vadd.f32 1e-12, %v373_v33  ;;  %v436_v41 = vmul.f32 %v977_v17, %v414_v32 }
 0x14c   : > { %v390_v42 = vadd.f32 1e-12, %v374_v36  ;;  %v717_v59 = vpop.eup %716  ;;  %v457_v44 = vadd.f32 %v984_v31, %v435_v35  ;;  %v415_v48 = vmul.f32 %v715_v38, %v905_v60  ;;  %v355_v53 = vpop.xlane.xlu1 %354 }
 0x14d   : > { %v357_v49 = vpop.xlane.xlu0 %356  ;;  %v416_v50 = vmul.f32 %v717_v59, %v912_v3  ;;  %726 = vrsqrt.f32 %v389_v39  ;;  %v375_v46 = vmul.f32 0.0078125, %v355_v53  ;;  %v458_v58 = vadd.f32 %v984_v31, %v436_v41 }
 0x14e   : > { %v656_v51 = vpack.c.bf16 %v457_v44, %v456_v43  ;;  %v437_v54 = vmul.f32 %v977_v17, %v415_v48  ;;  %728 = vrsqrt.f32 %v390_v42  ;;  %v376_v55 = vmul.f32 0.0078125, %v357_v49 }
 0x14f   : > { %v719_v47 = vpop.eup %718  ;;  %v438_v60 = vmul.f32 %v977_v17, %v416_v50  ;;  %v391_v56 = vadd.f32 1e-12, %v375_v46 }
 0x150   : > { %v721_v57 = vpop.eup %720  ;;  %657 = vst [vmem:[%s996_s17] sm:$0xff] %v656_v51   ;;  %v459_v61 = vadd.f32 %v984_v31, %v437_v54  ;;  %v417_v3 = vmul.f32 %v719_v47, %v915_v4  ;;  %v392_v62 = vadd.f32 1e-12, %v376_v55  ;;  %v359_v63 = vpop.xlane.xlu1 %358 }
 0x151   : > { %v361_v0 = vpop.xlane.xlu0 %360  ;;  %v418_v1 = vmul.f32 %v721_v57, %v922_v11  ;;  %730 = vrsqrt.f32 %v391_v56  ;;  %v377_v2 = vmul.f32 0.0078125, %v359_v63  ;;  %v460_v9 = vadd.f32 %v984_v31, %v438_v60 }
 0x152   : > { %v661_v5 = vpack.c.bf16 %v459_v61, %v458_v58  ;;  %v439_v6 = vmul.f32 %v977_v17, %v417_v3  ;;  %732 = vrsqrt.f32 %v392_v62  ;;  %v378_v7 = vmul.f32 0.0078125, %v361_v0 }
 0x153   : > { %v723_v8 = vpop.eup %722  ;;  %v393_v10 = vadd.f32 1e-12, %v377_v2  ;;  %v440_v14 = vmul.f32 %v977_v17, %v418_v1 }
 0x154   : > { %v725_v13 = vpop.eup %724  ;;  %693 = vst [vmem:[%s996_s17 + $0x8] sm:$0xff] %v661_v5   ;;  %v461_v4 = vadd.f32 %v984_v31, %v439_v6  ;;  %v419_v11 = vmul.f32 %v723_v8, %v925_v12  ;;  %v394_v15 = vadd.f32 1e-12, %v378_v7  ;;  %v363_v16 = vpop.xlane.xlu1 %362 }
 0x155   : > { %v420_v18 = vmul.f32 %v725_v13, %v932_v19  ;;  %734 = vrsqrt.f32 %v393_v10  ;;  %v379_v21 = vmul.f32 0.0078125, %v363_v16  ;;  %v462_v52 = vadd.f32 %v984_v31, %v440_v14 }
 0x156   : > { %v666_v22 = vpack.c.bf16 %v461_v4, %v460_v9  ;;  %v441_v23 = vmul.f32 %v977_v17, %v419_v11  ;;  %736 = vrsqrt.f32 %v394_v15 }
 0x157   : > { %v727_v24 = vpop.eup %726  ;;  %v395_v25 = vadd.f32 1e-12, %v379_v21  ;;  %v442_v12 = vmul.f32 %v977_v17, %v420_v18 }
 0x158   : > { %v729_v26 = vpop.eup %728  ;;  %694 = vst [vmem:[%s996_s17 + $0x10] sm:$0xff] %v666_v22   ;;  %v463_v29 = vadd.f32 %v984_v31, %v441_v23  ;;  %v421_v30 = vmul.f32 %v727_v24, %v935_v20 }
 0x159   : > { %v422_v19 = vmul.f32 %v729_v26, %v942_v27  ;;  %738 = vrsqrt.f32 %v395_v25  ;;  %v464_v38 = vadd.f32 %v984_v31, %v442_v12 }
 0x15a   : > { %v671_v32 = vpack.c.bf16 %v463_v29, %v462_v52  ;;  %v443_v33 = vmul.f32 %v977_v17, %v421_v30 }
 0x15b   : > { %v731_v36 = vpop.eup %730  ;;  %v444_v42 = vmul.f32 %v977_v17, %v422_v19 }
 0x15c   : > { %v733_v35 = vpop.eup %732  ;;  %695 = vst [vmem:[%s996_s17 + $0x18] sm:$0xff] %v671_v32   ;;  %v465_v39 = vadd.f32 %v984_v31, %v443_v33  ;;  %v423_v59 = vmul.f32 %v731_v36, %v945_v28 }
 0x15d   : > { %v424_v20 = vmul.f32 %v733_v35, %v952_v37  ;;  %v466_v48 = vadd.f32 %v984_v31, %v444_v42 }
 0x15e   : > { %v676_v27 = vpack.c.bf16 %v465_v39, %v464_v38  ;;  %v445_v43 = vmul.f32 %v977_v17, %v423_v59 }
 0x15f   : > { %v735_v44 = vpop.eup %734  ;;  %v446_v49 = vmul.f32 %v977_v17, %v424_v20 }
 0x160   : > { %v737_v41 = vpop.eup %736  ;;  %696 = vst [vmem:[%s996_s17 + $0x20] sm:$0xff] %v676_v27   ;;  %v467_v53 = vadd.f32 %v984_v31, %v445_v43  ;;  %v425_v50 = vmul.f32 %v735_v44, %v955_v34 }
 0x161   : > { %v426_v28 = vmul.f32 %v737_v41, %v962_v45  ;;  %v468_v54 = vadd.f32 %v984_v31, %v446_v49 }
 0x162   : > { %v681_v46 = vpack.c.bf16 %v467_v53, %v466_v48  ;;  %v447_v37 = vmul.f32 %v977_v17, %v425_v50 }
 0x163   : > { %v739_v51 = vpop.eup %738  ;;  %v448_v47 = vmul.f32 %v977_v17, %v426_v28 }
 0x164   : > { %697 = vst [vmem:[%s996_s17 + $0x28] sm:$0xff] %v681_v46   ;;  %v469_v55 = vadd.f32 %v984_v31, %v447_v37  ;;  %v427_v60 = vmul.f32 %v739_v51, %v965_v40 }
 0x165   : > { %v470_v34 = vadd.f32 %v984_v31, %v448_v47 }
 0x166   : > { %v686_v56 = vpack.c.bf16 %v469_v55, %v468_v54  ;;  %v449_v57 = vmul.f32 %v977_v17, %v427_v60 }
 0x168   : > { %698 = vst [vmem:[%s996_s17 + $0x30] sm:$0xff] %v686_v56   ;;  %v471_v45 = vadd.f32 %v984_v31, %v449_v57 }
 0x16a   : > { %v691_v58 = vpack.c.bf16 %v471_v45, %v470_v34 }
 0x16c   : > { %699 = vst [vmem:[%s996_s17 + $0x38] sm:$0xff] %v691_v58  }
 0x16d PF: > { %s14_s15 = sadd.s32 1, %s746_s15  }
 0x16e   : > { %p11_p4 = scmp.ge.s32.totalorder %s14_s15, 6  }
 0x170   :  { %13 = sbr.rel (!%p11_p4) target bundleno = 1 (0x1), region = 66 }

// kernel: sentiment_classifier_forward.7
= control target key start
LH: loop header
LB: loop body
LE: loop exit
PB: predicated region body
PF: predicated region fallthrough
CT: control target
= control target key end

     0   :  { %v384_v1 = vmov 0.0   ;;  %vm385_vm0 = vmmov 0   ;;  %s486_s0 = inlined_call_operand.vmem [shape: bf16[4,128], index: 0, kind: input, shape index: {}]   ;;  %s487_s1 = inlined_call_operand.vmem [shape: bf16[128,128], index: 1, kind: input, shape index: {}]   ;;  %s488_s2 = inlined_call_operand.vmem [shape: f32[1,128], index: 2, kind: input, shape index: {}]   ;;  %s489_s3 = inlined_call_operand.vmem [shape: bf16[128,3], index: 3, kind: input, shape index: {}]   ;;  %s490_s4 = inlined_call_operand.vmem [shape: f32[1,3], index: 4, kind: input, shape index: {}]   ;;  %s491_s5 = inlined_call_operand.hbm [shape: f32[4,3], index: 5, kind: output, shape index: {}]  }
   0x1   :  { %v342_v0 = vld [vmem:[%s487_s1] sm:$0xff]   ;;  %299 = vmatprep.subr.bf16.mxu0 %v384_v1  ;;  %319 = vmatprep.subr.bf16.mxu1 %v384_v1  ;;  %v343_v2 = vld [vmem:[%s487_s1 + $0x8] sm:$0xff]   ;;  %v344_v3 = vld [vmem:[%s487_s1 + $0x10] sm:$0xff]  }
   0x2   :  { %300 = vmatpush3.bf16.msra.mxu0 %v342_v0  ;;  %315 = vmatprep.mubr.msk.bf16.mxu0 %vm385_vm0, %v384_v1  ;;  %v350_v4 = vld [vmem:[%s489_s3] sm:$0xff]   ;;  %v345_v5 = vld [vmem:[%s487_s1 + $0x18] sm:$0xff]   ;;  %v351_v6 = vld [vmem:[%s489_s3 + $0x8] sm:$0xff]  }
   0x3   :  { %301 = vmatprep.subr.bf16.mxu0 %v384_v1  ;;  %335 = vmatprep.mubr.msk.bf16.mxu1 %vm385_vm0, %v384_v1  ;;  %v346_v7 = vld [vmem:[%s487_s1 + $0x20] sm:$0xff]   ;;  %v352_v8 = vld [vmem:[%s489_s3 + $0x10] sm:$0xff]  }
   0x4   :  { %320 = vmatpush3.bf16.msra.mxu1 %v350_v4 }
   0x5   :  { %321 = vmatprep.subr.bf16.mxu1 %v384_v1 }
   0x6   :  { %302 = vmatpush3.bf16.msra.mxu0 %v343_v2 }
   0x7   :  { %303 = vmatprep.subr.bf16.mxu0 %v384_v1 }
   0x8   :  { %322 = vmatpush3.bf16.msra.mxu1 %v351_v6 }
   0xa   :  { %304 = vmatpush3.bf16.msra.mxu0 %v344_v3 }
   0xb   :  { %305 = vmatprep.subr.bf16.mxu0 %v384_v1 }
   0xe   :  { %306 = vmatpush3.bf16.msra.mxu0 %v345_v5 }
   0xf   :  { %307 = vmatprep.subr.bf16.mxu0 %v384_v1 }
  0x10   :  { %10 = vsyncpa [#allocation3], 0  ;;  %323 = vmatprep.subr.bf16.mxu1 %v384_v1  ;;  %v347_v9 = vld [vmem:[%s487_s1 + $0x28] sm:$0xff]   ;;  %v353_v10 = vld [vmem:[%s489_s3 + $0x18] sm:$0xff]   ;;  %s386_s29 = smov [#allocation2]   ;;  %vm247_vm1 = vcmask 19456  }
  0x11   :  { %324 = vmatpush3.bf16.msra.mxu1 %v352_v8  ;;  %v348_v11 = vld [vmem:[%s487_s1 + $0x30] sm:$0xff]   ;;  %v349_v12 = vld [vmem:[%s487_s1 + $0x38] sm:$0xff]   ;;  %v22_v13 = vld [vmem:[%s486_s0] sm:$0x3] }
  0x12   :  { %308 = vmatpush3.bf16.msra.mxu0 %v346_v7  ;;  %325 = vmatprep.subr.bf16.mxu1 %v384_v1  ;;  %v354_v14 = vld [vmem:[%s489_s3 + $0x20] sm:$0xff]   ;;  %v355_v15 = vld [vmem:[%s489_s3 + $0x28] sm:$0xff]   ;;  %v356_v16 = vld [vmem:[%s489_s3 + $0x30] sm:$0xff]  }
  0x13   :  { %309 = vmatprep.subr.bf16.mxu0 %v384_v1  ;;  %v357_v17 = vld [vmem:[%s489_s3 + $0x38] sm:$0xff]   ;;  %v263_v18 = vld [vmem:[%s488_s2] ss:$0 sm:$0xff]  ;;  %s255_s3 = sshll.u32 %s386_s29, 4  ;;  %s256_s3 = int_to_ptr.vmem [resolvable:$true] %s255_s3 }
  0x14   :  { %v272_v26 = vld [vmem:[%s490_s4] ss:$0 sm:$0xff]  ;;  %s360_s2 = scalar_lea.vmem %s256_s3, 64  ;;  %p365_p1 = scmp.lt.s32.totalorder %s256_s3, %s256_s3 }
  0x15   :  { %326 = vmatpush3.bf16.msra.mxu1 %v353_v10  ;;  %p361_p0 = scmp.ne.s32.totalorder %s256_s3, %s360_s2  ;;  %p366_p2 = scmp.lt.s32.totalorder %s360_s2, %s360_s2 }
  0x16   :  { %310 = vmatpush3.bf16.msra.mxu0 %v347_v9  ;;  %327 = vmatprep.subr.bf16.mxu1 %v384_v1 }
  0x17   :  { %311 = vmatprep.subr.bf16.mxu0 %v384_v1  ;;  %p367_p3 = por %p366_p2, %p365_p1 }
  0x19   :  { %328 = vmatpush3.bf16.msra.mxu1 %v354_v14  ;;  %p368_p4 = pnand %p367_p3, %p361_p0 }
  0x1a   :  { %312 = vmatpush3.bf16.msra.mxu0 %v348_v11  ;;  %329 = vmatprep.subr.bf16.mxu1 %v384_v1 }
  0x1b   :  { %313 = vmatprep.subr.bf16.mxu0 %v384_v1 }
  0x1d   :  { %330 = vmatpush3.bf16.msra.mxu1 %v355_v15 }
  0x1e   :  { %314 = vmatpush3.bf16.msra.mxu0 %v349_v12  ;;  %331 = vmatprep.subr.bf16.mxu1 %v384_v1 }
  0x21   :  { %316 = vmatmul.mubr.bf16.vlgmr.msra.gmra.mrb[0].mxu0 %v22_v13  ;;  %332 = vmatpush3.bf16.msra.mxu1 %v356_v16 }
  0x22   :  { %333 = vmatprep.subr.bf16.mxu1 %v384_v1 }
  0x25   :  { %334 = vmatpush3.bf16.msra.mxu1 %v357_v17 }
  0xf4   :  { %v128_v19 = vpop.f32.mrb[0].mxu0 }
  0xf5   :  { %v129_v20 = vadd.f32 %v263_v18, %v128_v19  ;;  %v317_v21 = vpop.f32.mrb[1].mxu0 }
  0xf6   :  { %v131_v22 = vpop.f32.mrb[2].mxu0 }
  0xf7   :  { %358 = vtanh.f32 %v129_v20  ;;  %v318_v23 = vpop.f32.mrb[3].mxu0 }
 0x101   :  { %v359_v24 = vpop.eup %358 }
 0x102   :  { %v135_v25 = vpack.c.bf16 %v359_v24, %v359_v24 }
 0x104   :  { %336 = vmatmul.mubr.bf16.vlgmr.msra.gmra.mrb[0].mxu1 %v135_v25 }
 0x1d7   :  { %v241_v27 = vpop.f32.mrb[0].mxu1 }
 0x1d8   :  { %v242_v28 = vadd.f32 %v272_v26, %v241_v27  ;;  %v337_v29 = vpop.f32.mrb[1].mxu1 }
 0x1d9   :  { %v244_v30 = vpop.f32.mrb[2].mxu1 }
 0x1da   :  { %v338_v31 = vpop.f32.mrb[3].mxu1  ;;  %248 = vst.msk [vmem:[#allocation2] sm:$0xf] %vm247_vm1, %v242_v28 }
 0x1db   :  { %371 = shalt.err (!%p368_p4)
}
 0x1dc   :  { %s372_s4 = scalar_lea.hbm %s491_s5, 64 }
 0x1dd   :  { %p373_p5 = scmp.ne.s32.totalorder %s491_s5, %s372_s4  ;;  %p376_p6 = scmp.lt.u32.totalorder %s372_s4, %s491_s5 }
 0x1df   :  { %p378_p7 = pnand %p376_p6, %p373_p5 }
 0x1e1   :  { %381 = shalt.err (!%p378_p7)
}
 0x1e2   :  { %258 = dma.vmem_to_hbm [thread:$0]  %s256_s3, 64, %s491_s5, [#allocation3]  }
 0x1e3   :  { %382 = dma.done.wait [#allocation3], 64  }
 0x1e4   :  { %383 = vsyncadd [#allocation3], 4294967232 }
 0x1e5   :  { %262 = vsyncpa [#allocation3], 1 }

// kernel: sentiment_classifier_forward.5
= control target key start
LH: loop header
LB: loop body
LE: loop exit
PB: predicated region body
PF: predicated region fallthrough
CT: control target
= control target key end

     0   :  { %s7446_s29 = smov 0   ;;  %s10656_s0 = inlined_call_operand.vmem [shape: bf16[512,128], index: 0, kind: input, shape index: {}]   ;;  %s10657_s1 = inlined_call_operand.vmem [shape: f32[4,1,128], index: 1, kind: input, shape index: {}]   ;;  %s10658_s2 = inlined_call_operand.vmem [shape: bf16[128,384], index: 2, kind: input, shape index: {}]   ;;  %s10659_s3 = inlined_call_operand.vmem [shape: f32[1,384], index: 3, kind: input, shape index: {}]   ;;  %s10660_s4 = inlined_call_operand.vmem [shape: bf16[128,128], index: 4, kind: input, shape index: {}]   ;;  %s10661_s5 = inlined_call_operand.vmem [shape: f32[1,128], index: 5, kind: input, shape index: {}]   ;;  %s10662_s6 = inlined_call_operand.vmem [shape: f32[1,128], index: 6, kind: input, shape index: {}]   ;;  %s10663_s7 = inlined_call_operand.vmem [shape: f32[1,128], index: 7, kind: input, shape index: {}]   ;;  %s10664_s8 = inlined_call_operand.vmem [shape: bf16[128,512], index: 8, kind: input, shape index: {}]   ;;  %s10665_s9 = inlined_call_operand.vmem [shape: f32[1,512], index: 9, kind: input, shape index: {}]   ;;  %s10666_s10 = inlined_call_operand.vmem [shape: bf16[512,128], index: 10, kind: input, shape index: {}]   ;;  %s10667_s11 = inlined_call_operand.vmem [shape: f32[1,128], index: 11, kind: input, shape index: {}]   ;;  %s10668_s12 = inlined_call_operand.vmem [shape: f32[1,128], index: 12, kind: input, shape index: {}]   ;;  %s10669_s13 = inlined_call_operand.vmem [shape: f32[1,128], index: 13, kind: input, shape index: {}]   ;;  %s10670_s14 = inlined_call_operand.vmem [shape: bf16[512,128], index: 14, kind: output, shape index: {}]  }
   0x1 LB: > { %s7452_s30 = sadd.s32 4294967295, %s7365_s29   ;;  %p5856_p0 = scmp.ge.s32.totalorder %s7365_s29, 1  ;;  %s7365_s29 = sphi %s7446_s29, %s24_s29  }
   0x2   : > { %p421_p1 = scmp.lt.s32.totalorder %s7365_s29, 5 }
   0x4   : > { %p422_p2 = pnand %p5856_p0, %p421_p1 }
   0x6   : > { %425 = sbr.rel (%p422_p2) target bundleno = 4658 (0x1232), region = 76 }
   0xd   : > { %v6753_v0 = vld [vmem:[%s10658_s2 + $0x4] ss:$12 sps:$4 sm:$0xff]   ;;  %s5857_s17 = sshll.u32 %s7452_s30, 4  ;;  %v6755_v1 = vld [vmem:[%s10658_s2] ss:$12 sps:$4 sm:$0xff]   ;;  %v10674_v2 = vmov 0   ;;  %v545_v33 = vlaneseq }
   0xe   : > { %768 = vmatprep.mubr.bf16.mxu0 %v10674_v2  ;;  %p471_p3 = scmp.lt.s32.totalorder %s5857_s17, 63  ;;  %736 = vmatprep.subr.bf16.mxu0 %v6753_v0  ;;  %v6756_v3 = vld [vmem:[%s10658_s2 + $0x1c] ss:$12 sps:$4 sm:$0xff]   ;;  %v6758_v4 = vld [vmem:[%s10658_s2 + $0x18] ss:$12 sps:$4 sm:$0xff]   ;;  %vm1019_vm0 = vcmask 261120  }
   0xf   : > { %737 = vmatpush1.bf16.msra.mxu0 %v6755_v1  ;;  %v6759_v5 = vld [vmem:[%s10658_s2 + $0x34] ss:$12 sps:$4 sm:$0xff]   ;;  %v6761_v6 = vld [vmem:[%s10658_s2 + $0x30] ss:$12 sps:$4 sm:$0xff]   ;;  %v6762_v7 = vld [vmem:[%s10658_s2 + $0x4c] ss:$12 sps:$4 sm:$0xff]  }
  0x10   : > { %s11025_s17 = smov (!%p471_p3, %s5857_s17), 63  ;;  %738 = vmatprep.subr.bf16.mxu0 %v6756_v3  ;;  %v6764_v9 = vld [vmem:[%s10658_s2 + $0x48] ss:$12 sps:$4 sm:$0xff]   ;;  %v6765_v10 = vld [vmem:[%s10658_s2 + $0x64] ss:$12 sps:$4 sm:$0xff]   ;;  %v7555_v34 = vshrl.u32 %v545_v33, 7 }
  0x11   : > { %s5858_s26 = sshll.u32 %s11025_s17, 2  ;;  %v6784_v11 = vld [vmem:[%s10658_s2 + $0x8] ss:$12 sps:$4 sm:$0xff]   ;;  %v6767_v12 = vld [vmem:[%s10658_s2 + $0x60] ss:$12 sps:$4 sm:$0xff]   ;;  %s7368_s24 = smov 96  }
  0x12   : > { %s7484_s18 = scalar_lea.vmem %s10656_s0, %s5858_s26  ;;  %6373 = vmatprep.subr.bf16.mxu1 %v6784_v11  ;;  %v6786_v13 = vld [vmem:[%s10658_s2 + $0x20] ss:$12 sps:$4 sm:$0xff]   ;;  %v6768_v14 = vld [vmem:[%s10658_s2 + $0x7c] ss:$12 sps:$4 sm:$0xff]   ;;  %v6787_v15 = vld [vmem:[%s10658_s2 + $0x38] ss:$12 sps:$4 sm:$0xff]  }
  0x13   : > { %739 = vmatpush1.bf16.msra.mxu0 %v6758_v4  ;;  %v495_v8 = vld [vmem:[%s7484_s18] sm:$0xff]   ;;  %6374 = vmatpush3.bf16.msra.mxu1 %v6784_v11  ;;  %v6773_v18 = vld [vmem:[%s10658_s2 + $0x90] ss:$12 sps:$4 sm:$0xff]   ;;  %v6774_v20 = vld [vmem:[%s10658_s2 + $0xac] ss:$12 sps:$4 sm:$0xff]   ;;  %10762 = vst [vmem:[#allocation4_spill] sm:$0xff] %v7555_v34 }
  0x14   : > { %740 = vmatprep.subr.bf16.mxu0 %v6759_v5  ;;  %6389 = vmatprep.mubr.bf16.mxu1 %v495_v8  ;;  %v6770_v16 = vld [vmem:[%s10658_s2 + $0x78] ss:$12 sps:$4 sm:$0xff]   ;;  %v6771_v17 = vld [vmem:[%s10658_s2 + $0x94] ss:$12 sps:$4 sm:$0xff]   ;;  %v6788_v19 = vld [vmem:[%s10658_s2 + $0x50] ss:$12 sps:$4 sm:$0xff]  }
  0x15   : > { %6375 = vmatprep.subr.bf16.mxu1 %v6786_v13  ;;  %v6789_v21 = vld [vmem:[%s10658_s2 + $0x68] ss:$12 sps:$4 sm:$0xff]   ;;  %v6790_v23 = vld [vmem:[%s10658_s2 + $0x80] ss:$12 sps:$4 sm:$0xff]   ;;  %v6791_v24 = vld [vmem:[%s10658_s2 + $0x98] ss:$12 sps:$4 sm:$0xff]  }
  0x16   : > { %v6776_v22 = vld [vmem:[%s10658_s2 + $0xa8] ss:$12 sps:$4 sm:$0xff]   ;;  %v6792_v26 = vld [vmem:[%s10658_s2 + $0xb0] ss:$12 sps:$4 sm:$0xff]   ;;  %v503_v29 = vld [vmem:[%s7484_s18 + $0x20] sm:$0xff]   ;;  %v10673_v35 = vsub.s32 0, %v7555_v34 }
  0x17   : > { %741 = vmatpush1.bf16.msra.mxu0 %v6761_v6  ;;  %6376 = vmatpush3.bf16.msra.mxu1 %v6786_v13  ;;  %v497_v25 = vld [vmem:[%s7484_s18 + $0x8] sm:$0xff]   ;;  %v499_v27 = vld [vmem:[%s7484_s18 + $0x10] sm:$0xff]   ;;  %v501_v28 = vld [vmem:[%s7484_s18 + $0x18] sm:$0xff]   ;;  %v10671_v37 = vsub.s32 1, %v7555_v34  ;;  %v10672_v50 = vsub.s32 2, %v7555_v34  ;;  %p476_p4 = scmp.lt.s32.totalorder %s7452_s30, 3 }
  0x18   : > { %742 = vmatprep.subr.bf16.mxu0 %v6762_v7  ;;  %6377 = vmatprep.subr.bf16.mxu1 %v6787_v15  ;;  %v505_v30 = vld [vmem:[%s7484_s18 + $0x28] sm:$0xff]   ;;  %v507_v31 = vld [vmem:[%s7484_s18 + $0x30] sm:$0xff]   ;;  %v509_v32 = vld [vmem:[%s7484_s18 + $0x38] sm:$0xff]   ;;  %s7370_s15 = smov 32   ;;  %vm2038_vm1 = vcmask 523520   ;;  %vm2617_vm2 = vcmask 785920  }
  0x19   : > { %v543_v36 = vld [vmem:[%s10659_s3] sm:$0x7]  ;;  %s11027_s30 = smov (!%p476_p4, %s7452_s30), 3  ;;  %vm3196_vm3 = vcmask 1048320  }
  0x1a   : > { %v7564_v38 = vrot.slane %v543_v36, %v10673_v35  ;;  %v7568_v40 = vrot.slane %v543_v36, %v10671_v37  ;;  %v7591_v58 = vrot.slane %v543_v36, %v10672_v50  ;;  %s7748_s28 = scalar_lea.vmem %s10657_s1, %s11027_s30  ;;  %s7369_s30 = smov 64  }
  0x1b   : > { %743 = vmatpush1.bf16.msra.mxu0 %v6764_v9  ;;  %6378 = vmatpush3.bf16.msra.mxu1 %v6787_v15 }
  0x1c   : > { %744 = vmatprep.subr.bf16.mxu0 %v6765_v10  ;;  %6379 = vmatprep.subr.bf16.mxu1 %v6788_v19 }
  0x1f   : > { %745 = vmatpush1.bf16.msra.mxu0 %v6767_v12  ;;  %6380 = vmatpush3.bf16.msra.mxu1 %v6788_v19 }
  0x20   : > { %746 = vmatprep.subr.bf16.mxu0 %v6768_v14  ;;  %6381 = vmatprep.subr.bf16.mxu1 %v6789_v21 }
  0x23   : > { %747 = vmatpush1.bf16.msra.mxu0 %v6770_v16  ;;  %6382 = vmatpush3.bf16.msra.mxu1 %v6789_v21 }
  0x24   : > { %748 = vmatprep.subr.bf16.mxu0 %v6771_v17  ;;  %6383 = vmatprep.subr.bf16.mxu1 %v6790_v23 }
  0x27   : > { %749 = vmatpush1.bf16.msra.mxu0 %v6773_v18  ;;  %6384 = vmatpush3.bf16.msra.mxu1 %v6790_v23 }
  0x28   : > { %750 = vmatprep.subr.bf16.mxu0 %v6774_v20  ;;  %6385 = vmatprep.subr.bf16.mxu1 %v6791_v24 }
  0x2b   : > { %751 = vmatpush1.bf16.msra.mxu0 %v6776_v22  ;;  %6386 = vmatpush3.bf16.msra.mxu1 %v6791_v24 }
  0x2c   : > { %6387 = vmatprep.subr.bf16.mxu1 %v6792_v26 }
  0x2e   : > { %769 = vmatmul.mubr.bf16.vlgmr.msra.gmra.mrb[0].mxu0 %v495_v8 }
  0x2f   : > { %778 = vmatprep.mubr.bf16.mxu0 %v10674_v2  ;;  %6388 = vmatpush3.bf16.msra.mxu1 %v6792_v26 }
  0x32   : > { %6390 = vmatmul.mubr.bf16.vlgmr.msra.gmra.mrb[0].mxu1 %v497_v25 }
  0x33   : > { %6393 = vmatprep.mubr.bf16.mxu1 %v499_v27 }
  0x36   : > { %779 = vmatmul.mubr.bf16.gmra.mrb[4].mxu0 %v497_v25 }
  0x37   : > { %788 = vmatprep.mubr.bf16.mxu0 %v10674_v2 }
  0x3a   : > { %6394 = vmatmul.mubr.bf16.gmra.mrb[4].mxu1 %v501_v28 }
  0x3b   : > { %6397 = vmatprep.mubr.bf16.mxu1 %v503_v29 }
  0x3e   : > { %789 = vmatmul.mubr.bf16.gmra.mrb[8].mxu0 %v499_v27 }
  0x3f   : > { %798 = vmatprep.mubr.bf16.mxu0 %v10674_v2 }
  0x42   : > { %6398 = vmatmul.mubr.bf16.gmra.mrb[8].mxu1 %v505_v30 }
  0x43   : > { %6401 = vmatprep.mubr.bf16.mxu1 %v507_v31 }
  0x46   : > { %799 = vmatmul.mubr.bf16.gmra.mrb[12].mxu0 %v501_v28 }
  0x47   : > { %808 = vmatprep.mubr.bf16.mxu0 %v10674_v2 }
  0x4a   : > { %6402 = vmatmul.mubr.bf16.gmra.mrb[12].mxu1 %v509_v32 }
  0x4e   : > { %809 = vmatmul.mubr.bf16.gmra.mrb[16].mxu0 %v503_v29 }
  0x4f   : > { %818 = vmatprep.mubr.bf16.mxu0 %v10674_v2 }
  0x56   : > { %819 = vmatmul.mubr.bf16.gmra.mrb[20].mxu0 %v505_v30 }
  0x57   : > { %828 = vmatprep.mubr.bf16.mxu0 %v10674_v2 }
  0x5e   : > { %829 = vmatmul.mubr.bf16.gmra.mrb[24].mxu0 %v507_v31 }
  0x5f   : > { %838 = vmatprep.mubr.bf16.mxu0 %v10674_v2 }
  0x66   : > { %839 = vmatmul.mubr.bf16.gmra.mrb[28].mxu0 %v509_v32 }
 0x101   : > { %v770_v39 = vpop.f32.mrb[0].mxu0 }
 0x102   : > { %v772_v41 = vpop.f32.mrb[1].mxu0  ;;  %v771_v43 = vadd.f32 %v770_v39, %v7564_v38 }
 0x103   : > { %v774_v42 = vpop.f32.mrb[2].mxu0  ;;  %v773_v46 = vadd.f32 %v772_v41, %v7568_v40 }
 0x104   : > { %v775_v44 = vadd.f32 %v774_v42, %v7564_v38  ;;  %v776_v45 = vpop.f32.mrb[3].mxu0 }
 0x105   : > { %v777_v47 = vadd.f32 %v776_v45, %v7568_v40  ;;  %v6391_v62 = vpop.f32.mrb[0].mxu1 }
 0x106   : > { %v7574_v48 = vpack.c.bf16 %v775_v44, %v771_v43  ;;  %v892_v0 = vadd.f32 %v6391_v62, %v7591_v58  ;;  %v883_v1 = vpop.f32.mrb[1].mxu1 }
 0x107   : > { %v7576_v49 = vpack.c.bf16 %v777_v47, %v773_v46  ;;  %v884_v3 = vadd.f32 %v883_v1, %v7591_v58  ;;  %v6392_v4 = vpop.f32.mrb[2].mxu1 }
 0x108   : > { %6421 = vmatprep.mubr.msk.bf16.mxu0 %vm1019_vm0, %v7574_v48  ;;  %v895_v7 = vadd.f32 %v6392_v4, %v7591_v58  ;;  %v886_v8 = vpop.f32.mrb[3].mxu1 }
 0x109   : > { %v780_v51 = vpop.f32.mrb[4].mxu0  ;;  %1524 = vrot.lane.b32.xlu0 %v7576_v49, %s7368_s24  ;;  %6709 = vmatprep.subr.msk.bf16.mxu0 %vm1019_vm0, %v7576_v49  ;;  %v1045_v52 = vsel %vm1019_vm0, %v7576_v49, 0  ;;  %v887_v11 = vadd.f32 %v886_v8, %v7591_v58 }
 0x10a   : > { %v781_v53 = vadd.f32 %v780_v51, %v7564_v38  ;;  %v782_v54 = vpop.f32.mrb[5].mxu0  ;;  %6406 = vmatpush3.bf16.xpose.msra.mxu0 %v1045_v52  ;;  %v7610_v13 = vpack.c.bf16 %v895_v7, %v892_v0 }
 0x10b   : > { %v784_v55 = vpop.f32.mrb[6].mxu0  ;;  %v783_v59 = vadd.f32 %v782_v54, %v7568_v40  ;;  %v7613_v16 = vpack.c.bf16 %v887_v11, %v884_v3 }
 0x10c   : > { %v785_v56 = vadd.f32 %v784_v55, %v7564_v38  ;;  %v786_v57 = vpop.f32.mrb[7].mxu0 }
 0x10d   : > { %v787_v60 = vadd.f32 %v786_v57, %v7568_v40  ;;  %v6395_v20 = vpop.f32.mrb[4].mxu1  ;;  %6437 = vmatprep.subr.bf16.mxu1 %v7613_v16 }
 0x10e   : > { %v7595_v61 = vpack.c.bf16 %v785_v56, %v781_v53  ;;  %v908_v22 = vadd.f32 %v6395_v20, %v7591_v58  ;;  %v899_v23 = vpop.f32.mrb[5].mxu1  ;;  %6438 = vmatpush3.bf16.msra.mxu1 %v7613_v16 }
 0x10f   : > { %v7597_v63 = vpack.c.bf16 %v787_v60, %v783_v59  ;;  %v900_v24 = vadd.f32 %v899_v23, %v7591_v58  ;;  %v6396_v25 = vpop.f32.mrb[6].mxu1  ;;  %6439 = vmatprep.subr.bf16.mxu1 %v7610_v13 }
 0x110   : > { %v911_v28 = vadd.f32 %v6396_v25, %v7591_v58  ;;  %v902_v29 = vpop.f32.mrb[7].mxu1 }
 0x111   : > { %v790_v5 = vpop.f32.mrb[8].mxu0  ;;  %1526 = vrot.lane.b32.xlu1 %v7597_v63, %s7368_s24  ;;  %6710 = vmatprep.subr.msk.bf16.mxu0 %vm1019_vm0, %v7597_v63  ;;  %v1048_v6 = vsel %vm1019_vm0, %v7597_v63, 0  ;;  %v903_v32 = vadd.f32 %v902_v29, %v7591_v58 }
 0x112   : > { %v791_v9 = vadd.f32 %v790_v5, %v7564_v38  ;;  %v792_v10 = vpop.f32.mrb[9].mxu0  ;;  %6408 = vmatpush3.bf16.xpose.msra.mxu0 %v1048_v6  ;;  %v7633_v36 = vpack.c.bf16 %v911_v28, %v908_v22  ;;  %6440 = vmatpush3.bf16.msra.mxu1 %v7610_v13 }
 0x113   : > { %v794_v12 = vpop.f32.mrb[10].mxu0  ;;  %v793_v17 = vadd.f32 %v792_v10, %v7568_v40  ;;  %v7637_v42 = vpack.c.bf16 %v903_v32, %v900_v24 }
 0x114   : > { %v795_v14 = vadd.f32 %v794_v12, %v7564_v38  ;;  %v796_v15 = vpop.f32.mrb[11].mxu0 }
 0x115   : > { %v797_v18 = vadd.f32 %v796_v15, %v7568_v40  ;;  %v6399_v46 = vpop.f32.mrb[8].mxu1  ;;  %6441 = vmatprep.subr.bf16.mxu1 %v7637_v42 }
 0x116   : > { %v7617_v19 = vpack.c.bf16 %v795_v14, %v791_v9  ;;  %v924_v51 = vadd.f32 %v6399_v46, %v7591_v58  ;;  %v915_v52 = vpop.f32.mrb[9].mxu1  ;;  %6442 = vmatpush3.bf16.msra.mxu1 %v7637_v42 }
 0x117   : > { %v7620_v21 = vpack.c.bf16 %v797_v18, %v793_v17  ;;  %v916_v53 = vadd.f32 %v915_v52, %v7591_v58  ;;  %v6400_v54 = vpop.f32.mrb[10].mxu1  ;;  %6443 = vmatprep.subr.bf16.mxu1 %v7633_v36 }
 0x118   : > { %v927_v57 = vadd.f32 %v6400_v54, %v7591_v58  ;;  %v918_v59 = vpop.f32.mrb[11].mxu1 }
 0x119   : > { %v800_v26 = vpop.f32.mrb[12].mxu0  ;;  %6711 = vmatprep.subr.msk.bf16.mxu0 %vm1019_vm0, %v7620_v21  ;;  %v1051_v27 = vsel %vm1019_vm0, %v7620_v21, 0  ;;  %v919_v0 = vadd.f32 %v918_v59, %v7591_v58 }
 0x11a   : > { %v801_v30 = vadd.f32 %v800_v26, %v7564_v38  ;;  %v802_v31 = vpop.f32.mrb[13].mxu0  ;;  %6410 = vmatpush3.bf16.xpose.msra.mxu0 %v1051_v27  ;;  %v7657_v3 = vpack.c.bf16 %v927_v57, %v924_v51  ;;  %6444 = vmatpush3.bf16.msra.mxu1 %v7633_v36 }
 0x11b   : > { %v804_v33 = vpop.f32.mrb[14].mxu0  ;;  %v803_v43 = vadd.f32 %v802_v31, %v7568_v40  ;;  %v7661_v6 = vpack.c.bf16 %v919_v0, %v916_v53 }
 0x11c   : > { %v805_v39 = vadd.f32 %v804_v33, %v7564_v38  ;;  %v806_v41 = vpop.f32.mrb[15].mxu0 }
 0x11d   : > { %v807_v44 = vadd.f32 %v806_v41, %v7568_v40  ;;  %v6403_v10 = vpop.f32.mrb[12].mxu1  ;;  %6445 = vmatprep.subr.bf16.mxu1 %v7661_v6 }
 0x11e   : > { %v7641_v45 = vpack.c.bf16 %v805_v39, %v801_v30  ;;  %v940_v12 = vadd.f32 %v6403_v10, %v7591_v58  ;;  %v931_v14 = vpop.f32.mrb[13].mxu1  ;;  %6446 = vmatpush3.bf16.msra.mxu1 %v7661_v6 }
 0x11f   : > { %v7644_v47 = vpack.c.bf16 %v807_v44, %v803_v43  ;;  %v932_v15 = vadd.f32 %v931_v14, %v7591_v58  ;;  %v6404_v17 = vpop.f32.mrb[14].mxu1  ;;  %6447 = vmatprep.subr.bf16.mxu1 %v7657_v3 }
 0x120   : > { %v943_v22 = vadd.f32 %v6404_v17, %v7591_v58  ;;  %v934_v23 = vpop.f32.mrb[15].mxu1 }
 0x121   : > { %v810_v55 = vpop.f32.mrb[16].mxu0  ;;  %6712 = vmatprep.subr.msk.bf16.mxu0 %vm1019_vm0, %v7644_v47  ;;  %v1054_v56 = vsel %vm1019_vm0, %v7644_v47, 0  ;;  %v935_v26 = vadd.f32 %v934_v23, %v7591_v58 }
 0x122   : > { %v811_v60 = vadd.f32 %v810_v55, %v7564_v38  ;;  %v812_v62 = vpop.f32.mrb[17].mxu0  ;;  %6412 = vmatpush3.bf16.xpose.msra.mxu0 %v1054_v56  ;;  %v7681_v28 = vpack.c.bf16 %v943_v22, %v940_v12  ;;  %6448 = vmatpush3.bf16.msra.mxu1 %v7657_v3 }
 0x123   : > { %v814_v1 = vpop.f32.mrb[18].mxu0  ;;  %v813_v7 = vadd.f32 %v812_v62, %v7568_v40  ;;  %v7685_v31 = vpack.c.bf16 %v935_v26, %v932_v15  ;;  %v7751_v15 = vld [vmem:[%s7748_s28] ss:$0 sm:$0xff] }
 0x124   : > { %v815_v4 = vadd.f32 %v814_v1, %v7564_v38  ;;  %v816_v5 = vpop.f32.mrb[19].mxu0 }
 0x125   : > { %v817_v8 = vadd.f32 %v816_v5, %v7568_v40  ;;  %6449 = vmatprep.subr.bf16.mxu1 %v7685_v31 }
 0x126   : > { %v7665_v9 = vpack.c.bf16 %v815_v4, %v811_v60  ;;  %6450 = vmatpush3.bf16.msra.mxu1 %v7685_v31 }
 0x127   : > { %v7668_v11 = vpack.c.bf16 %v817_v8, %v813_v7  ;;  %6451 = vmatprep.subr.bf16.mxu1 %v7681_v28 }
 0x129   : > { %v820_v18 = vpop.f32.mrb[20].mxu0  ;;  %6713 = vmatprep.subr.msk.bf16.mxu0 %vm1019_vm0, %v7668_v11  ;;  %v1057_v20 = vsel %vm1019_vm0, %v7668_v11, 0 }
 0x12a   : > { %v821_v24 = vadd.f32 %v820_v18, %v7564_v38  ;;  %v822_v25 = vpop.f32.mrb[21].mxu0  ;;  %6414 = vmatpush3.bf16.xpose.msra.mxu0 %v1057_v20  ;;  %6452 = vmatpush3.bf16.msra.mxu1 %v7681_v28 }
 0x12b   : > { %v824_v27 = vpop.f32.mrb[22].mxu0  ;;  %v823_v32 = vadd.f32 %v822_v25, %v7568_v40 }
 0x12c   : > { %v825_v29 = vadd.f32 %v824_v27, %v7564_v38  ;;  %v826_v30 = vpop.f32.mrb[23].mxu0 }
 0x12d   : > { %v827_v33 = vadd.f32 %v826_v30, %v7568_v40 }
 0x12e   : > { %v7689_v39 = vpack.c.bf16 %v825_v29, %v821_v24 }
 0x12f   : > { %v7692_v41 = vpack.c.bf16 %v827_v33, %v823_v32 }
 0x131   : > { %v830_v58 = vpop.f32.mrb[24].mxu0  ;;  %6714 = vmatprep.subr.msk.bf16.mxu0 %vm1019_vm0, %v7692_v41  ;;  %v1060_v43 = vsel %vm1019_vm0, %v7692_v41, 0 }
 0x132   : > { %v831_v44 = vadd.f32 %v830_v58, %v7564_v38  ;;  %v832_v46 = vpop.f32.mrb[25].mxu0  ;;  %6416 = vmatpush3.bf16.xpose.msra.mxu0 %v1060_v43 }
 0x133   : > { %v834_v51 = vpop.f32.mrb[26].mxu0  ;;  %v833_v54 = vadd.f32 %v832_v46, %v7568_v40 }
 0x134   : > { %v835_v52 = vadd.f32 %v834_v51, %v7564_v38  ;;  %v836_v53 = vpop.f32.mrb[27].mxu0 }
 0x135   : > { %v837_v55 = vadd.f32 %v836_v53, %v7568_v40 }
 0x136   : > { %v7705_v56 = vpack.c.bf16 %v835_v52, %v831_v44 }
 0x137   : > { %v7707_v57 = vpack.c.bf16 %v837_v55, %v833_v54 }
 0x139   : > { %v840_v59 = vpop.f32.mrb[28].mxu0  ;;  %6715 = vmatprep.subr.msk.bf16.mxu0 %vm1019_vm0, %v7707_v57  ;;  %v1063_v60 = vsel %vm1019_vm0, %v7707_v57, 0 }
 0x13a   : > { %v841_v62 = vadd.f32 %v840_v59, %v7564_v38  ;;  %v842_v0 = vpop.f32.mrb[29].mxu0  ;;  %6418 = vmatpush3.bf16.xpose.msra.mxu0 %v1063_v60 }
 0x13b   : > { %v844_v1 = vpop.f32.mrb[30].mxu0  ;;  %v843_v7 = vadd.f32 %v842_v0, %v7568_v40 }
 0x13c   : > { %v845_v4 = vadd.f32 %v844_v1, %v7564_v38  ;;  %v846_v5 = vpop.f32.mrb[31].mxu0 }
 0x13d   : > { %v847_v8 = vadd.f32 %v846_v5, %v7568_v40 }
 0x13e   : > { %v7717_v10 = vpack.c.bf16 %v845_v4, %v841_v62 }
 0x13f   : > { %v7719_v12 = vpack.c.bf16 %v847_v8, %v843_v7 }
 0x141   : > { %6716 = vmatprep.subr.msk.bf16.mxu0 %vm1019_vm0, %v7719_v12  ;;  %v1066_v14 = vsel %vm1019_vm0, %v7719_v12, 0 }
 0x142   : > { %6420 = vmatpush3.bf16.xpose.msra.mxu0 %v1066_v14 }
 0x149   : > { %6422 = vmatmul.mubr.msk.bf16.vlgmr.msra.gmra.mrb[32].mxu0 %vm1019_vm0, %v7595_v61 }
 0x14a   : > { %6425 = vmatprep.mubr.msk.bf16.mxu0 %vm1019_vm0, %v7617_v19 }
 0x151   : > { %6426 = vmatmul.mubr.msk.bf16.gmra.mrb[36].mxu0 %vm1019_vm0, %v7641_v45 }
 0x152   : > { %6429 = vmatprep.mubr.msk.bf16.mxu0 %vm1019_vm0, %v7665_v9 }
 0x159   : > { %6430 = vmatmul.mubr.msk.bf16.gmra.mrb[40].mxu0 %vm1019_vm0, %v7689_v39 }
 0x15a   : > { %6433 = vmatprep.mubr.msk.bf16.mxu0 %vm1019_vm0, %v7705_v56 }
 0x161   : > { %6434 = vmatmul.mubr.msk.bf16.gmra.mrb[44].mxu0 %vm1019_vm0, %v7717_v10 }
 0x17b   : > { %v7739_v38 = vpop.permute.xlu0 %1524 }
 0x17c   : > { %6717 = vmatprep.subr.msk.bf16.mxu1 %vm1019_vm0, %v7739_v38 }
 0x21c   : > { %v6423_v40 = vpop.f32.mrb[32].mxu0 }
 0x21d   : > { %v1167_v17 = vmul.f32 0.17677669, %v6423_v40  ;;  %v1102_v18 = vpop.f32.mrb[33].mxu0 }
 0x21e   : > { %v1165_v20 = vmul.f32 0.17677669, %v1102_v18  ;;  %v6424_v22 = vpop.f32.mrb[34].mxu0 }
 0x21f   : > { %v1168_v23 = vmul.f32 0.17677669, %v6424_v22  ;;  %v1105_v24 = vpop.f32.mrb[35].mxu0  ;;  %v7754_v25 = vadd.f32 %v7751_v15, %v1167_v17 }
 0x220   : > { %v1166_v26 = vmul.f32 0.17677669, %v1105_v24  ;;  %v7757_v27 = vadd.f32 %v7751_v15, %v1165_v20 }
 0x221   : > { %1207 = vmax.xlane.f32.xlu1 %v7754_v25  ;;  %v7762_v29 = vadd.f32 %v7751_v15, %v1168_v23 }
 0x222   : > { %1203 = vmax.xlane.f32.xlu0 %v7757_v27  ;;  %v7765_v32 = vadd.f32 %v7751_v15, %v1166_v26 }
 0x224   : > { %v6427_v30 = vpop.f32.mrb[36].mxu0 }
 0x225   : > { %v1171_v33 = vmul.f32 0.17677669, %v6427_v30  ;;  %1209 = vmax.xlane.f32.xlu1 %v7762_v29  ;;  %v1118_v58 = vpop.f32.mrb[37].mxu0 }
 0x226   : > { %1205 = vmax.xlane.f32.xlu0 %v7765_v32  ;;  %v6428_v43 = vpop.f32.mrb[38].mxu0  ;;  %v1169_v52 = vmul.f32 0.17677669, %v1118_v58 }
 0x227   : > { %v1172_v44 = vmul.f32 0.17677669, %v6428_v43  ;;  %v1121_v46 = vpop.f32.mrb[39].mxu0  ;;  %v7770_v51 = vadd.f32 %v7751_v15, %v1171_v33 }
 0x228   : > { %v1170_v53 = vmul.f32 0.17677669, %v1121_v46  ;;  %v7778_v59 = vadd.f32 %v7751_v15, %v1169_v52 }
 0x229   : > { %v7773_v54 = vadd.f32 %v7751_v15, %v1172_v44 }
 0x22a   : > { %1215 = vmax.xlane.f32.xlu0 %v7770_v51  ;;  %v7781_v0 = vadd.f32 %v7751_v15, %v1170_v53  ;;  %v7821_v53 = vpop.permute.xlu1 %1526 }
 0x22b   : > { %1217 = vmax.xlane.f32.xlu1 %v7773_v54 }
 0x22c   : > { %v6431_v55 = vpop.f32.mrb[40].mxu0 }
 0x22d   : > { %v1175_v60 = vmul.f32 0.17677669, %v6431_v55  ;;  %v1134_v62 = vpop.f32.mrb[41].mxu0 }
 0x22e   : > { %1211 = vmax.xlane.f32.xlu0 %v7778_v59  ;;  %v6432_v1 = vpop.f32.mrb[42].mxu0  ;;  %v1173_v8 = vmul.f32 0.17677669, %v1134_v62 }
 0x22f   : > { %v1176_v4 = vmul.f32 0.17677669, %v6432_v1  ;;  %1213 = vmax.xlane.f32.xlu1 %v7781_v0  ;;  %v1137_v5 = vpop.f32.mrb[43].mxu0  ;;  %v7786_v7 = vadd.f32 %v7751_v15, %v1175_v60 }
 0x230   : > { %v1174_v14 = vmul.f32 0.17677669, %v1137_v5  ;;  %v7794_v18 = vadd.f32 %v7751_v15, %v1173_v8 }
 0x231   : > { %v7789_v40 = vadd.f32 %v7751_v15, %v1176_v4 }
 0x232   : > { %1223 = vmax.xlane.f32.xlu0 %v7786_v7  ;;  %v7797_v23 = vadd.f32 %v7751_v15, %v1174_v14 }
 0x233   : > { %1225 = vmax.xlane.f32.xlu1 %v7789_v40 }
 0x234   : > { %v6435_v17 = vpop.f32.mrb[44].mxu0 }
 0x235   : > { %v1179_v20 = vmul.f32 0.17677669, %v6435_v17  ;;  %v1150_v22 = vpop.f32.mrb[45].mxu0 }
 0x236   : > { %1219 = vmax.xlane.f32.xlu0 %v7794_v18  ;;  %v6436_v24 = vpop.f32.mrb[46].mxu0  ;;  %v1177_v33 = vmul.f32 0.17677669, %v1150_v22 }
 0x237   : > { %1221 = vmax.xlane.f32.xlu1 %v7797_v23  ;;  %v1153_v26 = vpop.f32.mrb[47].mxu0  ;;  %v7802_v30 = vadd.f32 %v7751_v15, %v1179_v20  ;;  %v1180_v43 = vmul.f32 0.17677669, %v6436_v24 }
 0x238   : > { %v7806_v58 = vadd.f32 %v7751_v15, %v1177_v33  ;;  %v1178_v44 = vmul.f32 0.17677669, %v1153_v26 }
 0x239   : > { %v7814_v46 = vadd.f32 %v7751_v15, %v1180_v43 }
 0x23a   : > { %1231 = vmax.xlane.f32.xlu0 %v7802_v30  ;;  %v7818_v52 = vadd.f32 %v7751_v15, %v1178_v44 }
 0x23e   : > { %1227 = vmax.xlane.f32.xlu0 %v7806_v58 }
 0x248   : > { %1530 = vrot.lane.b32.xlu1 %v7644_v47, %s7368_s24 }
 0x254   : > { %1528 = vrot.lane.b32.xlu0 %v7620_v21, %s7368_s24 }
 0x26c   : > { %1233 = vmax.xlane.f32.xlu1 %v7814_v46 }
 0x270   : > { %1229 = vmax.xlane.f32.xlu1 %v7818_v52 }
 0x2ae   : > { %v1208_v55 = vpop.xlane.xlu1 %1207 }
 0x2af   : > { %v1237_v60 = vsub.f32 %v7754_v25, %v1208_v55  ;;  %v1204_v62 = vpop.xlane.xlu0 %1203 }
 0x2b0   : > { %v1235_v1 = vsub.f32 %v7757_v27, %v1204_v62 }
 0x2b1   : > { %v1255_v4 = vmul.f32 1.442695, %v1237_v60 }
 0x2b2   : > { %v1251_v5 = vmul.f32 1.442695, %v1235_v1  ;;  %v1210_v8 = vpop.xlane.xlu1 %1209 }
 0x2b3   : > { %6889 = vpow2.f32 %v1255_v4  ;;  %v1238_v14 = vsub.f32 %v7762_v29, %v1210_v8  ;;  %v1206_v17 = vpop.xlane.xlu0 %1205 }
 0x2b4   : > { %v1236_v20 = vsub.f32 %v7765_v32, %v1206_v17  ;;  %6891 = vpow2.f32 %v1251_v5 }
 0x2b5   : > { %v1257_v22 = vmul.f32 1.442695, %v1238_v14 }
 0x2b6   : > { %v1253_v24 = vmul.f32 1.442695, %v1236_v20 }
 0x2b7   : > { %6893 = vpow2.f32 %v1257_v22  ;;  %v1216_v32 = vpop.xlane.xlu0 %1215 }
 0x2b8   : > { %6895 = vpow2.f32 %v1253_v24  ;;  %v1218_v44 = vpop.xlane.xlu1 %1217  ;;  %v1241_v62 = vsub.f32 %v7770_v51, %v1216_v32 }
 0x2b9   : > { %v1242_v17 = vsub.f32 %v7773_v54, %v1218_v44 }
 0x2ba   : > { %v1263_v5 = vmul.f32 1.442695, %v1241_v62 }
 0x2bb   : > { %v1212_v33 = vpop.xlane.xlu0 %1211  ;;  %v1265_v50 = vmul.f32 1.442695, %v1242_v17 }
 0x2bc   : > { %v1214_v60 = vpop.xlane.xlu1 %1213  ;;  %v1239_v1 = vsub.f32 %v7778_v59, %v1212_v33  ;;  %6897 = vpow2.f32 %v1263_v5 }
 0x2bd   : > { %v7827_v26 = vpop.eup %6889  ;;  %v1240_v8 = vsub.f32 %v7781_v0, %v1214_v60 }
 0x2be   : > { %1287 = vadd.xlane.f32.xlu0 %v7827_v26  ;;  %v7830_v25 = vpop.eup %6891  ;;  %v1259_v20 = vmul.f32 1.442695, %v1239_v1 }
 0x2bf   : > { %v1224_v43 = vpop.xlane.xlu0 %1223  ;;  %v1261_v22 = vmul.f32 1.442695, %v1240_v8 }
 0x2c0   : > { %v1226_v14 = vpop.xlane.xlu1 %1225  ;;  %6899 = vpow2.f32 %v1259_v20  ;;  %v1245_v35 = vsub.f32 %v7786_v7, %v1224_v43 }
 0x2c1   : > { %v7832_v27 = vpop.eup %6893  ;;  %6901 = vpow2.f32 %v1261_v22  ;;  %v1246_v7 = vsub.f32 %v7789_v40, %v1226_v14 }
 0x2c2   : > { %1283 = vadd.xlane.f32.xlu0 %v7830_v25  ;;  %1289 = vadd.xlane.f32.xlu1 %v7832_v27  ;;  %v7836_v29 = vpop.eup %6895  ;;  %6903 = vpow2.f32 %v1265_v50  ;;  %v1271_v0 = vmul.f32 1.442695, %v1245_v35 }
 0x2c3   : > { %v1220_v55 = vpop.xlane.xlu0 %1219 }
 0x2c4   : > { %v1222_v51 = vpop.xlane.xlu1 %1221  ;;  %v1243_v33 = vsub.f32 %v7794_v18, %v1220_v55  ;;  %v1273_v18 = vmul.f32 1.442695, %v1246_v7 }
 0x2c6   : > { %1285 = vadd.xlane.f32.xlu1 %v7836_v29  ;;  %v7853_v60 = vpop.eup %6897 }
 0x2c7   : > { %v1232_v4 = vpop.xlane.xlu0 %1231 }
 0x2c8   : > { %v1249_v24 = vsub.f32 %v7802_v30, %v1232_v4  ;;  %v7851_v44 = vpop.permute.xlu1 %1530  ;;  %v1267_v30 = vmul.f32 1.442695, %v1243_v33 }
 0x2ca   : > { %v1279_v59 = vmul.f32 1.442695, %v1249_v24  ;;  %v7857_v43 = vpop.eup %6899 }
 0x2cb   : > { %v1228_v37 = vpop.xlane.xlu0 %1227  ;;  %v7859_v50 = vpop.eup %6901 }
 0x2cc   : > { %v1247_v32 = vsub.f32 %v7806_v58, %v1228_v37  ;;  %6905 = vpow2.f32 %v1279_v59  ;;  %v1244_v58 = vsub.f32 %v7797_v23, %v1222_v51  ;;  %v7865_v62 = vpop.eup %6903 }
 0x2cd   : > { %6907 = vpow2.f32 %v1271_v0 }
 0x2ce   : > { %v1275_v54 = vmul.f32 1.442695, %v1247_v32 }
 0x2cf   : > { %v1529_v24 = vpop.permute.xlu0 %1528 }
 0x2d0   : > { %6909 = vpow2.f32 %v1275_v54 }
 0x2d1   : > { %6911 = vpow2.f32 %v1267_v30 }
 0x2d6   : > { %v7867_v1 = vpop.eup %6905 }
 0x2d7   : > { %1534 = vrot.lane.b32.xlu1 %v7692_v41, %s7368_s24  ;;  %v7872_v5 = vpop.eup %6907 }
 0x2d8   : > { %1532 = vrot.lane.b32.xlu0 %v7668_v11, %s7368_s24 }
 0x2da   : > { %v7874_v8 = vpop.eup %6909 }
 0x2db   : > { %v7878_v14 = vpop.eup %6911 }
 0x2f7   : > { %1295 = vadd.xlane.f32.xlu0 %v7853_v60 }
 0x2f9   : > { %v1234_v37 = vpop.xlane.xlu1 %1233 }
 0x2fa   : > { %v1250_v35 = vsub.f32 %v7814_v46, %v1234_v37  ;;  %v1269_v46 = vmul.f32 1.442695, %v1244_v58 }
 0x2fb   : > { %1293 = vadd.xlane.f32.xlu0 %v7859_v50  ;;  %1291 = vadd.xlane.f32.xlu1 %v7857_v43 }
 0x2fc   : > { %v1281_v55 = vmul.f32 1.442695, %v1250_v35 }
 0x2fd   : > { %v1230_v40 = vpop.xlane.xlu1 %1229 }
 0x2fe   : > { %6913 = vpow2.f32 %v1281_v55  ;;  %v1248_v4 = vsub.f32 %v7818_v52, %v1230_v40 }
 0x2ff   : > { %1311 = vadd.xlane.f32.xlu0 %v7867_v1  ;;  %1297 = vadd.xlane.f32.xlu1 %v7865_v62  ;;  %6915 = vpow2.f32 %v1273_v18 }
 0x300   : > { %6917 = vpow2.f32 %v1269_v46  ;;  %v1277_v23 = vmul.f32 1.442695, %v1248_v4  ;;  %v1565_v46 = vsel %vm1019_vm0, %v7739_v38, 0 }
 0x302   : > { %6919 = vpow2.f32 %v1277_v23 }
 0x303   : > { %1307 = vadd.xlane.f32.xlu0 %v7874_v8  ;;  %1303 = vadd.xlane.f32.xlu1 %v7872_v5 }
 0x307   : > { %1299 = vadd.xlane.f32.xlu1 %v7878_v14 }
 0x308   : > { %v7881_v17 = vpop.eup %6913 }
 0x309   : > { %1313 = vadd.xlane.f32.xlu0 %v7881_v17  ;;  %v7884_v52 = vpop.eup %6915 }
 0x30a   : > { %v7887_v20 = vpop.eup %6917 }
 0x30b   : > { %1305 = vadd.xlane.f32.xlu1 %v7884_v52 }
 0x30c   : > { %v7890_v22 = vpop.eup %6919 }
 0x30f   : > { %1301 = vadd.xlane.f32.xlu1 %v7887_v20 }
 0x313   : > { %1309 = vadd.xlane.f32.xlu1 %v7890_v22 }
 0x31f   : > { %1536 = vrot.lane.b32.xlu0 %v7707_v57, %s7368_s24 }
 0x323   : > { %1500 = vrot.lane.b32.xlu0 %v7574_v48, %s7368_s24 }
 0x324   : > { %1538 = vrot.lane.b32.xlu1 %v7719_v12, %s7368_s24 }
 0x327   : > { %1504 = vrot.lane.b32.xlu0 %v7617_v19, %s7368_s24 }
 0x328   : > { %1502 = vrot.lane.b32.xlu1 %v7595_v61, %s7368_s24 }
 0x32b   : > { %1508 = vrot.lane.b32.xlu0 %v7665_v9, %s7368_s24 }
 0x32c   : > { %1506 = vrot.lane.b32.xlu1 %v7641_v45, %s7368_s24 }
 0x32f   : > { %1512 = vrot.lane.b32.xlu0 %v7705_v56, %s7368_s24 }
 0x330   : > { %1510 = vrot.lane.b32.xlu1 %v7689_v39, %s7368_s24 }
 0x333   : > { %1877 = vrot.lane.b32.xlu0 %v7613_v16, %s7368_s24 }
 0x334   : > { %1514 = vrot.lane.b32.xlu1 %v7717_v10, %s7368_s24 }
 0x337   : > { %1881 = vrot.lane.b32.xlu0 %v7637_v42, %s7368_s24 }
 0x338   : > { %1879 = vrot.lane.b32.xlu1 %v7610_v13, %s7368_s24 }
 0x33b   : > { %1885 = vrot.lane.b32.xlu0 %v7661_v6, %s7368_s24 }
 0x33c   : > { %1883 = vrot.lane.b32.xlu1 %v7633_v36, %s7368_s24 }
 0x33f   : > { %1889 = vrot.lane.b32.xlu0 %v7685_v31, %s7368_s24 }
 0x340   : > { %1887 = vrot.lane.b32.xlu1 %v7657_v3, %s7368_s24 }
 0x343   : > { %2103 = vrot.lane.b32.xlu0 %v7576_v49, %s7369_s30 }
 0x344   : > { %1891 = vrot.lane.b32.xlu1 %v7681_v28, %s7368_s24 }
 0x348   : > { %2105 = vrot.lane.b32.xlu1 %v7597_v63, %s7369_s30 }
 0x34b   : > { %v1288_v51 = vpop.xlane.xlu0 %1287 }
 0x34f   : > { %v1284_v59 = vpop.xlane.xlu0 %1283  ;;  %v1290_v32 = vpop.xlane.xlu1 %1289 }
 0x350   : > { %6921 = vrcp.f32 %v1290_v32 }
 0x351   : > { %6923 = vrcp.f32 %v1284_v59 }
 0x352   : > { %6925 = vrcp.f32 %v1288_v51 }
 0x353   : > { %v1286_v0 = vpop.xlane.xlu1 %1285  ;;  %v1533_v38 = vpop.permute.xlu0 %1532 }
 0x354   : > { %6927 = vrcp.f32 %v1286_v0 }
 0x35a   : > { %v6922_v33 = vpop.eup %6921 }
 0x35b   : > { %v6924_v54 = vpop.eup %6923  ;;  %v1334_v37 = vmul.f32 %v6922_v33, %v7832_v27  ;;  %v1568_v27 = vsel %vm1019_vm0, %v7821_v53, 0 }
 0x35c   : > { %v6926_v7 = vpop.eup %6925  ;;  %v1331_v35 = vmul.f32 %v6924_v54, %v7830_v25  ;;  %v1571_v25 = vsel %vm1019_vm0, %v1529_v24, 0 }
 0x35d   : > { %v1333_v58 = vmul.f32 %v6926_v7, %v7827_v26  ;;  %v1574_v26 = vsel %vm1019_vm0, %v7851_v44, 0 }
 0x35e   : > { %v6928_v30 = vpop.eup %6927 }
 0x35f   : > { %v1332_v18 = vmul.f32 %v6928_v30, %v7836_v29  ;;  %v1348_v40 = vpack.c.bf16 %v1334_v37, %v1333_v58  ;;  %v1535_v29 = vpop.permute.xlu1 %1534 }
 0x360   : > { %v1580_v59 = vsel %vm1019_vm0, %v1535_v29, 0 }
 0x361   : > { %v1347_v55 = vpack.c.bf16 %v1332_v18, %v1331_v35 }
 0x363   : > { %6453 = vmatprep.mubr.bf16.mxu1 %v1347_v55 }
 0x364   : > { %6454 = vmatmul.mubr.bf16.vlgmr.msra.gmra.mrb[16].mxu1 %v1348_v40 }
 0x365   : > { %6470 = vmatpush3.bf16.xpose.msra.mxu1 %v1565_v46 }
 0x366   : > { %6718 = vmatprep.subr.msk.bf16.mxu1 %vm1019_vm0, %v7821_v53  ;;  %v1577_v53 = vsel %vm1019_vm0, %v1533_v38, 0 }
 0x36d   : > { %6472 = vmatpush3.bf16.xpose.msra.mxu1 %v1568_v27 }
 0x36e   : > { %6719 = vmatprep.subr.msk.bf16.mxu1 %vm1019_vm0, %v1529_v24 }
 0x375   : > { %6474 = vmatpush3.bf16.xpose.msra.mxu1 %v1571_v25 }
 0x376   : > { %6720 = vmatprep.subr.msk.bf16.mxu1 %vm1019_vm0, %v7851_v44 }
 0x37d   : > { %6476 = vmatpush3.bf16.xpose.msra.mxu1 %v1574_v26 }
 0x37e   : > { %6721 = vmatprep.subr.msk.bf16.mxu1 %vm1019_vm0, %v1533_v38 }
 0x384   : > { %v1296_v4 = vpop.xlane.xlu0 %1295 }
 0x385   : > { %6478 = vmatpush3.bf16.xpose.msra.mxu1 %v1577_v53 }
 0x386   : > { %6722 = vmatprep.subr.msk.bf16.mxu1 %vm1019_vm0, %v1535_v29 }
 0x388   : > { %v1294_v23 = vpop.xlane.xlu0 %1293  ;;  %v1292_v24 = vpop.xlane.xlu1 %1291 }
 0x389   : > { %6929 = vrcp.f32 %v1294_v23 }
 0x38a   : > { %6931 = vrcp.f32 %v1292_v24 }
 0x38b   : > { %6933 = vrcp.f32 %v1296_v4 }
 0x38c   : > { %v1312_v51 = vpop.xlane.xlu0 %1311  ;;  %v1298_v44 = vpop.xlane.xlu1 %1297 }
 0x38d   : > { %6480 = vmatpush3.bf16.xpose.msra.mxu1 %v1580_v59  ;;  %6935 = vrcp.f32 %v1298_v44 }
 0x390   : > { %v1304_v32 = vpop.xlane.xlu1 %1303  ;;  %v1308_v0 = vpop.xlane.xlu0 %1307 }
 0x393   : > { %v6930_v33 = vpop.eup %6929 }
 0x394   : > { %v6932_v54 = vpop.eup %6931  ;;  %v1300_v7 = vpop.xlane.xlu1 %1299  ;;  %v1336_v30 = vmul.f32 %v6930_v33, %v7859_v50 }
 0x395   : > { %v1335_v37 = vmul.f32 %v6932_v54, %v7857_v43  ;;  %v6934_v35 = vpop.eup %6933 }
 0x396   : > { %v1314_v18 = vpop.xlane.xlu0 %1313  ;;  %v1337_v46 = vmul.f32 %v6934_v35, %v7853_v60 }
 0x397   : > { %v1349_v58 = vpack.c.bf16 %v1336_v30, %v1335_v37  ;;  %v6936_v55 = vpop.eup %6935 }
 0x398   : > { %v1306_v40 = vpop.xlane.xlu1 %1305  ;;  %v1338_v27 = vmul.f32 %v6936_v55, %v7865_v62 }
 0x399   : > { %6457 = vmatprep.mubr.bf16.mxu1 %v1349_v58  ;;  %6937 = vrcp.f32 %v1306_v40 }
 0x39a   : > { %v1537_v25 = vpop.permute.xlu0 %1536  ;;  %6939 = vrcp.f32 %v1300_v7  ;;  %v1350_v26 = vpack.c.bf16 %v1338_v27, %v1337_v46 }
 0x39b   : > { %6723 = vmatprep.subr.msk.bf16.mxu1 %vm1019_vm0, %v1537_v25  ;;  %v1583_v50 = vsel %vm1019_vm0, %v1537_v25, 0  ;;  %6941 = vrcp.f32 %v1304_v32 }
 0x39c   : > { %6482 = vmatpush3.bf16.xpose.msra.mxu1 %v1583_v50  ;;  %v1302_v43 = vpop.xlane.xlu1 %1301 }
 0x39d   : > { %6458 = vmatmul.mubr.bf16.gmra.mrb[20].mxu1 %v1350_v26  ;;  %6943 = vrcp.f32 %v1302_v43 }
 0x39e   : > { %v1501_v38 = vpop.permute.xlu0 %1500  ;;  %6945 = vrcp.f32 %v1308_v0 }
 0x3a0   : > { %v1310_v29 = vpop.xlane.xlu1 %1309 }
 0x3a1   : > { %6947 = vrcp.f32 %v1310_v29 }
 0x3a2   : > { %6949 = vrcp.f32 %v1314_v18  ;;  %v1505_v60 = vpop.permute.xlu0 %1504 }
 0x3a3   : > { %v6938_v62 = vpop.eup %6937  ;;  %6951 = vrcp.f32 %v1312_v51 }
 0x3a4   : > { %v1539_v4 = vpop.permute.xlu1 %1538  ;;  %v6940_v53 = vpop.eup %6939  ;;  %v1342_v32 = vmul.f32 %v6938_v62, %v7884_v52 }
 0x3a5   : > { %6724 = vmatprep.subr.msk.bf16.mxu1 %vm1019_vm0, %v1539_v4  ;;  %v1586_v23 = vsel %vm1019_vm0, %v1539_v4, 0  ;;  %v6942_v24 = vpop.eup %6941  ;;  %v1339_v0 = vmul.f32 %v6940_v53, %v7878_v14 }
 0x3a6   : > { %v1509_v59 = vpop.permute.xlu0 %1508  ;;  %6484 = vmatpush3.bf16.xpose.msra.mxu1 %v1586_v23  ;;  %v1341_v51 = vmul.f32 %v6942_v24, %v7872_v5 }
 0x3a7   : > { %v6944_v44 = vpop.eup %6943 }
 0x3a8   : > { %v1503_v33 = vpop.permute.xlu1 %1502  ;;  %v1340_v54 = vmul.f32 %v6944_v44, %v7887_v20  ;;  %v6946_v7 = vpop.eup %6945  ;;  %v1352_v18 = vpack.c.bf16 %v1342_v32, %v1341_v51 }
 0x3a9   : > { %v1343_v40 = vmul.f32 %v6946_v7, %v7874_v8 }
 0x3aa   : > { %v1513_v30 = vpop.permute.xlu0 %1512  ;;  %v1351_v37 = vpack.c.bf16 %v1340_v54, %v1339_v0 }
 0x3ab   : > { %v6948_v35 = vpop.eup %6947 }
 0x3ac   : > { %v6950_v58 = vpop.eup %6949  ;;  %6461 = vmatprep.mubr.bf16.mxu1 %v1351_v37  ;;  %v1507_v55 = vpop.permute.xlu1 %1506  ;;  %v1344_v46 = vmul.f32 %v6948_v35, %v7890_v22 }
 0x3ad   : > { %6462 = vmatmul.mubr.bf16.gmra.mrb[24].mxu1 %v1352_v18  ;;  %v6952_v52 = vpop.eup %6951  ;;  %v1346_v20 = vmul.f32 %v6950_v58, %v7881_v17 }
 0x3ae   : > { %v1878_v27 = vpop.permute.xlu0 %1877  ;;  %v1353_v14 = vpack.c.bf16 %v1344_v46, %v1343_v40  ;;  %v1345_v25 = vmul.f32 %v6952_v52, %v7867_v1 }
 0x3af   : > { %6501 = vmatprep.subr.bf16.mxu0 %v1878_v27 }
 0x3b0   : > { %6465 = vmatprep.mubr.bf16.mxu1 %v1353_v14  ;;  %v1511_v5 = vpop.permute.xlu1 %1510  ;;  %6502 = vmatpush3.bf16.msra.mxu0 %v1878_v27  ;;  %v1354_v26 = vpack.c.bf16 %v1346_v20, %v1345_v25 }
 0x3b2   : > { %v1882_v22 = vpop.permute.xlu0 %1881 }
 0x3b4   : > { %v1515_v50 = vpop.permute.xlu1 %1514 }
 0x3b5   : > { %6466 = vmatmul.mubr.bf16.gmra.mrb[28].mxu1 %v1354_v26 }
 0x3b6   : > { %6485 = vmatprep.mubr.msk.bf16.mxu1 %vm1019_vm0, %v1501_v38  ;;  %v1886_v17 = vpop.permute.xlu0 %1885 }
 0x3b8   : > { %v1880_v8 = vpop.permute.xlu1 %1879 }
 0x3b9   : > { %6503 = vmatprep.subr.bf16.mxu0 %v1880_v8 }
 0x3ba   : > { %6504 = vmatpush3.bf16.msra.mxu0 %v1880_v8  ;;  %v1890_v38 = vpop.permute.xlu0 %1889 }
 0x3bb   : > { %6505 = vmatprep.subr.bf16.mxu0 %v1882_v22 }
 0x3bc   : > { %v1884_v43 = vpop.permute.xlu1 %1883 }
 0x3bd   : > { %6486 = vmatmul.mubr.msk.bf16.vlgmr.msra.gmra.mrb[32].mxu1 %vm1019_vm0, %v1503_v33 }
 0x3be   : > { %6489 = vmatprep.mubr.msk.bf16.mxu1 %vm1019_vm0, %v1505_v60  ;;  %6506 = vmatpush3.bf16.msra.mxu0 %v1882_v22  ;;  %v7976_v60 = vpop.permute.xlu0 %2103 }
 0x3bf   : > { %6507 = vmatprep.subr.bf16.mxu0 %v1884_v43 }
 0x3c0   : > { %v1888_v1 = vpop.permute.xlu1 %1887 }
 0x3c2   : > { %6508 = vmatpush3.bf16.msra.mxu0 %v1884_v43 }
 0x3c3   : > { %6509 = vmatprep.subr.bf16.mxu0 %v1886_v17 }
 0x3c4   : > { %v1892_v29 = vpop.permute.xlu1 %1891 }
 0x3c5   : > { %6490 = vmatmul.mubr.msk.bf16.gmra.mrb[36].mxu1 %vm1019_vm0, %v1507_v55 }
 0x3c6   : > { %6493 = vmatprep.mubr.msk.bf16.mxu1 %vm1019_vm0, %v1509_v59  ;;  %6510 = vmatpush3.bf16.msra.mxu0 %v1886_v17 }
 0x3c7   : > { %6511 = vmatprep.subr.bf16.mxu0 %v1888_v1 }
 0x3ca   : > { %6512 = vmatpush3.bf16.msra.mxu0 %v1888_v1 }
 0x3cb   : > { %6513 = vmatprep.subr.bf16.mxu0 %v1890_v38 }
 0x3cd   : > { %6494 = vmatmul.mubr.msk.bf16.gmra.mrb[40].mxu1 %vm1019_vm0, %v1511_v5 }
 0x3ce   : > { %6497 = vmatprep.mubr.msk.bf16.mxu1 %vm1019_vm0, %v1513_v30  ;;  %6514 = vmatpush3.bf16.msra.mxu0 %v1890_v38 }
 0x3cf   : > { %6515 = vmatprep.subr.bf16.mxu0 %v1892_v29 }
 0x3d2   : > { %6516 = vmatpush3.bf16.msra.mxu0 %v1892_v29 }
 0x3d3   : > { %6725 = vmatprep.subr.msk.bf16.mxu0 %vm1019_vm0, %v7976_v60 }
 0x3d5   : > { %6498 = vmatmul.mubr.msk.bf16.gmra.mrb[44].mxu1 %vm1019_vm0, %v1515_v50 }
 0x437   : > { %v6455_v62 = vpop.f32.mrb[16].mxu1 }
 0x438   : > { %v1389_v4 = vpop.f32.mrb[17].mxu1 }
 0x439   : > { %v6456_v53 = vpop.f32.mrb[18].mxu1 }
 0x43a   : > { %v1453_v23 = vpack.c.bf16 %v6456_v53, %v6455_v62  ;;  %v1392_v24 = vpop.f32.mrb[19].mxu1 }
 0x43b   : > { %v1452_v59 = vpack.c.bf16 %v1392_v24, %v1389_v4 }
 0x43c   : > { %1461 = vst.msk [vmem:[#allocation3 + $0x8] sm:$0xff] %vm1019_vm0, %v1453_v23 }
 0x43d   : > { %1460 = vst.msk [vmem:[#allocation3] sm:$0xff] %vm1019_vm0, %v1452_v59 }
 0x470   : > { %v6459_v44 = vpop.f32.mrb[20].mxu1 }
 0x471   : > { %v1405_v32 = vpop.f32.mrb[21].mxu1 }
 0x472   : > { %v6460_v33 = vpop.f32.mrb[22].mxu1 }
 0x473   : > { %v1455_v0 = vpack.c.bf16 %v6460_v33, %v6459_v44  ;;  %v1408_v54 = vpop.f32.mrb[23].mxu1 }
 0x474   : > { %v1454_v7 = vpack.c.bf16 %v1408_v54, %v1405_v32 }
 0x475   : > { %1463 = vst.msk [vmem:[#allocation3 + $0x18] sm:$0xff] %vm1019_vm0, %v1455_v0 }
 0x476   : > { %1462 = vst.msk [vmem:[#allocation3 + $0x10] sm:$0xff] %vm1019_vm0, %v1454_v7 }
 0x480   : > { %v6463_v51 = vpop.f32.mrb[24].mxu1 }
 0x481   : > { %v1421_v30 = vpop.f32.mrb[25].mxu1 }
 0x482   : > { %v6464_v37 = vpop.f32.mrb[26].mxu1 }
 0x483   : > { %v1457_v35 = vpack.c.bf16 %v6464_v37, %v6463_v51  ;;  %v1424_v18 = vpop.f32.mrb[27].mxu1 }
 0x484   : > { %v1456_v58 = vpack.c.bf16 %v1424_v18, %v1421_v30 }
 0x485   : > { %1465 = vst.msk [vmem:[#allocation3 + $0x28] sm:$0xff] %vm1019_vm0, %v1457_v35 }
 0x486   : > { %1464 = vst.msk [vmem:[#allocation3 + $0x20] sm:$0xff] %vm1019_vm0, %v1456_v58 }
 0x488   : > { %v6467_v55 = vpop.f32.mrb[28].mxu1 }
 0x489   : > { %v1437_v40 = vpop.f32.mrb[29].mxu1 }
 0x48a   : > { %v6468_v46 = vpop.f32.mrb[30].mxu1 }
 0x48b   : > { %v1459_v52 = vpack.c.bf16 %v6468_v46, %v6467_v55  ;;  %v1440_v27 = vpop.f32.mrb[31].mxu1 }
 0x48c   : > { %v1458_v14 = vpack.c.bf16 %v1440_v27, %v1437_v40 }
 0x48d   : > { %1467 = vst.msk [vmem:[#allocation3 + $0x38] sm:$0xff] %vm1019_vm0, %v1459_v52 }
 0x48e   : > { %1466 = vst.msk [vmem:[#allocation3 + $0x30] sm:$0xff] %vm1019_vm0, %v1458_v14 }
 0x490   : > { %v6487_v20 = vpop.f32.mrb[32].mxu1 }
 0x491   : > { %v1687_v5 = vmul.f32 0.17677669, %v6487_v20  ;;  %v1622_v25 = vpop.f32.mrb[33].mxu1 }
 0x492   : > { %v6488_v26 = vpop.f32.mrb[34].mxu1  ;;  %v1685_v50 = vmul.f32 0.17677669, %v1622_v25 }
 0x493   : > { %v1625_v8 = vpop.f32.mrb[35].mxu1  ;;  %v7990_v22 = vadd.f32 %v7751_v15, %v1687_v5  ;;  %v1688_v1 = vmul.f32 0.17677669, %v6488_v26 }
 0x494   : > { %v1686_v43 = vmul.f32 0.17677669, %v1625_v8  ;;  %v7997_v38 = vadd.f32 %v7751_v15, %v1685_v50 }
 0x495   : > { %1721 = vmax.xlane.f32.xlu0 %v7990_v22  ;;  %v1704_v59 = vadd.f32 %v7751_v15, %v1688_v1 }
 0x496   : > { %v7994_v17 = vadd.f32 %v7751_v15, %v1686_v43 }
 0x498   : > { %1719 = vmax.xlane.f32.xlu1 %v7994_v17  ;;  %v6491_v29 = vpop.f32.mrb[36].mxu1 }
 0x499   : > { %1717 = vmax.xlane.f32.xlu0 %v7997_v38  ;;  %v1638_v62 = vpop.f32.mrb[37].mxu1  ;;  %v1691_v53 = vmul.f32 0.17677669, %v6491_v29 }
 0x49a   : > { %v6492_v4 = vpop.f32.mrb[38].mxu1  ;;  %v1689_v33 = vmul.f32 0.17677669, %v1638_v62 }
 0x49b   : > { %v1692_v23 = vmul.f32 0.17677669, %v6492_v4  ;;  %v1641_v24 = vpop.f32.mrb[39].mxu1  ;;  %v8007_v0 = vadd.f32 %v7751_v15, %v1691_v53 }
 0x49c   : > { %v1690_v44 = vmul.f32 0.17677669, %v1641_v24  ;;  %v8015_v58 = vadd.f32 %v7751_v15, %v1689_v33 }
 0x49d   : > { %1723 = vmax.xlane.f32.xlu0 %v1704_v59  ;;  %v8003_v32 = vadd.f32 %v7751_v15, %v1692_v23  ;;  %v8054_v23 = vpop.permute.xlu1 %2105 }
 0x49e   : > { %v8011_v51 = vadd.f32 %v7751_v15, %v1690_v44 }
 0x49f   : > { %1731 = vmax.xlane.f32.xlu1 %v8003_v32 }
 0x4a0   : > { %v6495_v54 = vpop.f32.mrb[40].mxu1 }
 0x4a1   : > { %1729 = vmax.xlane.f32.xlu0 %v8007_v0  ;;  %v1654_v7 = vpop.f32.mrb[41].mxu1  ;;  %v1695_v37 = vmul.f32 0.17677669, %v6495_v54 }
 0x4a2   : > { %v6496_v30 = vpop.f32.mrb[42].mxu1  ;;  %v1693_v46 = vmul.f32 0.17677669, %v1654_v7 }
 0x4a3   : > { %v1696_v35 = vmul.f32 0.17677669, %v6496_v30  ;;  %1727 = vmax.xlane.f32.xlu1 %v8011_v51  ;;  %v1657_v18 = vpop.f32.mrb[43].mxu1  ;;  %v8023_v52 = vadd.f32 %v7751_v15, %v1695_v37 }
 0x4a4   : > { %v1694_v55 = vmul.f32 0.17677669, %v1657_v18  ;;  %v8031_v50 = vadd.f32 %v7751_v15, %v1693_v46 }
 0x4a5   : > { %1725 = vmax.xlane.f32.xlu0 %v8015_v58  ;;  %v8019_v40 = vadd.f32 %v7751_v15, %v1696_v35 }
 0x4a6   : > { %v8027_v20 = vadd.f32 %v7751_v15, %v1694_v55 }
 0x4a7   : > { %1739 = vmax.xlane.f32.xlu1 %v8019_v40 }
 0x4a8   : > { %v6499_v27 = vpop.f32.mrb[44].mxu1 }
 0x4a9   : > { %1737 = vmax.xlane.f32.xlu0 %v8023_v52  ;;  %v1670_v14 = vpop.f32.mrb[45].mxu1  ;;  %v1699_v25 = vmul.f32 0.17677669, %v6499_v27 }
 0x4aa   : > { %v6500_v5 = vpop.f32.mrb[46].mxu1  ;;  %v1697_v8 = vmul.f32 0.17677669, %v1670_v14 }
 0x4ab   : > { %1735 = vmax.xlane.f32.xlu1 %v8027_v20  ;;  %v1673_v26 = vpop.f32.mrb[47].mxu1  ;;  %v8035_v43 = vadd.f32 %v7751_v15, %v1699_v25  ;;  %v1700_v29 = vmul.f32 0.17677669, %v6500_v5 }
 0x4ac   : > { %v8039_v1 = vadd.f32 %v7751_v15, %v1697_v8  ;;  %v1698_v62 = vmul.f32 0.17677669, %v1673_v26 }
 0x4ad   : > { %1733 = vmax.xlane.f32.xlu0 %v8031_v50  ;;  %v8047_v4 = vadd.f32 %v7751_v15, %v1700_v29 }
 0x4ae   : > { %v8051_v53 = vadd.f32 %v7751_v15, %v1698_v62 }
 0x4b1   : > { %1745 = vmax.xlane.f32.xlu0 %v8035_v43 }
 0x4b5   : > { %1741 = vmax.xlane.f32.xlu0 %v8039_v1 }
 0x4bc   : > { %2109 = vrot.lane.b32.xlu1 %v7644_v47, %s7369_s30 }
 0x4cb   : > { %2107 = vrot.lane.b32.xlu0 %v7620_v21, %s7369_s30 }
 0x4e0   : > { %1747 = vmax.xlane.f32.xlu1 %v8047_v4 }
 0x4e4   : > { %1743 = vmax.xlane.f32.xlu1 %v8051_v53 }
 0x522   : > { %v1722_v24 = vpop.xlane.xlu0 %1721 }
 0x523   : > { %v1751_v44 = vsub.f32 %v7990_v22, %v1722_v24 }
 0x525   : > { %v1769_v33 = vmul.f32 1.442695, %v1751_v44  ;;  %v1720_v54 = vpop.xlane.xlu1 %1719 }
 0x526   : > { %v1750_v7 = vsub.f32 %v7994_v17, %v1720_v54  ;;  %v1718_v30 = vpop.xlane.xlu0 %1717 }
 0x527   : > { %6953 = vpow2.f32 %v1769_v33  ;;  %v1749_v37 = vsub.f32 %v7997_v38, %v1718_v30 }
 0x528   : > { %v1767_v35 = vmul.f32 1.442695, %v1750_v7 }
 0x529   : > { %v1765_v18 = vmul.f32 1.442695, %v1749_v37 }
 0x52a   : > { %6955 = vpow2.f32 %v1767_v35  ;;  %v1724_v15 = vpop.xlane.xlu0 %1723 }
 0x52b   : > { %6957 = vpow2.f32 %v1765_v18  ;;  %v1752_v55 = vsub.f32 %v1704_v59, %v1724_v15 }
 0x52c   : > { %v1732_v5 = vpop.xlane.xlu1 %1731 }
 0x52d   : > { %v1771_v46 = vmul.f32 1.442695, %v1752_v55  ;;  %v1756_v7 = vsub.f32 %v8003_v32, %v1732_v5 }
 0x52e   : > { %v1730_v38 = vpop.xlane.xlu0 %1729 }
 0x52f   : > { %6959 = vpow2.f32 %v1771_v46  ;;  %v1755_v26 = vsub.f32 %v8007_v0, %v1730_v38  ;;  %v1779_v18 = vmul.f32 1.442695, %v1756_v7 }
 0x530   : > { %v1728_v8 = vpop.xlane.xlu1 %1727 }
 0x531   : > { %v8059_v27 = vpop.eup %6953  ;;  %v1777_v62 = vmul.f32 1.442695, %v1755_v26  ;;  %v1754_v44 = vsub.f32 %v8011_v51, %v1728_v8 }
 0x532   : > { %1801 = vadd.xlane.f32.xlu1 %v8059_v27  ;;  %v1726_v59 = vpop.xlane.xlu0 %1725 }
 0x533   : > { %v1753_v24 = vsub.f32 %v8015_v58, %v1726_v59  ;;  %6961 = vpow2.f32 %v1777_v62  ;;  %v1775_v37 = vmul.f32 1.442695, %v1754_v44 }
 0x534   : > { %v8062_v22 = vpop.eup %6955  ;;  %v1740_v33 = vpop.xlane.xlu1 %1739 }
 0x535   : > { %v8064_v14 = vpop.eup %6957  ;;  %1799 = vadd.xlane.f32.xlu0 %v8062_v22  ;;  %v1773_v30 = vmul.f32 1.442695, %v1753_v24  ;;  %v1760_v32 = vsub.f32 %v8019_v40, %v1740_v33 }
 0x536   : > { %1797 = vadd.xlane.f32.xlu1 %v8064_v14  ;;  %v1738_v25 = vpop.xlane.xlu0 %1737 }
 0x537   : > { %v1759_v35 = vsub.f32 %v8023_v52, %v1738_v25  ;;  %6963 = vpow2.f32 %v1773_v30  ;;  %v1787_v25 = vmul.f32 1.442695, %v1760_v32 }
 0x538   : > { %v1736_v15 = vpop.xlane.xlu1 %1735  ;;  %6965 = vpow2.f32 %v1775_v37 }
 0x539   : > { %v8068_v17 = vpop.eup %6959  ;;  %v1785_v55 = vmul.f32 1.442695, %v1759_v35  ;;  %6967 = vpow2.f32 %v1779_v18 }
 0x53a   : > { %1803 = vadd.xlane.f32.xlu1 %v8068_v17  ;;  %v1734_v29 = vpop.xlane.xlu0 %1733 }
 0x53b   : > { %v1757_v58 = vsub.f32 %v8031_v50, %v1734_v29  ;;  %6969 = vpow2.f32 %v1785_v55  ;;  %v1758_v50 = vsub.f32 %v8027_v20, %v1736_v15 }
 0x53c   : > { %v8086_v52 = vpop.permute.xlu1 %2109 }
 0x53d   : > { %v1781_v59 = vmul.f32 1.442695, %v1757_v58  ;;  %v8084_v5 = vpop.eup %6961  ;;  %v1783_v29 = vmul.f32 1.442695, %v1758_v50 }
 0x53e   : > { %v1746_v54 = vpop.xlane.xlu0 %1745 }
 0x53f   : > { %v1763_v0 = vsub.f32 %v8035_v43, %v1746_v54 }
 0x541   : > { %v1793_v51 = vmul.f32 1.442695, %v1763_v0  ;;  %v8090_v26 = vpop.eup %6963 }
 0x542   : > { %v1742_v46 = vpop.xlane.xlu0 %1741 }
 0x543   : > { %v1761_v38 = vsub.f32 %v8039_v1, %v1742_v46  ;;  %6971 = vpow2.f32 %v1793_v51  ;;  %v8092_v1 = vpop.eup %6965 }
 0x544   : > { %6973 = vpow2.f32 %v1781_v59  ;;  %v8097_v24 = vpop.eup %6967 }
 0x545   : > { %v1789_v43 = vmul.f32 1.442695, %v1761_v38  ;;  %v8099_v20 = vpop.eup %6969 }
 0x546   : > { %v2108_v15 = vpop.permute.xlu0 %2107 }
 0x547   : > { %6975 = vpow2.f32 %v1789_v43 }
 0x548   : > { %6977 = vpow2.f32 %v1787_v25 }
 0x54b   : > { %2113 = vrot.lane.b32.xlu1 %v7692_v41, %s7369_s30  ;;  %2111 = vrot.lane.b32.xlu0 %v7668_v11, %s7369_s30 }
 0x54d   : > { %v8104_v54 = vpop.eup %6971 }
 0x54e   : > { %v8106_v7 = vpop.eup %6973 }
 0x551   : > { %v8110_v30 = vpop.eup %6975 }
 0x552   : > { %v8112_v37 = vpop.eup %6977 }
 0x56a   : > { %1809 = vadd.xlane.f32.xlu0 %v8084_v5 }
 0x56d   : > { %v1748_v8 = vpop.xlane.xlu1 %1747 }
 0x56e   : > { %v1764_v40 = vsub.f32 %v8047_v4, %v1748_v8  ;;  %1805 = vadd.xlane.f32.xlu0 %v8090_v26 }
 0x56f   : > { %1807 = vadd.xlane.f32.xlu1 %v8092_v1 }
 0x570   : > { %v1795_v62 = vmul.f32 1.442695, %v1764_v40  ;;  %v2144_v40 = vsel %vm1019_vm0, %v7976_v60, 0 }
 0x571   : > { %v1744_v44 = vpop.xlane.xlu1 %1743 }
 0x572   : > { %6979 = vpow2.f32 %v1795_v62  ;;  %v1762_v33 = vsub.f32 %v8051_v53, %v1744_v44  ;;  %1811 = vadd.xlane.f32.xlu0 %v8097_v24 }
 0x573   : > { %1817 = vadd.xlane.f32.xlu1 %v8099_v20  ;;  %6981 = vpow2.f32 %v1783_v29 }
 0x574   : > { %v1791_v4 = vmul.f32 1.442695, %v1762_v33 }
 0x576   : > { %1825 = vadd.xlane.f32.xlu0 %v8104_v54  ;;  %6983 = vpow2.f32 %v1791_v4 }
 0x577   : > { %1813 = vadd.xlane.f32.xlu1 %v8106_v7 }
 0x57a   : > { %1821 = vadd.xlane.f32.xlu0 %v8110_v30 }
 0x57b   : > { %1819 = vadd.xlane.f32.xlu1 %v8112_v37 }
 0x57c   : > { %v8116_v53 = vpop.eup %6979 }
 0x57d   : > { %v8118_v35 = vpop.eup %6981 }
 0x57e   : > { %1827 = vadd.xlane.f32.xlu0 %v8116_v53 }
 0x57f   : > { %1815 = vadd.xlane.f32.xlu1 %v8118_v35 }
 0x580   : > { %v8122_v18 = vpop.eup %6983 }
 0x583   : > { %1823 = vadd.xlane.f32.xlu1 %v8122_v18 }
 0x594   : > { %2115 = vrot.lane.b32.xlu0 %v7707_v57, %s7369_s30  ;;  %2117 = vrot.lane.b32.xlu1 %v7719_v12, %s7369_s30 }
 0x598   : > { %2079 = vrot.lane.b32.xlu0 %v7574_v48, %s7369_s30  ;;  %2081 = vrot.lane.b32.xlu1 %v7595_v61, %s7369_s30 }
 0x59c   : > { %2083 = vrot.lane.b32.xlu0 %v7617_v19, %s7369_s30  ;;  %2085 = vrot.lane.b32.xlu1 %v7641_v45, %s7369_s30 }
 0x5a0   : > { %2087 = vrot.lane.b32.xlu0 %v7665_v9, %s7369_s30  ;;  %2089 = vrot.lane.b32.xlu1 %v7689_v39, %s7369_s30 }
 0x5a4   : > { %2091 = vrot.lane.b32.xlu0 %v7705_v56, %s7369_s30  ;;  %2093 = vrot.lane.b32.xlu1 %v7717_v10, %s7369_s30 }
 0x5a8   : > { %2456 = vrot.lane.b32.xlu0 %v7613_v16, %s7369_s30  ;;  %2458 = vrot.lane.b32.xlu1 %v7610_v13, %s7369_s30 }
 0x5ac   : > { %2460 = vrot.lane.b32.xlu0 %v7637_v42, %s7369_s30  ;;  %2462 = vrot.lane.b32.xlu1 %v7633_v36, %s7369_s30 }
 0x5b0   : > { %2464 = vrot.lane.b32.xlu0 %v7661_v6, %s7369_s30  ;;  %2466 = vrot.lane.b32.xlu1 %v7657_v3, %s7369_s30 }
 0x5b4   : > { %2468 = vrot.lane.b32.xlu0 %v7685_v31, %s7369_s30  ;;  %2470 = vrot.lane.b32.xlu1 %v7681_v28, %s7369_s30 }
 0x5b8   : > { %2682 = vrot.lane.b32.xlu0 %v7576_v49, %s7370_s15  ;;  %2684 = vrot.lane.b32.xlu1 %v7597_v63, %s7370_s15 }
 0x5bf   : > { %v1802_v0 = vpop.xlane.xlu1 %1801 }
 0x5c2   : > { %v1800_v55 = vpop.xlane.xlu0 %1799 }
 0x5c3   : > { %6985 = vrcp.f32 %v1800_v55  ;;  %v1798_v58 = vpop.xlane.xlu1 %1797 }
 0x5c4   : > { %6987 = vrcp.f32 %v1798_v58 }
 0x5c5   : > { %6989 = vrcp.f32 %v1802_v0 }
 0x5c6   : > { %v2112_v60 = vpop.permute.xlu0 %2111 }
 0x5c7   : > { %v1804_v46 = vpop.xlane.xlu1 %1803  ;;  %v2156_v29 = vsel %vm1019_vm0, %v2112_v60, 0 }
 0x5c8   : > { %6991 = vrcp.f32 %v1804_v46 }
 0x5cd   : > { %v6986_v51 = vpop.eup %6985 }
 0x5ce   : > { %v6988_v38 = vpop.eup %6987  ;;  %v1846_v32 = vmul.f32 %v6986_v51, %v8062_v22  ;;  %v2147_v22 = vsel %vm1019_vm0, %v8054_v23, 0 }
 0x5cf   : > { %v1845_v59 = vmul.f32 %v6988_v38, %v8064_v14  ;;  %v6990_v43 = vpop.eup %6989  ;;  %v2153_v14 = vsel %vm1019_vm0, %v8086_v52, 0 }
 0x5d0   : > { %v1847_v63 = vmul.f32 %v6990_v43, %v8059_v27  ;;  %v2150_v27 = vsel %vm1019_vm0, %v2108_v15, 0 }
 0x5d1   : > { %v1861_v49 = vpack.c.bf16 %v1846_v32, %v1845_v59 }
 0x5d2   : > { %v6992_v25 = vpop.eup %6991 }
 0x5d3   : > { %v1848_v50 = vmul.f32 %v6992_v25, %v8068_v17  ;;  %6517 = vmatprep.mubr.bf16.mxu0 %v1861_v49 }
 0x5d5   : > { %v1862_v8 = vpack.c.bf16 %v1848_v50, %v1847_v63 }
 0x5d7   : > { %6518 = vmatmul.mubr.bf16.vlgmr.msra.gmra.mrb[48].mxu0 %v1862_v8 }
 0x5d8   : > { %6534 = vmatpush3.bf16.xpose.msra.mxu0 %v2144_v40 }
 0x5d9   : > { %6726 = vmatprep.subr.msk.bf16.mxu0 %vm1019_vm0, %v8054_v23  ;;  %v2114_v23 = vpop.permute.xlu1 %2113 }
 0x5da   : > { %v2159_v4 = vsel %vm1019_vm0, %v2114_v23, 0 }
 0x5e0   : > { %6536 = vmatpush3.bf16.xpose.msra.mxu0 %v2147_v22 }
 0x5e1   : > { %6727 = vmatprep.subr.msk.bf16.mxu0 %vm1019_vm0, %v2108_v15 }
 0x5e8   : > { %6538 = vmatpush3.bf16.xpose.msra.mxu0 %v2150_v27 }
 0x5e9   : > { %6728 = vmatprep.subr.msk.bf16.mxu0 %vm1019_vm0, %v8086_v52 }
 0x5f0   : > { %6540 = vmatpush3.bf16.xpose.msra.mxu0 %v2153_v14 }
 0x5f1   : > { %6729 = vmatprep.subr.msk.bf16.mxu0 %vm1019_vm0, %v2112_v60 }
 0x5f7   : > { %v1810_v17 = vpop.xlane.xlu0 %1809 }
 0x5f8   : > { %6542 = vmatpush3.bf16.xpose.msra.mxu0 %v2156_v29 }
 0x5f9   : > { %6730 = vmatprep.subr.msk.bf16.mxu0 %vm1019_vm0, %v2114_v23 }
 0x5fb   : > { %v1806_v62 = vpop.xlane.xlu0 %1805 }
 0x5fc   : > { %6993 = vrcp.f32 %v1806_v62  ;;  %v1808_v44 = vpop.xlane.xlu1 %1807 }
 0x5fd   : > { %6995 = vrcp.f32 %v1808_v44 }
 0x5fe   : > { %6997 = vrcp.f32 %v1810_v17 }
 0x5ff   : > { %v1812_v33 = vpop.xlane.xlu0 %1811 }
 0x600   : > { %6999 = vrcp.f32 %v1812_v33  ;;  %6544 = vmatpush3.bf16.xpose.msra.mxu0 %v2159_v4  ;;  %v1818_v52 = vpop.xlane.xlu1 %1817 }
 0x603   : > { %v1826_v15 = vpop.xlane.xlu0 %1825 }
 0x604   : > { %v1814_v0 = vpop.xlane.xlu1 %1813 }
 0x606   : > { %v6994_v55 = vpop.eup %6993 }
 0x607   : > { %v6996_v58 = vpop.eup %6995  ;;  %v1822_v46 = vpop.xlane.xlu0 %1821  ;;  %v1849_v51 = vmul.f32 %v6994_v55, %v8090_v26 }
 0x608   : > { %v6998_v38 = vpop.eup %6997  ;;  %v1820_v32 = vpop.xlane.xlu1 %1819  ;;  %v1850_v59 = vmul.f32 %v6996_v58, %v8092_v1 }
 0x609   : > { %7001 = vrcp.f32 %v1820_v32  ;;  %v1851_v63 = vmul.f32 %v6998_v38, %v8084_v5 }
 0x60a   : > { %v7000_v43 = vpop.eup %6999  ;;  %v1863_v49 = vpack.c.bf16 %v1850_v59, %v1849_v51  ;;  %7003 = vrcp.f32 %v1814_v0 }
 0x60b   : > { %v1828_v25 = vpop.xlane.xlu0 %1827  ;;  %v1852_v50 = vmul.f32 %v7000_v43, %v8097_v24  ;;  %7005 = vrcp.f32 %v1818_v52 }
 0x60c   : > { %6521 = vmatprep.mubr.bf16.mxu0 %v1863_v49  ;;  %v1816_v8 = vpop.xlane.xlu1 %1815 }
 0x60d   : > { %7007 = vrcp.f32 %v1816_v8  ;;  %v1864_v40 = vpack.c.bf16 %v1852_v50, %v1851_v63 }
 0x60e   : > { %7009 = vrcp.f32 %v1822_v46 }
 0x60f   : > { %v2116_v26 = vpop.permute.xlu0 %2115  ;;  %6522 = vmatmul.mubr.bf16.gmra.mrb[52].mxu0 %v1864_v40 }
 0x610   : > { %6731 = vmatprep.subr.msk.bf16.mxu0 %vm1019_vm0, %v2116_v26  ;;  %v1824_v1 = vpop.xlane.xlu1 %1823  ;;  %v2162_v22 = vsel %vm1019_vm0, %v2116_v26, 0 }
 0x611   : > { %7011 = vrcp.f32 %v1824_v1  ;;  %6546 = vmatpush3.bf16.xpose.msra.mxu0 %v2162_v22 }
 0x612   : > { %7013 = vrcp.f32 %v1828_v25 }
 0x613   : > { %v2080_v27 = vpop.permute.xlu0 %2079  ;;  %v7002_v5 = vpop.eup %7001  ;;  %7015 = vrcp.f32 %v1826_v15 }
 0x614   : > { %v2118_v24 = vpop.permute.xlu1 %2117  ;;  %v7004_v14 = vpop.eup %7003  ;;  %v1856_v23 = vmul.f32 %v7002_v5, %v8112_v37 }
 0x615   : > { %6732 = vmatprep.subr.msk.bf16.mxu0 %vm1019_vm0, %v2118_v24  ;;  %v7006_v60 = vpop.eup %7005  ;;  %v2165_v44 = vsel %vm1019_vm0, %v2118_v24, 0  ;;  %v1853_v33 = vmul.f32 %v7004_v14, %v8106_v7 }
 0x616   : > { %v1855_v15 = vmul.f32 %v7006_v60, %v8099_v20 }
 0x617   : > { %v7008_v17 = vpop.eup %7007  ;;  %v2084_v29 = vpop.permute.xlu0 %2083 }
 0x618   : > { %v2082_v62 = vpop.permute.xlu1 %2081  ;;  %v1854_v4 = vmul.f32 %v7008_v17, %v8118_v35  ;;  %v7010_v52 = vpop.eup %7009  ;;  %v1866_v46 = vpack.c.bf16 %v1856_v23, %v1855_v15 }
 0x619   : > { %6548 = vmatpush3.bf16.xpose.msra.mxu0 %v2165_v44  ;;  %v1857_v37 = vmul.f32 %v7010_v52, %v8110_v30 }
 0x61a   : > { %v1865_v0 = vpack.c.bf16 %v1854_v4, %v1853_v33 }
 0x61b   : > { %v7012_v55 = vpop.eup %7011  ;;  %v2088_v58 = vpop.permute.xlu0 %2087 }
 0x61c   : > { %v7014_v51 = vpop.eup %7013  ;;  %6525 = vmatprep.mubr.bf16.mxu0 %v1865_v0  ;;  %v2086_v38 = vpop.permute.xlu1 %2085  ;;  %v1858_v32 = vmul.f32 %v7012_v55, %v8122_v18 }
 0x61d   : > { %6526 = vmatmul.mubr.bf16.gmra.mrb[56].mxu0 %v1866_v46  ;;  %v7016_v59 = vpop.eup %7015  ;;  %v1860_v35 = vmul.f32 %v7014_v51, %v8116_v53 }
 0x61e   : > { %v1867_v7 = vpack.c.bf16 %v1858_v32, %v1857_v37  ;;  %v1859_v20 = vmul.f32 %v7016_v59, %v8104_v54 }
 0x61f   : > { %v2092_v43 = vpop.permute.xlu0 %2091 }
 0x620   : > { %6529 = vmatprep.mubr.bf16.mxu0 %v1867_v7  ;;  %v2090_v49 = vpop.permute.xlu1 %2089  ;;  %v1868_v63 = vpack.c.bf16 %v1860_v35, %v1859_v20  ;;  %v8262_v20 = vld [vmem:[%s7748_s28] ss:$0 sm:$0xff] }
 0x623   : > { %v2457_v25 = vpop.permute.xlu0 %2456 }
 0x624   : > { %6565 = vmatprep.subr.bf16.mxu1 %v2457_v25  ;;  %v2094_v50 = vpop.permute.xlu1 %2093 }
 0x625   : > { %6530 = vmatmul.mubr.bf16.gmra.mrb[60].mxu0 %v1868_v63  ;;  %6566 = vmatpush3.bf16.msra.mxu1 %v2457_v25 }
 0x626   : > { %6549 = vmatprep.mubr.msk.bf16.mxu0 %vm1019_vm0, %v2080_v27 }
 0x627   : > { %v2461_v18 = vpop.permute.xlu0 %2460 }
 0x628   : > { %v2459_v30 = vpop.permute.xlu1 %2458 }
 0x629   : > { %6567 = vmatprep.subr.bf16.mxu1 %v2459_v30 }
 0x62a   : > { %6568 = vmatpush3.bf16.msra.mxu1 %v2459_v30 }
 0x62b   : > { %6569 = vmatprep.subr.bf16.mxu1 %v2461_v18  ;;  %v2465_v54 = vpop.permute.xlu0 %2464 }
 0x62c   : > { %v2463_v53 = vpop.permute.xlu1 %2462 }
 0x62d   : > { %6550 = vmatmul.mubr.msk.bf16.vlgmr.msra.gmra.mrb[64].mxu0 %vm1019_vm0, %v2082_v62 }
 0x62e   : > { %6553 = vmatprep.mubr.msk.bf16.mxu0 %vm1019_vm0, %v2084_v29  ;;  %6570 = vmatpush3.bf16.msra.mxu1 %v2461_v18 }
 0x62f   : > { %6571 = vmatprep.subr.bf16.mxu1 %v2463_v53  ;;  %v2469_v40 = vpop.permute.xlu0 %2468 }
 0x630   : > { %v2467_v8 = vpop.permute.xlu1 %2466 }
 0x632   : > { %6572 = vmatpush3.bf16.msra.mxu1 %v2463_v53 }
 0x633   : > { %6573 = vmatprep.subr.bf16.mxu1 %v2465_v54  ;;  %v8208_v1 = vpop.permute.xlu0 %2682 }
 0x634   : > { %v2471_v26 = vpop.permute.xlu1 %2470 }
 0x635   : > { %6554 = vmatmul.mubr.msk.bf16.gmra.mrb[68].mxu0 %vm1019_vm0, %v2086_v38 }
 0x636   : > { %6557 = vmatprep.mubr.msk.bf16.mxu0 %vm1019_vm0, %v2088_v58  ;;  %6574 = vmatpush3.bf16.msra.mxu1 %v2465_v54 }
 0x637   : > { %6575 = vmatprep.subr.bf16.mxu1 %v2467_v8 }
 0x63a   : > { %6576 = vmatpush3.bf16.msra.mxu1 %v2467_v8 }
 0x63b   : > { %6577 = vmatprep.subr.bf16.mxu1 %v2469_v40 }
 0x63d   : > { %6558 = vmatmul.mubr.msk.bf16.gmra.mrb[72].mxu0 %vm1019_vm0, %v2090_v49 }
 0x63e   : > { %6561 = vmatprep.mubr.msk.bf16.mxu0 %vm1019_vm0, %v2092_v43  ;;  %6578 = vmatpush3.bf16.msra.mxu1 %v2469_v40 }
 0x63f   : > { %6579 = vmatprep.subr.bf16.mxu1 %v2471_v26 }
 0x642   : > { %6580 = vmatpush3.bf16.msra.mxu1 %v2471_v26 }
 0x643   : > { %6733 = vmatprep.subr.msk.bf16.mxu1 %vm1019_vm0, %v8208_v1 }
 0x645   : > { %6562 = vmatmul.mubr.msk.bf16.gmra.mrb[76].mxu0 %vm1019_vm0, %v2094_v50 }
 0x6aa   : > { %v8213_v22 = vpop.f32.mrb[48].mxu0 }
 0x6ab   : > { %v8215_v27 = vpop.f32.mrb[49].mxu0 }
 0x6ac   : > { %v8217_v5 = vpop.f32.mrb[50].mxu0 }
 0x6ad   : > { %v8221_v14 = vpop.f32.mrb[51].mxu0 }
 0x6e2   : > { %v8225_v17 = vpop.f32.mrb[52].mxu0 }
 0x6e3   : > { %v8227_v29 = vpop.f32.mrb[53].mxu0 }
 0x6e4   : > { %v8229_v23 = vpop.f32.mrb[54].mxu0 }
 0x6e5   : > { %v8233_v44 = vpop.f32.mrb[55].mxu0 }
 0x6f0   : > { %v8237_v4 = vpop.f32.mrb[56].mxu0 }
 0x6f1   : > { %10763 = vst [vmem:[#allocation5_spill] sm:$0xff] %v8237_v4  ;;  %v8239_v52 = vpop.f32.mrb[57].mxu0 }
 0x6f2   : > { %10764 = vst [vmem:[#allocation6_spill] sm:$0xff] %v8239_v52  ;;  %v8241_v15 = vpop.f32.mrb[58].mxu0 }
 0x6f3   : > { %v8245_v55 = vpop.f32.mrb[59].mxu0 }
 0x6f4   : > { %10765 = vst [vmem:[#allocation7_spill] sm:$0xff] %v8245_v55 }
 0x6f8   : > { %v8249_v46 = vpop.f32.mrb[60].mxu0 }
 0x6f9   : > { %10766 = vst [vmem:[#allocation8_spill] sm:$0xff] %v8249_v46  ;;  %v8251_v51 = vpop.f32.mrb[61].mxu0 }
 0x6fa   : > { %10767 = vst [vmem:[#allocation9_spill] sm:$0xff] %v8251_v51  ;;  %v8253_v38 = vpop.f32.mrb[62].mxu0 }
 0x6fb   : > { %10768 = vst [vmem:[#allocation10_spill] sm:$0xff] %v8253_v38  ;;  %v8257_v32 = vpop.f32.mrb[63].mxu0 }
 0x6fc   : > { %10769 = vst [vmem:[#allocation11_spill] sm:$0xff] %v8257_v32 }
 0x700   : > { %v6551_v7 = vpop.f32.mrb[64].mxu0 }
 0x701   : > { %v2266_v43 = vmul.f32 0.17677669, %v6551_v7  ;;  %v2201_v35 = vpop.f32.mrb[65].mxu0 }
 0x702   : > { %v6552_v49 = vpop.f32.mrb[66].mxu0  ;;  %v2264_v63 = vmul.f32 0.17677669, %v2201_v35 }
 0x703   : > { %v8265_v25 = vadd.f32 %v8262_v20, %v2266_v43  ;;  %v2204_v50 = vpop.f32.mrb[67].mxu0  ;;  %v2267_v54 = vmul.f32 0.17677669, %v6552_v49 }
 0x704   : > { %v2265_v30 = vmul.f32 0.17677669, %v2204_v50  ;;  %v8272_v53 = vadd.f32 %v8262_v20, %v2264_v63 }
 0x705   : > { %2300 = vmax.xlane.f32.xlu0 %v8265_v25  ;;  %v8277_v7 = vadd.f32 %v8262_v20, %v2267_v54 }
 0x706   : > { %v8269_v18 = vadd.f32 %v8262_v20, %v2265_v30 }
 0x708   : > { %2298 = vmax.xlane.f32.xlu1 %v8269_v18  ;;  %v6555_v8 = vpop.f32.mrb[68].mxu0 }
 0x709   : > { %2296 = vmax.xlane.f32.xlu0 %v8272_v53  ;;  %v2217_v40 = vpop.f32.mrb[69].mxu0  ;;  %v2270_v43 = vmul.f32 0.17677669, %v6555_v8 }
 0x70a   : > { %v6556_v26 = vpop.f32.mrb[70].mxu0  ;;  %v2268_v63 = vmul.f32 0.17677669, %v2217_v40 }
 0x70b   : > { %v2271_v35 = vmul.f32 0.17677669, %v6556_v26  ;;  %v2220_v50 = vpop.f32.mrb[71].mxu0  ;;  %v8284_v49 = vadd.f32 %v8262_v20, %v2270_v43 }
 0x70c   : > { %v2269_v59 = vmul.f32 0.17677669, %v2220_v50  ;;  %v8292_v26 = vadd.f32 %v8262_v20, %v2268_v63 }
 0x70d   : > { %v8280_v30 = vadd.f32 %v8262_v20, %v2271_v35  ;;  %2302 = vmax.xlane.f32.xlu0 %v8277_v7 }
 0x70e   : > { %v8288_v58 = vadd.f32 %v8262_v20, %v2269_v59 }
 0x70f   : > { %2310 = vmax.xlane.f32.xlu1 %v8280_v30 }
 0x710   : > { %v6559_v37 = vpop.f32.mrb[72].mxu0 }
 0x711   : > { %2308 = vmax.xlane.f32.xlu0 %v8284_v49  ;;  %v2233_v54 = vpop.f32.mrb[73].mxu0  ;;  %v2274_v35 = vmul.f32 0.17677669, %v6559_v37 }
 0x712   : > { %v6560_v8 = vpop.f32.mrb[74].mxu0  ;;  %v2272_v33 = vmul.f32 0.17677669, %v2233_v54 }
 0x713   : > { %v2275_v50 = vmul.f32 0.17677669, %v6560_v8  ;;  %2306 = vmax.xlane.f32.xlu1 %v8288_v58  ;;  %v2236_v43 = vpop.f32.mrb[75].mxu0  ;;  %v8300_v59 = vadd.f32 %v8262_v20, %v2274_v35 }
 0x714   : > { %v2273_v0 = vmul.f32 0.17677669, %v2236_v43 }
 0x715   : > { %v8296_v40 = vadd.f32 %v8262_v20, %v2275_v50  ;;  %2304 = vmax.xlane.f32.xlu0 %v8292_v26  ;;  %v8308_v50 = vadd.f32 %v8262_v20, %v2272_v33 }
 0x716   : > { %v8304_v63 = vadd.f32 %v8262_v20, %v2273_v0 }
 0x717   : > { %2318 = vmax.xlane.f32.xlu1 %v8296_v40 }
 0x718   : > { %v6563_v62 = vpop.f32.mrb[76].mxu0 }
 0x719   : > { %2316 = vmax.xlane.f32.xlu0 %v8300_v59  ;;  %v2249_v37 = vpop.f32.mrb[77].mxu0  ;;  %v2278_v43 = vmul.f32 0.17677669, %v6563_v62 }
 0x71a   : > { %v6564_v8 = vpop.f32.mrb[78].mxu0  ;;  %v2276_v35 = vmul.f32 0.17677669, %v2249_v37 }
 0x71b   : > { %2314 = vmax.xlane.f32.xlu1 %v8304_v63  ;;  %v2252_v60 = vpop.f32.mrb[79].mxu0  ;;  %v8313_v54 = vadd.f32 %v8262_v20, %v2278_v43  ;;  %v2279_v62 = vmul.f32 0.17677669, %v6564_v8 }
 0x71c   : > { %v8317_v0 = vadd.f32 %v8262_v20, %v2276_v35  ;;  %v2277_v43 = vmul.f32 0.17677669, %v2252_v60  ;;  %v8332_v35 = vpop.permute.xlu1 %2684 }
 0x71d   : > { %2312 = vmax.xlane.f32.xlu0 %v8308_v50  ;;  %v8325_v33 = vadd.f32 %v8262_v20, %v2279_v62 }
 0x71e   : > { %v8329_v37 = vadd.f32 %v8262_v20, %v2277_v43 }
 0x721   : > { %2324 = vmax.xlane.f32.xlu0 %v8313_v54 }
 0x725   : > { %2320 = vmax.xlane.f32.xlu0 %v8317_v0 }
 0x72c   : > { %2688 = vrot.lane.b32.xlu1 %v7644_v47, %s7370_s15 }
 0x73b   : > { %2686 = vrot.lane.b32.xlu0 %v7620_v21, %s7370_s15 }
 0x750   : > { %2326 = vmax.xlane.f32.xlu1 %v8325_v33 }
 0x754   : > { %2322 = vmax.xlane.f32.xlu1 %v8329_v37 }
 0x792   : > { %v2301_v24 = vpop.xlane.xlu0 %2300 }
 0x793   : > { %v2330_v47 = vsub.f32 %v8265_v25, %v2301_v24 }
 0x795   : > { %v2348_v2 = vmul.f32 1.442695, %v2330_v47  ;;  %v2299_v34 = vpop.xlane.xlu1 %2298 }
 0x796   : > { %v2329_v21 = vsub.f32 %v8269_v18, %v2299_v34  ;;  %v2297_v8 = vpop.xlane.xlu0 %2296 }
 0x797   : > { %7017 = vpow2.f32 %v2348_v2  ;;  %v2328_v60 = vsub.f32 %v8272_v53, %v2297_v8 }
 0x798   : > { %v2346_v62 = vmul.f32 1.442695, %v2329_v21 }
 0x799   : > { %v2344_v51 = vmul.f32 1.442695, %v2328_v60 }
 0x79a   : > { %7019 = vpow2.f32 %v2346_v62  ;;  %v2303_v43 = vpop.xlane.xlu0 %2302 }
 0x79b   : > { %7021 = vpow2.f32 %v2344_v51  ;;  %v2331_v32 = vsub.f32 %v8277_v7, %v2303_v43 }
 0x79d   : > { %v2350_v46 = vmul.f32 1.442695, %v2331_v32  ;;  %v2311_v32 = vpop.xlane.xlu1 %2310 }
 0x79e   : > { %v2309_v51 = vpop.xlane.xlu0 %2308  ;;  %v2335_v43 = vsub.f32 %v8280_v30, %v2311_v32 }
 0x79f   : > { %7023 = vpow2.f32 %v2350_v46  ;;  %v2334_v18 = vsub.f32 %v8284_v49, %v2309_v51 }
 0x7a0   : > { %v2358_v55 = vmul.f32 1.442695, %v2335_v43 }
 0x7a1   : > { %v8338_v38 = vpop.eup %7017  ;;  %v2307_v53 = vpop.xlane.xlu1 %2306  ;;  %v2356_v47 = vmul.f32 1.442695, %v2334_v18 }
 0x7a2   : > { %2380 = vadd.xlane.f32.xlu1 %v8338_v38  ;;  %v2305_v46 = vpop.xlane.xlu0 %2304  ;;  %v2333_v8 = vsub.f32 %v8288_v58, %v2307_v53 }
 0x7a3   : > { %v2332_v21 = vsub.f32 %v8292_v26, %v2305_v46  ;;  %7025 = vpow2.f32 %v2356_v47 }
 0x7a4   : > { %v8341_v24 = vpop.eup %7019  ;;  %v2354_v52 = vmul.f32 1.442695, %v2333_v8 }
 0x7a5   : > { %v8343_v34 = vpop.eup %7021  ;;  %2378 = vadd.xlane.f32.xlu0 %v8341_v24  ;;  %v2319_v60 = vpop.xlane.xlu1 %2318 }
 0x7a6   : > { %2376 = vadd.xlane.f32.xlu1 %v8343_v34  ;;  %v2317_v25 = vpop.xlane.xlu0 %2316  ;;  %v2339_v30 = vsub.f32 %v8296_v40, %v2319_v60 }
 0x7a9   : > { %v8347_v2 = vpop.eup %7023  ;;  %v2315_v4 = vpop.xlane.xlu1 %2314 }
 0x7aa   : > { %2382 = vadd.xlane.f32.xlu1 %v8347_v2  ;;  %v2313_v7 = vpop.xlane.xlu0 %2312 }
 0x7ab   : > { %v2336_v26 = vsub.f32 %v8308_v50, %v2313_v7  ;;  %v2337_v50 = vsub.f32 %v8304_v63, %v2315_v4 }
 0x7ad   : > { %v2360_v32 = vmul.f32 1.442695, %v2336_v26  ;;  %v8363_v53 = vpop.eup %7025  ;;  %v2362_v7 = vmul.f32 1.442695, %v2337_v50  ;;  %v2723_v26 = vsel %vm1019_vm0, %v8208_v1, 0 }
 0x7ae   : > { %v2325_v62 = vpop.xlane.xlu0 %2324 }
 0x7af   : > { %v2342_v49 = vsub.f32 %v8313_v54, %v2325_v62  ;;  %v2366_v54 = vmul.f32 1.442695, %v2339_v30 }
 0x7b1   : > { %v2372_v58 = vmul.f32 1.442695, %v2342_v49 }
 0x7b2   : > { %v2321_v46 = vpop.xlane.xlu0 %2320 }
 0x7b3   : > { %v2340_v18 = vsub.f32 %v8317_v0, %v2321_v46 }
 0x7bb   : > { %2692 = vrot.lane.b32.xlu1 %v7692_v41, %s7370_s15  ;;  %2690 = vrot.lane.b32.xlu0 %v7668_v11, %s7370_s15  ;;  %v2352_v41 = vmul.f32 1.442695, %v2332_v21  ;;  %v2338_v11 = vsub.f32 %v8300_v59, %v2317_v25  ;;  %v8365_v59 = vpop.permute.xlu1 %2688 }
 0x7bd   : > { %7027 = vpow2.f32 %v2352_v41  ;;  %v2364_v51 = vmul.f32 1.442695, %v2338_v11 }
 0x7be   : > { %7029 = vpow2.f32 %v2354_v52  ;;  %v2368_v52 = vmul.f32 1.442695, %v2340_v18 }
 0x7bf   : > { %7031 = vpow2.f32 %v2358_v55 }
 0x7c0   : > { %7033 = vpow2.f32 %v2364_v51 }
 0x7c1   : > { %7035 = vpow2.f32 %v2372_v58 }
 0x7c2   : > { %7037 = vpow2.f32 %v2360_v32 }
 0x7c3   : > { %7039 = vpow2.f32 %v2368_v52 }
 0x7c4   : > { %7041 = vpow2.f32 %v2366_v54 }
 0x7c7   : > { %v8369_v55 = vpop.eup %7027 }
 0x7c8   : > { %v8371_v0 = vpop.eup %7029 }
 0x7c9   : > { %v8376_v21 = vpop.eup %7031 }
 0x7ca   : > { %v8378_v4 = vpop.eup %7033 }
 0x7cb   : > { %v8383_v60 = vpop.eup %7035 }
 0x7cc   : > { %v8385_v62 = vpop.eup %7037 }
 0x7cd   : > { %v8389_v43 = vpop.eup %7039 }
 0x7ce   : > { %v8391_v41 = vpop.eup %7041 }
 0x7da   : > { %2388 = vadd.xlane.f32.xlu0 %v8363_v53 }
 0x7dd   : > { %v2327_v25 = vpop.xlane.xlu1 %2326 }
 0x7de   : > { %v2343_v40 = vsub.f32 %v8325_v33, %v2327_v25  ;;  %2384 = vadd.xlane.f32.xlu0 %v8369_v55 }
 0x7df   : > { %2386 = vadd.xlane.f32.xlu1 %v8371_v0 }
 0x7e0   : > { %v2374_v47 = vmul.f32 1.442695, %v2343_v40 }
 0x7e1   : > { %v2323_v8 = vpop.xlane.xlu1 %2322 }
 0x7e2   : > { %7043 = vpow2.f32 %v2374_v47  ;;  %v2341_v63 = vsub.f32 %v8329_v37, %v2323_v8  ;;  %2390 = vadd.xlane.f32.xlu0 %v8376_v21 }
 0x7e3   : > { %2396 = vadd.xlane.f32.xlu1 %v8378_v4  ;;  %7045 = vpow2.f32 %v2362_v7 }
 0x7e4   : > { %v2370_v33 = vmul.f32 1.442695, %v2341_v63 }
 0x7e6   : > { %2404 = vadd.xlane.f32.xlu0 %v8383_v60  ;;  %7047 = vpow2.f32 %v2370_v33 }
 0x7e7   : > { %2392 = vadd.xlane.f32.xlu1 %v8385_v62 }
 0x7ea   : > { %2400 = vadd.xlane.f32.xlu0 %v8389_v43 }
 0x7eb   : > { %2398 = vadd.xlane.f32.xlu1 %v8391_v41 }
 0x7ec   : > { %v8395_v37 = vpop.eup %7043 }
 0x7ed   : > { %v8397_v11 = vpop.eup %7045 }
 0x7ee   : > { %2406 = vadd.xlane.f32.xlu0 %v8395_v37 }
 0x7ef   : > { %2394 = vadd.xlane.f32.xlu1 %v8397_v11 }
 0x7f0   : > { %v8401_v49 = vpop.eup %7047 }
 0x7f3   : > { %2402 = vadd.xlane.f32.xlu1 %v8401_v49 }
 0x804   : > { %2694 = vrot.lane.b32.xlu0 %v7707_v57, %s7370_s15  ;;  %2696 = vrot.lane.b32.xlu1 %v7719_v12, %s7370_s15 }
 0x808   : > { %2658 = vrot.lane.b32.xlu0 %v7574_v48, %s7370_s15  ;;  %2660 = vrot.lane.b32.xlu1 %v7595_v61, %s7370_s15  ;;  %v2687_v48 = vpop.permute.xlu0 %2686 }
 0x80c   : > { %2662 = vrot.lane.b32.xlu0 %v7617_v19, %s7370_s15  ;;  %2664 = vrot.lane.b32.xlu1 %v7641_v45, %s7370_s15 }
 0x810   : > { %2666 = vrot.lane.b32.xlu0 %v7665_v9, %s7370_s15  ;;  %2668 = vrot.lane.b32.xlu1 %v7689_v39, %s7370_s15 }
 0x814   : > { %2670 = vrot.lane.b32.xlu0 %v7705_v56, %s7370_s15  ;;  %2672 = vrot.lane.b32.xlu1 %v7717_v10, %s7370_s15 }
 0x818   : > { %3035 = vrot.lane.b32.xlu0 %v7613_v16, %s7370_s15  ;;  %3037 = vrot.lane.b32.xlu1 %v7610_v13, %s7370_s15 }
 0x81c   : > { %3039 = vrot.lane.b32.xlu0 %v7637_v42, %s7370_s15 }
 0x820   : > { %3041 = vrot.lane.b32.xlu0 %v7633_v36, %s7370_s15 }
 0x82f   : > { %v2381_v61 = vpop.xlane.xlu1 %2380 }
 0x832   : > { %v2379_v19 = vpop.xlane.xlu0 %2378 }
 0x833   : > { %7049 = vrcp.f32 %v2379_v19  ;;  %v2377_v45 = vpop.xlane.xlu1 %2376 }
 0x834   : > { %7051 = vrcp.f32 %v2377_v45 }
 0x835   : > { %7053 = vrcp.f32 %v2381_v61 }
 0x836   : > { %v2691_v1 = vpop.permute.xlu0 %2690 }
 0x837   : > { %v2383_v9 = vpop.xlane.xlu1 %2382  ;;  %v2735_v46 = vsel %vm1019_vm0, %v2691_v1, 0 }
 0x838   : > { %7055 = vrcp.f32 %v2383_v9 }
 0x83d   : > { %v7050_v39 = vpop.eup %7049 }
 0x83e   : > { %v7052_v16 = vpop.eup %7051  ;;  %v2425_v56 = vmul.f32 %v7050_v39, %v8341_v24  ;;  %v2726_v24 = vsel %vm1019_vm0, %v8332_v35, 0 }
 0x83f   : > { %v2424_v13 = vmul.f32 %v7052_v16, %v8343_v34  ;;  %v7054_v57 = vpop.eup %7053  ;;  %v2732_v34 = vsel %vm1019_vm0, %v8365_v59, 0 }
 0x840   : > { %v2426_v36 = vmul.f32 %v7054_v57, %v8338_v38  ;;  %v2729_v38 = vsel %vm1019_vm0, %v2687_v48, 0 }
 0x841   : > { %v2440_v42 = vpack.c.bf16 %v2425_v56, %v2424_v13 }
 0x842   : > { %v7056_v10 = vpop.eup %7055 }
 0x843   : > { %v2427_v12 = vmul.f32 %v7056_v10, %v8347_v2  ;;  %6581 = vmatprep.mubr.bf16.mxu1 %v2440_v42 }
 0x845   : > { %v2441_v51 = vpack.c.bf16 %v2427_v12, %v2426_v36 }
 0x847   : > { %6582 = vmatmul.mubr.bf16.vlgmr.msra.gmra.mrb[48].mxu1 %v2441_v51 }
 0x848   : > { %6598 = vmatpush3.bf16.xpose.msra.mxu1 %v2723_v26 }
 0x849   : > { %6734 = vmatprep.subr.msk.bf16.mxu1 %vm1019_vm0, %v8332_v35  ;;  %v2693_v35 = vpop.permute.xlu1 %2692 }
 0x84a   : > { %v2738_v32 = vsel %vm1019_vm0, %v2693_v35, 0 }
 0x850   : > { %6600 = vmatpush3.bf16.xpose.msra.mxu1 %v2726_v24 }
 0x851   : > { %6735 = vmatprep.subr.msk.bf16.mxu1 %vm1019_vm0, %v2687_v48 }
 0x858   : > { %6602 = vmatpush3.bf16.xpose.msra.mxu1 %v2729_v38 }
 0x859   : > { %6736 = vmatprep.subr.msk.bf16.mxu1 %vm1019_vm0, %v8365_v59 }
 0x860   : > { %6604 = vmatpush3.bf16.xpose.msra.mxu1 %v2732_v34 }
 0x861   : > { %6737 = vmatprep.subr.msk.bf16.mxu1 %vm1019_vm0, %v2691_v1 }
 0x867   : > { %v2389_v2 = vpop.xlane.xlu0 %2388 }
 0x868   : > { %6606 = vmatpush3.bf16.xpose.msra.mxu1 %v2735_v46 }
 0x869   : > { %6738 = vmatprep.subr.msk.bf16.mxu1 %vm1019_vm0, %v2693_v35 }
 0x86b   : > { %v2385_v58 = vpop.xlane.xlu0 %2384 }
 0x86c   : > { %7057 = vrcp.f32 %v2385_v58  ;;  %v2387_v18 = vpop.xlane.xlu1 %2386 }
 0x86d   : > { %7059 = vrcp.f32 %v2387_v18 }
 0x86e   : > { %7061 = vrcp.f32 %v2389_v2 }
 0x86f   : > { %v2391_v30 = vpop.xlane.xlu0 %2390 }
 0x870   : > { %7063 = vrcp.f32 %v2391_v30  ;;  %6608 = vmatpush3.bf16.xpose.msra.mxu1 %v2738_v32  ;;  %v2397_v59 = vpop.xlane.xlu1 %2396 }
 0x873   : > { %v2405_v52 = vpop.xlane.xlu0 %2404 }
 0x874   : > { %v2393_v54 = vpop.xlane.xlu1 %2392 }
 0x876   : > { %v7058_v50 = vpop.eup %7057 }
 0x877   : > { %v7060_v25 = vpop.eup %7059  ;;  %v2401_v40 = vpop.xlane.xlu0 %2400  ;;  %v2428_v7 = vmul.f32 %v7058_v50, %v8369_v55 }
 0x878   : > { %v7062_v47 = vpop.eup %7061  ;;  %v2399_v8 = vpop.xlane.xlu1 %2398  ;;  %v2429_v63 = vmul.f32 %v7060_v25, %v8371_v0 }
 0x879   : > { %7065 = vrcp.f32 %v2399_v8  ;;  %v2430_v19 = vmul.f32 %v7062_v47, %v8363_v53 }
 0x87a   : > { %v7064_v33 = vpop.eup %7063  ;;  %v2442_v48 = vpack.c.bf16 %v2429_v63, %v2428_v7  ;;  %7067 = vrcp.f32 %v2393_v54 }
 0x87b   : > { %v2407_v61 = vpop.xlane.xlu0 %2406  ;;  %v2431_v45 = vmul.f32 %v7064_v33, %v8376_v21  ;;  %7069 = vrcp.f32 %v2397_v59 }
 0x87c   : > { %6585 = vmatprep.mubr.bf16.mxu1 %v2442_v48  ;;  %v2395_v9 = vpop.xlane.xlu1 %2394 }
 0x87d   : > { %7071 = vrcp.f32 %v2395_v9  ;;  %v2443_v39 = vpack.c.bf16 %v2431_v45, %v2430_v19 }
 0x87e   : > { %7073 = vrcp.f32 %v2401_v40 }
 0x87f   : > { %v2695_v55 = vpop.permute.xlu0 %2694  ;;  %6586 = vmatmul.mubr.bf16.gmra.mrb[52].mxu1 %v2443_v39 }
 0x880   : > { %6739 = vmatprep.subr.msk.bf16.mxu1 %vm1019_vm0, %v2695_v55  ;;  %v2403_v0 = vpop.xlane.xlu1 %2402  ;;  %v2741_v16 = vsel %vm1019_vm0, %v2695_v55, 0 }
 0x881   : > { %7075 = vrcp.f32 %v2403_v0  ;;  %6610 = vmatpush3.bf16.xpose.msra.mxu1 %v2741_v16 }
 0x882   : > { %7077 = vrcp.f32 %v2407_v61 }
 0x883   : > { %v2659_v56 = vpop.permute.xlu0 %2658  ;;  %v7066_v53 = vpop.eup %7065  ;;  %7079 = vrcp.f32 %v2405_v52 }
 0x884   : > { %v2697_v21 = vpop.permute.xlu1 %2696  ;;  %v7068_v13 = vpop.eup %7067  ;;  %v2435_v36 = vmul.f32 %v7066_v53, %v8391_v41 }
 0x885   : > { %6740 = vmatprep.subr.msk.bf16.mxu1 %vm1019_vm0, %v2697_v21  ;;  %v7070_v57 = vpop.eup %7069  ;;  %v2744_v51 = vsel %vm1019_vm0, %v2697_v21, 0  ;;  %v2432_v26 = vmul.f32 %v7068_v13, %v8385_v62 }
 0x886   : > { %v2434_v34 = vmul.f32 %v7070_v57, %v8378_v4 }
 0x887   : > { %v7072_v42 = vpop.eup %7071  ;;  %v2663_v10 = vpop.permute.xlu0 %2662 }
 0x888   : > { %v2661_v12 = vpop.permute.xlu1 %2660  ;;  %v2433_v24 = vmul.f32 %v7072_v42, %v8397_v11  ;;  %v7074_v38 = vpop.eup %7073  ;;  %v2445_v35 = vpack.c.bf16 %v2435_v36, %v2434_v34 }
 0x889   : > { %6612 = vmatpush3.bf16.xpose.msra.mxu1 %v2744_v51  ;;  %v2436_v41 = vmul.f32 %v7074_v38, %v8389_v43 }
 0x88a   : > { %v2444_v1 = vpack.c.bf16 %v2433_v24, %v2432_v26 }
 0x88b   : > { %v7076_v2 = vpop.eup %7075  ;;  %v2667_v46 = vpop.permute.xlu0 %2666 }
 0x88c   : > { %v7078_v58 = vpop.eup %7077  ;;  %6589 = vmatprep.mubr.bf16.mxu1 %v2444_v1  ;;  %v2665_v18 = vpop.permute.xlu1 %2664  ;;  %v2437_v30 = vmul.f32 %v7076_v2, %v8401_v49 }
 0x88d   : > { %6590 = vmatmul.mubr.bf16.gmra.mrb[56].mxu1 %v2445_v35  ;;  %v7080_v32 = vpop.eup %7079  ;;  %v2439_v11 = vmul.f32 %v7078_v58, %v8395_v37 }
 0x88e   : > { %v2446_v62 = vpack.c.bf16 %v2437_v30, %v2436_v41  ;;  %v2438_v4 = vmul.f32 %v7080_v32, %v8383_v60  ;;  %v10770_v60 = vmov 0  }
 0x88f   : > { %v2671_v59 = vpop.permute.xlu0 %2670 }
 0x890   : > { %6593 = vmatprep.mubr.bf16.mxu1 %v2446_v62  ;;  %v2669_v52 = vpop.permute.xlu1 %2668  ;;  %v2447_v50 = vpack.c.bf16 %v2439_v11, %v2438_v4 }
 0x893   : > { %v3036_v54 = vpop.permute.xlu0 %3035 }
 0x894   : > { %6629 = vmatprep.subr.bf16.mxu0 %v3036_v54  ;;  %v2673_v25 = vpop.permute.xlu1 %2672 }
 0x895   : > { %6594 = vmatmul.mubr.bf16.gmra.mrb[60].mxu1 %v2447_v50  ;;  %6630 = vmatpush3.bf16.msra.mxu0 %v3036_v54 }
 0x896   : > { %6613 = vmatprep.mubr.msk.bf16.mxu1 %vm1019_vm0, %v2659_v56 }
 0x897   : > { %v3040_v43 = vpop.permute.xlu0 %3039 }
 0x898   : > { %v3038_v49 = vpop.permute.xlu1 %3037 }
 0x899   : > { %6631 = vmatprep.subr.bf16.mxu0 %v3038_v49 }
 0x89a   : > { %6632 = vmatpush3.bf16.msra.mxu0 %v3038_v49 }
 0x89b   : > { %6633 = vmatprep.subr.bf16.mxu0 %v3040_v43  ;;  %v3042_v37 = vpop.permute.xlu0 %3041 }
 0x89d   : > { %6614 = vmatmul.mubr.msk.bf16.vlgmr.msra.gmra.mrb[64].mxu1 %vm1019_vm0, %v2661_v12 }
 0x89e   : > { %6617 = vmatprep.mubr.msk.bf16.mxu1 %vm1019_vm0, %v2663_v10  ;;  %6634 = vmatpush3.bf16.msra.mxu0 %v3040_v43 }
 0x89f   : > { %6635 = vmatprep.subr.bf16.mxu0 %v3042_v37 }
 0x8a2   : > { %6636 = vmatpush3.bf16.msra.mxu0 %v3042_v37 }
 0x8a5   : > { %6618 = vmatmul.mubr.msk.bf16.gmra.mrb[68].mxu1 %vm1019_vm0, %v2665_v18 }
 0x8a6   : > { %6621 = vmatprep.mubr.msk.bf16.mxu1 %vm1019_vm0, %v2667_v46 }
 0x8ad   : > { %6622 = vmatmul.mubr.msk.bf16.gmra.mrb[72].mxu1 %vm1019_vm0, %v2669_v52 }
 0x8ae   : > { %6625 = vmatprep.mubr.msk.bf16.mxu1 %vm1019_vm0, %v2671_v59 }
 0x8b5   : > { %6626 = vmatmul.mubr.msk.bf16.gmra.mrb[76].mxu1 %vm1019_vm0, %v2673_v25 }
 0x8b6   : > { %3890 = vmatprep.mubr.bf16.mxu1 %v10770_v60 }
 0x91a   : > { %v8477_v40 = vpop.f32.mrb[48].mxu1 }
 0x91b   : > { %v8479_v7 = vpop.f32.mrb[49].mxu1 }
 0x91c   : > { %v8481_v47 = vpop.f32.mrb[50].mxu1 }
 0x91d   : > { %v2578_v8 = vpack.c.bf16 %v8481_v47, %v8477_v40  ;;  %v8485_v63 = vpop.f32.mrb[51].mxu1 }
 0x91e   : > { %v2577_v33 = vpack.c.bf16 %v8485_v63, %v8479_v7 }
 0x952   : > { %v8489_v48 = vpop.f32.mrb[52].mxu1 }
 0x953   : > { %v8491_v61 = vpop.f32.mrb[53].mxu1 }
 0x954   : > { %v8493_v19 = vpop.f32.mrb[54].mxu1 }
 0x955   : > { %v2580_v45 = vpack.c.bf16 %v8493_v19, %v8489_v48  ;;  %v8497_v9 = vpop.f32.mrb[55].mxu1 }
 0x956   : > { %v2579_v39 = vpack.c.bf16 %v8497_v9, %v8491_v61 }
 0x960   : > { %v8501_v55 = vpop.f32.mrb[56].mxu1 }
 0x961   : > { %v8503_v0 = vpop.f32.mrb[57].mxu1 }
 0x962   : > { %v8505_v16 = vpop.f32.mrb[58].mxu1 }
 0x963   : > { %v8509_v53 = vpop.f32.mrb[59].mxu1  ;;  %v10780_v48 = vpack.c.bf16 %v8505_v16, %v8501_v55  ;;  %v10783_v55 = vld [vmem:[#allocation8_spill] sm:$0xff] }
 0x964   : > { %v10781_v61 = vpack.c.bf16 %v8509_v53, %v8503_v0  ;;  %v10785_v0 = vld [vmem:[#allocation11_spill] sm:$0xff]  ;;  %v10786_v53 = vld [vmem:[#allocation9_spill] sm:$0xff] }
 0x968   : > { %v8513_v13 = vpop.f32.mrb[60].mxu1 }
 0x969   : > { %v8515_v57 = vpop.f32.mrb[61].mxu1 }
 0x96a   : > { %v8517_v42 = vpop.f32.mrb[62].mxu1 }
 0x96b   : > { %v8521_v36 = vpop.f32.mrb[63].mxu1 }
 0x970   : > { %v6615_v51 = vpop.f32.mrb[64].mxu1 }
 0x971   : > { %v2845_v26 = vmul.f32 0.17677669, %v6615_v51  ;;  %v2780_v24 = vpop.f32.mrb[65].mxu1 }
 0x972   : > { %v6616_v38 = vpop.f32.mrb[66].mxu1  ;;  %v2843_v1 = vmul.f32 0.17677669, %v2780_v24 }
 0x973   : > { %v8526_v34 = vadd.f32 %v8262_v20, %v2845_v26  ;;  %v2783_v2 = vpop.f32.mrb[67].mxu1  ;;  %v2846_v18 = vmul.f32 0.17677669, %v6616_v38 }
 0x974   : > { %v2844_v46 = vmul.f32 0.17677669, %v2783_v2  ;;  %v8533_v58 = vadd.f32 %v8262_v20, %v2843_v1 }
 0x975   : > { %2879 = vmax.xlane.f32.xlu0 %v8526_v34  ;;  %v2862_v62 = vadd.f32 %v8262_v20, %v2846_v18 }
 0x976   : > { %v8530_v35 = vadd.f32 %v8262_v20, %v2844_v46 }
 0x978   : > { %2877 = vmax.xlane.f32.xlu1 %v8530_v35  ;;  %v6619_v41 = vpop.f32.mrb[68].mxu1 }
 0x979   : > { %2875 = vmax.xlane.f32.xlu0 %v8533_v58  ;;  %v2796_v30 = vpop.f32.mrb[69].mxu1  ;;  %v2849_v59 = vmul.f32 0.17677669, %v6619_v41 }
 0x97a   : > { %v6620_v32 = vpop.f32.mrb[70].mxu1  ;;  %v2847_v25 = vmul.f32 0.17677669, %v2796_v30 }
 0x97b   : > { %v2850_v11 = vmul.f32 0.17677669, %v6620_v32  ;;  %v2799_v52 = vpop.f32.mrb[71].mxu1  ;;  %v8542_v50 = vadd.f32 %v8262_v20, %v2849_v59 }
 0x97c   : > { %v2848_v54 = vmul.f32 0.17677669, %v2799_v52  ;;  %v8550_v26 = vadd.f32 %v8262_v20, %v2847_v25 }
 0x97d   : > { %v8539_v4 = vadd.f32 %v8262_v20, %v2850_v11  ;;  %2881 = vmax.xlane.f32.xlu0 %v2862_v62 }
 0x97e   : > { %v8546_v49 = vadd.f32 %v8262_v20, %v2848_v54 }
 0x97f   : > { %2889 = vmax.xlane.f32.xlu1 %v8539_v4 }
 0x980   : > { %v6623_v43 = vpop.f32.mrb[72].mxu1 }
 0x981   : > { %2887 = vmax.xlane.f32.xlu0 %v8542_v50  ;;  %v2812_v37 = vpop.f32.mrb[73].mxu1  ;;  %v2853_v24 = vmul.f32 0.17677669, %v6623_v43 }
 0x982   : > { %v6624_v51 = vpop.f32.mrb[74].mxu1  ;;  %v2851_v41 = vmul.f32 0.17677669, %v2812_v37 }
 0x983   : > { %v2854_v38 = vmul.f32 0.17677669, %v6624_v51  ;;  %2885 = vmax.xlane.f32.xlu1 %v8546_v49  ;;  %v2815_v1 = vpop.f32.mrb[75].mxu1  ;;  %v8558_v18 = vadd.f32 %v8262_v20, %v2853_v24 }
 0x984   : > { %v2852_v46 = vmul.f32 0.17677669, %v2815_v1  ;;  %v8566_v52 = vadd.f32 %v8262_v20, %v2851_v41 }
 0x985   : > { %v8554_v2 = vadd.f32 %v8262_v20, %v2854_v38  ;;  %2883 = vmax.xlane.f32.xlu0 %v8550_v26 }
 0x986   : > { %v8562_v32 = vadd.f32 %v8262_v20, %v2852_v46 }
 0x987   : > { %2897 = vmax.xlane.f32.xlu1 %v8554_v2 }
 0x988   : > { %v6627_v30 = vpop.f32.mrb[76].mxu1 }
 0x989   : > { %2895 = vmax.xlane.f32.xlu0 %v8558_v18  ;;  %v2828_v59 = vpop.f32.mrb[77].mxu1  ;;  %v2857_v54 = vmul.f32 0.17677669, %v6627_v30 }
 0x98a   : > { %v6628_v11 = vpop.f32.mrb[78].mxu1  ;;  %v2855_v37 = vmul.f32 0.17677669, %v2828_v59 }
 0x98b   : > { %2893 = vmax.xlane.f32.xlu1 %v8562_v32  ;;  %v2831_v25 = vpop.f32.mrb[79].mxu1  ;;  %v8571_v43 = vadd.f32 %v8262_v20, %v2857_v54  ;;  %v2858_v24 = vmul.f32 0.17677669, %v6628_v11 }
 0x98c   : > { %v8575_v51 = vadd.f32 %v8262_v20, %v2855_v37  ;;  %v2856_v1 = vmul.f32 0.17677669, %v2831_v25 }
 0x98d   : > { %2891 = vmax.xlane.f32.xlu0 %v8566_v52  ;;  %v8583_v38 = vadd.f32 %v8262_v20, %v2858_v24 }
 0x98e   : > { %v8587_v46 = vadd.f32 %v8262_v20, %v2856_v1 }
 0x991   : > { %2903 = vmax.xlane.f32.xlu0 %v8571_v43 }
 0x995   : > { %2899 = vmax.xlane.f32.xlu0 %v8575_v51 }
 0x99c   : > { %3045 = vrot.lane.b32.xlu1 %v7657_v3, %s7370_s15 }
 0x9ab   : > { %3043 = vrot.lane.b32.xlu0 %v7661_v6, %s7370_s15 }
 0x9c0   : > { %2905 = vmax.xlane.f32.xlu1 %v8583_v38 }
 0x9c4   : > { %2901 = vmax.xlane.f32.xlu1 %v8587_v46 }
 0xa02   : > { %v2880_v41 = vpop.xlane.xlu0 %2879 }
 0xa03   : > { %v2909_v30 = vsub.f32 %v8526_v34, %v2880_v41 }
 0xa05   : > { %v2927_v59 = vmul.f32 1.442695, %v2909_v30  ;;  %v2878_v54 = vpop.xlane.xlu1 %2877 }
 0xa06   : > { %v2876_v3 = vpop.xlane.xlu0 %2875  ;;  %v2908_v37 = vsub.f32 %v8530_v35, %v2878_v54 }
 0xa07   : > { %7081 = vpow2.f32 %v2927_v59  ;;  %v2907_v6 = vsub.f32 %v8533_v58, %v2876_v3 }
 0xa08   : > { %v2925_v1 = vmul.f32 1.442695, %v2908_v37 }
 0xa09   : > { %v2923_v11 = vmul.f32 1.442695, %v2907_v6 }
 0xa0a   : > { %v2882_v25 = vpop.xlane.xlu0 %2881 }
 0xa0b   : > { %7083 = vpow2.f32 %v2923_v11  ;;  %v2910_v24 = vsub.f32 %v2862_v62, %v2882_v25 }
 0xa0c   : > { %v2890_v12 = vpop.xlane.xlu1 %2889 }
 0xa0d   : > { %v2929_v20 = vmul.f32 1.442695, %v2910_v24  ;;  %v2914_v10 = vsub.f32 %v8539_v4, %v2890_v12 }
 0xa0e   : > { %v2888_v21 = vpop.xlane.xlu0 %2887 }
 0xa0f   : > { %7085 = vpow2.f32 %v2929_v20  ;;  %v2913_v34 = vsub.f32 %v8542_v50, %v2888_v21  ;;  %v2937_v58 = vmul.f32 1.442695, %v2914_v10 }
 0xa10   : > { %v2886_v41 = vpop.xlane.xlu1 %2885  ;;  %7087 = vpow2.f32 %v2925_v1 }
 0xa11   : > { %v8595_v30 = vpop.eup %7081  ;;  %v2935_v59 = vmul.f32 1.442695, %v2913_v34  ;;  %v2912_v35 = vsub.f32 %v8546_v49, %v2886_v41 }
 0xa12   : > { %v2884_v3 = vpop.xlane.xlu0 %2883  ;;  %2959 = vadd.xlane.f32.xlu1 %v8595_v30 }
 0xa13   : > { %7089 = vpow2.f32 %v2935_v59  ;;  %v2911_v62 = vsub.f32 %v8550_v26, %v2884_v3  ;;  %v2933_v21 = vmul.f32 1.442695, %v2912_v35 }
 0xa14   : > { %7091 = vpow2.f32 %v2937_v58  ;;  %v2898_v49 = vpop.xlane.xlu1 %2897 }
 0xa15   : > { %v8600_v54 = vpop.eup %7083  ;;  %v2931_v12 = vmul.f32 1.442695, %v2911_v62  ;;  %v2918_v58 = vsub.f32 %v8554_v2, %v2898_v49 }
 0xa16   : > { %v2896_v4 = vpop.xlane.xlu0 %2895  ;;  %2955 = vadd.xlane.f32.xlu1 %v8600_v54 }
 0xa17   : > { %7093 = vpow2.f32 %v2931_v12  ;;  %v2945_v62 = vmul.f32 1.442695, %v2918_v58  ;;  %v2917_v12 = vsub.f32 %v8558_v18, %v2896_v4 }
 0xa18   : > { %7095 = vpow2.f32 %v2933_v21  ;;  %v2894_v24 = vpop.xlane.xlu1 %2893 }
 0xa19   : > { %v8603_v50 = vpop.eup %7085  ;;  %v2916_v3 = vsub.f32 %v8562_v32, %v2894_v24 }
 0xa1a   : > { %v2892_v10 = vpop.xlane.xlu0 %2891  ;;  %2961 = vadd.xlane.f32.xlu1 %v8603_v50  ;;  %v8606_v6 = vpop.eup %7087 }
 0xa1b   : > { %v2915_v59 = vsub.f32 %v8566_v52, %v2892_v10  ;;  %v2941_v21 = vmul.f32 1.442695, %v2916_v3 }
 0xa1c   : > { %v3046_v41 = vpop.permute.xlu1 %3045 }
 0xa1d   : > { %v8608_v11 = vpop.eup %7089  ;;  %v2939_v35 = vmul.f32 1.442695, %v2915_v59  ;;  %v10772_v59 = vpack.c.bf16 %v8221_v14, %v8215_v27 }
 0xa1e   : > { %v2904_v26 = vpop.xlane.xlu0 %2903  ;;  %2967 = vadd.xlane.f32.xlu0 %v8608_v11  ;;  %2957 = vadd.xlane.f32.xlu1 %v8606_v6  ;;  %v8612_v37 = vpop.eup %7091 }
 0xa1f   : > { %7097 = vpow2.f32 %v2939_v35  ;;  %v2921_v2 = vsub.f32 %v8571_v43, %v2904_v26 }
 0xa20   : > { %7099 = vpow2.f32 %v2945_v62 }
 0xa21   : > { %v8614_v25 = vpop.eup %7093  ;;  %7101 = vpow2.f32 %v2941_v21  ;;  %v2951_v4 = vmul.f32 1.442695, %v2921_v2 }
 0xa22   : > { %v2900_v20 = vpop.xlane.xlu0 %2899  ;;  %2963 = vadd.xlane.f32.xlu1 %v8614_v25  ;;  %2969 = vadd.xlane.f32.xlu0 %v8612_v37  ;;  %v8618_v1 = vpop.eup %7095 }
 0xa26   : > { %v3044_v34 = vpop.permute.xlu0 %3043  ;;  %2965 = vadd.xlane.f32.xlu0 %v8618_v1 }
 0xa27   : > { %6637 = vmatprep.subr.bf16.mxu0 %v3044_v34 }
 0xa28   : > { %6638 = vmatpush3.bf16.msra.mxu0 %v3044_v34 }
 0xa29   : > { %6639 = vmatprep.subr.bf16.mxu0 %v3046_v41  ;;  %v8633_v49 = vpop.eup %7097 }
 0xa2a   : > { %v8636_v24 = vpop.eup %7099 }
 0xa2c   : > { %6640 = vmatpush3.bf16.msra.mxu0 %v3046_v41  ;;  %v2943_v41 = vmul.f32 1.442695, %v2917_v12 }
 0xa2e   : > { %7103 = vpow2.f32 %v2943_v41 }
 0xa33   : > { %3049 = vrot.lane.b32.xlu1 %v7681_v28, %s7370_s15  ;;  %v2919_v28 = vsub.f32 %v8575_v51, %v2900_v20  ;;  %v8638_v51 = vpop.eup %7101  ;;  %v10771_v20 = vpack.c.bf16 %v8217_v5, %v8213_v22 }
 0xa35   : > { %v2947_v32 = vmul.f32 1.442695, %v2919_v28 }
 0xa3c   : > { %3047 = vrot.lane.b32.xlu0 %v7685_v31, %s7370_s15 }
 0xa4d   : > { %v2906_v34 = vpop.xlane.xlu1 %2905 }
 0xa4e   : > { %v2922_v31 = vsub.f32 %v8583_v38, %v2906_v34 }
 0xa50   : > { %v2953_v18 = vmul.f32 1.442695, %v2922_v31 }
 0xa51   : > { %v2902_v56 = vpop.xlane.xlu1 %2901 }
 0xa52   : > { %v2920_v52 = vsub.f32 %v8587_v46, %v2902_v56  ;;  %v8642_v56 = vpop.eup %7103 }
 0xa54   : > { %v2949_v10 = vmul.f32 1.442695, %v2920_v52 }
 0xa56   : > { %7105 = vpow2.f32 %v2949_v10 }
 0xa57   : > { %2971 = vadd.xlane.f32.xlu1 %v8633_v49  ;;  %7107 = vpow2.f32 %v2947_v32 }
 0xa58   : > { %7109 = vpow2.f32 %v2953_v18 }
 0xa59   : > { %7111 = vpow2.f32 %v2951_v4 }
 0xa5b   : > { %2977 = vadd.xlane.f32.xlu1 %v8636_v24  ;;  %2973 = vadd.xlane.f32.xlu0 %v8638_v51 }
 0xa5f   : > { %2975 = vadd.xlane.f32.xlu0 %v8642_v56 }
 0xa60   : > { %v8645_v43 = vpop.eup %7105 }
 0xa61   : > { %2981 = vadd.xlane.f32.xlu1 %v8645_v43  ;;  %v8648_v38 = vpop.eup %7107 }
 0xa62   : > { %v8651_v46 = vpop.eup %7109 }
 0xa63   : > { %2979 = vadd.xlane.f32.xlu0 %v8648_v38  ;;  %v8654_v26 = vpop.eup %7111 }
 0xa65   : > { %2985 = vadd.xlane.f32.xlu1 %v8651_v46 }
 0xa67   : > { %2983 = vadd.xlane.f32.xlu0 %v8654_v26 }
 0xa76   : > { %2016 = vrot.lane.b32.xlu1 %v10771_v20, %s7370_s15 }
 0xa7a   : > { %2593 = vrot.lane.b32.xlu1 %v2577_v33, %s7369_s30 }
 0xa7d   : > { %2014 = vrot.lane.b32.xlu0 %v10772_v59, %s7370_s15 }
 0xa7e   : > { %2595 = vrot.lane.b32.xlu1 %v2578_v8, %s7369_s30 }
 0xa9f   : > { %v2960_v58 = vpop.xlane.xlu1 %2959 }
 0xaa3   : > { %v2956_v3 = vpop.xlane.xlu1 %2955 }
 0xaa4   : > { %7113 = vrcp.f32 %v2956_v3 }
 0xaa7   : > { %v2962_v35 = vpop.xlane.xlu1 %2961 }
 0xaa8   : > { %7115 = vrcp.f32 %v2962_v35 }
 0xaab   : > { %v2968_v22 = vpop.xlane.xlu0 %2967  ;;  %v2958_v5 = vpop.xlane.xlu1 %2957 }
 0xaac   : > { %7117 = vrcp.f32 %v2958_v5 }
 0xaad   : > { %7119 = vrcp.f32 %v2960_v58 }
 0xaae   : > { %v7114_v27 = vpop.eup %7113 }
 0xaaf   : > { %v2970_v7 = vpop.xlane.xlu0 %2969  ;;  %v2964_v63 = vpop.xlane.xlu1 %2963  ;;  %v3003_v47 = vmul.f32 %v7114_v27, %v8600_v54 }
 0xab0   : > { %7121 = vrcp.f32 %v2964_v63 }
 0xab2   : > { %v7116_v14 = vpop.eup %7115 }
 0xab3   : > { %v2966_v33 = vpop.xlane.xlu0 %2965  ;;  %v3050_v21 = vpop.permute.xlu1 %3049  ;;  %v3006_v34 = vmul.f32 %v7116_v14, %v8603_v50 }
 0xab4   : > { %7123 = vrcp.f32 %v2966_v33 }
 0xab5   : > { %7125 = vrcp.f32 %v2970_v7 }
 0xab6   : > { %v7118_v62 = vpop.eup %7117  ;;  %7127 = vrcp.f32 %v2968_v22 }
 0xab7   : > { %v3048_v40 = vpop.permute.xlu0 %3047  ;;  %v3004_v8 = vmul.f32 %v7118_v62, %v8606_v6  ;;  %v7120_v12 = vpop.eup %7119 }
 0xab8   : > { %6641 = vmatprep.subr.bf16.mxu0 %v3048_v40  ;;  %v3005_v31 = vmul.f32 %v7120_v12, %v8595_v30 }
 0xab9   : > { %6642 = vmatpush3.bf16.msra.mxu0 %v3048_v40  ;;  %v3019_v41 = vpack.c.bf16 %v3004_v8, %v3003_v47 }
 0xaba   : > { %6643 = vmatprep.subr.bf16.mxu0 %v3050_v21  ;;  %v7122_v28 = vpop.eup %7121  ;;  %v3020_v2 = vpack.c.bf16 %v3006_v34, %v3005_v31 }
 0xabb   : > { %6645 = vmatprep.mubr.bf16.mxu0 %v3019_v41  ;;  %v3007_v10 = vmul.f32 %v7122_v28, %v8614_v25 }
 0xabd   : > { %6644 = vmatpush3.bf16.msra.mxu0 %v3050_v21 }
 0xabe   : > { %v7124_v52 = vpop.eup %7123 }
 0xabf   : > { %v7126_v32 = vpop.eup %7125  ;;  %v3008_v54 = vmul.f32 %v7124_v52, %v8618_v1 }
 0xac0   : > { %6646 = vmatmul.mubr.bf16.vlgmr.msra.gmra.mrb[80].mxu0 %v3020_v2  ;;  %v7128_v6 = vpop.eup %7127  ;;  %v3010_v4 = vmul.f32 %v7126_v32, %v8612_v37  ;;  %v6793_v32 = vld [vmem:[%s10660_s4] sm:$0xff]  }
 0xac1   : > { %v3021_v18 = vpack.c.bf16 %v3008_v54, %v3007_v10  ;;  %v3009_v50 = vmul.f32 %v7128_v6, %v8608_v11  ;;  %6661 = vmatprep.subr.bf16.mxu0 %v6793_v32  ;;  %v6798_v10 = vld [vmem:[%s10660_s4 + $0x28] sm:$0xff]   ;;  %v6799_v54 = vld [vmem:[%s10660_s4 + $0x30] sm:$0xff]   ;;  %v6800_v6 = vld [vmem:[%s10660_s4 + $0x38] sm:$0xff]  }
 0xac2   : > { %6662 = vmatpush3.bf16.msra.mxu0 %v6793_v32 }
 0xac3   : > { %6649 = vmatprep.mubr.bf16.mxu0 %v3021_v18  ;;  %v3022_v20 = vpack.c.bf16 %v3010_v4, %v3009_v50 }
 0xac8   : > { %6650 = vmatmul.mubr.bf16.gmra.mrb[84].mxu0 %v3022_v20 }
 0xae4   : > { %v2972_v30 = vpop.xlane.xlu1 %2971 }
 0xae5   : > { %7129 = vrcp.f32 %v2972_v30 }
 0xae8   : > { %v2974_v59 = vpop.xlane.xlu0 %2973  ;;  %v2978_v58 = vpop.xlane.xlu1 %2977 }
 0xae9   : > { %7131 = vrcp.f32 %v2974_v59 }
 0xaea   : > { %7133 = vrcp.f32 %v2978_v58 }
 0xaec   : > { %v2976_v3 = vpop.xlane.xlu0 %2975 }
 0xaed   : > { %7135 = vrcp.f32 %v2976_v3  ;;  %v10773_v3 = vpack.c.bf16 %v8229_v23, %v8225_v17  ;;  %v10775_v17 = vld [vmem:[#allocation5_spill] sm:$0xff]  ;;  %v10777_v23 = vld [vmem:[#allocation7_spill] sm:$0xff] }
 0xaee   : > { %v2982_v25 = vpop.xlane.xlu1 %2981 }
 0xaef   : > { %7137 = vrcp.f32 %v2982_v25  ;;  %v7130_v35 = vpop.eup %7129 }
 0xaf0   : > { %v2980_v1 = vpop.xlane.xlu0 %2979  ;;  %v3011_v11 = vmul.f32 %v7130_v35, %v8633_v49 }
 0xaf1   : > { %7139 = vrcp.f32 %v2980_v1  ;;  %v10774_v1 = vpack.c.bf16 %v8233_v44, %v8227_v29  ;;  %v10776_v29 = vpack.c.bf16 %v8241_v15, %v10775_v17  ;;  %v10778_v44 = vld [vmem:[#allocation6_spill] sm:$0xff] }
 0xaf2   : > { %v2986_v22 = vpop.xlane.xlu1 %2985 }
 0xaf3   : > { %v7132_v37 = vpop.eup %7131  ;;  %7141 = vrcp.f32 %v2986_v22 }
 0xaf4   : > { %v2984_v5 = vpop.xlane.xlu0 %2983  ;;  %v3012_v7 = vmul.f32 %v7132_v37, %v8638_v51  ;;  %v7134_v63 = vpop.eup %7133 }
 0xaf5   : > { %7143 = vrcp.f32 %v2984_v5  ;;  %v3014_v47 = vmul.f32 %v7134_v63, %v8636_v24 }
 0xaf6   : > { %v2017_v33 = vpop.permute.xlu1 %2016  ;;  %v3023_v27 = vpack.c.bf16 %v3012_v7, %v3011_v11  ;;  %v10779_v11 = vpack.c.bf16 %v10777_v23, %v10778_v44  ;;  %v7339_v23 = vld [vmem:[%s7484_s18 + $0x8] sm:$0xff]  }
 0xaf7   : > { %v7136_v14 = vpop.eup %7135  ;;  %2040 = vst.msk [vmem:[#allocation3 + $0x8] sm:$0xff] %vm2038_vm1, %v2017_v33  ;;  %v10782_v33 = vld [vmem:[#allocation10_spill] sm:$0xff]  ;;  %v3383_v44 = vunpack.c.l.bf16 %v7339_v23 }
 0xaf8   : > { %v2015_v62 = vpop.permute.xlu0 %2014  ;;  %6653 = vmatprep.mubr.bf16.mxu0 %v3023_v27  ;;  %v3013_v40 = vmul.f32 %v7136_v14, %v8642_v56  ;;  %v10784_v16 = vpack.c.bf16 %v10782_v33, %v10783_v55  ;;  %v10787_v14 = vpack.c.bf16 %v10785_v0, %v10786_v53 }
 0xaf9   : > { %v7138_v8 = vpop.eup %7137  ;;  %2039 = vst.msk [vmem:[#allocation3] sm:$0xff] %vm2038_vm1, %v2015_v62 }
 0xafa   : > { %v2594_v49 = vpop.permute.xlu1 %2593  ;;  %v3024_v12 = vpack.c.bf16 %v3014_v47, %v3013_v40  ;;  %v3016_v34 = vmul.f32 %v7138_v8, %v8645_v43  ;;  %v6794_v43 = vld [vmem:[%s10660_s4 + $0x8] sm:$0xff]  }
 0xafb   : > { %v7140_v51 = vpop.eup %7139  ;;  %2618 = vst.msk [vmem:[#allocation3] sm:$0xff] %vm2617_vm2, %v2594_v49  ;;  %6663 = vmatprep.subr.bf16.mxu0 %v6794_v43  ;;  %v10788_v49 = vpack.c.bf16 %v8517_v42, %v8513_v13 }
 0xafc   : > { %6654 = vmatmul.mubr.bf16.gmra.mrb[88].mxu0 %v3024_v12  ;;  %v3015_v21 = vmul.f32 %v7140_v51, %v8648_v38  ;;  %v6795_v38 = vld [vmem:[%s10660_s4 + $0x10] sm:$0xff]   ;;  %v10789_v12 = vpack.c.bf16 %v8521_v36, %v8515_v57 }
 0xafd   : > { %v7142_v41 = vpop.eup %7141  ;;  %6664 = vmatpush3.bf16.msra.mxu0 %v6794_v43 }
 0xafe   : > { %v2596_v28 = vpop.permute.xlu1 %2595  ;;  %v3025_v31 = vpack.c.bf16 %v3016_v34, %v3015_v21  ;;  %v3018_v56 = vmul.f32 %v7142_v41, %v8651_v46  ;;  %6665 = vmatprep.subr.bf16.mxu0 %v6795_v38  ;;  %v6796_v46 = vld [vmem:[%s10660_s4 + $0x18] sm:$0xff]  }
 0xaff   : > { %v7144_v52 = vpop.eup %7143  ;;  %2619 = vst.msk [vmem:[#allocation3 + $0x8] sm:$0xff] %vm2617_vm2, %v2596_v28 }
 0xb00   : > { %6657 = vmatprep.mubr.bf16.mxu0 %v3025_v31  ;;  %v3017_v24 = vmul.f32 %v7144_v52, %v8654_v26  ;;  %v6797_v26 = vld [vmem:[%s10660_s4 + $0x20] sm:$0xff]  }
 0xb01   : > { %6666 = vmatpush3.bf16.msra.mxu0 %v6795_v38 }
 0xb02   : > { %v3026_v2 = vpack.c.bf16 %v3018_v56, %v3017_v24  ;;  %6667 = vmatprep.subr.bf16.mxu0 %v6796_v46 }
 0xb04   : > { %6658 = vmatmul.mubr.bf16.gmra.mrb[92].mxu0 %v3026_v2 }
 0xb05   : > { %6668 = vmatpush3.bf16.msra.mxu0 %v6796_v46 }
 0xb06   : > { %6669 = vmatprep.subr.bf16.mxu0 %v6797_v26 }
 0xb09   : > { %6670 = vmatpush3.bf16.msra.mxu0 %v6797_v26 }
 0xb0a   : > { %6671 = vmatprep.subr.bf16.mxu0 %v6798_v10 }
 0xb0d   : > { %6672 = vmatpush3.bf16.msra.mxu0 %v6798_v10 }
 0xb0e   : > { %6673 = vmatprep.subr.bf16.mxu0 %v6799_v54 }
 0xb11   : > { %6674 = vmatpush3.bf16.msra.mxu0 %v6799_v54 }
 0xb12   : > { %6675 = vmatprep.subr.bf16.mxu0 %v6800_v6 }
 0xb15   : > { %6676 = vmatpush3.bf16.msra.mxu0 %v6800_v6 }
 0xb93   : > { %v6647_v18 = vpop.f32.mrb[80].mxu0 }
 0xb94   : > { %v3093_v4 = vpop.f32.mrb[81].mxu0 }
 0xb95   : > { %v6648_v50 = vpop.f32.mrb[82].mxu0 }
 0xb96   : > { %v3157_v20 = vpack.c.bf16 %v6648_v50, %v6647_v18  ;;  %v3096_v30 = vpop.f32.mrb[83].mxu0 }
 0xb97   : > { %v3156_v59 = vpack.c.bf16 %v3096_v30, %v3093_v4 }
 0xb98   : > { %3174 = vrot.lane.b32.xlu1 %v3157_v20, %s7368_s24 }
 0xb99   : > { %3172 = vrot.lane.b32.xlu0 %v3156_v59, %s7368_s24 }
 0xb9b   : > { %v6651_v58 = vpop.f32.mrb[84].mxu0 }
 0xb9c   : > { %2020 = vrot.lane.b32.xlu1 %v10773_v3, %s7370_s15  ;;  %v3109_v25 = vpop.f32.mrb[85].mxu0 }
 0xb9d   : > { %2018 = vrot.lane.b32.xlu0 %v10774_v1, %s7370_s15  ;;  %v6652_v35 = vpop.f32.mrb[86].mxu0 }
 0xb9e   : > { %v3159_v22 = vpack.c.bf16 %v6652_v35, %v6651_v58  ;;  %v3112_v37 = vpop.f32.mrb[87].mxu0  ;;  %v8797_v58 = vld [vmem:[%s10661_s5] ss:$0 sm:$0xff] }
 0xb9f   : > { %v3158_v5 = vpack.c.bf16 %v3112_v37, %v3109_v25  ;;  %v7338_v25 = vld [vmem:[%s7484_s18] sm:$0xff]  }
 0xba0   : > { %2599 = vrot.lane.b32.xlu1 %v2580_v45, %s7369_s30  ;;  %v3381_v1 = vunpack.c.l.bf16 %v7338_v25 }
 0xba1   : > { %2597 = vrot.lane.b32.xlu0 %v2579_v39, %s7369_s30 }
 0xba4   : > { %3178 = vrot.lane.b32.xlu1 %v3159_v22, %s7368_s24 }
 0xba5   : > { %3176 = vrot.lane.b32.xlu0 %v3158_v5, %s7368_s24  ;;  %v3382_v5 = vunpack.c.h.bf16 %v7338_v25  ;;  %v7345_v25 = vld [vmem:[%s7484_s18 + $0x38] sm:$0xff]  }
 0xba8   : > { %2024 = vrot.lane.b32.xlu1 %v10776_v29, %s7370_s15 }
 0xba9   : > { %2022 = vrot.lane.b32.xlu0 %v10779_v11, %s7370_s15 }
 0xbac   : > { %2603 = vrot.lane.b32.xlu1 %v10780_v48, %s7369_s30 }
 0xbad   : > { %2601 = vrot.lane.b32.xlu0 %v10781_v61, %s7369_s30 }
 0xbcf   : > { %v6655_v19 = vpop.f32.mrb[88].mxu0 }
 0xbd0   : > { %v3125_v45 = vpop.f32.mrb[89].mxu0 }
 0xbd1   : > { %v6656_v9 = vpop.f32.mrb[90].mxu0 }
 0xbd2   : > { %v3161_v15 = vpack.c.bf16 %v6656_v9, %v6655_v19  ;;  %v3128_v39 = vpop.f32.mrb[91].mxu0  ;;  %v3384_v9 = vunpack.c.h.bf16 %v7339_v23 }
 0xbd3   : > { %v3160_v7 = vpack.c.bf16 %v3128_v39, %v3125_v45 }
 0xbd4   : > { %3182 = vrot.lane.b32.xlu1 %v3161_v15, %s7368_s24 }
 0xbd5   : > { %3180 = vrot.lane.b32.xlu0 %v3160_v7, %s7368_s24  ;;  %v7340_v7 = vld [vmem:[%s7484_s18 + $0x10] sm:$0xff]  }
 0xbd7   : > { %v6659_v63 = vpop.f32.mrb[92].mxu0 }
 0xbd8   : > { %2028 = vrot.lane.b32.xlu1 %v10784_v16, %s7370_s15  ;;  %v3141_v27 = vpop.f32.mrb[93].mxu0 }
 0xbd9   : > { %2026 = vrot.lane.b32.xlu0 %v10787_v14, %s7370_s15  ;;  %v6660_v62 = vpop.f32.mrb[94].mxu0  ;;  %v7341_v14 = vld [vmem:[%s7484_s18 + $0x18] sm:$0xff]  }
 0xbda   : > { %v3163_v40 = vpack.c.bf16 %v6660_v62, %v6659_v63  ;;  %v3144_v47 = vpop.f32.mrb[95].mxu0  ;;  %v3385_v63 = vunpack.c.l.bf16 %v7340_v7  ;;  %v3387_v62 = vunpack.c.l.bf16 %v7341_v14 }
 0xbdb   : > { %v3162_v8 = vpack.c.bf16 %v3144_v47, %v3141_v27  ;;  %v3386_v27 = vunpack.c.h.bf16 %v7340_v7  ;;  %v6807_v7 = vld [vmem:[%s10664_s8 + $0x20] ss:$16 sps:$4 sm:$0xff]  }
 0xbdc   : > { %2607 = vrot.lane.b32.xlu1 %v10788_v49, %s7369_s30  ;;  %v3388_v49 = vunpack.c.h.bf16 %v7341_v14 }
 0xbdd   : > { %2605 = vrot.lane.b32.xlu0 %v10789_v12, %s7369_s30  ;;  %s10604_s30 = scalar_lea.vmem %s10670_s14, %s5858_s26 }
 0xbe0   : > { %3186 = vrot.lane.b32.xlu1 %v3163_v40, %s7368_s24 }
 0xbe1   : > { %3184 = vrot.lane.b32.xlu0 %v3162_v8, %s7368_s24 }
 0xc0a   : > { %v3175_v51 = vpop.permute.xlu1 %3174 }
 0xc0b   : > { %3198 = vst.msk [vmem:[#allocation3 + $0x8] sm:$0xff] %vm3196_vm3, %v3175_v51  ;;  %v3173_v21 = vpop.permute.xlu0 %3172 }
 0xc0c   : > { %3197 = vst.msk [vmem:[#allocation3] sm:$0xff] %vm3196_vm3, %v3173_v21 }
 0xc0e   : > { %v2021_v34 = vpop.permute.xlu1 %2020 }
 0xc0f   : > { %2042 = vst.msk [vmem:[#allocation3 + $0x18] sm:$0xff] %vm2038_vm1, %v2021_v34  ;;  %v2019_v13 = vpop.permute.xlu0 %2018 }
 0xc10   : > { %2041 = vst.msk [vmem:[#allocation3 + $0x10] sm:$0xff] %vm2038_vm1, %v2019_v13  ;;  %v7342_v13 = vld [vmem:[%s7484_s18 + $0x20] sm:$0xff]  }
 0xc12   : > { %v2600_v42 = vpop.permute.xlu1 %2599  ;;  %v3206_v41 = vld [vmem:[#allocation3 + $0x8] sm:$0xff] }
 0xc13   : > { %2621 = vst.msk [vmem:[#allocation3 + $0x18] sm:$0xff] %vm2617_vm2, %v2600_v42  ;;  %v2598_v57 = vpop.permute.xlu0 %2597  ;;  %v3205_v36 = vld [vmem:[#allocation3] sm:$0xff]  ;;  %v3389_v42 = vunpack.c.l.bf16 %v7342_v13 }
 0xc14   : > { %2620 = vst.msk [vmem:[#allocation3 + $0x10] sm:$0xff] %vm2617_vm2, %v2598_v57  ;;  %6677 = vmatprep.mubr.bf16.mxu0 %v3205_v36 }
 0xc15   : > { %6678 = vmatmul.mubr.bf16.vlgmr.msra.gmra.mrb[96].mxu0 %v3206_v41 }
 0xc16   : > { %v3179_v28 = vpop.permute.xlu1 %3178 }
 0xc17   : > { %3200 = vst.msk [vmem:[#allocation3 + $0x18] sm:$0xff] %vm3196_vm3, %v3179_v28  ;;  %v3177_v31 = vpop.permute.xlu0 %3176  ;;  %v3390_v28 = vunpack.c.h.bf16 %v7342_v13 }
 0xc18   : > { %3199 = vst.msk [vmem:[#allocation3 + $0x10] sm:$0xff] %vm3196_vm3, %v3177_v31 }
 0xc1a   : > { %v2025_v52 = vpop.permute.xlu1 %2024 }
 0xc1b   : > { %2044 = vst.msk [vmem:[#allocation3 + $0x28] sm:$0xff] %vm2038_vm1, %v2025_v52  ;;  %v2023_v24 = vpop.permute.xlu0 %2022 }
 0xc1c   : > { %2043 = vst.msk [vmem:[#allocation3 + $0x20] sm:$0xff] %vm2038_vm1, %v2023_v24  ;;  %v7343_v24 = vld [vmem:[%s7484_s18 + $0x28] sm:$0xff]  }
 0xc1e   : > { %v2604_v56 = vpop.permute.xlu1 %2603  ;;  %v3208_v43 = vld [vmem:[#allocation3 + $0x18] sm:$0xff] }
 0xc1f   : > { %2623 = vst.msk [vmem:[#allocation3 + $0x28] sm:$0xff] %vm2617_vm2, %v2604_v56  ;;  %v2602_v2 = vpop.permute.xlu0 %2601  ;;  %v3207_v32 = vld [vmem:[#allocation3 + $0x10] sm:$0xff]  ;;  %v3391_v56 = vunpack.c.l.bf16 %v7343_v24 }
 0xc20   : > { %2622 = vst.msk [vmem:[#allocation3 + $0x20] sm:$0xff] %vm2617_vm2, %v2602_v2  ;;  %6681 = vmatprep.mubr.bf16.mxu0 %v3207_v32 }
 0xc21   : > { %6682 = vmatmul.mubr.bf16.gmra.mrb[100].mxu0 %v3208_v43 }
 0xc46   : > { %v3183_v38 = vpop.permute.xlu1 %3182 }
 0xc47   : > { %3202 = vst.msk [vmem:[#allocation3 + $0x28] sm:$0xff] %vm3196_vm3, %v3183_v38  ;;  %v3181_v46 = vpop.permute.xlu0 %3180  ;;  %v3392_v38 = vunpack.c.h.bf16 %v7343_v24 }
 0xc48   : > { %3201 = vst.msk [vmem:[#allocation3 + $0x20] sm:$0xff] %vm3196_vm3, %v3181_v46 }
 0xc4a   : > { %v2029_v26 = vpop.permute.xlu1 %2028 }
 0xc4b   : > { %2046 = vst.msk [vmem:[#allocation3 + $0x38] sm:$0xff] %vm2038_vm1, %v2029_v26  ;;  %v2027_v10 = vpop.permute.xlu0 %2026 }
 0xc4c   : > { %2045 = vst.msk [vmem:[#allocation3 + $0x30] sm:$0xff] %vm2038_vm1, %v2027_v10 }
 0xc4e   : > { %v2608_v54 = vpop.permute.xlu1 %2607  ;;  %v3210_v4 = vld [vmem:[#allocation3 + $0x28] sm:$0xff] }
 0xc4f   : > { %2625 = vst.msk [vmem:[#allocation3 + $0x38] sm:$0xff] %vm2617_vm2, %v2608_v54  ;;  %v2606_v6 = vpop.permute.xlu0 %2605  ;;  %v3209_v18 = vld [vmem:[#allocation3 + $0x20] sm:$0xff] }
 0xc50   : > { %2624 = vst.msk [vmem:[#allocation3 + $0x30] sm:$0xff] %vm2617_vm2, %v2606_v6  ;;  %6685 = vmatprep.mubr.bf16.mxu0 %v3209_v18  ;;  %v7344_v6 = vld [vmem:[%s7484_s18 + $0x30] sm:$0xff]  }
 0xc51   : > { %6686 = vmatmul.mubr.bf16.gmra.mrb[104].mxu0 %v3210_v4  ;;  %v3393_v18 = vunpack.c.l.bf16 %v7344_v6 }
 0xc52   : > { %v3187_v50 = vpop.permute.xlu1 %3186 }
 0xc53   : > { %3204 = vst.msk [vmem:[#allocation3 + $0x38] sm:$0xff] %vm3196_vm3, %v3187_v50  ;;  %v3185_v20 = vpop.permute.xlu0 %3184 }
 0xc54   : > { %3203 = vst.msk [vmem:[#allocation3 + $0x30] sm:$0xff] %vm3196_vm3, %v3185_v20 }
 0xc5a   : > { %v3212_v59 = vld [vmem:[#allocation3 + $0x38] sm:$0xff] }
 0xc5b   : > { %v3211_v30 = vld [vmem:[#allocation3 + $0x30] sm:$0xff] }
 0xc5c   : > { %6689 = vmatprep.mubr.bf16.mxu0 %v3211_v30  ;;  %v3394_v30 = vunpack.c.h.bf16 %v7344_v6  ;;  %v6813_v6 = vld [vmem:[%s10664_s8 + $0x40] ss:$16 sps:$4 sm:$0xff]  }
 0xc5d   : > { %6690 = vmatmul.mubr.bf16.gmra.mrb[108].mxu0 %v3212_v59 }
 0xc5e   : > { %4003 = vmatprep.mubr.bf16.mxu0 %v10770_v60 }
 0xce8   : > { %v6679_v3 = vpop.f32.mrb[96].mxu0 }
 0xce9   : > { %v3318_v35 = vpop.f32.mrb[97].mxu0  ;;  %v3327_v29 = vadd.f32 %v6679_v3, %v8797_v58 }
 0xcea   : > { %v3319_v22 = vadd.f32 %v8797_v58, %v3318_v35  ;;  %v6680_v37 = vpop.f32.mrb[98].mxu0 }
 0xceb   : > { %v3321_v17 = vpop.f32.mrb[99].mxu0  ;;  %v8809_v19 = vadd.f32 %v3383_v44, %v3327_v29  ;;  %v3330_v45 = vadd.f32 %v6680_v37, %v8797_v58  ;;  %v6801_v44 = vld [vmem:[%s10664_s8] ss:$16 sps:$4 sm:$0xff]  }
 0xcec   : > { %v8803_v11 = vadd.f32 %v3381_v1, %v3319_v22  ;;  %v3322_v48 = vadd.f32 %v8797_v58, %v3321_v17  ;;  %v3395_v1 = vunpack.c.l.bf16 %v7345_v25 }
 0xced   : > { %v8814_v15 = vadd.f32 %v3384_v9, %v3330_v45  ;;  %v6806_v45 = vld [vmem:[%s10664_s8 + $0xc] ss:$16 sps:$4 sm:$0xff]   ;;  %v6809_v9 = vld [vmem:[%s10664_s8 + $0x24] ss:$16 sps:$4 sm:$0xff]  }
 0xcee   : > { %v8806_v61 = vadd.f32 %v3382_v5, %v3322_v48  ;;  %3415 = vadd.xlane.f32.xlu0 %v8803_v11  ;;  %v3396_v5 = vunpack.c.h.bf16 %v7345_v25  ;;  %v6804_v48 = vld [vmem:[%s10664_s8 + $0x8] ss:$16 sps:$4 sm:$0xff]   ;;  %3971 = vmatprep.subr.bf16.mxu0 %v6806_v45  ;;  %v6825_v25 = vld [vmem:[%s10664_s8 + $0x80] ss:$16 sps:$4 sm:$0xff]  }
 0xcef   : > { %3972 = vmatpush1.bf16.msra.mxu0 %v6804_v48  ;;  %v6842_v48 = vld [vmem:[%s10664_s8 + $0xcc] ss:$16 sps:$4 sm:$0xff]   ;;  %v6837_v45 = vld [vmem:[%s10664_s8 + $0xc0] ss:$16 sps:$4 sm:$0xff]  }
 0xcf0   : > { %3417 = vadd.xlane.f32.xlu1 %v8806_v61 }
 0xcf2   : > { %3419 = vadd.xlane.f32.xlu0 %v8809_v19 }
 0xcf4   : > { %v6683_v39 = vpop.f32.mrb[100].mxu0 }
 0xcf5   : > { %v3334_v33 = vpop.f32.mrb[101].mxu0  ;;  %v3343_v53 = vadd.f32 %v6683_v39, %v8797_v58  ;;  %v6812_v39 = vld [vmem:[%s10664_s8 + $0x2c] ss:$16 sps:$4 sm:$0xff]  }
 0xcf6   : > { %v3335_v55 = vadd.f32 %v8797_v58, %v3334_v33  ;;  %3421 = vadd.xlane.f32.xlu0 %v8814_v15  ;;  %v6684_v16 = vpop.f32.mrb[102].mxu0  ;;  %3973 = vmatprep.subr.bf16.mxu0 %v6812_v39  ;;  %v6845_v39 = vld [vmem:[%s10664_s8 + $0xe4] ss:$16 sps:$4 sm:$0xff]  }
 0xcf7   : > { %v3337_v0 = vpop.f32.mrb[103].mxu0  ;;  %v3346_v8 = vadd.f32 %v6684_v16, %v8797_v58  ;;  %v8828_v51 = vadd.f32 %v3387_v62, %v3343_v53 }
 0xcf8   : > { %v8821_v40 = vadd.f32 %v3385_v63, %v3335_v55  ;;  %v3338_v47 = vadd.f32 %v8797_v58, %v3337_v0  ;;  %v6810_v63 = vld [vmem:[%s10664_s8 + $0x28] ss:$16 sps:$4 sm:$0xff]  }
 0xcf9   : > { %v8831_v21 = vadd.f32 %v3388_v49, %v3346_v8  ;;  %3974 = vmatpush1.bf16.msra.mxu0 %v6810_v63  ;;  %v6843_v63 = vld [vmem:[%s10664_s8 + $0xe0] ss:$16 sps:$4 sm:$0xff]  }
 0xcfa   : > { %v8825_v12 = vadd.f32 %v3386_v27, %v3338_v47  ;;  %3423 = vadd.xlane.f32.xlu0 %v8821_v40 }
 0xcfc   : > { %3425 = vadd.xlane.f32.xlu1 %v8825_v12 }
 0xcfe   : > { %3427 = vadd.xlane.f32.xlu0 %v8828_v51 }
 0xd00   : > { %3429 = vadd.xlane.f32.xlu1 %v8831_v21 }
 0xd24   : > { %v6687_v34 = vpop.f32.mrb[104].mxu0 }
 0xd25   : > { %v3350_v57 = vpop.f32.mrb[105].mxu0  ;;  %v3359_v52 = vadd.f32 %v6687_v34, %v8797_v58 }
 0xd26   : > { %v3351_v36 = vadd.f32 %v8797_v58, %v3350_v57  ;;  %v6688_v41 = vpop.f32.mrb[106].mxu0 }
 0xd27   : > { %v3353_v31 = vpop.f32.mrb[107].mxu0  ;;  %v3362_v43 = vadd.f32 %v6688_v41, %v8797_v58  ;;  %v8846_v26 = vadd.f32 %v3391_v56, %v3359_v52 }
 0xd28   : > { %v8839_v2 = vadd.f32 %v3389_v42, %v3351_v36  ;;  %v3354_v32 = vadd.f32 %v8797_v58, %v3353_v31 }
 0xd29   : > { %v8849_v10 = vadd.f32 %v3392_v38, %v3362_v43 }
 0xd2a   : > { %v8843_v46 = vadd.f32 %v3390_v28, %v3354_v32  ;;  %3431 = vadd.xlane.f32.xlu0 %v8839_v2 }
 0xd2c   : > { %3433 = vadd.xlane.f32.xlu1 %v8843_v46 }
 0xd2e   : > { %3435 = vadd.xlane.f32.xlu0 %v8846_v26 }
 0xd30   : > { %3437 = vadd.xlane.f32.xlu1 %v8849_v10  ;;  %v6691_v54 = vpop.f32.mrb[108].mxu0 }
 0xd31   : > { %v3366_v4 = vpop.f32.mrb[109].mxu0  ;;  %v3375_v3 = vadd.f32 %v6691_v54, %v8797_v58  ;;  %v6815_v54 = vld [vmem:[%s10664_s8 + $0x44] ss:$16 sps:$4 sm:$0xff]  }
 0xd32   : > { %v3367_v50 = vadd.f32 %v8797_v58, %v3366_v4  ;;  %v6692_v20 = vpop.f32.mrb[110].mxu0  ;;  %v6821_v4 = vld [vmem:[%s10664_s8 + $0x64] ss:$16 sps:$4 sm:$0xff]  }
 0xd33   : > { %v3369_v59 = vpop.f32.mrb[111].mxu0  ;;  %v3378_v37 = vadd.f32 %v6692_v20, %v8797_v58  ;;  %v8864_v29 = vadd.f32 %v3395_v1, %v3375_v3  ;;  %v6819_v20 = vld [vmem:[%s10664_s8 + $0x60] ss:$16 sps:$4 sm:$0xff]   ;;  %v6830_v3 = vld [vmem:[%s10664_s8 + $0x8c] ss:$16 sps:$4 sm:$0xff]  }
 0xd34   : > { %v8857_v35 = vadd.f32 %v3393_v18, %v3367_v50  ;;  %v3370_v22 = vadd.f32 %v8797_v58, %v3369_v59  ;;  %v6803_v58 = vld [vmem:[%s10664_s8 + $0x4] ss:$16 sps:$4 sm:$0xff]   ;;  %v6824_v50 = vld [vmem:[%s10664_s8 + $0x6c] ss:$16 sps:$4 sm:$0xff]   ;;  %v6828_v1 = vld [vmem:[%s10664_s8 + $0x88] ss:$16 sps:$4 sm:$0xff]  }
 0xd35   : > { %v8867_v23 = vadd.f32 %v3396_v5, %v3378_v37  ;;  %3858 = vmatprep.subr.bf16.mxu1 %v6803_v58  ;;  %v6827_v59 = vld [vmem:[%s10664_s8 + $0x84] ss:$16 sps:$4 sm:$0xff]   ;;  %v6836_v37 = vld [vmem:[%s10664_s8 + $0xac] ss:$16 sps:$4 sm:$0xff]   ;;  %v6831_v5 = vld [vmem:[%s10664_s8 + $0xa0] ss:$16 sps:$4 sm:$0xff]  }
 0xd36   : > { %v8861_v17 = vadd.f32 %v3394_v30, %v3370_v22  ;;  %3439 = vadd.xlane.f32.xlu0 %v8857_v35  ;;  %3859 = vmatpush1.bf16.msra.mxu1 %v6801_v44  ;;  %v6822_v30 = vld [vmem:[%s10664_s8 + $0x68] ss:$16 sps:$4 sm:$0xff]   ;;  %v6833_v22 = vld [vmem:[%s10664_s8 + $0xa4] ss:$16 sps:$4 sm:$0xff]  }
 0xd37   : > { %3860 = vmatprep.subr.bf16.mxu1 %v6809_v9  ;;  %v6834_v44 = vld [vmem:[%s10664_s8 + $0xa8] ss:$16 sps:$4 sm:$0xff]   ;;  %v6839_v58 = vld [vmem:[%s10664_s8 + $0xc4] ss:$16 sps:$4 sm:$0xff]  }
 0xd38   : > { %3441 = vadd.xlane.f32.xlu1 %v8861_v17  ;;  %v6840_v9 = vld [vmem:[%s10664_s8 + $0xc8] ss:$16 sps:$4 sm:$0xff]  }
 0xd3a   : > { %3443 = vadd.xlane.f32.xlu0 %v8864_v29  ;;  %3861 = vmatpush1.bf16.msra.mxu1 %v6807_v7  ;;  %v6848_v7 = vld [vmem:[%s10664_s8 + $0xec] ss:$16 sps:$4 sm:$0xff]  }
 0xd3b   : > { %3862 = vmatprep.subr.bf16.mxu1 %v6815_v54 }
 0xd3c   : > { %3445 = vadd.xlane.f32.xlu1 %v8867_v23 }
 0xd3e   : > { %3863 = vmatpush1.bf16.msra.mxu1 %v6813_v6 }
 0xd3f   : > { %3864 = vmatprep.subr.bf16.mxu1 %v6821_v4 }
 0xd42   : > { %3865 = vmatpush1.bf16.msra.mxu1 %v6819_v20 }
 0xd43   : > { %3866 = vmatprep.subr.bf16.mxu1 %v6827_v59 }
 0xd46   : > { %3867 = vmatpush1.bf16.msra.mxu1 %v6825_v25 }
 0xd47   : > { %3868 = vmatprep.subr.bf16.mxu1 %v6833_v22 }
 0xd4a   : > { %3869 = vmatpush1.bf16.msra.mxu1 %v6831_v5 }
 0xd4b   : > { %3870 = vmatprep.subr.bf16.mxu1 %v6839_v58 }
 0xd4e   : > { %3871 = vmatpush1.bf16.msra.mxu1 %v6837_v45 }
 0xd4f   : > { %3872 = vmatprep.subr.bf16.mxu1 %v6845_v39 }
 0xd52   : > { %3873 = vmatpush1.bf16.msra.mxu1 %v6843_v63 }
 0xd7b   : > { %v3416_v33 = vpop.xlane.xlu0 %3415 }
 0xd7c   : > { %v3448_v55 = vmul.f32 0.0078125, %v3416_v33  ;;  %v6846_v33 = vld [vmem:[%s10664_s8 + $0xe8] ss:$16 sps:$4 sm:$0xff]  }
 0xd7d   : > { %v3418_v16 = vpop.xlane.xlu1 %3417 }
 0xd7e   : > { %v8896_v27 = vsub.f32 %v8803_v11, %v3448_v55  ;;  %v3449_v0 = vmul.f32 0.0078125, %v3418_v16 }
 0xd7f   : > { %v3420_v53 = vpop.xlane.xlu0 %3419 }
 0xd80   : > { %v8899_v14 = vsub.f32 %v8806_v61, %v3449_v0  ;;  %v3450_v62 = vmul.f32 0.0078125, %v3420_v53  ;;  %v3480_v47 = vmul.f32 %v8896_v27, %v8896_v27 }
 0xd82   : > { %v8904_v8 = vsub.f32 %v8809_v19, %v3450_v62  ;;  %3496 = vadd.xlane.f32.xlu0 %v3480_v47  ;;  %v3481_v49 = vmul.f32 %v8899_v14, %v8899_v14 }
 0xd83   : > { %v3422_v34 = vpop.xlane.xlu0 %3421 }
 0xd84   : > { %v3451_v13 = vmul.f32 0.0078125, %v3422_v34  ;;  %3498 = vadd.xlane.f32.xlu1 %v3481_v49  ;;  %v3482_v11 = vmul.f32 %v8904_v8, %v8904_v8 }
 0xd86   : > { %v8911_v61 = vsub.f32 %v8814_v15, %v3451_v13  ;;  %3500 = vadd.xlane.f32.xlu0 %v3482_v11 }
 0xd87   : > { %v3424_v42 = vpop.xlane.xlu0 %3423 }
 0xd88   : > { %v3452_v57 = vmul.f32 0.0078125, %v3424_v42  ;;  %v3483_v19 = vmul.f32 %v8911_v61, %v8911_v61 }
 0xd89   : > { %v3426_v36 = vpop.xlane.xlu1 %3425 }
 0xd8a   : > { %v8916_v41 = vsub.f32 %v8821_v40, %v3452_v57  ;;  %v3453_v28 = vmul.f32 0.0078125, %v3426_v36  ;;  %3502 = vadd.xlane.f32.xlu1 %v3483_v19 }
 0xd8b   : > { %v3428_v31 = vpop.xlane.xlu0 %3427 }
 0xd8c   : > { %v8919_v52 = vsub.f32 %v8825_v12, %v3453_v28  ;;  %v3454_v24 = vmul.f32 0.0078125, %v3428_v31  ;;  %v3484_v15 = vmul.f32 %v8916_v41, %v8916_v41 }
 0xd8d   : > { %v3430_v56 = vpop.xlane.xlu1 %3429 }
 0xd8e   : > { %v8924_v32 = vsub.f32 %v8828_v51, %v3454_v24  ;;  %v3455_v43 = vmul.f32 0.0078125, %v3430_v56  ;;  %3504 = vadd.xlane.f32.xlu0 %v3484_v15  ;;  %v3485_v40 = vmul.f32 %v8919_v52, %v8919_v52  ;;  %v6818_v51 = vld [vmem:[%s10664_s8 + $0x4c] ss:$16 sps:$4 sm:$0xff]  }
 0xd8f   : > { %3975 = vmatprep.subr.bf16.mxu0 %v6818_v51 }
 0xd90   : > { %v8929_v38 = vsub.f32 %v8831_v21, %v3455_v43  ;;  %3506 = vadd.xlane.f32.xlu1 %v3485_v40  ;;  %v3486_v12 = vmul.f32 %v8924_v32, %v8924_v32  ;;  %v6816_v21 = vld [vmem:[%s10664_s8 + $0x48] ss:$16 sps:$4 sm:$0xff]  }
 0xd91   : > { %3976 = vmatpush1.bf16.msra.mxu0 %v6816_v21 }
 0xd92   : > { %3508 = vadd.xlane.f32.xlu0 %v3486_v12  ;;  %v3487_v18 = vmul.f32 %v8929_v38, %v8929_v38  ;;  %3977 = vmatprep.subr.bf16.mxu0 %v6824_v50 }
 0xd94   : > { %3510 = vadd.xlane.f32.xlu1 %v3487_v18 }
 0xd95   : > { %3978 = vmatpush1.bf16.msra.mxu0 %v6822_v30 }
 0xd96   : > { %3979 = vmatprep.subr.bf16.mxu0 %v6830_v3 }
 0xd99   : > { %3980 = vmatpush1.bf16.msra.mxu0 %v6828_v1 }
 0xd9a   : > { %3981 = vmatprep.subr.bf16.mxu0 %v6836_v37 }
 0xd9d   : > { %3982 = vmatpush1.bf16.msra.mxu0 %v6834_v44 }
 0xd9e   : > { %3983 = vmatprep.subr.bf16.mxu0 %v6842_v48  ;;  %v9050_v48 = vld [vmem:[%s10662_s6] ss:$0 sm:$0xff] }
 0xda1   : > { %3984 = vmatpush1.bf16.msra.mxu0 %v6840_v9 }
 0xda2   : > { %3985 = vmatprep.subr.bf16.mxu0 %v6848_v7 }
 0xda5   : > { %3986 = vmatpush1.bf16.msra.mxu0 %v6846_v33 }
 0xdb7   : > { %v3432_v55 = vpop.xlane.xlu0 %3431 }
 0xdb8   : > { %v3456_v16 = vmul.f32 0.0078125, %v3432_v55 }
 0xdb9   : > { %v3434_v0 = vpop.xlane.xlu1 %3433 }
 0xdba   : > { %v9008_v53 = vsub.f32 %v8839_v2, %v3456_v16  ;;  %v3457_v62 = vmul.f32 0.0078125, %v3434_v0 }
 0xdbb   : > { %v3436_v47 = vpop.xlane.xlu0 %3435 }
 0xdbc   : > { %v9011_v49 = vsub.f32 %v8843_v46, %v3457_v62  ;;  %v3458_v34 = vmul.f32 0.0078125, %v3436_v47  ;;  %v3488_v13 = vmul.f32 %v9008_v53, %v9008_v53 }
 0xdbd   : > { %v3438_v11 = vpop.xlane.xlu1 %3437 }
 0xdbe   : > { %v9016_v42 = vsub.f32 %v8846_v26, %v3458_v34  ;;  %v3459_v57 = vmul.f32 0.0078125, %v3438_v11  ;;  %3512 = vadd.xlane.f32.xlu0 %v3488_v13  ;;  %v3489_v19 = vmul.f32 %v9011_v49, %v9011_v49  ;;  %v9058_v13 = vld [vmem:[%s10663_s7] ss:$0 sm:$0xff] }
 0xdc0   : > { %v9021_v2 = vsub.f32 %v8849_v10, %v3459_v57  ;;  %3514 = vadd.xlane.f32.xlu1 %v3489_v19  ;;  %v3490_v46 = vmul.f32 %v9016_v42, %v9016_v42 }
 0xdc2   : > { %3516 = vadd.xlane.f32.xlu0 %v3490_v46  ;;  %v3491_v36 = vmul.f32 %v9021_v2, %v9021_v2 }
 0xdc3   : > { %v3440_v28 = vpop.xlane.xlu0 %3439 }
 0xdc4   : > { %v3460_v31 = vmul.f32 0.0078125, %v3440_v28  ;;  %3518 = vadd.xlane.f32.xlu1 %v3491_v36 }
 0xdc5   : > { %v3442_v26 = vpop.xlane.xlu1 %3441 }
 0xdc6   : > { %v9028_v24 = vsub.f32 %v8857_v35, %v3460_v31  ;;  %v3461_v15 = vmul.f32 0.0078125, %v3442_v26 }
 0xdc7   : > { %v3444_v56 = vpop.xlane.xlu0 %3443 }
 0xdc8   : > { %v9031_v10 = vsub.f32 %v8861_v17, %v3461_v15  ;;  %v3462_v43 = vmul.f32 0.0078125, %v3444_v56  ;;  %v3492_v40 = vmul.f32 %v9028_v24, %v9028_v24 }
 0xdc9   : > { %v3446_v12 = vpop.xlane.xlu1 %3445 }
 0xdca   : > { %v9036_v54 = vsub.f32 %v8864_v29, %v3462_v43  ;;  %v3463_v51 = vmul.f32 0.0078125, %v3446_v12  ;;  %3520 = vadd.xlane.f32.xlu0 %v3492_v40  ;;  %v3493_v6 = vmul.f32 %v9031_v10, %v9031_v10 }
 0xdcc   : > { %v9041_v35 = vsub.f32 %v8867_v23, %v3463_v51  ;;  %3522 = vadd.xlane.f32.xlu1 %v3493_v6  ;;  %v3494_v17 = vmul.f32 %v9036_v54, %v9036_v54 }
 0xdce   : > { %3524 = vadd.xlane.f32.xlu0 %v3494_v17  ;;  %v3495_v21 = vmul.f32 %v9041_v35, %v9041_v35 }
 0xdd0   : > { %3526 = vadd.xlane.f32.xlu1 %v3495_v21 }
 0xe0f   : > { %v3497_v18 = vpop.xlane.xlu0 %3496 }
 0xe10   : > { %v3528_v29 = vmul.f32 0.0078125, %v3497_v18 }
 0xe11   : > { %v3499_v4 = vpop.xlane.xlu1 %3498 }
 0xe12   : > { %v3544_v50 = vadd.f32 1e-12, %v3528_v29  ;;  %v3529_v20 = vmul.f32 0.0078125, %v3499_v4 }
 0xe13   : > { %v3501_v30 = vpop.xlane.xlu0 %3500 }
 0xe14   : > { %7145 = vrsqrt.f32 %v3544_v50  ;;  %v3545_v59 = vadd.f32 1e-12, %v3529_v20  ;;  %v3530_v3 = vmul.f32 0.0078125, %v3501_v30 }
 0xe16   : > { %7147 = vrsqrt.f32 %v3545_v59  ;;  %v3546_v23 = vadd.f32 1e-12, %v3530_v3 }
 0xe17   : > { %v3503_v25 = vpop.xlane.xlu1 %3502 }
 0xe18   : > { %7149 = vrsqrt.f32 %v3546_v23  ;;  %v3531_v1 = vmul.f32 0.0078125, %v3503_v25 }
 0xe1a   : > { %v3547_v22 = vadd.f32 1e-12, %v3531_v1 }
 0xe1b   : > { %v3505_v37 = vpop.xlane.xlu0 %3504 }
 0xe1c   : > { %7151 = vrsqrt.f32 %v3547_v22  ;;  %v3532_v5 = vmul.f32 0.0078125, %v3505_v37 }
 0xe1d   : > { %v3507_v44 = vpop.xlane.xlu1 %3506 }
 0xe1e   : > { %v7146_v58 = vpop.eup %7145  ;;  %v3548_v45 = vadd.f32 1e-12, %v3532_v5  ;;  %v3533_v9 = vmul.f32 0.0078125, %v3507_v44 }
 0xe1f   : > { %v3576_v39 = vmul.f32 %v7146_v58, %v8896_v27  ;;  %v3509_v7 = vpop.xlane.xlu0 %3508 }
 0xe20   : > { %v7148_v63 = vpop.eup %7147  ;;  %7153 = vrsqrt.f32 %v3548_v45  ;;  %v3549_v33 = vadd.f32 1e-12, %v3533_v9  ;;  %v3534_v55 = vmul.f32 0.0078125, %v3509_v7 }
 0xe21   : > { %v3598_v16 = vmul.f32 %v9050_v48, %v3576_v39  ;;  %v3577_v0 = vmul.f32 %v7148_v63, %v8899_v14  ;;  %v3511_v62 = vpop.xlane.xlu1 %3510 }
 0xe22   : > { %v7150_v47 = vpop.eup %7149  ;;  %7155 = vrsqrt.f32 %v3549_v33  ;;  %v3535_v34 = vmul.f32 0.0078125, %v3511_v62  ;;  %v3550_v11 = vadd.f32 1e-12, %v3534_v55 }
 0xe23   : > { %v3599_v27 = vmul.f32 %v9050_v48, %v3577_v0  ;;  %v9062_v19 = vadd.f32 %v9058_v13, %v3598_v16  ;;  %v3578_v14 = vmul.f32 %v7150_v47, %v8904_v8 }
 0xe24   : > { %v3551_v57 = vadd.f32 1e-12, %v3535_v34 }
 0xe25   : > { %10790 = vst [vmem:[#allocation5_spill] sm:$0xff] %v9062_v19  ;;  %v9065_v46 = vadd.f32 %v9058_v13, %v3599_v27  ;;  %v3600_v26 = vmul.f32 %v9050_v48, %v3578_v14 }
 0xe26   : > { %v7152_v36 = vpop.eup %7151  ;;  %7157 = vrsqrt.f32 %v3551_v57 }
 0xe27   : > { %10791 = vst [vmem:[#allocation7_spill] sm:$0xff] %v9065_v46  ;;  %v3636_v28 = vpack.c.bf16 %v9065_v46, %v9062_v19  ;;  %v3579_v31 = vmul.f32 %v7152_v36, %v8911_v61  ;;  %7159 = vrsqrt.f32 %v3550_v11  ;;  %v9079_v40 = vadd.f32 %v9058_v13, %v3600_v26 }
 0xe29   : > { %3891 = vmatmul.mubr.bf16.vlgmr.msra.gmra.mrb[80].mxu1 %v3636_v28  ;;  %4004 = vmatmul.mubr.bf16.vlgmr.msra.gmra.mrb[112].mxu0 %v3636_v28  ;;  %v3601_v15 = vmul.f32 %v9050_v48, %v3579_v31  ;;  %10793 = vst [vmem:[#allocation10_spill] sm:$0xff] %v9079_v40 }
 0xe2a   : > { %v7154_v56 = vpop.eup %7153  ;;  %3900 = vmatprep.mubr.bf16.mxu1 %v10770_v60  ;;  %4013 = vmatprep.mubr.bf16.mxu0 %v10770_v60 }
 0xe2b   : > { %v9076_v8 = vadd.f32 %v9058_v13, %v3601_v15  ;;  %v3580_v61 = vmul.f32 %v7154_v56, %v8916_v41 }
 0xe2c   : > { %v7156_v43 = vpop.eup %7155 }
 0xe2d   : > { %10792 = vst [vmem:[#allocation6_spill] sm:$0xff] %v9076_v8  ;;  %v3581_v12 = vmul.f32 %v7156_v43, %v8919_v52  ;;  %v3637_v51 = vpack.c.bf16 %v9076_v8, %v9079_v40  ;;  %v3602_v21 = vmul.f32 %v9050_v48, %v3580_v61 }
 0xe2f   : > { %v3603_v6 = vmul.f32 %v9050_v48, %v3581_v12  ;;  %v9094_v52 = vadd.f32 %v9058_v13, %v3602_v21 }
 0xe30   : > { %v7158_v17 = vpop.eup %7157 }
 0xe31   : > { %3901 = vmatmul.mubr.bf16.gmra.mrb[84].mxu1 %v3637_v51  ;;  %4014 = vmatmul.mubr.bf16.gmra.mrb[116].mxu0 %v3637_v51  ;;  %v7160_v18 = vpop.eup %7159  ;;  %v9090_v29 = vadd.f32 %v9058_v13, %v3603_v6  ;;  %v3583_v41 = vmul.f32 %v7158_v17, %v8929_v38  ;;  %10795 = vst [vmem:[#allocation11_spill] sm:$0xff] %v9094_v52 }
 0xe32   : > { %3910 = vmatprep.mubr.bf16.mxu1 %v10770_v60  ;;  %4023 = vmatprep.mubr.bf16.mxu0 %v10770_v60  ;;  %v3582_v4 = vmul.f32 %v7160_v18, %v8924_v32 }
 0xe33   : > { %10794 = vst [vmem:[#allocation8_spill] sm:$0xff] %v9090_v29  ;;  %v3638_v50 = vpack.c.bf16 %v9090_v29, %v9094_v52  ;;  %v3605_v20 = vmul.f32 %v9050_v48, %v3583_v41 }
 0xe34   : > { %v3604_v30 = vmul.f32 %v9050_v48, %v3582_v4 }
 0xe35   : > { %v9104_v38 = vadd.f32 %v9058_v13, %v3605_v20 }
 0xe36   : > { %v9107_v59 = vadd.f32 %v9058_v13, %v3604_v30 }
 0xe37   : > { %10796 = vst [vmem:[#allocation9_spill] sm:$0xff] %v9104_v38 }
 0xe38   : > { %10797 = vst [vmem:[#allocation12_spill] sm:$0xff] %v9107_v59  ;;  %v3639_v32 = vpack.c.bf16 %v9104_v38, %v9107_v59 }
 0xe39   : > { %3911 = vmatmul.mubr.bf16.gmra.mrb[88].mxu1 %v3638_v50  ;;  %4024 = vmatmul.mubr.bf16.gmra.mrb[120].mxu0 %v3638_v50 }
 0xe3a   : > { %3920 = vmatprep.mubr.bf16.mxu1 %v10770_v60  ;;  %4033 = vmatprep.mubr.bf16.mxu0 %v10770_v60 }
 0xe41   : > { %3921 = vmatmul.mubr.bf16.gmra.mrb[92].mxu1 %v3639_v32  ;;  %4034 = vmatmul.mubr.bf16.gmra.mrb[124].mxu0 %v3639_v32 }
 0xe42   : > { %3930 = vmatprep.mubr.bf16.mxu1 %v10770_v60  ;;  %4043 = vmatprep.mubr.bf16.mxu0 %v10770_v60 }
 0xe4b   : > { %v3513_v3 = vpop.xlane.xlu0 %3512 }
 0xe4c   : > { %v3536_v23 = vmul.f32 0.0078125, %v3513_v3 }
 0xe4d   : > { %v3515_v25 = vpop.xlane.xlu1 %3514 }
 0xe4e   : > { %v3552_v1 = vadd.f32 1e-12, %v3536_v23  ;;  %v3537_v22 = vmul.f32 0.0078125, %v3515_v25 }
 0xe4f   : > { %v3517_v37 = vpop.xlane.xlu0 %3516 }
 0xe50   : > { %7161 = vrsqrt.f32 %v3552_v1  ;;  %v3553_v5 = vadd.f32 1e-12, %v3537_v22  ;;  %v3538_v44 = vmul.f32 0.0078125, %v3517_v37 }
 0xe51   : > { %v3519_v58 = vpop.xlane.xlu1 %3518 }
 0xe52   : > { %7163 = vrsqrt.f32 %v3553_v5  ;;  %v3554_v45 = vadd.f32 1e-12, %v3538_v44  ;;  %v3539_v9 = vmul.f32 0.0078125, %v3519_v58  ;;  %v6849_v44 = vld [vmem:[%s10666_s10 + $0x40] sm:$0xff]   ;;  %v6853_v58 = vld [vmem:[%s10666_s10 + $0x48] sm:$0xff]  }
 0xe53   : > { %6245 = vmatprep.subr.bf16.mxu1 %v6849_v44 }
 0xe54   : > { %7165 = vrsqrt.f32 %v3554_v45  ;;  %v3555_v39 = vadd.f32 1e-12, %v3539_v9  ;;  %v9188_v45 = vld [vmem:[%s10666_s10 + $0xc8] sm:$0xff]  }
 0xe55   : > { %v6855_v9 = vld [vmem:[%s10666_s10 + $0x8] sm:$0xff]  }
 0xe56   : > { %7167 = vrsqrt.f32 %v3555_v39  ;;  %v6856_v39 = vld [vmem:[%s10666_s10 + $0x88] sm:$0xff]  }
 0xe57   : > { %v3521_v7 = vpop.xlane.xlu0 %3520 }
 0xe58   : > { %v3540_v63 = vmul.f32 0.0078125, %v3521_v7  ;;  %v6857_v7 = vld [vmem:[%s10666_s10 + $0x50] sm:$0xff]  }
 0xe59   : > { %v3523_v33 = vpop.xlane.xlu1 %3522 }
 0xe5a   : > { %v7162_v55 = vpop.eup %7161  ;;  %v3556_v16 = vadd.f32 1e-12, %v3540_v63  ;;  %v3541_v0 = vmul.f32 0.0078125, %v3523_v33  ;;  %v6858_v63 = vld [vmem:[%s10666_s10 + $0xd0] sm:$0xff]  }
 0xe5b   : > { %v3525_v62 = vpop.xlane.xlu0 %3524  ;;  %v3584_v47 = vmul.f32 %v7162_v55, %v9008_v53  ;;  %v6859_v33 = vld [vmem:[%s10666_s10 + $0x10] sm:$0xff]  }
 0xe5c   : > { %v7164_v34 = vpop.eup %7163  ;;  %7169 = vrsqrt.f32 %v3556_v16  ;;  %v3557_v27 = vadd.f32 1e-12, %v3541_v0  ;;  %v3542_v11 = vmul.f32 0.0078125, %v3525_v62  ;;  %v6860_v55 = vld [vmem:[%s10666_s10 + $0x90] sm:$0xff]   ;;  %v6861_v16 = vld [vmem:[%s10666_s10 + $0x58] sm:$0xff]  }
 0xe5d   : > { %v3527_v57 = vpop.xlane.xlu1 %3526  ;;  %v3585_v14 = vmul.f32 %v7164_v34, %v9011_v49  ;;  %v3606_v36 = vmul.f32 %v9050_v48, %v3584_v47  ;;  %v6862_v0 = vld [vmem:[%s10666_s10 + $0xd8] sm:$0xff]   ;;  %v6865_v34 = vld [vmem:[%s10666_s10 + $0x60] sm:$0xff]  }
 0xe5e   : > { %v7166_v28 = vpop.eup %7165  ;;  %7171 = vrsqrt.f32 %v3557_v27  ;;  %v3543_v31 = vmul.f32 0.0078125, %v3527_v57  ;;  %v3558_v56 = vadd.f32 1e-12, %v3542_v11  ;;  %v6863_v62 = vld [vmem:[%s10666_s10 + $0x18] sm:$0xff]   ;;  %v6866_v27 = vld [vmem:[%s10666_s10 + $0xe0] sm:$0xff]  }
 0xe5f   : > { %v3607_v26 = vmul.f32 %v9050_v48, %v3585_v14  ;;  %v9118_v61 = vadd.f32 %v9058_v13, %v3606_v36  ;;  %v3586_v12 = vmul.f32 %v7166_v28, %v9016_v42  ;;  %v6864_v47 = vld [vmem:[%s10666_s10 + $0x98] sm:$0xff]   ;;  %v6867_v11 = vld [vmem:[%s10666_s10 + $0x20] sm:$0xff]   ;;  %v6869_v14 = vld [vmem:[%s10666_s10 + $0x68] sm:$0xff]  }
 0xe60   : > { %v7168_v15 = vpop.eup %7167  ;;  %v3559_v43 = vadd.f32 1e-12, %v3543_v31  ;;  %v6868_v57 = vld [vmem:[%s10666_s10 + $0xa0] sm:$0xff]   ;;  %v6870_v36 = vld [vmem:[%s10666_s10 + $0xe8] sm:$0xff]  }
 0xe61   : > { %10798 = vst [vmem:[#allocation13_spill] sm:$0xff] %v9118_v61  ;;  %v9121_v53 = vadd.f32 %v9058_v13, %v3607_v26  ;;  %v3587_v49 = vmul.f32 %v7168_v15, %v9021_v2  ;;  %v3608_v17 = vmul.f32 %v9050_v48, %v3586_v12  ;;  %v6871_v28 = vld [vmem:[%s10666_s10 + $0x28] sm:$0xff]   ;;  %v6873_v26 = vld [vmem:[%s10666_s10 + $0x70] sm:$0xff]   ;;  %v6877_v12 = vld [vmem:[%s10666_s10 + $0x78] sm:$0xff]  }
 0xe62   : > { %7173 = vrsqrt.f32 %v3559_v43  ;;  %v6872_v31 = vld [vmem:[%s10666_s10 + $0xa8] sm:$0xff]   ;;  %v6874_v15 = vld [vmem:[%s10666_s10 + $0xf0] sm:$0xff]  }
 0xe63   : > { %10799 = vst [vmem:[#allocation14_spill] sm:$0xff] %v9121_v53  ;;  %v3640_v51 = vpack.c.bf16 %v9121_v53, %v9118_v61  ;;  %v3609_v6 = vmul.f32 %v9050_v48, %v3587_v49  ;;  %7175 = vrsqrt.f32 %v3558_v56  ;;  %v9135_v18 = vadd.f32 %v9058_v13, %v3608_v17  ;;  %v6875_v56 = vld [vmem:[%s10666_s10 + $0x30] sm:$0xff]   ;;  %v6878_v49 = vld [vmem:[%s10666_s10 + $0xf8] sm:$0xff]   ;;  %v3676_v17 = vld [vmem:[%s10665_s9] sm:$0xf] }
 0xe64   : > { %v6876_v43 = vld [vmem:[%s10666_s10 + $0xb0] sm:$0xff]  }
 0xe65   : > { %3931 = vmatmul.mubr.bf16.gmra.mrb[96].mxu1 %v3640_v51  ;;  %4044 = vmatmul.mubr.bf16.gmra.mrb[128].mxu0 %v3640_v51  ;;  %v9132_v42 = vadd.f32 %v9058_v13, %v3609_v6  ;;  %10801 = vst [vmem:[#allocation16_spill] sm:$0xff] %v9135_v18  ;;  %v6879_v51 = vld [vmem:[%s10666_s10 + $0x38] sm:$0xff]  }
 0xe66   : > { %v7170_v21 = vpop.eup %7169  ;;  %3940 = vmatprep.mubr.bf16.mxu1 %v10770_v60  ;;  %4053 = vmatprep.mubr.bf16.mxu0 %v10770_v60  ;;  %v6880_v6 = vld [vmem:[%s10666_s10 + $0xb8] sm:$0xff]  }
 0xe67   : > { %10800 = vst [vmem:[#allocation15_spill] sm:$0xff] %v9132_v42  ;;  %v3588_v41 = vmul.f32 %v7170_v21, %v9028_v24  ;;  %v3641_v50 = vpack.c.bf16 %v9132_v42, %v9135_v18  ;;  %v10806_v21 = vld [vmem:[#allocation4_spill] sm:$0xff] }
 0xe68   : > { %v7172_v2 = vpop.eup %7171 }
 0xe69   : > { %v3589_v4 = vmul.f32 %v7172_v2, %v9031_v10  ;;  %v3610_v32 = vmul.f32 %v9050_v48, %v3588_v41  ;;  %v3692_v2 = vsub.s32 3, %v10806_v21  ;;  %v10807_v41 = vsub.s32 0, %v10806_v21 }
 0xe6b   : > { %v3611_v20 = vmul.f32 %v9050_v48, %v3589_v4  ;;  %v9150_v10 = vadd.f32 %v9058_v13, %v3610_v32  ;;  %v9275_v4 = vrot.slane %v3676_v17, %v10807_v41 }
 0xe6c   : > { %v7174_v30 = vpop.eup %7173 }
 0xe6d   : > { %3941 = vmatmul.mubr.bf16.gmra.mrb[100].mxu1 %v3641_v50  ;;  %4054 = vmatmul.mubr.bf16.gmra.mrb[132].mxu0 %v3641_v50  ;;  %v7176_v3 = vpop.eup %7175  ;;  %v9146_v23 = vadd.f32 %v9058_v13, %v3611_v20  ;;  %v3591_v24 = vmul.f32 %v7174_v30, %v9041_v35  ;;  %10803 = vst [vmem:[#allocation18_spill] sm:$0xff] %v9150_v10  ;;  %v10808_v50 = vsub.s32 2, %v10806_v21 }
 0xe6e   : > { %3950 = vmatprep.mubr.bf16.mxu1 %v10770_v60  ;;  %4063 = vmatprep.mubr.bf16.mxu0 %v10770_v60  ;;  %v3590_v25 = vmul.f32 %v7176_v3, %v9036_v54  ;;  %v10809_v3 = vsub.s32 1, %v10806_v21 }
 0xe6f   : > { %10802 = vst [vmem:[#allocation17_spill] sm:$0xff] %v9146_v23  ;;  %v3642_v1 = vpack.c.bf16 %v9146_v23, %v9150_v10  ;;  %v3613_v22 = vmul.f32 %v9050_v48, %v3591_v24  ;;  %v9279_v20 = vrot.slane %v3676_v17, %v10808_v50 }
 0xe70   : > { %v3612_v37 = vmul.f32 %v9050_v48, %v3590_v25  ;;  %v6851_v48 = vld [vmem:[%s10666_s10 + $0xc0] sm:$0xff]   ;;  %v9283_v24 = vrot.slane %v3676_v17, %v10809_v3  ;;  %v9285_v25 = vrot.slane %v3676_v17, %v3692_v2 }
 0xe71   : > { %v9160_v35 = vadd.f32 %v9058_v13, %v3613_v22  ;;  %6309 = vmatprep.subr.bf16.mxu0 %v6851_v48 }
 0xe72   : > { %v9163_v5 = vadd.f32 %v9058_v13, %v3612_v37  ;;  %v9179_v13 = vld [vmem:[%s10666_s10 + $0x80] sm:$0xff]  }
 0xe73   : > { %10804 = vst [vmem:[#allocation19_spill] sm:$0xff] %v9160_v35  ;;  %6310 = vmatpush3.bf16.msra.mxu0 %v9179_v13 }
 0xe74   : > { %10805 = vst [vmem:[#allocation20_spill] sm:$0xff] %v9163_v5  ;;  %v3643_v54 = vpack.c.bf16 %v9160_v35, %v9163_v5  ;;  %6311 = vmatprep.subr.bf16.mxu0 %v9188_v45 }
 0xe75   : > { %3951 = vmatmul.mubr.bf16.gmra.mrb[104].mxu1 %v3642_v1  ;;  %4064 = vmatmul.mubr.bf16.gmra.mrb[136].mxu0 %v3642_v1 }
 0xe76   : > { %3960 = vmatprep.mubr.bf16.mxu1 %v10770_v60  ;;  %4073 = vmatprep.mubr.bf16.mxu0 %v10770_v60  ;;  %v6850_v60 = vld [vmem:[%s10666_s10] sm:$0xff]  }
 0xe77   : > { %6246 = vmatpush3.bf16.msra.mxu1 %v6850_v60  ;;  %6312 = vmatpush3.bf16.msra.mxu0 %v6856_v39 }
 0xe78   : > { %6247 = vmatprep.subr.bf16.mxu1 %v6853_v58  ;;  %6313 = vmatprep.subr.bf16.mxu0 %v6858_v63 }
 0xe7b   : > { %6248 = vmatpush3.bf16.msra.mxu1 %v6855_v9  ;;  %6314 = vmatpush3.bf16.msra.mxu0 %v6860_v55 }
 0xe7c   : > { %6249 = vmatprep.subr.bf16.mxu1 %v6857_v7  ;;  %6315 = vmatprep.subr.bf16.mxu0 %v6862_v0 }
 0xe7d   : > { %3961 = vmatmul.mubr.bf16.gmra.mrb[108].mxu1 %v3643_v54  ;;  %4074 = vmatmul.mubr.bf16.gmra.mrb[140].mxu0 %v3643_v54 }
 0xe7f   : > { %6250 = vmatpush3.bf16.msra.mxu1 %v6859_v33  ;;  %6316 = vmatpush3.bf16.msra.mxu0 %v6864_v47 }
 0xe80   : > { %6251 = vmatprep.subr.bf16.mxu1 %v6861_v16  ;;  %6317 = vmatprep.subr.bf16.mxu0 %v6866_v27 }
 0xe83   : > { %6252 = vmatpush3.bf16.msra.mxu1 %v6863_v62  ;;  %6318 = vmatpush3.bf16.msra.mxu0 %v6868_v57 }
 0xe84   : > { %6253 = vmatprep.subr.bf16.mxu1 %v6865_v34  ;;  %6319 = vmatprep.subr.bf16.mxu0 %v6870_v36 }
 0xe87   : > { %6254 = vmatpush3.bf16.msra.mxu1 %v6867_v11  ;;  %6320 = vmatpush3.bf16.msra.mxu0 %v6872_v31 }
 0xe88   : > { %6255 = vmatprep.subr.bf16.mxu1 %v6869_v14  ;;  %6321 = vmatprep.subr.bf16.mxu0 %v6874_v15 }
 0xe8b   : > { %6256 = vmatpush3.bf16.msra.mxu1 %v6871_v28  ;;  %6322 = vmatpush3.bf16.msra.mxu0 %v6876_v43 }
 0xe8c   : > { %6257 = vmatprep.subr.bf16.mxu1 %v6873_v26  ;;  %6323 = vmatprep.subr.bf16.mxu0 %v6878_v49 }
 0xe8f   : > { %6258 = vmatpush3.bf16.msra.mxu1 %v6875_v56  ;;  %6324 = vmatpush3.bf16.msra.mxu0 %v6880_v6 }
 0xe90   : > { %6259 = vmatprep.subr.bf16.mxu1 %v6877_v12 }
 0xe93   : > { %6260 = vmatpush3.bf16.msra.mxu1 %v6879_v51 }
 0xe94   : > { %6693 = vmatprep.subr.bf16.mxu1 %v6851_v48 }
 0xefc   : > { %v3892_v30 = vpop.f32.mrb[80].mxu1  ;;  %v4005_v32 = vpop.f32.mrb[112].mxu0 }
 0xefd   : > { %v3894_v1 = vpop.f32.mrb[81].mxu1  ;;  %v4007_v22 = vpop.f32.mrb[113].mxu0  ;;  %v3893_v44 = vadd.f32 %v3892_v30, %v9275_v4  ;;  %v4006_v60 = vadd.f32 %v4005_v32, %v9279_v20 }
 0xefe   : > { %v3896_v37 = vpop.f32.mrb[82].mxu1  ;;  %v4009_v54 = vpop.f32.mrb[114].mxu0  ;;  %v3895_v7 = vadd.f32 %v3894_v1, %v9283_v24  ;;  %v4008_v63 = vadd.f32 %v4007_v22, %v9285_v25 }
 0xeff   : > { %v3897_v48 = vadd.f32 %v3896_v37, %v9275_v4  ;;  %v4010_v58 = vadd.f32 %v4009_v54, %v9279_v20  ;;  %v3898_v9 = vpop.f32.mrb[83].mxu1  ;;  %v4011_v39 = vpop.f32.mrb[115].mxu0 }
 0xf00   : > { %v3899_v33 = vadd.f32 %v3898_v9, %v9283_v24  ;;  %v4012_v55 = vadd.f32 %v4011_v39, %v9285_v25 }
 0xf01   : > { %v9295_v16 = vpack.c.bf16 %v3897_v48, %v3893_v44  ;;  %v9297_v0 = vpack.c.bf16 %v4010_v58, %v4006_v60 }
 0xf02   : > { %v9299_v62 = vpack.c.bf16 %v3899_v33, %v3895_v7  ;;  %v9301_v47 = vpack.c.bf16 %v4012_v55, %v4008_v63 }
 0xf03   : > { %v10690_v34 = vmul.bf16 1060454197, %v9295_v16  ;;  %v10689_v27 = vmul.bf16 1060454197, %v9297_v0 }
 0xf04   : > { %v3902_v14 = vpop.f32.mrb[84].mxu1  ;;  %v10687_v31 = vmul.bf16 1060454197, %v9299_v62  ;;  %v4015_v56 = vpop.f32.mrb[116].mxu0  ;;  %v10686_v48 = vmul.bf16 1060454197, %v9301_v47 }
 0xf05   : > { %v4148_v11 = vand.u32 2147450879, %v10690_v34  ;;  %v4150_v57 = vand.u32 2147450879, %v10689_v27  ;;  %v3904_v43 = vpop.f32.mrb[85].mxu1  ;;  %v4017_v12 = vpop.f32.mrb[117].mxu0  ;;  %v3903_v2 = vadd.f32 %v3902_v14, %v9275_v4  ;;  %v4016_v41 = vadd.f32 %v4015_v56, %v9279_v20 }
 0xf06   : > { %v3906_v49 = vpop.f32.mrb[86].mxu1  ;;  %v4019_v51 = vpop.f32.mrb[118].mxu0  ;;  %v9312_v6 = vand.u32 2147450879, %v10687_v31  ;;  %v3905_v50 = vadd.f32 %v3904_v43, %v9283_v24  ;;  %v4018_v1 = vadd.f32 %v4017_v12, %v9285_v25  ;;  %v4151_v56 = vand.u32 2147450879, %v10686_v48 }
 0xf07   : > { %v4180_v36 = vmul.bf16 1051213480, %v4148_v11  ;;  %v4182_v28 = vmul.bf16 1051213480, %v4150_v57  ;;  %v3908_v17 = vpop.f32.mrb[87].mxu1  ;;  %v4021_v21 = vpop.f32.mrb[119].mxu0  ;;  %v3907_v30 = vadd.f32 %v3906_v49, %v9275_v4  ;;  %v4020_v22 = vadd.f32 %v4019_v51, %v9279_v20 }
 0xf08   : > { %v3909_v37 = vadd.f32 %v3908_v17, %v9283_v24  ;;  %v4022_v54 = vadd.f32 %v4021_v21, %v9285_v25  ;;  %v4596_v7 = vsub.bf16 0, %v4148_v11 }
 0xf09   : > { %v4212_v26 = vadd.bf16 1065369472, %v4180_v36  ;;  %v4214_v15 = vadd.bf16 1065369472, %v4182_v28  ;;  %v9329_v58 = vpack.c.bf16 %v3907_v30, %v3903_v2  ;;  %v9333_v63 = vpack.c.bf16 %v4020_v22, %v4016_v41 }
 0xf0a   : > { %v9335_v33 = vpack.c.bf16 %v3909_v37, %v3905_v50  ;;  %v9337_v55 = vpack.c.bf16 %v4022_v54, %v4018_v1  ;;  %v4598_v28 = vsub.bf16 0, %v4150_v57  ;;  %v4628_v17 = vmul.bf16 %v4596_v7, %v4148_v11 }
 0xf0b   : > { %7177 = vrcp.bf16 %v4212_v26  ;;  %10810 = vst [vmem:[#allocation4_spill] sm:$0xff] %v9329_v58  ;;  %10811 = vst [vmem:[#allocation21_spill] sm:$0xff] %v9333_v63  ;;  %v4181_v26 = vmul.bf16 1051213480, %v9312_v6  ;;  %v10688_v43 = vmul.bf16 1060454197, %v9333_v63 }
 0xf0c   : > { %7179 = vrcp.bf16 %v4214_v15  ;;  %v3912_v32 = vpop.f32.mrb[88].mxu1  ;;  %v9318_v3 = vpop.f32.mrb[120].mxu0  ;;  %10812 = vst [vmem:[#allocation22_spill] sm:$0xff] %v9337_v55  ;;  %v10685_v15 = vmul.bf16 1060454197, %v9329_v58  ;;  %v4630_v41 = vmul.bf16 %v4598_v28, %v4150_v57  ;;  %v4599_v50 = vsub.bf16 0, %v4151_v56 }
 0xf0d   : > { %v9324_v44 = vpop.f32.mrb[89].mxu1  ;;  %v9326_v60 = vpop.f32.mrb[121].mxu0  ;;  %v3913_v12 = vadd.f32 %v3912_v32, %v9275_v4  ;;  %v4213_v54 = vadd.bf16 1065369472, %v4181_v26  ;;  %v4183_v11 = vmul.bf16 1051213480, %v4151_v56 }
 0xf0e   : > { %v3916_v9 = vpop.f32.mrb[90].mxu1  ;;  %v9331_v39 = vpop.f32.mrb[122].mxu0  ;;  %v9362_v32 = vand.u32 2147450879, %v10685_v15  ;;  %v9368_v57 = vand.u32 2147450879, %v10688_v43  ;;  %v9398_v42 = vmul.bf16 %v4599_v50, %v4151_v56 }
 0xf0f   : > { %v9339_v14 = vpop.f32.mrb[91].mxu1  ;;  %v9341_v36 = vpop.f32.mrb[123].mxu0  ;;  %v3917_v49 = vadd.f32 %v3916_v9, %v9275_v4  ;;  %v4661_v28 = vmul.bf16 1069105081, %v4628_v17  ;;  %v4597_v15 = vsub.bf16 0, %v9312_v6 }
 0xf10   : > { %v4184_v48 = vmul.bf16 1051213480, %v9362_v32  ;;  %v4215_v2 = vadd.bf16 1065369472, %v4183_v11  ;;  %v4186_v27 = vmul.bf16 1051213480, %v9368_v57  ;;  %v4026_v11 = vadd.f32 %v9318_v3, %v9279_v20 }
 0xf11   : > { %v9354_v30 = vpack.c.bf16 %v3917_v49, %v3913_v12  ;;  %7181 = vpow.bf16 %v4661_v28  ;;  %v9389_v31 = vmul.bf16 %v4597_v15, %v9312_v6  ;;  %v10814_v35 = vmul.bf16 1060454197, %v9335_v33 }
 0xf12   : > { %v4216_v34 = vadd.bf16 1065369472, %v4184_v48  ;;  %v10815_v15 = vmul.bf16 1060454197, %v9337_v55  ;;  %v4600_v3 = vsub.bf16 0, %v9362_v32 }
 0xf13   : > { %10813 = vst [vmem:[#allocation23_spill] sm:$0xff] %v9354_v30  ;;  %v4153_v23 = vand.u32 2147450879, %v10814_v35  ;;  %v3915_v35 = vadd.f32 %v9324_v44, %v9283_v24  ;;  %v10698_v56 = vmul.bf16 1060454197, %v9354_v30 }
 0xf14   : > { %v9350_v51 = vpop.f32.mrb[92].mxu1  ;;  %v9356_v1 = vpop.f32.mrb[124].mxu0  ;;  %v9429_v44 = vmul.bf16 %v4600_v3, %v9362_v32 }
 0xf15   : > { %v9371_v12 = vpop.f32.mrb[93].mxu1  ;;  %v9373_v49 = vpop.f32.mrb[125].mxu0  ;;  %v4185_v50 = vmul.bf16 1051213480, %v4153_v23 }
 0xf16   : > { %v7178_v21 = vpop.eup %7177  ;;  %v9385_v5 = vpop.f32.mrb[126].mxu0 }
 0xf17   : > { %v7180_v22 = vpop.eup %7179  ;;  %v9358_v37 = vmul.bf16 1065369472, %v7178_v21  ;;  %v4667_v21 = vmul.bf16 1069105081, %v4630_v41  ;;  %v9383_v41 = vpop.f32.mrb[94].mxu1 }
 0xf18   : > { %v9364_v9 = vmul.bf16 1065369472, %v7180_v22 }
 0xf19   : > { %v4308_v7 = vmul.bf16 1065893768, %v9358_v37  ;;  %7183 = vpow.bf16 %v4667_v21  ;;  %v4155_v21 = vand.u32 2147450879, %v10815_v15 }
 0xf1a   : > { %v4310_v26 = vmul.bf16 1065893768, %v9364_v9  ;;  %7185 = vrcp.bf16 %v4213_v54  ;;  %v4030_v54 = vadd.f32 %v9331_v39, %v9279_v20 }
 0xf1b   : > { %v4340_v22 = vadd.bf16 3216687034, %v4308_v7  ;;  %7187 = vrcp.bf16 %v4215_v2  ;;  %v4187_v15 = vmul.bf16 1051213480, %v4155_v21  ;;  %v4603_v18 = vsub.bf16 0, %v4155_v21 }
 0xf1c   : > { %v4342_v43 = vadd.bf16 3216687034, %v4310_v26  ;;  %v9392_v26 = vpop.f32.mrb[95].mxu1  ;;  %7189 = vrcp.bf16 %v4216_v34 }
 0xf1d   : > { %v4372_v17 = vmul.bf16 %v4340_v22, %v9358_v37  ;;  %v9394_v22 = vpop.f32.mrb[127].mxu0 }
 0xf1e   : > { %v4374_v7 = vmul.bf16 %v4342_v43, %v9364_v9  ;;  %v4218_v43 = vadd.bf16 1065369472, %v4186_v27  ;;  %v3919_v27 = vadd.f32 %v9339_v14, %v9283_v24 }
 0xf1f   : > { %v4404_v28 = vadd.bf16 1068908470, %v4372_v17  ;;  %v9413_v17 = vpack.c.bf16 %v4030_v54, %v4026_v11  ;;  %v4156_v11 = vand.u32 2147450879, %v10698_v56 }
 0xf20   : > { %v4406_v10 = vadd.bf16 1068908470, %v4374_v7  ;;  %7191 = vrcp.bf16 %v4218_v43  ;;  %v9416_v39 = vpack.c.bf16 %v3919_v27, %v3915_v35  ;;  %v4032_v35 = vadd.f32 %v9341_v36, %v9285_v25  ;;  %v7182_v27 = vpop.eup %7181 }
 0xf21   : > { %v4436_v6 = vmul.bf16 %v4404_v28, %v9358_v37  ;;  %10816 = vst [vmem:[#allocation24_spill] sm:$0xff] %v9413_v17  ;;  %v4602_v28 = vsub.bf16 0, %v9368_v57  ;;  %v4188_v32 = vmul.bf16 1051213480, %v4156_v11  ;;  %v4604_v3 = vsub.bf16 0, %v4156_v11 }
 0xf22   : > { %v4438_v48 = vmul.bf16 %v4406_v10, %v9364_v9  ;;  %10817 = vst [vmem:[#allocation25_spill] sm:$0xff] %v9416_v39 }
 0xf23   : > { %v4468_v2 = vadd.bf16 3197288082, %v4436_v6  ;;  %v4601_v6 = vsub.bf16 0, %v4153_v23  ;;  %v9434_v56 = vmul.bf16 %v4602_v28, %v9368_v57 }
 0xf24   : > { %v4470_v7 = vadd.bf16 3197288082, %v4438_v48  ;;  %v4217_v48 = vadd.bf16 1065369472, %v4185_v50  ;;  %v7184_v34 = vpop.eup %7183  ;;  %v4028_v50 = vadd.f32 %v9326_v60, %v9285_v25 }
 0xf25   : > { %v4500_v10 = vmul.bf16 %v4468_v2, %v9358_v37  ;;  %v7186_v43 = vpop.eup %7185 }
 0xf26   : > { %v4502_v14 = vmul.bf16 %v4470_v7, %v9364_v9  ;;  %v7188_v61 = vpop.eup %7187  ;;  %7193 = vrcp.bf16 %v4217_v48  ;;  %v10700_v7 = vmul.bf16 1060454197, %v9413_v17 }
 0xf27   : > { %v4532_v54 = vadd.bf16 1048723074, %v4500_v10  ;;  %v4219_v10 = vadd.bf16 1065369472, %v4187_v15  ;;  %v9447_v15 = vmul.bf16 %v4603_v18, %v4155_v21  ;;  %v7190_v48 = vpop.eup %7189  ;;  %v10819_v21 = vmul.bf16 1060454197, %v9416_v39 }
 0xf28   : > { %v4534_v2 = vadd.bf16 1048723074, %v4502_v14  ;;  %v9439_v14 = vmul.bf16 %v4601_v6, %v4153_v23  ;;  %v9449_v23 = vmul.bf16 1065369472, %v7186_v43  ;;  %v4158_v18 = vand.u32 2147450879, %v10700_v7 }
 0xf29   : > { %v4564_v53 = vmul.bf16 %v4532_v54, %v9358_v37  ;;  %v9443_v54 = vpack.c.bf16 %v4032_v35, %v4028_v50  ;;  %7195 = vrcp.bf16 %v4219_v10  ;;  %v4220_v35 = vadd.bf16 1065369472, %v4188_v32 }
 0xf2a   : > { %v4566_v36 = vmul.bf16 %v4534_v2, %v9364_v9  ;;  %v9452_v2 = vmul.bf16 1065369472, %v7188_v61  ;;  %v9455_v50 = vmul.bf16 %v4604_v3, %v4156_v11  ;;  %v9470_v3 = vmul.bf16 1065369472, %v7190_v48 }
 0xf2b   : > { %10818 = vst [vmem:[#allocation26_spill] sm:$0xff] %v9443_v54  ;;  %v4756_v57 = vmul.bf16 %v7182_v27, %v4564_v53  ;;  %v7192_v53 = vpop.eup %7191  ;;  %v10702_v27 = vmul.bf16 1060454197, %v9443_v54  ;;  %7197 = vrcp.bf16 %v4220_v35  ;;  %v4190_v60 = vmul.bf16 1051213480, %v4158_v18 }
 0xf2c   : > { %v4758_v9 = vmul.bf16 %v7184_v34, %v4566_v36  ;;  %v4157_v34 = vand.u32 2147450879, %v10819_v21  ;;  %v10820_v36 = vmul.bf16 1060454197, %v9295_v16  ;;  %v9473_v7 = vmul.bf16 1065369472, %v7192_v53 }
 0xf2d   : > { %v4788_v43 = vsub.bf16 1065369472, %v4756_v57  ;;  %v4606_v61 = vsub.bf16 0, %v4158_v18  ;;  %v3927_v48 = vadd.f32 %v9383_v41, %v9275_v4  ;;  %v4040_v35 = vadd.f32 %v9385_v5, %v9279_v20 }
 0xf2e   : > { %vm9466_vm4 = vcmp.lt.bf16.partialorder %v10820_v36, 0  ;;  %v4790_v11 = vsub.bf16 1065369472, %v4758_v9  ;;  %v4605_v10 = vsub.bf16 0, %v4157_v34  ;;  %v3923_v36 = vadd.f32 %v9350_v51, %v9275_v4 }
 0xf2f   : > { %v4852_v37 = vsub.bf16 0, %v4788_v43  ;;  %v4036_v9 = vadd.f32 %v9356_v1, %v9279_v20  ;;  %v4159_v21 = vand.u32 2147450879, %v10702_v27  ;;  %v3925_v57 = vadd.f32 %v9371_v12, %v9283_v24 }
 0xf30   : > { %v4854_v53 = vsub.bf16 0, %v4790_v11  ;;  %v3929_v51 = vadd.f32 %v9392_v26, %v9283_v24  ;;  %v4038_v1 = vadd.f32 %v9373_v49, %v9285_v25  ;;  %v9493_v28 = vpack.c.bf16 %v3927_v48, %v3923_v36 }
 0xf31   : > { %v7194_v6 = vpop.eup %7193  ;;  %v9495_v41 = vpack.c.bf16 %v4040_v35, %v4036_v9  ;;  %v4042_v5 = vadd.f32 %v9394_v22, %v9285_v25  ;;  %v9499_v38 = vmul.bf16 %v4606_v61, %v4158_v18  ;;  %v4189_v27 = vmul.bf16 1051213480, %v4157_v34 }
 0xf32   : > { %10823 = vst [vmem:[#allocation27_spill] sm:$0xff] %v9493_v28  ;;  %v9502_v12 = vpack.c.bf16 %v3929_v51, %v3925_v57  ;;  %v9504_v26 = vmul.bf16 %v4605_v10, %v4157_v34  ;;  %v10707_v52 = vmul.bf16 1060454197, %v9493_v28  ;;  %v10827_v9 = vmul.bf16 1060454197, %v9297_v0 }
 0xf33   : > { %10824 = vst [vmem:[#allocation28_spill] sm:$0xff] %v9495_v41  ;;  %v10706_v49 = vmul.bf16 1060454197, %v9495_v41  ;;  %v9508_v36 = vpack.c.bf16 %v4042_v5, %v4038_v1  ;;  %v9512_v22 = vmul.bf16 1065369472, %v7194_v6  ;;  %v4607_v61 = vsub.bf16 0, %v4159_v21 }
 0xf34   : > { %10825 = vst [vmem:[#allocation29_spill] sm:$0xff] %v9502_v12  ;;  %v7196_v29 = vpop.eup %7195  ;;  %vm4822_vm5 = vcmp.lt.bf16.partialorder %v10827_v9, 0  ;;  %v4222_v18 = vadd.bf16 1065369472, %v4190_v60  ;;  %v9516_v57 = vsel %vm9466_vm4, %v4852_v37, %v4788_v43  ;;  %v4191_v34 = vmul.bf16 1051213480, %v4159_v21 }
 0xf35   : > { %10826 = vst [vmem:[#allocation30_spill] sm:$0xff] %v9508_v36  ;;  %v9518_v48 = vsel %vm4822_vm5, %v4854_v53, %v4790_v11  ;;  %v10708_v10 = vmul.bf16 1060454197, %v9502_v12  ;;  %v10828_v35 = vmul.bf16 1069105081, %v9389_v31  ;;  %v9537_v53 = vmul.bf16 %v4607_v61, %v4159_v21 }
 0xf36   : > { %v9523_v51 = vmul.bf16 1065369472, %v7196_v29  ;;  %v4221_v6 = vadd.bf16 1065369472, %v4189_v27  ;;  %v10829_v60 = vmul.bf16 1069105081, %v9398_v42  ;;  %v7198_v11 = vpop.eup %7197 }
 0xf37   : > { %7199 = vpow.bf16 %v10828_v35  ;;  %v4160_v37 = vand.u32 2147450879, %v10707_v52  ;;  %v9533_v43 = vand.u32 2147450879, %v10706_v49  ;;  %v10830_v42 = vmul.bf16 1069105081, %v9429_v44 }
 0xf38   : > { %7201 = vpow.bf16 %v10829_v60  ;;  %v4223_v5 = vadd.bf16 1065369472, %v4191_v34  ;;  %v9544_v9 = vand.u32 2147450879, %v10708_v10  ;;  %v3932_v35 = vpop.f32.mrb[96].mxu1  ;;  %v4045_v52 = vpop.f32.mrb[128].mxu0 }
 0xf39   : > { %7203 = vpow.bf16 %v10830_v42  ;;  %v4309_v60 = vmul.bf16 1065893768, %v9449_v23  ;;  %v4311_v49 = vmul.bf16 1065893768, %v9452_v2  ;;  %v3934_v59 = vpop.f32.mrb[97].mxu1  ;;  %v4047_v42 = vpop.f32.mrb[129].mxu0  ;;  %v3933_v17 = vadd.f32 %v3932_v35, %v9275_v4 }
 0xf3a   : > { %7205 = vrcp.bf16 %v4222_v18  ;;  %v10831_v21 = vmul.bf16 1069105081, %v9434_v56  ;;  %v4192_v61 = vmul.bf16 1051213480, %v4160_v37  ;;  %v4194_v44 = vmul.bf16 1051213480, %v9533_v43 }
 0xf3b   : > { %v10832_v34 = vmul.bf16 1069105081, %v9439_v14  ;;  %v9553_v10 = vmul.bf16 1065369472, %v7198_v11  ;;  %v4608_v27 = vsub.bf16 0, %v4160_v37  ;;  %v4610_v29 = vsub.bf16 0, %v9533_v43 }
 0xf3c   : > { %7207 = vpow.bf16 %v10831_v21  ;;  %v4609_v31 = vsub.bf16 0, %v9544_v9  ;;  %v3936_v21 = vpop.f32.mrb[98].mxu1  ;;  %v4049_v32 = vpop.f32.mrb[130].mxu0  ;;  %v10834_v1 = vmul.bf16 1069105081, %v9447_v15  ;;  %v4046_v15 = vadd.f32 %v4045_v52, %v9279_v20 }
 0xf3d   : > { %7209 = vpow.bf16 %v10832_v34  ;;  %10833 = vst [vmem:[#allocation31_spill] sm:$0xff] %v9553_v10  ;;  %v4341_v8 = vadd.bf16 3216687034, %v4309_v60  ;;  %v4343_v14 = vadd.bf16 3216687034, %v4311_v49  ;;  %v3938_v34 = vpop.f32.mrb[99].mxu1  ;;  %v4048_v39 = vadd.f32 %v4047_v42, %v9285_v25 }
 0xf3e   : > { %7211 = vrcp.bf16 %v4221_v6  ;;  %v4051_v11 = vpop.f32.mrb[131].mxu0  ;;  %v4224_v40 = vadd.bf16 1065369472, %v4192_v61  ;;  %v4226_v18 = vadd.bf16 1065369472, %v4194_v44  ;;  %v3937_v61 = vadd.f32 %v3936_v21, %v9275_v4 }
 0xf3f   : > { %7213 = vpow.bf16 %v10834_v1  ;;  %v4373_v19 = vmul.bf16 %v4341_v8, %v9449_v23  ;;  %v4375_v56 = vmul.bf16 %v4343_v14, %v9452_v2  ;;  %v4050_v44 = vadd.f32 %v4049_v32, %v9279_v20 }
 0xf40   : > { %7215 = vrcp.bf16 %v4223_v5  ;;  %v9561_v46 = vpop.f32.mrb[100].mxu1  ;;  %v9563_v6 = vpop.f32.mrb[132].mxu0  ;;  %v3935_v5 = vadd.f32 %v3934_v59, %v9283_v24  ;;  %v3939_v8 = vadd.f32 %v3938_v34, %v9283_v24  ;;  %v4052_v10 = vadd.f32 %v4051_v11, %v9285_v25 }
 0xf41   : > { %v9569_v1 = vpop.f32.mrb[101].mxu1  ;;  %v9571_v49 = vpop.f32.mrb[133].mxu0  ;;  %v4405_v52 = vadd.bf16 1068908470, %v4373_v19  ;;  %v4407_v54 = vadd.bf16 1068908470, %v4375_v56  ;;  %v4640_v21 = vmul.bf16 %v4608_v27, %v4160_v37  ;;  %v9591_v32 = vpack.c.bf16 %v3937_v61, %v3933_v17 }
 0xf42   : > { %10835 = vst [vmem:[#allocation32_spill] sm:$0xff] %v9571_v49  ;;  %v9573_v60 = vpop.eup %7199  ;;  %v9579_v30 = vpop.f32.mrb[102].mxu1  ;;  %v9593_v34 = vpack.c.bf16 %v4050_v44, %v4046_v15  ;;  %v9595_v63 = vpack.c.bf16 %v3939_v8, %v3935_v5  ;;  %7217 = vrcp.bf16 %v4224_v40  ;;  %v9605_v11 = vpack.c.bf16 %v4052_v10, %v4048_v39 }
 0xf43   : > { %v9581_v14 = vpop.f32.mrb[134].mxu0  ;;  %v9583_v35 = vpop.eup %7201  ;;  %10836 = vst [vmem:[#allocation33_spill] sm:$0xff] %v9591_v32  ;;  %v4437_v42 = vmul.bf16 %v4405_v52, %v9449_v23  ;;  %v4439_v56 = vmul.bf16 %v4407_v54, %v9452_v2  ;;  %7219 = vrcp.bf16 %v4226_v18  ;;  %v4642_v15 = vmul.bf16 %v4610_v29, %v9533_v43 }
 0xf44   : > { %v9587_v49 = vpop.f32.mrb[103].mxu1  ;;  %v9589_v59 = vpop.f32.mrb[135].mxu0  ;;  %10837 = vst [vmem:[#allocation34_spill] sm:$0xff] %v9593_v34  ;;  %v10842_v5 = vmul.bf16 1060454197, %v9508_v36  ;;  %v4641_v29 = vmul.bf16 %v4609_v31, %v9544_v9 }
 0xf45   : > { %v9601_v19 = vpop.eup %7203  ;;  %v4313_v44 = vmul.bf16 1065893768, %v9512_v22  ;;  %v10843_v8 = vmul.bf16 1069105081, %v9455_v50  ;;  %v4193_v39 = vmul.bf16 1051213480, %v9544_v9 }
 0xf46   : > { %v7206_v27 = vpop.eup %7205  ;;  %v4163_v61 = vand.u32 2147450879, %v10842_v5  ;;  %v4469_v54 = vadd.bf16 3197288082, %v4437_v42  ;;  %v4471_v10 = vadd.bf16 3197288082, %v4439_v56 }
 0xf47   : > { %v9615_v40 = vpop.eup %7207  ;;  %7221 = vpow.bf16 %v10843_v8  ;;  %v10845_v43 = vmul.bf16 1069105081, %v9499_v38  ;;  %v4703_v31 = vmul.bf16 1069105081, %v4642_v15  ;;  %v10848_v28 = vmul.bf16 1056980736, %v9295_v16 }
 0xf48   : > { %v9597_v58 = vpop.f32.mrb[104].mxu1  ;;  %v9599_v55 = vpop.f32.mrb[136].mxu0  ;;  %v4501_v50 = vmul.bf16 %v4469_v54, %v9449_v23  ;;  %v4503_v8 = vmul.bf16 %v4471_v10, %v9452_v2  ;;  %v4195_v9 = vmul.bf16 1051213480, %v4163_v61  ;;  %v4611_v18 = vsub.bf16 0, %v4163_v61 }
 0xf49   : > { %10838 = vst [vmem:[#allocation35_spill] sm:$0xff] %v9597_v58  ;;  %10839 = vst [vmem:[#allocation36_spill] sm:$0xff] %v9599_v55  ;;  %v9607_v37 = vpop.f32.mrb[105].mxu1  ;;  %v9609_v17 = vpop.f32.mrb[137].mxu0  ;;  %v4697_v55 = vmul.bf16 1069105081, %v4640_v21  ;;  %7223 = vpow.bf16 %v10845_v43 }
 0xf4a   : > { %10840 = vst [vmem:[#allocation37_spill] sm:$0xff] %v9607_v37  ;;  %10841 = vst [vmem:[#allocation38_spill] sm:$0xff] %v9609_v17  ;;  %v9620_v52 = vpop.eup %7209  ;;  %v9626_v37 = vmul.bf16 1065369472, %v7206_v27  ;;  %v9630_v42 = vpop.f32.mrb[106].mxu1 }
 0xf4b   : > { %v7212_v17 = vpop.eup %7211  ;;  %v9632_v56 = vpop.f32.mrb[138].mxu0  ;;  %v10847_v21 = vmul.bf16 1069105081, %v9504_v26  ;;  %v4225_v54 = vadd.bf16 1065369472, %v4193_v39 }
 0xf4c   : > { %10844 = vst [vmem:[#allocation39_spill] sm:$0xff] %v9632_v56  ;;  %v9634_v58 = vpop.eup %7213  ;;  %v9638_v5 = vpop.f32.mrb[107].mxu1  ;;  %v4533_v10 = vadd.bf16 1048723074, %v4501_v50  ;;  %v4535_v41 = vadd.bf16 1048723074, %v4503_v8 }
 0xf4d   : > { %10846 = vst [vmem:[#allocation40_spill] sm:$0xff] %v9638_v5  ;;  %v7216_v27 = vpop.eup %7215  ;;  %7225 = vpow.bf16 %v10847_v21  ;;  %v10849_v12 = vadd.bf16 1065369472, %v9516_v57  ;;  %v10850_v38 = vmul.bf16 1060454197, %v9299_v62 }
 0xf4e   : > { %v10853_v43 = vmul.bf16 1060454197, %v9301_v47  ;;  %v9660_v39 = vmul.bf16 1065369472, %v7212_v17  ;;  %v10856_v16 = vmul.bf16 1069105081, %v9537_v53  ;;  %v4567_v50 = vmul.bf16 %v4535_v41, %v9452_v2 }
 0xf4f   : > { %v9646_v56 = vmul.bf16 %v10849_v12, %v10848_v28  ;;  %vm9650_vm6 = vcmp.lt.bf16.partialorder %v10850_v38, 0  ;;  %v4700_v57 = vmul.bf16 1069105081, %v4641_v29  ;;  %v9664_v28 = vpop.f32.mrb[139].mxu0  ;;  %v4565_v12 = vmul.bf16 %v4533_v10, %v9449_v23 }
 0xf50   : > { %vm9656_vm7 = vcmp.lt.bf16.partialorder %v10853_v43, 0  ;;  %7227 = vpow.bf16 %v10856_v16  ;;  %v4345_v8 = vadd.bf16 3216687034, %v4313_v44  ;;  %v9668_v21 = vpop.f32.mrb[108].mxu1  ;;  %v9670_v38 = vpop.f32.mrb[140].mxu0  ;;  %v4643_v17 = vmul.bf16 %v4611_v18, %v4163_v61 }
 0xf51   : > { %7229 = vpow.bf16 %v4697_v55  ;;  %v4227_v43 = vadd.bf16 1065369472, %v4195_v9  ;;  %v9673_v53 = vpop.f32.mrb[109].mxu1  ;;  %v9675_v29 = vpop.f32.mrb[141].mxu0  ;;  %v9677_v16 = vmul.bf16 1065369472, %v7216_v27  ;;  %v4757_v55 = vmul.bf16 %v9573_v60, %v4565_v12 }
 0xf52   : > { %7231 = vpow.bf16 %v4703_v31  ;;  %10857 = vst [vmem:[#allocation41_spill] sm:$0xff] %v9673_v53  ;;  %10858 = vst [vmem:[#allocation42_spill] sm:$0xff] %v9675_v29  ;;  %v4759_v23 = vmul.bf16 %v9583_v35, %v4567_v50  ;;  %v9681_v2 = vpop.f32.mrb[110].mxu1  ;;  %v9683_v41 = vpop.f32.mrb[142].mxu0  ;;  %v10861_v61 = vmul.bf16 1056980736, %v9297_v0  ;;  %v4377_v50 = vmul.bf16 %v4345_v8, %v9512_v22 }
 0xf53   : > { %7233 = vrcp.bf16 %v4225_v54  ;;  %10859 = vst [vmem:[#allocation43_spill] sm:$0xff] %v9681_v2  ;;  %10860 = vst [vmem:[#allocation44_spill] sm:$0xff] %v9683_v41  ;;  %v7218_v44 = vpop.eup %7217  ;;  %v10862_v18 = vadd.bf16 1065369472, %v9518_v48  ;;  %v9691_v54 = vpop.f32.mrb[111].mxu1 }
 0xf54   : > { %7235 = vpow.bf16 %v4700_v57  ;;  %10863 = vst [vmem:[#allocation45_spill] sm:$0xff] %v9691_v54  ;;  %v9693_v60 = vpop.f32.mrb[143].mxu0  ;;  %v7220_v35 = vpop.eup %7219  ;;  %v4789_v10 = vsub.bf16 1065369472, %v4757_v55  ;;  %v4791_v12 = vsub.bf16 1065369472, %v4759_v23 }
 0xf55   : > { %v4982_v31 = vmul.bf16 %v10862_v18, %v10861_v61  ;;  %10864 = vst [vmem:[#allocation46_spill] sm:$0xff] %v9693_v60  ;;  %v4315_v5 = vmul.bf16 1065893768, %v9523_v51  ;;  %v9697_v0 = vpop.eup %7221  ;;  %7237 = vrcp.bf16 %v4227_v43  ;;  %v4706_v48 = vmul.bf16 1069105081, %v4643_v17 }
 0xf56   : > { %v10865_v57 = vmul.bf16 1060454197, %v9591_v32  ;;  %v9702_v9 = vmul.bf16 1065369472, %v7218_v44  ;;  %v4853_v27 = vsub.bf16 0, %v4789_v10  ;;  %v4855_v29 = vsub.bf16 0, %v4791_v12 }
 0xf57   : > { %v9705_v23 = vmul.bf16 1065369472, %v7220_v35  ;;  %v10866_v8 = vmul.bf16 1060454197, %v9593_v34  ;;  %v3943_v17 = vadd.f32 %v9561_v46, %v9275_v4  ;;  %v4409_v55 = vadd.bf16 1068908470, %v4377_v50 }
 0xf58   : > { %v4164_v61 = vand.u32 2147450879, %v10865_v57  ;;  %v9714_v57 = vpop.eup %7223  ;;  %v4885_v44 = vsel %vm9650_vm6, %v4853_v27, %v4789_v10  ;;  %v4887_v18 = vsel %vm9656_vm7, %v4855_v29, %v4791_v12  ;;  %v4347_v35 = vadd.bf16 3216687034, %v4315_v5 }
 0xf59   : > { %v9709_v60 = vand.u32 2147450879, %v10866_v8  ;;  %v9720_v32 = vpop.eup %7225  ;;  %v4949_v34 = vadd.bf16 1065369472, %v4885_v44  ;;  %v4951_v8 = vadd.bf16 1065369472, %v4887_v18  ;;  %v3947_v43 = vadd.f32 %v9579_v30, %v9275_v4 }
 0xf5a   : > { %v4196_v36 = vmul.bf16 1051213480, %v4164_v61  ;;  %v4612_v46 = vsub.bf16 0, %v4164_v61  ;;  %v4441_v41 = vmul.bf16 %v4409_v55, %v9512_v22  ;;  %v4379_v15 = vmul.bf16 %v4347_v35, %v9523_v51 }
 0xf5b   : > { %v9724_v54 = vpop.eup %7227  ;;  %v4312_v26 = vmul.bf16 1065893768, %v9470_v3  ;;  %v10867_v5 = vmul.bf16 1056980736, %v9299_v62  ;;  %v10868_v10 = vmul.bf16 1056980736, %v9301_v47  ;;  %7239 = vpow.bf16 %v4706_v48 }
 0xf5c   : > { %v9729_v29 = vpop.eup %7229  ;;  %v10869_v50 = vmul.bf16 1060454197, %v9595_v63  ;;  %v4314_v18 = vmul.bf16 1065893768, %v9473_v7  ;;  %v4473_v55 = vadd.bf16 3197288082, %v4441_v41  ;;  %v4056_v62 = vadd.f32 %v9563_v6, %v9279_v20 }
 0xf5d   : > { %v4981_v27 = vmul.bf16 %v4949_v34, %v10867_v5  ;;  %v4983_v12 = vmul.bf16 %v4951_v8, %v10868_v10  ;;  %v9740_v44 = vpop.eup %7231  ;;  %v4411_v35 = vadd.bf16 1068908470, %v4379_v15  ;;  %v4344_v2 = vadd.bf16 3216687034, %v4312_v26 }
 0xf5e   : > { %v9737_v30 = vand.u32 2147450879, %v10869_v50  ;;  %v7234_v53 = vpop.eup %7233  ;;  %v4346_v47 = vadd.bf16 3216687034, %v4314_v18  ;;  %v3945_v34 = vadd.f32 %v9569_v1, %v9283_v24  ;;  %v9746_v8 = vpack.c.bf16 %v3947_v43, %v3943_v17 }
 0xf5f   : > { %5307 = vmatprep.mubr.bf16.mxu1 %v4981_v27  ;;  %5404 = vmatprep.mubr.bf16.mxu0 %v4983_v12  ;;  %v9748_v5 = vpop.eup %7235  ;;  %v4644_v41 = vmul.bf16 %v4612_v46, %v4164_v61  ;;  %v4198_v48 = vmul.bf16 1051213480, %v9709_v60  ;;  %v4505_v15 = vmul.bf16 %v4473_v55, %v9512_v22  ;;  %v4443_v26 = vmul.bf16 %v4411_v35, %v9523_v51 }
 0xf60   : > { %10870 = vst [vmem:[#allocation47_spill] sm:$0xff] %v9746_v8  ;;  %5308 = vmatmul.mubr.bf16.vlgmr.msra.gmra.mrb[112].mxu1 %v9646_v56  ;;  %5405 = vmatmul.mubr.bf16.vlgmr.msra.gmra.mrb[144].mxu0 %v4982_v31  ;;  %v4228_v27 = vadd.bf16 1065369472, %v4196_v36  ;;  %v4197_v6 = vmul.bf16 1051213480, %v9737_v30  ;;  %v4376_v10 = vmul.bf16 %v4344_v2, %v9470_v3  ;;  %v4378_v1 = vmul.bf16 %v4346_v47, %v9473_v7  ;;  %v7238_v43 = vpop.eup %7237 }
 0xf61   : > { %6701 = vmatpush3.bf16.msra.mxu1 %v9179_v13  ;;  %v4614_v56 = vsub.bf16 0, %v9709_v60  ;;  %v4537_v31 = vadd.bf16 1048723074, %v4505_v15  ;;  %v4475_v61 = vadd.bf16 3197288082, %v4443_v26  ;;  %v4060_v17 = vadd.f32 %v9581_v14, %v9279_v20 }
 0xf62   : > { %6694 = vmatprep.subr.bf16.mxu1 %v9188_v45  ;;  %v10871_v36 = vmul.bf16 1060454197, %v9335_v33  ;;  %v10743_v2 = vmul.bf16 1060454197, %v9605_v11  ;;  %v4408_v12 = vadd.bf16 1068908470, %v4376_v10  ;;  %v3949_v50 = vadd.f32 %v9587_v49, %v9283_v24 }
 0xf63   : > { %v4410_v13 = vadd.bf16 1068908470, %v4378_v1  ;;  %v4709_v18 = vmul.bf16 1069105081, %v4644_v41  ;;  %v4230_v55 = vadd.bf16 1065369472, %v4198_v48  ;;  %v4569_v35 = vmul.bf16 %v4537_v31, %v9512_v22 }
 0xf64   : > { %vm9764_vm8 = vcmp.lt.bf16.partialorder %v10871_v36, 0  ;;  %v4507_v14 = vmul.bf16 %v4475_v61, %v9523_v51  ;;  %v4229_v45 = vadd.bf16 1065369472, %v4197_v6  ;;  %v4613_v47 = vsub.bf16 0, %v9737_v30  ;;  %v7346_v10 = vld [vmem:[%s10666_s10 + $0x88] sm:$0xff]   ;;  %v7347_v6 = vld [vmem:[%s10666_s10 + $0xd0] sm:$0xff]  }
 0xf65   : > { %v4440_v15 = vmul.bf16 %v4408_v12, %v9470_v3  ;;  %v4442_v26 = vmul.bf16 %v4410_v13, %v9473_v7  ;;  %6702 = vmatpush3.bf16.msra.mxu1 %v7346_v10  ;;  %v4761_v49 = vmul.bf16 %v9620_v52, %v4569_v35  ;;  %v9780_v48 = vpack.c.bf16 %v4060_v17, %v4056_v62  ;;  %v10875_v1 = vld [vmem:[#allocation22_spill] sm:$0xff]  ;;  %v10879_v10 = vld [vmem:[#allocation4_spill] sm:$0xff] }
 0xf66   : > { %v4539_v41 = vadd.bf16 1048723074, %v4507_v14  ;;  %v9782_v22 = vpack.c.bf16 %v3949_v50, %v3945_v34  ;;  %6695 = vmatprep.subr.bf16.mxu1 %v7347_v6  ;;  %v10876_v31 = vmul.bf16 1060454197, %v10875_v1  ;;  %7241 = vrcp.bf16 %v4228_v27  ;;  %v9800_v50 = vpop.eup %7239 }
 0xf67   : > { %10874 = vst [vmem:[#allocation48_spill] sm:$0xff] %v9780_v48  ;;  %v4167_v52 = vand.u32 2147450879, %v10743_v2  ;;  %v4472_v36 = vadd.bf16 3197288082, %v4440_v15  ;;  %7243 = vrcp.bf16 %v4230_v55  ;;  %v4646_v35 = vmul.bf16 %v4614_v56, %v9709_v60  ;;  %v7348_v15 = vld [vmem:[%s10666_s10 + $0x90] sm:$0xff]  }
 0xf68   : > { %vm9789_vm9 = vcmp.lt.bf16.partialorder %v10876_v31, 0  ;;  %v4474_v62 = vadd.bf16 3197288082, %v4442_v26  ;;  %v9795_v17 = vmul.bf16 1065369472, %v7234_v53  ;;  %v4571_v13 = vmul.bf16 %v4539_v41, %v9523_v51  ;;  %v7349_v55 = vld [vmem:[%s10666_s10 + $0xd8] sm:$0xff]  }
 0xf69   : > { %v9797_v34 = vmul.bf16 1065369472, %v7238_v43  ;;  %v4793_v12 = vsub.bf16 1065369472, %v4761_v49  ;;  %v4504_v14 = vmul.bf16 %v4472_v36, %v9470_v3  ;;  %6703 = vmatpush3.bf16.msra.mxu1 %v7348_v15  ;;  %7245 = vpow.bf16 %v4709_v18  ;;  %v10883_v18 = vld [vmem:[#allocation21_spill] sm:$0xff] }
 0xf6a   : > { %v4506_v27 = vmul.bf16 %v4474_v62, %v9473_v7  ;;  %v4645_v53 = vmul.bf16 %v4613_v47, %v9737_v30  ;;  %v4763_v51 = vmul.bf16 %v9634_v58, %v4571_v13  ;;  %6696 = vmatprep.subr.bf16.mxu1 %v7349_v55  ;;  %7247 = vrcp.bf16 %v4229_v45 }
 0xf6b   : > { %v4857_v43 = vsub.bf16 0, %v4793_v12  ;;  %v4199_v60 = vmul.bf16 1051213480, %v4167_v52  ;;  %v4536_v56 = vadd.bf16 1048723074, %v4504_v14  ;;  %v4615_v58 = vsub.bf16 0, %v4167_v52 }
 0xf6c   : > { %v4538_v26 = vadd.bf16 1048723074, %v4506_v27  ;;  %v10880_v49 = vmul.bf16 1060454197, %v10879_v10  ;;  %v10884_v30 = vmul.bf16 1060454197, %v10883_v18 }
 0xf6d   : > { %v4889_v6 = vsel %vm9764_vm8, %v4857_v43, %v4793_v12  ;;  %v4795_v45 = vsub.bf16 1065369472, %v4763_v51  ;;  %v10741_v31 = vmul.bf16 1060454197, %v9746_v8  ;;  %v4715_v36 = vmul.bf16 1069105081, %v4646_v35 }
 0xf6e   : > { %vm9815_vm10 = vcmp.lt.bf16.partialorder %v10880_v49, 0  ;;  %vm9821_vm11 = vcmp.lt.bf16.partialorder %v10884_v30, 0  ;;  %v4953_v62 = vadd.bf16 1065369472, %v4889_v6  ;;  %v4568_v13 = vmul.bf16 %v4536_v56, %v9470_v3  ;;  %v7350_v27 = vld [vmem:[%s10666_s10 + $0x98] sm:$0xff]   ;;  %v10887_v12 = vld [vmem:[#allocation32_spill] sm:$0xff] }
 0xf6f   : > { %v4570_v14 = vmul.bf16 %v4538_v26, %v9473_v7  ;;  %6704 = vmatpush3.bf16.msra.mxu1 %v7350_v27  ;;  %v4859_v46 = vsub.bf16 0, %v4795_v45  ;;  %v4058_v43 = vadd.f32 %v10887_v12, %v9285_v25  ;;  %v7351_v35 = vld [vmem:[%s10666_s10 + $0xe0] sm:$0xff]   ;;  %v4712_v3 = vmul.bf16 1069105081, %v4645_v53 }
 0xf70   : > { %6697 = vmatprep.subr.bf16.mxu1 %v7351_v35  ;;  %v10888_v7 = vmul.bf16 1056980736, %v9335_v33  ;;  %v4760_v56 = vmul.bf16 %v9601_v19, %v4568_v13  ;;  %v4231_v49 = vadd.bf16 1065369472, %v4199_v60  ;;  %v4647_v30 = vmul.bf16 %v4615_v58, %v4167_v52  ;;  %v7352_v19 = vld [vmem:[%s10666_s10 + $0xa0] sm:$0xff]   ;;  %v7353_v60 = vld [vmem:[%s10666_s10 + $0xe8] sm:$0xff]  }
 0xf71   : > { %v4762_v26 = vmul.bf16 %v9615_v40, %v4570_v14  ;;  %v4891_v6 = vsel %vm9789_vm9, %v4859_v46, %v4795_v45  ;;  %v4168_v27 = vand.u32 2147450879, %v10741_v31  ;;  %v4062_v33 = vadd.f32 %v9589_v59, %v9285_v25  ;;  %v7242_v40 = vpop.eup %7241 }
 0xf72   : > { %v4985_v51 = vmul.bf16 %v4953_v62, %v10888_v7  ;;  %v4955_v12 = vadd.bf16 1065369472, %v4891_v6  ;;  %v4792_v55 = vsub.bf16 1065369472, %v4760_v56  ;;  %7249 = vpow.bf16 %v4715_v36  ;;  %v7244_v14 = vpop.eup %7243 }
 0xf73   : > { %v4794_v35 = vsub.bf16 1065369472, %v4762_v26  ;;  %6705 = vmatpush3.bf16.msra.mxu1 %v7352_v19  ;;  %v10740_v61 = vmul.bf16 1060454197, %v9780_v48  ;;  %v10742_v52 = vmul.bf16 1060454197, %v9782_v22  ;;  %v9861_v13 = vpack.c.bf16 %v4062_v33, %v4058_v43 }
 0xf74   : > { %5315 = vmatprep.mubr.bf16.mxu1 %v4985_v51  ;;  %v4317_v53 = vmul.bf16 1065893768, %v9660_v39  ;;  %6698 = vmatprep.subr.bf16.mxu1 %v7353_v60  ;;  %v10889_v59 = vmul.bf16 1056980736, %v10875_v1  ;;  %v4856_v45 = vsub.bf16 0, %v4792_v55  ;;  %7251 = vpow.bf16 %v4712_v3  ;;  %v9864_v51 = vpop.eup %7245  ;;  %v7354_v43 = vld [vmem:[%s10666_s10 + $0xa8] sm:$0xff]  }
 0xf75   : > { %v4858_v62 = vsub.bf16 0, %v4794_v35  ;;  %v4200_v36 = vmul.bf16 1051213480, %v4168_v27  ;;  %v4319_v7 = vmul.bf16 1065893768, %v9677_v16  ;;  %10890 = vst [vmem:[#allocation22_spill] sm:$0xff] %v9864_v51  ;;  %v7248_v3 = vpop.eup %7247  ;;  %7253 = vrcp.bf16 %v4231_v49 }
 0xf76   : > { %v4987_v58 = vmul.bf16 %v4955_v12, %v10889_v59  ;;  %v4349_v46 = vadd.bf16 3216687034, %v4317_v53  ;;  %v9866_v56 = vmul.bf16 1065369472, %v7242_v40  ;;  %v4718_v26 = vmul.bf16 1069105081, %v4647_v30 }
 0xf77   : > { %v4888_v1 = vsel %vm9815_vm10, %v4856_v45, %v4792_v55  ;;  %v4890_v6 = vsel %vm9821_vm11, %v4858_v62, %v4794_v35  ;;  %6706 = vmatpush3.bf16.msra.mxu1 %v7354_v43  ;;  %v4616_v19 = vsub.bf16 0, %v4168_v27  ;;  %v7355_v30 = vld [vmem:[%s10666_s10 + $0xf0] sm:$0xff]   ;;  %v9878_v41 = vmul.bf16 1065369472, %v7244_v14 }
 0xf78   : > { %5412 = vmatprep.mubr.bf16.mxu0 %v4987_v58  ;;  %v4952_v12 = vadd.bf16 1065369472, %v4888_v1  ;;  %v4954_v33 = vadd.bf16 1065369472, %v4890_v6  ;;  %6699 = vmatprep.subr.bf16.mxu1 %v7355_v30  ;;  %v9882_v47 = vand.u32 2147450879, %v10740_v61  ;;  %v4381_v49 = vmul.bf16 %v4349_v46, %v9660_v39 }
 0xf79   : > { %v9886_v55 = vand.u32 2147450879, %v10742_v52  ;;  %v10891_v35 = vmul.bf16 1056980736, %v10879_v10  ;;  %v10892_v53 = vmul.bf16 1056980736, %v10883_v18  ;;  %7255 = vpow.bf16 %v4718_v26 }
 0xf7a   : > { %v4232_v59 = vadd.bf16 1065369472, %v4200_v36  ;;  %v4351_v58 = vadd.bf16 3216687034, %v4319_v7  ;;  %v9893_v45 = vmul.bf16 1065369472, %v7248_v3  ;;  %v9899_v10 = vmul.bf16 %v4616_v19, %v4168_v27 }
 0xf7b   : > { %v4984_v40 = vmul.bf16 %v4952_v12, %v10891_v35  ;;  %v4986_v60 = vmul.bf16 %v4954_v33, %v10892_v53  ;;  %v4413_v14 = vadd.bf16 1068908470, %v4381_v49  ;;  %v7356_v1 = vld [vmem:[%s10666_s10 + $0xb0] sm:$0xff]   ;;  %v10893_v46 = vld [vmem:[#allocation31_spill] sm:$0xff]  ;;  %v4318_v7 = vmul.bf16 1065893768, %v9626_v37 }
 0xf7c   : > { %6707 = vmatpush3.bf16.msra.mxu1 %v7356_v1  ;;  %v4383_v18 = vmul.bf16 %v4351_v58, %v9677_v16  ;;  %v4316_v36 = vmul.bf16 1065893768, %v10893_v46  ;;  %v4202_v26 = vmul.bf16 1051213480, %v9882_v47  ;;  %v4618_v6 = vsub.bf16 0, %v9882_v47  ;;  %v7357_v12 = vld [vmem:[%s10666_s10 + $0xf8] sm:$0xff]  }
 0xf7d   : > { %5316 = vmatmul.mubr.bf16.gmra.mrb[116].mxu1 %v4984_v40  ;;  %5413 = vmatmul.mubr.bf16.gmra.mrb[148].mxu0 %v4986_v60  ;;  %v4201_v43 = vmul.bf16 1051213480, %v9886_v55  ;;  %v4445_v3 = vmul.bf16 %v4413_v14, %v9660_v39  ;;  %7257 = vrcp.bf16 %v4232_v59  ;;  %v9912_v30 = vpop.eup %7249  ;;  %v10895_v35 = vld [vmem:[#allocation35_spill] sm:$0xff]  ;;  %v10896_v53 = vld [vmem:[#allocation36_spill] sm:$0xff]  ;;  %v4350_v58 = vadd.bf16 3216687034, %v4318_v7 }
 0xf7e   : > { %6700 = vmatprep.subr.bf16.mxu1 %v7357_v12  ;;  %v4415_v33 = vadd.bf16 1068908470, %v4383_v18  ;;  %v4348_v19 = vadd.bf16 3216687034, %v4316_v36  ;;  %10894 = vst [vmem:[#allocation4_spill] sm:$0xff] %v9912_v30  ;;  %v3953_v40 = vadd.f32 %v10895_v35, %v9275_v4  ;;  %v4066_v60 = vadd.f32 %v10896_v53, %v9279_v20  ;;  %v7358_v14 = vld [vmem:[%s10666_s10 + $0xb8] sm:$0xff]  }
 0xf7f   : > { %v4477_v49 = vadd.bf16 3197288082, %v4445_v3  ;;  %v3957_v18 = vadd.f32 %v9630_v42, %v9275_v4  ;;  %v10897_v36 = vld [vmem:[#allocation39_spill] sm:$0xff]  ;;  %v9927_v12 = vpop.eup %7251  ;;  %v4382_v7 = vmul.bf16 %v4350_v58, %v9626_v37  ;;  %v10898_v53 = vld [vmem:[#allocation37_spill] sm:$0xff] }
 0xf80   : > { %6708 = vmatpush3.bf16.msra.mxu1 %v7358_v14  ;;  %v4447_v59 = vmul.bf16 %v4415_v33, %v9677_v16  ;;  %v4380_v1 = vmul.bf16 %v4348_v19, %v10893_v46  ;;  %v4070_v3 = vadd.f32 %v10897_v36, %v9279_v20  ;;  %v3955_v62 = vadd.f32 %v10898_v53, %v9283_v24  ;;  %v10899_v14 = vld [vmem:[#allocation40_spill] sm:$0xff]  ;;  %v7254_v31 = vpop.eup %7253  ;;  %v10901_v58 = vld [vmem:[#allocation25_spill] sm:$0xff] }
 0xf81   : > { %v4509_v35 = vmul.bf16 %v4477_v49, %v9660_v39  ;;  %v3959_v33 = vadd.f32 %v10899_v14, %v9283_v24  ;;  %v9935_v15 = vpack.c.bf16 %v3957_v18, %v3953_v40  ;;  %v4414_v52 = vadd.bf16 1068908470, %v4382_v7 }
 0xf82   : > { %v4479_v61 = vadd.bf16 3197288082, %v4447_v59  ;;  %v4412_v19 = vadd.bf16 1068908470, %v4380_v1  ;;  %v9937_v42 = vpack.c.bf16 %v4070_v3, %v4066_v60  ;;  %v4072_v49 = vadd.f32 %v9664_v28, %v9285_v25  ;;  %v10905_v1 = vld [vmem:[#allocation38_spill] sm:$0xff] }
 0xf83   : > { %v4541_v36 = vadd.bf16 1048723074, %v4509_v35  ;;  %v9939_v2 = vpack.c.bf16 %v3959_v33, %v3955_v62  ;;  %v10902_v27 = vmul.bf16 1060454197, %v10901_v58  ;;  %v4234_v59 = vadd.bf16 1065369472, %v4202_v26 }
 0xf84   : > { %10900 = vst [vmem:[#allocation21_spill] sm:$0xff] %v9937_v42  ;;  %v4511_v40 = vmul.bf16 %v4479_v61, %v9677_v16  ;;  %v4444_v60 = vmul.bf16 %v4412_v19, %v10893_v46  ;;  %v4068_v18 = vadd.f32 %v10905_v1, %v9285_v25  ;;  %v4617_v62 = vsub.bf16 0, %v9886_v55  ;;  %v10907_v61 = vld [vmem:[#allocation26_spill] sm:$0xff] }
 0xf85   : > { %vm9945_vm12 = vcmp.lt.bf16.partialorder %v10902_v27, 0  ;;  %v4573_v3 = vmul.bf16 %v4541_v36, %v9660_v39  ;;  %v4446_v28 = vmul.bf16 %v4414_v52, %v9626_v37  ;;  %v10746_v35 = vmul.bf16 1060454197, %v9937_v42  ;;  %v9957_v27 = vpop.eup %7255 }
 0xf86   : > { %10906 = vst [vmem:[#allocation32_spill] sm:$0xff] %v9957_v27  ;;  %v4233_v7 = vadd.bf16 1065369472, %v4201_v43  ;;  %v4543_v14 = vadd.bf16 1048723074, %v4511_v40  ;;  %v9959_v33 = vpack.c.bf16 %v4072_v49, %v4068_v18  ;;  %7259 = vrcp.bf16 %v4234_v59 }
 0xf87   : > { %v4476_v26 = vadd.bf16 3197288082, %v4444_v60  ;;  %v10908_v19 = vmul.bf16 1060454197, %v10907_v61  ;;  %v10911_v1 = vmul.bf16 1060454197, %v9861_v13  ;;  %v4765_v52 = vmul.bf16 %v9720_v32, %v4573_v3 }
 0xf88   : > { %v4478_v36 = vadd.bf16 3197288082, %v4446_v28  ;;  %v9972_v30 = vand.u32 2147450879, %v10746_v35  ;;  %v4575_v49 = vmul.bf16 %v4543_v14, %v9677_v16  ;;  %v7258_v60 = vpop.eup %7257  ;;  %v4650_v18 = vmul.bf16 %v4618_v6, %v9882_v47  ;;  %v10912_v35 = vld [vmem:[#allocation23_spill] sm:$0xff] }
 0xf89   : > { %vm9963_vm13 = vcmp.lt.bf16.partialorder %v10908_v19, 0  ;;  %v4171_v39 = vand.u32 2147450879, %v10911_v1  ;;  %v4508_v40 = vmul.bf16 %v4476_v26, %v10893_v46  ;;  %v4797_v19 = vsub.bf16 1065369472, %v4765_v52  ;;  %v10916_v52 = vld [vmem:[#allocation24_spill] sm:$0xff] }
 0xf8a   : > { %v4510_v1 = vmul.bf16 %v4478_v36, %v9626_v37  ;;  %v4206_v32 = vmul.bf16 1051213480, %v9972_v30  ;;  %v4721_v3 = vmul.bf16 1069105081, %v9899_v10  ;;  %7261 = vrcp.bf16 %v4233_v7 }
 0xf8b   : > { %v4767_v28 = vmul.bf16 %v9724_v54, %v4575_v49  ;;  %v4540_v59 = vadd.bf16 1048723074, %v4508_v40  ;;  %v10913_v43 = vmul.bf16 1060454197, %v10912_v35  ;;  %v4649_v14 = vmul.bf16 %v4617_v62, %v9886_v55 }
 0xf8c   : > { %v4619_v47 = vsub.bf16 0, %v4171_v39  ;;  %v4861_v6 = vsub.bf16 0, %v4797_v19  ;;  %v4542_v26 = vadd.bf16 1048723074, %v4510_v1  ;;  %v10917_v36 = vmul.bf16 1060454197, %v10916_v52 }
 0xf8d   : > { %vm9984_vm14 = vcmp.lt.bf16.partialorder %v10913_v43, 0  ;;  %v9995_v10 = vmul.bf16 1065369472, %v7254_v31  ;;  %v4799_v54 = vsub.bf16 1065369472, %v4767_v28  ;;  %v4572_v7 = vmul.bf16 %v4540_v59, %v10893_v46 }
 0xf8e   : > { %vm9991_vm15 = vcmp.lt.bf16.partialorder %v10917_v36, 0  ;;  %v10757_v43 = vmul.bf16 1060454197, %v9935_v15  ;;  %v4727_v49 = vmul.bf16 1069105081, %v4650_v18  ;;  %v4893_v55 = vsel %vm9945_vm12, %v4861_v6, %v4797_v19 }
 0xf8f   : > { %v4574_v62 = vmul.bf16 %v4542_v26, %v9626_v37  ;;  %v4238_v40 = vadd.bf16 1065369472, %v4206_v32  ;;  %v4203_v1 = vmul.bf16 1051213480, %v4171_v39  ;;  %v4957_v48 = vadd.bf16 1065369472, %v4893_v55 }
 0xf90   : > { %v4863_v36 = vsub.bf16 0, %v4799_v54  ;;  %v4764_v51 = vmul.bf16 %v9697_v0, %v4572_v7  ;;  %v4724_v27 = vmul.bf16 1069105081, %v4649_v14  ;;  %v4651_v31 = vmul.bf16 %v4619_v47, %v4171_v39 }
 0xf91   : > { %v4766_v28 = vmul.bf16 %v9714_v57, %v4574_v62  ;;  %7263 = vrcp.bf16 %v4238_v40  ;;  %v10920_v46 = vmul.bf16 1056980736, %v10901_v58  ;;  %v4172_v37 = vand.u32 2147450879, %v10757_v43  ;;  %v7260_v58 = vpop.eup %7259 }
 0xf92   : > { %v4895_v53 = vsel %vm9963_vm13, %v4863_v36, %v4799_v54  ;;  %v4796_v18 = vsub.bf16 1065369472, %v4764_v51  ;;  %7265 = vpow.bf16 %v4721_v3  ;;  %v10011_v14 = vmul.bf16 1065369472, %v7258_v60 }
 0xf93   : > { %v4989_v59 = vmul.bf16 %v4957_v48, %v10920_v46  ;;  %v4959_v32 = vadd.bf16 1065369472, %v4895_v53  ;;  %v4798_v0 = vsub.bf16 1065369472, %v4766_v28  ;;  %7267 = vpow.bf16 %v4727_v49 }
 0xf94   : > { %v4235_v57 = vadd.bf16 1065369472, %v4203_v1  ;;  %v4860_v39 = vsub.bf16 0, %v4796_v18  ;;  %v4730_v48 = vmul.bf16 1069105081, %v4651_v31  ;;  %7269 = vpow.bf16 %v4724_v27 }
 0xf95   : > { %5323 = vmatprep.mubr.bf16.mxu1 %v4989_v59  ;;  %v10921_v8 = vmul.bf16 1056980736, %v10907_v61  ;;  %v4862_v51 = vsub.bf16 0, %v4798_v0  ;;  %v10753_v6 = vmul.bf16 1060454197, %v9939_v2  ;;  %v7262_v54 = vpop.eup %7261  ;;  %v4620_v55 = vsub.bf16 0, %v4172_v37 }
 0xf96   : > { %v4892_v3 = vsel %vm9984_vm14, %v4860_v39, %v4796_v18  ;;  %v4204_v26 = vmul.bf16 1051213480, %v4172_v37  ;;  %v10751_v60 = vmul.bf16 1060454197, %v9959_v33  ;;  %v4622_v61 = vsub.bf16 0, %v9972_v30 }
 0xf97   : > { %v4991_v47 = vmul.bf16 %v4959_v32, %v10921_v8  ;;  %v4956_v7 = vadd.bf16 1065369472, %v4892_v3  ;;  %v4894_v49 = vsel %vm9991_vm15, %v4862_v51, %v4798_v0  ;;  %v10022_v62 = vmul.bf16 1065369472, %v7260_v58 }
 0xf98   : > { %7271 = vrcp.bf16 %v4235_v57  ;;  %v4958_v40 = vadd.bf16 1065369472, %v4894_v49  ;;  %v10922_v16 = vmul.bf16 1056980736, %v10912_v35  ;;  %v10029_v36 = vand.u32 2147450879, %v10753_v6 }
 0xf99   : > { %5420 = vmatprep.mubr.bf16.mxu0 %v4991_v47  ;;  %7273 = vpow.bf16 %v4730_v48  ;;  %v4321_v42 = vmul.bf16 1065893768, %v9795_v17  ;;  %v10032_v31 = vmul.bf16 1065369472, %v7262_v54  ;;  %v10923_v28 = vmul.bf16 1056980736, %v10916_v52 }
 0xf9a   : > { %v4988_v1 = vmul.bf16 %v4956_v7, %v10922_v16  ;;  %v4236_v59 = vadd.bf16 1065369472, %v4204_v26  ;;  %v10038_v53 = vand.u32 2147450879, %v10751_v60  ;;  %v4652_v18 = vmul.bf16 %v4620_v55, %v4172_v37  ;;  %v10924_v54 = vld [vmem:[#allocation41_spill] sm:$0xff] }
 0xf9b   : > { %v4990_v46 = vmul.bf16 %v4958_v40, %v10923_v28  ;;  %v10041_v35 = vmul.bf16 %v4622_v61, %v9972_v30  ;;  %v4353_v32 = vadd.bf16 3216687034, %v4321_v42  ;;  %v4323_v0 = vmul.bf16 1065893768, %v9797_v34  ;;  %v10925_v40 = vld [vmem:[#allocation43_spill] sm:$0xff]  ;;  %v10926_v28 = vld [vmem:[#allocation44_spill] sm:$0xff] }
 0xf9c   : > { %5324 = vmatmul.mubr.bf16.gmra.mrb[120].mxu1 %v4988_v1  ;;  %v7264_v57 = vpop.eup %7263  ;;  %v3963_v39 = vadd.f32 %v9668_v21, %v9275_v4  ;;  %v4076_v52 = vadd.f32 %v9670_v38, %v9279_v20  ;;  %v4320_v58 = vmul.bf16 1065893768, %v9702_v9  ;;  %v4322_v48 = vmul.bf16 1065893768, %v9705_v23 }
 0xf9d   : > { %5421 = vmatmul.mubr.bf16.gmra.mrb[152].mxu0 %v4990_v46  ;;  %v10050_v8 = vmul.bf16 1065369472, %v7264_v57  ;;  %v4205_v30 = vmul.bf16 1051213480, %v10029_v36  ;;  %v4385_v37 = vmul.bf16 %v4353_v32, %v9795_v17  ;;  %v4355_v47 = vadd.bf16 3216687034, %v4323_v0  ;;  %v10054_v51 = vpop.eup %7265 }
 0xf9e   : > { %v4207_v3 = vmul.bf16 1051213480, %v10038_v53  ;;  %v4352_v26 = vadd.bf16 3216687034, %v4320_v58  ;;  %v4354_v21 = vadd.bf16 3216687034, %v4322_v48  ;;  %v3965_v38 = vadd.f32 %v10924_v54, %v9283_v24  ;;  %v10059_v7 = vpop.eup %7267 }
 0xf9f   : > { %v4334_v49 = vmul.bf16 1065893768, %v10050_v8  ;;  %v4417_v55 = vadd.bf16 1068908470, %v4385_v37  ;;  %v4387_v61 = vmul.bf16 %v4355_v47, %v9797_v34  ;;  %v3967_v16 = vadd.f32 %v10925_v40, %v9275_v4  ;;  %v10927_v32 = vld [vmem:[#allocation45_spill] sm:$0xff]  ;;  %v10071_v57 = vpop.eup %7269 }
 0xfa0   : > { %v4384_v1 = vmul.bf16 %v4352_v26, %v9702_v9  ;;  %v4386_v42 = vmul.bf16 %v4354_v21, %v9705_v23  ;;  %v4080_v46 = vadd.f32 %v10926_v28, %v9279_v20  ;;  %v3969_v0 = vadd.f32 %v10927_v32, %v9283_v24 }
 0xfa1   : > { %v4366_v58 = vadd.bf16 3216687034, %v4334_v49  ;;  %v4449_v48 = vmul.bf16 %v4417_v55, %v9795_v17  ;;  %v4419_v37 = vadd.bf16 1068908470, %v4387_v61  ;;  %v10074_v47 = vpack.c.bf16 %v3967_v16, %v3963_v39 }
 0xfa2   : > { %v4416_v54 = vadd.bf16 1068908470, %v4384_v1  ;;  %v4418_v4 = vadd.bf16 1068908470, %v4386_v42  ;;  %v10076_v40 = vpack.c.bf16 %v4080_v46, %v4076_v52  ;;  %v10078_v26 = vpack.c.bf16 %v3969_v0, %v3965_v38 }
 0xfa3   : > { %v7272_v21 = vpop.eup %7271  ;;  %v4733_v60 = vmul.bf16 1069105081, %v4652_v18  ;;  %v4481_v20 = vadd.bf16 3197288082, %v4449_v48  ;;  %v4451_v28 = vmul.bf16 %v4419_v37, %v9797_v34  ;;  %v10752_v24 = vmul.bf16 1060454197, %v10074_v47 }
 0xfa4   : > { %10928 = vst [vmem:[#allocation31_spill] sm:$0xff] %v10076_v40  ;;  %v10082_v32 = vpop.eup %7273  ;;  %v4739_v49 = vmul.bf16 1069105081, %v10041_v35  ;;  %v4237_v55 = vadd.bf16 1065369472, %v4205_v30  ;;  %v4448_v39 = vmul.bf16 %v4416_v54, %v9702_v9  ;;  %v4450_v61 = vmul.bf16 %v4418_v4, %v9705_v23  ;;  %v10929_v48 = vld [vmem:[#allocation29_spill] sm:$0xff] }
 0xfa5   : > { %v4398_v52 = vmul.bf16 %v4366_v58, %v10050_v8  ;;  %v4513_v38 = vmul.bf16 %v4481_v20, %v9795_v17  ;;  %v4483_v16 = vadd.bf16 3197288082, %v4451_v28  ;;  %v4176_v18 = vand.u32 2147450879, %v10752_v24 }
 0xfa6   : > { %7275 = vrcp.bf16 %v4236_v59  ;;  %v4239_v1 = vadd.bf16 1065369472, %v4207_v3  ;;  %v4480_v42 = vadd.bf16 3197288082, %v4448_v39  ;;  %v4482_v46 = vadd.bf16 3197288082, %v4450_v61 }
 0xfa7   : > { %7277 = vpow.bf16 %v4733_v60  ;;  %v4621_v35 = vsub.bf16 0, %v10029_v36  ;;  %v4545_v30 = vadd.bf16 1048723074, %v4513_v38  ;;  %v4515_v0 = vmul.bf16 %v4483_v16, %v9797_v34  ;;  %v10933_v39 = vld [vmem:[#allocation30_spill] sm:$0xff] }
 0xfa8   : > { %v10930_v37 = vmul.bf16 1060454197, %v10929_v48  ;;  %v4512_v54 = vmul.bf16 %v4480_v42, %v9702_v9  ;;  %v4514_v4 = vmul.bf16 %v4482_v46, %v9705_v23  ;;  %v4208_v59 = vmul.bf16 1051213480, %v4176_v18  ;;  %v10937_v46 = vld [vmem:[#allocation27_spill] sm:$0xff] }
 0xfa9   : > { %v10754_v3 = vmul.bf16 1060454197, %v10076_v40  ;;  %v4430_v20 = vadd.bf16 1068908470, %v4398_v52  ;;  %7279 = vrcp.bf16 %v4237_v55  ;;  %v4577_v60 = vmul.bf16 %v4545_v30, %v9795_v17  ;;  %v10941_v55 = vld [vmem:[#allocation28_spill] sm:$0xff]  ;;  %v10967_v40 = vld [vmem:[#allocation22_spill] sm:$0xff] }
 0xfaa   : > { %vm10095_vm0 = vcmp.lt.bf16.partialorder %v10930_v37, 0  ;;  %v4547_v28 = vadd.bf16 1048723074, %v4515_v0  ;;  %v10934_v61 = vmul.bf16 1060454197, %v10933_v39  ;;  %7281 = vrcp.bf16 %v4239_v1 }
 0xfab   : > { %v10109_v16 = vmul.bf16 1065369472, %v7272_v21  ;;  %v4544_v42 = vadd.bf16 1048723074, %v4512_v54  ;;  %v4546_v37 = vadd.bf16 1048723074, %v4514_v4  ;;  %7283 = vpow.bf16 %v4739_v49 }
 0xfac   : > { %vm10105_vm1 = vcmp.lt.bf16.partialorder %v10934_v61, 0  ;;  %v10938_v24 = vmul.bf16 1060454197, %v10937_v46  ;;  %v10942_v17 = vmul.bf16 1060454197, %v10941_v55  ;;  %v4769_v30 = vmul.bf16 %v9748_v5, %v4577_v60 }
 0xfad   : > { %v4579_v21 = vmul.bf16 %v4547_v28, %v9797_v34  ;;  %v4240_v1 = vadd.bf16 1065369472, %v4208_v59  ;;  %v4623_v0 = vsub.bf16 0, %v10038_v53  ;;  %v4576_v54 = vmul.bf16 %v4544_v42, %v9702_v9 }
 0xfae   : > { %vm10113_vm2 = vcmp.lt.bf16.partialorder %v10938_v24, 0  ;;  %vm10119_vm3 = vcmp.lt.bf16.partialorder %v10942_v17, 0  ;;  %v4578_v24 = vmul.bf16 %v4546_v37, %v9705_v23  ;;  %v10130_v4 = vand.u32 2147450879, %v10754_v3 }
 0xfaf   : > { %v4462_v61 = vmul.bf16 %v4430_v20, %v10050_v8  ;;  %v4653_v17 = vmul.bf16 %v4621_v35, %v10029_v36  ;;  %v4801_v49 = vsub.bf16 1065369472, %v4769_v30  ;;  %v4771_v5 = vmul.bf16 %v9800_v50, %v4579_v21 }
 0xfb0   : > { %v4768_v59 = vmul.bf16 %v9729_v29, %v4576_v54  ;;  %v4770_v60 = vmul.bf16 %v9740_v44, %v4578_v24  ;;  %v4210_v9 = vmul.bf16 1051213480, %v10130_v4  ;;  %7285 = vrcp.bf16 %v4240_v1 }
 0xfb1   : > { %v4865_v23 = vsub.bf16 0, %v4801_v49  ;;  %v4803_v28 = vsub.bf16 1065369472, %v4771_v5  ;;  %v4624_v42 = vsub.bf16 0, %v4176_v18  ;;  %v4655_v37 = vmul.bf16 %v4623_v0, %v10038_v53  ;;  %v7276_v35 = vpop.eup %7275  ;;  %v10945_v5 = vld [vmem:[#allocation46_spill] sm:$0xff] }
 0xfb2   : > { %v4800_v20 = vsub.bf16 1065369472, %v4768_v59  ;;  %v4802_v3 = vsub.bf16 1065369472, %v4770_v60  ;;  %v4242_v36 = vadd.bf16 1065369472, %v4210_v9  ;;  %v10142_v54 = vpop.eup %7277 }
 0xfb3   : > { %v4494_v30 = vadd.bf16 3197288082, %v4462_v61  ;;  %v4736_v50 = vmul.bf16 1069105081, %v4653_v17  ;;  %v4897_v21 = vsel %vm10095_vm0, %v4865_v23, %v4801_v49  ;;  %v4867_v29 = vsub.bf16 0, %v4803_v28 }
 0xfb4   : > { %v4961_v44 = vadd.bf16 1065369472, %v4897_v21  ;;  %v4864_v24 = vsub.bf16 0, %v4800_v20  ;;  %v4866_v34 = vsub.bf16 0, %v4802_v3  ;;  %7287 = vrcp.bf16 %v4242_v36  ;;  %v7280_v17 = vpop.eup %7279 }
 0xfb5   : > { %v4899_v1 = vsel %vm10105_vm1, %v4867_v29, %v4803_v28  ;;  %v4656_v53 = vmul.bf16 %v4624_v42, %v4176_v18  ;;  %v10756_v0 = vmul.bf16 1060454197, %v10078_v26  ;;  %v4082_v61 = vadd.f32 %v10945_v5, %v9285_v25  ;;  %v7282_v23 = vpop.eup %7281  ;;  %v10947_v42 = vld [vmem:[#allocation42_spill] sm:$0xff] }
 0xfb6   : > { %v10946_v58 = vmul.bf16 1056980736, %v10929_v48  ;;  %v4963_v59 = vadd.bf16 1065369472, %v4899_v1  ;;  %v4896_v60 = vsel %vm10113_vm2, %v4864_v24, %v4800_v20  ;;  %v4898_v9 = vsel %vm10119_vm3, %v4866_v34, %v4802_v3  ;;  %v10158_v21 = vpop.eup %7283 }
 0xfb7   : > { %v4526_v38 = vmul.bf16 %v4494_v30, %v10050_v8  ;;  %v4960_v18 = vadd.bf16 1065369472, %v4896_v60  ;;  %v4962_v28 = vadd.bf16 1065369472, %v4898_v9  ;;  %v4078_v36 = vadd.f32 %v10947_v42, %v9285_v25 }
 0xfb8   : > { %v4993_v49 = vmul.bf16 %v4961_v44, %v10946_v58  ;;  %v10160_v29 = vmul.bf16 1065369472, %v7276_v35  ;;  %v4742_v48 = vmul.bf16 1069105081, %v4655_v37  ;;  %v10948_v6 = vmul.bf16 1056980736, %v10933_v39 }
 0xfb9   : > { %v4177_v3 = vand.u32 2147450879, %v10756_v0  ;;  %v10949_v52 = vmul.bf16 1056980736, %v10937_v46  ;;  %v10950_v30 = vmul.bf16 1056980736, %v10941_v55  ;;  %v10170_v25 = vpack.c.bf16 %v4082_v61, %v4078_v36 }
 0xfba   : > { %5331 = vmatprep.mubr.bf16.mxu1 %v4993_v49  ;;  %v4995_v20 = vmul.bf16 %v4963_v59, %v10948_v6  ;;  %v4745_v24 = vmul.bf16 1069105081, %v4656_v53  ;;  %v10172_v1 = vmul.bf16 1065369472, %v7280_v17  ;;  %7289 = vpow.bf16 %v4736_v50 }
 0xfbb   : > { %v4992_v34 = vmul.bf16 %v4960_v18, %v10949_v52  ;;  %v4994_v44 = vmul.bf16 %v4962_v28, %v10950_v30  ;;  %10951 = vst [vmem:[#allocation35_spill] sm:$0xff] %v10170_v25  ;;  %v10174_v37 = vmul.bf16 1065369472, %v7282_v23  ;;  %v4209_v39 = vmul.bf16 1051213480, %v4177_v3  ;;  %v7286_v58 = vpop.eup %7285 }
 0xfbc   : > { %5428 = vmatprep.mubr.bf16.mxu0 %v4995_v20  ;;  %v10176_v35 = vadd.bf16 1048723074, %v4526_v38  ;;  %v4626_v46 = vsub.bf16 0, %v10130_v4  ;;  %v4625_v5 = vsub.bf16 0, %v4177_v3  ;;  %v10755_v55 = vmul.bf16 1060454197, %v10170_v25 }
 0xfbd   : > { %5332 = vmatmul.mubr.bf16.gmra.mrb[124].mxu1 %v4992_v34  ;;  %5429 = vmatmul.mubr.bf16.gmra.mrb[156].mxu0 %v4994_v44  ;;  %7291 = vpow.bf16 %v4742_v48  ;;  %v4241_v53 = vadd.bf16 1065369472, %v4209_v39  ;;  %v4325_v61 = vmul.bf16 1065893768, %v9893_v45  ;;  %v4327_v50 = vmul.bf16 1065893768, %v9995_v10 }
 0xfbe   : > { %7293 = vpow.bf16 %v4745_v24  ;;  %v4657_v17 = vmul.bf16 %v4625_v5, %v4177_v3  ;;  %v4179_v49 = vand.u32 2147450879, %v10755_v55  ;;  %v4324_v59 = vmul.bf16 1065893768, %v9866_v56 }
 0xfbf   : > { %7295 = vrcp.bf16 %v4241_v53  ;;  %v4357_v60 = vadd.bf16 3216687034, %v4325_v61  ;;  %v4359_v9 = vadd.bf16 3216687034, %v4327_v50  ;;  %v4326_v23 = vmul.bf16 1065893768, %v9878_v41  ;;  %v7288_v38 = vpop.eup %7287 }
 0xfc0   : > { %v10186_v18 = vmul.bf16 1065369472, %v7286_v58  ;;  %v10189_v28 = vmul.bf16 %v4626_v46, %v10130_v4  ;;  %v4211_v42 = vmul.bf16 1051213480, %v4179_v49  ;;  %v4627_v36 = vsub.bf16 0, %v4179_v49 }
 0xfc1   : > { %v4748_v48 = vmul.bf16 1069105081, %v4657_v17  ;;  %v4389_v6 = vmul.bf16 %v4357_v60, %v9893_v45  ;;  %v4391_v20 = vmul.bf16 %v4359_v9, %v9995_v10  ;;  %v4356_v3 = vadd.bf16 3216687034, %v4324_v59 }
 0xfc2   : > { %v10193_v52 = vmul.bf16 1065369472, %v7288_v38  ;;  %v4243_v34 = vadd.bf16 1065369472, %v4211_v42  ;;  %v10195_v30 = vmul.bf16 %v4627_v36, %v4179_v49  ;;  %v4358_v44 = vadd.bf16 3216687034, %v4326_v23 }
 0xfc3   : > { %v4421_v24 = vadd.bf16 1068908470, %v4389_v6  ;;  %v4423_v39 = vadd.bf16 1068908470, %v4391_v20  ;;  %v4388_v5 = vmul.bf16 %v4356_v3, %v9866_v56  ;;  %v4329_v4 = vmul.bf16 1065893768, %v10032_v31 }
 0xfc4   : > { %7297 = vrcp.bf16 %v4243_v34  ;;  %v4390_v58 = vmul.bf16 %v4358_v44, %v9878_v41  ;;  %v4331_v53 = vmul.bf16 1065893768, %v10109_v16  ;;  %v4328_v23 = vmul.bf16 1065893768, %v10011_v14 }
 0xfc5   : > { %v4453_v61 = vmul.bf16 %v4421_v24, %v9893_v45  ;;  %v4455_v50 = vmul.bf16 %v4423_v39, %v9995_v10  ;;  %v4420_v17 = vadd.bf16 1068908470, %v4388_v5  ;;  %v4361_v49 = vadd.bf16 3216687034, %v4329_v4  ;;  %v10204_v59 = vpop.eup %7289 }
 0xfc6   : > { %7299 = vpow.bf16 %v4748_v48  ;;  %v4422_v60 = vadd.bf16 1068908470, %v4390_v58  ;;  %v4363_v9 = vadd.bf16 3216687034, %v4331_v53  ;;  %v4360_v44 = vadd.bf16 3216687034, %v4328_v23 }
 0xfc7   : > { %v4485_v38 = vadd.bf16 3197288082, %v4453_v61  ;;  %v4487_v42 = vadd.bf16 3197288082, %v4455_v50  ;;  %v4452_v36 = vmul.bf16 %v4420_v17, %v9866_v56  ;;  %v4393_v6 = vmul.bf16 %v4361_v49, %v10032_v31 }
 0xfc8   : > { %v10209_v20 = vpop.eup %7291  ;;  %v4454_v3 = vmul.bf16 %v4422_v60, %v9878_v41  ;;  %v4395_v34 = vmul.bf16 %v4363_v9, %v10109_v16  ;;  %v4330_v24 = vmul.bf16 1065893768, %v10022_v62  ;;  %v4392_v17 = vmul.bf16 %v4360_v44, %v10011_v14 }
 0xfc9   : > { %v10214_v48 = vpop.eup %7293  ;;  %v4517_v39 = vmul.bf16 %v4485_v38, %v9893_v45  ;;  %v4519_v5 = vmul.bf16 %v4487_v42, %v9995_v10  ;;  %v4484_v4 = vadd.bf16 3197288082, %v4452_v36  ;;  %v4425_v58 = vadd.bf16 1068908470, %v4393_v6 }
 0xfca   : > { %v7296_v53 = vpop.eup %7295  ;;  %v4486_v61 = vadd.bf16 3197288082, %v4454_v3  ;;  %v4427_v50 = vadd.bf16 1068908470, %v4395_v34  ;;  %v4362_v49 = vadd.bf16 3216687034, %v4330_v24 }
 0xfcb   : > { %v10219_v60 = vmul.bf16 1065369472, %v7296_v53  ;;  %v4549_v9 = vadd.bf16 1048723074, %v4517_v39  ;;  %v4551_v23 = vadd.bf16 1048723074, %v4519_v5  ;;  %v4516_v55 = vmul.bf16 %v4484_v4, %v9866_v56 }
 0xfcc   : > { %v10952_v0 = vmul.bf16 1060454197, %v9595_v63  ;;  %v10955_v42 = vmul.bf16 1060454197, %v9605_v11  ;;  %v4518_v6 = vmul.bf16 %v4486_v61, %v9878_v41  ;;  %v4457_v3 = vmul.bf16 %v4425_v58, %v10032_v31  ;;  %v10958_v4 = vld [vmem:[#allocation33_spill] sm:$0xff] }
 0xfcd   : > { %v4459_v34 = vmul.bf16 %v4427_v50, %v10109_v16  ;;  %v4424_v44 = vadd.bf16 1068908470, %v4392_v17  ;;  %v4581_v24 = vmul.bf16 %v4549_v9, %v9893_v45  ;;  %v4548_v39 = vadd.bf16 1048723074, %v4516_v55  ;;  %v10962_v17 = vld [vmem:[#allocation34_spill] sm:$0xff]  ;;  %v10966_v55 = vld [vmem:[#allocation32_spill] sm:$0xff] }
 0xfce   : > { %vm10224_vm4 = vcmp.lt.bf16.partialorder %v10952_v0, 0  ;;  %vm10230_vm5 = vcmp.lt.bf16.partialorder %v10955_v42, 0  ;;  %v4583_v0 = vmul.bf16 %v4551_v23, %v9995_v10  ;;  %v4394_v5 = vmul.bf16 %v4362_v49, %v10022_v62 }
 0xfcf   : > { %v10959_v53 = vmul.bf16 1060454197, %v10958_v4  ;;  %v4550_v43 = vadd.bf16 1048723074, %v4518_v6  ;;  %v4489_v61 = vadd.bf16 3197288082, %v4457_v3  ;;  %v4456_v58 = vmul.bf16 %v4424_v44, %v10011_v14  ;;  %v7298_v50 = vpop.eup %7297 }
 0xfd0   : > { %v4491_v46 = vadd.bf16 3197288082, %v4459_v34  ;;  %v10963_v27 = vmul.bf16 1060454197, %v10962_v17  ;;  %v4773_v10 = vmul.bf16 %v9927_v12, %v4581_v24  ;;  %v4775_v49 = vmul.bf16 %v10966_v55, %v4583_v0  ;;  %v10968_v24 = vld [vmem:[#allocation4_spill] sm:$0xff] }
 0xfd1   : > { %vm10242_vm6 = vcmp.lt.bf16.partialorder %v10959_v53, 0  ;;  %v4580_v9 = vmul.bf16 %v4548_v39, %v9866_v56  ;;  %v4426_v23 = vadd.bf16 1068908470, %v4394_v5  ;;  %v10256_v53 = vmul.bf16 1065369472, %v7298_v50  ;;  %v10261_v44 = vpop.eup %7299 }
 0xfd2   : > { %vm10249_vm7 = vcmp.lt.bf16.partialorder %v10963_v27, 0  ;;  %v4582_v6 = vmul.bf16 %v4550_v43, %v9878_v41  ;;  %v4521_v3 = vmul.bf16 %v4489_v61, %v10032_v31  ;;  %v4523_v34 = vmul.bf16 %v4491_v46, %v10109_v16 }
 0xfd3   : > { %v4805_v27 = vsub.bf16 1065369472, %v4773_v10  ;;  %v4807_v19 = vsub.bf16 1065369472, %v4775_v49  ;;  %v4772_v25 = vmul.bf16 %v10967_v40, %v4580_v9  ;;  %v4488_v12 = vadd.bf16 3197288082, %v4456_v58 }
 0xfd4   : > { %v4774_v0 = vmul.bf16 %v10968_v24, %v4582_v6  ;;  %v4553_v55 = vadd.bf16 1048723074, %v4521_v3  ;;  %v4555_v56 = vadd.bf16 1048723074, %v4523_v34  ;;  %v4458_v39 = vmul.bf16 %v4426_v23, %v10022_v62 }
 0xfd5   : > { %v4869_v5 = vsub.bf16 0, %v4805_v27  ;;  %v4871_v50 = vsub.bf16 0, %v4807_v19  ;;  %v4804_v41 = vsub.bf16 1065369472, %v4772_v25  ;;  %v4520_v43 = vmul.bf16 %v4488_v12, %v10011_v14  ;;  %v10975_v12 = vld [vmem:[#allocation47_spill] sm:$0xff] }
 0xfd6   : > { %v10969_v46 = vmul.bf16 1060454197, %v9782_v22  ;;  %v10972_v40 = vmul.bf16 1060454197, %v9861_v13  ;;  %v4806_v10 = vsub.bf16 1065369472, %v4774_v0  ;;  %v4585_v49 = vmul.bf16 %v4553_v55, %v10032_v31 }
 0xfd7   : > { %v4587_v9 = vmul.bf16 %v4555_v56, %v10109_v16  ;;  %v4490_v25 = vadd.bf16 3197288082, %v4458_v39  ;;  %v4901_v23 = vsel %vm10224_vm4, %v4869_v5, %v4805_v27  ;;  %v4903_v6 = vsel %vm10230_vm5, %v4871_v50, %v4807_v19 }
 0xfd8   : > { %vm10269_vm8 = vcmp.lt.bf16.partialorder %v10969_v46, 0  ;;  %vm10275_vm9 = vcmp.lt.bf16.partialorder %v10972_v40, 0  ;;  %v4868_v3 = vsub.bf16 0, %v4804_v41  ;;  %v4552_v34 = vadd.bf16 1048723074, %v4520_v43 }
 0xfd9   : > { %v10976_v24 = vmul.bf16 1060454197, %v10975_v12  ;;  %v4965_v0 = vadd.bf16 1065369472, %v4901_v23  ;;  %v4967_v40 = vadd.bf16 1065369472, %v4903_v6  ;;  %v4777_v16 = vmul.bf16 %v10071_v57, %v4585_v49 }
 0xfda   : > { %v4870_v31 = vsub.bf16 0, %v4806_v10  ;;  %v4900_v38 = vsel %vm10242_vm6, %v4868_v3, %v4804_v41  ;;  %v4779_v27 = vmul.bf16 %v10082_v32, %v4587_v9  ;;  %v4584_v19 = vmul.bf16 %v4552_v34, %v10011_v14 }
 0xfdb   : > { %vm10287_vm10 = vcmp.lt.bf16.partialorder %v10976_v24, 0  ;;  %v4522_v36 = vmul.bf16 %v4490_v25, %v10022_v62  ;;  %v10979_v55 = vmul.bf16 1056980736, %v9595_v63  ;;  %v10980_v39 = vmul.bf16 1056980736, %v9605_v11  ;;  %v10982_v25 = vld [vmem:[#allocation48_spill] sm:$0xff] }
 0xfdc   : > { %v4964_v50 = vadd.bf16 1065369472, %v4900_v38  ;;  %v4902_v43 = vsel %vm10249_vm7, %v4870_v31, %v4806_v10  ;;  %v4809_v49 = vsub.bf16 1065369472, %v4777_v16  ;;  %v4811_v42 = vsub.bf16 1065369472, %v4779_v27 }
 0xfdd   : > { %v4997_v56 = vmul.bf16 %v4965_v0, %v10979_v55  ;;  %v4999_v5 = vmul.bf16 %v4967_v40, %v10980_v39  ;;  %v4966_v57 = vadd.bf16 1065369472, %v4902_v43  ;;  %v4776_v41 = vmul.bf16 %v10054_v51, %v4584_v19 }
 0xfde   : > { %v10981_v14 = vmul.bf16 1056980736, %v10958_v4  ;;  %v4554_v9 = vadd.bf16 1048723074, %v4522_v36  ;;  %v4333_v63 = vmul.bf16 1065893768, %v10172_v1 }
 0xfdf   : > { %5339 = vmatprep.mubr.bf16.mxu1 %v4997_v56  ;;  %5436 = vmatprep.mubr.bf16.mxu0 %v4999_v5  ;;  %v4332_v11 = vmul.bf16 1065893768, %v10160_v29  ;;  %v10983_v23 = vmul.bf16 1060454197, %v10982_v25  ;;  %v10986_v10 = vmul.bf16 1056980736, %v10962_v17 }
 0xfe0   : > { %v4996_v32 = vmul.bf16 %v4964_v50, %v10981_v14  ;;  %v4873_v51 = vsub.bf16 0, %v4809_v49  ;;  %v4875_v3 = vsub.bf16 0, %v4811_v42  ;;  %v4808_v34 = vsub.bf16 1065369472, %v4776_v41 }
 0xfe1   : > { %vm10310_vm11 = vcmp.lt.bf16.partialorder %v10983_v23, 0  ;;  %v4998_v6 = vmul.bf16 %v4966_v57, %v10986_v10  ;;  %v4586_v4 = vmul.bf16 %v4554_v9, %v10022_v62  ;;  %v4365_v24 = vadd.bf16 3216687034, %v4333_v63 }
 0xfe2   : > { %5340 = vmatmul.mubr.bf16.gmra.mrb[128].mxu1 %v4996_v32  ;;  %v4364_v0 = vadd.bf16 3216687034, %v4332_v11  ;;  %v4337_v40 = vmul.bf16 1065893768, %v10219_v60  ;;  %v4905_v31 = vsel %vm10269_vm8, %v4873_v51, %v4809_v49  ;;  %v4907_v16 = vsel %vm10275_vm9, %v4875_v3, %v4811_v42 }
 0xfe3   : > { %5437 = vmatmul.mubr.bf16.gmra.mrb[160].mxu0 %v4998_v6  ;;  %v4872_v38 = vsub.bf16 0, %v4808_v34  ;;  %v4336_v17 = vmul.bf16 1065893768, %v10186_v18  ;;  %v4969_v27 = vadd.bf16 1065369472, %v4905_v31  ;;  %v4778_v36 = vmul.bf16 %v10059_v7, %v4586_v4 }
 0xfe4   : > { %v4971_v19 = vadd.bf16 1065369472, %v4907_v16  ;;  %v4397_v62 = vmul.bf16 %v4365_v24, %v10172_v1  ;;  %v4396_v56 = vmul.bf16 %v4364_v0, %v10160_v29  ;;  %v4369_v39 = vadd.bf16 3216687034, %v4337_v40 }
 0xfe5   : > { %v4904_v55 = vsel %vm10287_vm10, %v4872_v38, %v4808_v34  ;;  %v4368_v61 = vadd.bf16 3216687034, %v4336_v17  ;;  %v10987_v5 = vmul.bf16 1056980736, %v9782_v22  ;;  %v10988_v50 = vmul.bf16 1056980736, %v9861_v13 }
 0xfe6   : > { %v4968_v57 = vadd.bf16 1065369472, %v4904_v55  ;;  %v4810_v49 = vsub.bf16 1065369472, %v4778_v36  ;;  %v4429_v42 = vadd.bf16 1068908470, %v4397_v62  ;;  %v4401_v7 = vmul.bf16 %v4369_v39, %v10219_v60 }
 0xfe7   : > { %v5001_v58 = vmul.bf16 %v4969_v27, %v10987_v5  ;;  %v5003_v43 = vmul.bf16 %v4971_v19, %v10988_v50  ;;  %v4428_v41 = vadd.bf16 1068908470, %v4396_v56  ;;  %v4400_v14 = vmul.bf16 %v4368_v61, %v10186_v18 }
 0xfe8   : > { %v10989_v46 = vmul.bf16 1056980736, %v10975_v12  ;;  %v4874_v9 = vsub.bf16 0, %v4810_v49  ;;  %v4335_v22 = vmul.bf16 1065893768, %v10174_v37  ;;  %v4461_v13 = vmul.bf16 %v4429_v42, %v10172_v1 }
 0xfe9   : > { %5347 = vmatprep.mubr.bf16.mxu1 %v5001_v58  ;;  %5444 = vmatprep.mubr.bf16.mxu0 %v5003_v43  ;;  %v4339_v63 = vmul.bf16 1065893768, %v10256_v53  ;;  %v4460_v11 = vmul.bf16 %v4428_v41, %v10160_v29  ;;  %v4433_v23 = vadd.bf16 1068908470, %v4401_v7  ;;  %v4432_v10 = vadd.bf16 1068908470, %v4400_v14 }
 0xfea   : > { %v5000_v32 = vmul.bf16 %v4968_v57, %v10989_v46  ;;  %v4906_v6 = vsel %vm10310_vm11, %v4874_v9, %v4810_v49  ;;  %v4367_v51 = vadd.bf16 3216687034, %v4335_v22  ;;  %v4338_v12 = vmul.bf16 1065893768, %v10193_v52 }
 0xfeb   : > { %v4371_v3 = vadd.bf16 3216687034, %v4339_v63  ;;  %v4970_v34 = vadd.bf16 1065369472, %v4906_v6  ;;  %v4493_v4 = vadd.bf16 3197288082, %v4461_v13  ;;  %v4465_v0 = vmul.bf16 %v4433_v23, %v10219_v60 }
 0xfec   : > { %5348 = vmatmul.mubr.bf16.gmra.mrb[132].mxu1 %v5000_v32  ;;  %v4492_v24 = vadd.bf16 3197288082, %v4460_v11  ;;  %v4464_v40 = vmul.bf16 %v4432_v10, %v10186_v18  ;;  %v4399_v31 = vmul.bf16 %v4367_v51, %v10174_v37  ;;  %v4370_v38 = vadd.bf16 3216687034, %v4338_v12 }
 0xfed   : > { %v4403_v16 = vmul.bf16 %v4371_v3, %v10256_v53  ;;  %v10990_v17 = vmul.bf16 1056980736, %v10982_v25  ;;  %v4525_v27 = vmul.bf16 %v4493_v4, %v10172_v1  ;;  %v4497_v36 = vadd.bf16 3197288082, %v4465_v0 }
 0xfee   : > { %v4524_v19 = vmul.bf16 %v4492_v24, %v10160_v29  ;;  %v4496_v62 = vadd.bf16 3197288082, %v4464_v40  ;;  %v4431_v55 = vadd.bf16 1068908470, %v4399_v31  ;;  %v4402_v39 = vmul.bf16 %v4370_v38, %v10193_v52 }
 0xfef   : > { %v5002_v45 = vmul.bf16 %v4970_v34, %v10990_v17  ;;  %v4435_v56 = vadd.bf16 1068908470, %v4403_v16  ;;  %v10991_v61 = vmul.bf16 1069105081, %v10195_v30  ;;  %v4557_v5 = vadd.bf16 1048723074, %v4525_v27 }
 0xff0   : > { %v4556_v58 = vadd.bf16 1048723074, %v4524_v19  ;;  %v4529_v50 = vmul.bf16 %v4497_v36, %v10219_v60  ;;  %v10992_v25 = vmul.bf16 1060454197, %v9935_v15  ;;  %v10995_v57 = vmul.bf16 1060454197, %v9939_v2 }
 0xff1   : > { %7301 = vpow.bf16 %v10991_v61  ;;  %5445 = vmatmul.mubr.bf16.gmra.mrb[164].mxu0 %v5002_v45  ;;  %v4528_v30 = vmul.bf16 %v4496_v62, %v10186_v18  ;;  %v4463_v42 = vmul.bf16 %v4431_v55, %v10174_v37  ;;  %v4467_v41 = vmul.bf16 %v4435_v56, %v10256_v53 }
 0xff2   : > { %vm10357_vm12 = vcmp.lt.bf16.partialorder %v10992_v25, 0  ;;  %vm10363_vm13 = vcmp.lt.bf16.partialorder %v10995_v57, 0  ;;  %v4434_v7 = vadd.bf16 1068908470, %v4402_v39  ;;  %v4751_v14 = vmul.bf16 1069105081, %v10189_v28 }
 0xff3   : > { %v4589_v46 = vmul.bf16 %v4557_v5, %v10172_v1  ;;  %v4588_v32 = vmul.bf16 %v4556_v58, %v10160_v29  ;;  %v4561_v9 = vadd.bf16 1048723074, %v4529_v50  ;;  %v4560_v22 = vadd.bf16 1048723074, %v4528_v30 }
 0xff4   : > { %v4495_v63 = vadd.bf16 3197288082, %v4463_v42  ;;  %v4499_v13 = vadd.bf16 3197288082, %v4467_v41  ;;  %v4466_v11 = vmul.bf16 %v4434_v7, %v10193_v52  ;;  %v4590_v23 = vmul.bf16 %v10176_v35, %v10050_v8 }
 0xff5   : > { %v4781_v10 = vmul.bf16 %v10204_v59, %v4589_v46  ;;  %v4780_v6 = vmul.bf16 %v10142_v54, %v4588_v32  ;;  %v4593_v51 = vmul.bf16 %v4561_v9, %v10219_v60  ;;  %v4592_v28 = vmul.bf16 %v4560_v22, %v10186_v18 }
 0xff6   : > { %v4527_v1 = vmul.bf16 %v4495_v63, %v10174_v37  ;;  %v4531_v29 = vmul.bf16 %v4499_v13, %v10256_v53  ;;  %v4498_v3 = vadd.bf16 3197288082, %v4466_v11  ;;  %7303 = vpow.bf16 %v4751_v14  ;;  %v11002_v63 = vld [vmem:[#allocation21_spill] sm:$0xff] }
 0xff7   : > { %v4813_v12 = vsub.bf16 1065369472, %v4781_v10  ;;  %v4812_v34 = vsub.bf16 1065369472, %v4780_v6  ;;  %v4785_v4 = vmul.bf16 %v10261_v44, %v4593_v51  ;;  %v4784_v8 = vmul.bf16 %v10214_v48, %v4592_v28 }
 0xff8   : > { %v4559_v35 = vadd.bf16 1048723074, %v4527_v1  ;;  %v4563_v59 = vadd.bf16 1048723074, %v4531_v29  ;;  %v4530_v54 = vmul.bf16 %v4498_v3, %v10193_v52  ;;  %v4782_v60 = vmul.bf16 %v10158_v21, %v4590_v23  ;;  %v11004_v23 = vld [vmem:[#allocation35_spill] sm:$0xff] }
 0xff9   : > { %v4877_v24 = vsub.bf16 0, %v4813_v12  ;;  %v4876_v18 = vsub.bf16 0, %v4812_v34  ;;  %v4817_v0 = vsub.bf16 1065369472, %v4785_v4  ;;  %v10998_v40 = vmul.bf16 1060454197, %v10078_v26 }
 0xffa   : > { %v4816_v31 = vsub.bf16 1065369472, %v4784_v8  ;;  %v4591_v16 = vmul.bf16 %v4559_v35, %v10174_v37  ;;  %v4595_v38 = vmul.bf16 %v4563_v59, %v10256_v53  ;;  %v4562_v45 = vadd.bf16 1048723074, %v4530_v54 }
 0xffb   : > { %vm4849_vm14 = vcmp.lt.bf16.partialorder %v10998_v40, 0  ;;  %v4909_v48 = vsel %vm10363_vm13, %v4877_v24, %v4813_v12  ;;  %v4908_v44 = vsel %vm10357_vm12, %v4876_v18, %v4812_v34  ;;  %v4881_v17 = vsub.bf16 0, %v4817_v0  ;;  %v11006_v34 = vld [vmem:[#allocation31_spill] sm:$0xff] }
 0xffc   : > { %v7302_v21 = vpop.eup %7301  ;;  %v4973_v27 = vadd.bf16 1065369472, %v4909_v48  ;;  %v4972_v19 = vadd.bf16 1065369472, %v4908_v44  ;;  %v4880_v36 = vsub.bf16 0, %v4816_v31  ;;  %v4783_v62 = vmul.bf16 %v10209_v20, %v4591_v16 }
 0xffd   : > { %v4940_v55 = vmul.bf16 1056980736, %v9935_v15  ;;  %v4913_v56 = vsel %vm4849_vm14, %v4881_v17, %v4817_v0  ;;  %v4787_v37 = vmul.bf16 %v7302_v21, %v4595_v38  ;;  %v4945_v53 = vmul.bf16 1056980736, %v10078_v26  ;;  %v10418_v0 = vld [vmem:[%s10667_s11] ss:$0 sm:$0xff] }
 0xffe   : > { %v10999_v39 = vmul.bf16 1056980736, %v9939_v2  ;;  %v4977_v5 = vadd.bf16 1065369472, %v4913_v56  ;;  %v11000_v58 = vmul.bf16 1060454197, %v10074_v47  ;;  %v4594_v20 = vmul.bf16 %v4562_v45, %v10193_v52 }
 0xfff   : > { %v5004_v50 = vmul.bf16 %v4972_v19, %v4940_v55  ;;  %v4815_v25 = vsub.bf16 1065369472, %v4783_v62  ;;  %v4814_v43 = vsub.bf16 1065369472, %v4782_v60  ;;  %v4819_v30 = vsub.bf16 1065369472, %v4787_v37 }
0x1000   : > { %v5005_v61 = vmul.bf16 %v4973_v27, %v10999_v39  ;;  %vm4848_vm15 = vcmp.lt.bf16.partialorder %v11000_v58, 0  ;;  %v5009_v57 = vmul.bf16 %v4977_v5, %v4945_v53  ;;  %v11001_v26 = vmul.bf16 1060454197, %v9959_v33  ;;  %v11008_v56 = vld [vmem:[#allocation5_spill] sm:$0xff]  ;;  %v11009_v53 = vld [vmem:[#allocation7_spill] sm:$0xff] }
0x1001   : > { %v4912_v49 = vsel %vm4848_vm15, %v4880_v36, %v4816_v31  ;;  %v4879_v15 = vsub.bf16 0, %v4815_v25  ;;  %v7304_v42 = vpop.eup %7303  ;;  %v4878_v7 = vsub.bf16 0, %v4814_v43  ;;  %v4944_v32 = vmul.bf16 1056980736, %v10074_v47 }
0x1002   : > { %5355 = vmatprep.mubr.bf16.mxu1 %v5005_v61  ;;  %vm4847_vm0 = vcmp.lt.bf16.partialorder %v11001_v26, 0  ;;  %v4976_v2 = vadd.bf16 1065369472, %v4912_v49  ;;  %v4786_v46 = vmul.bf16 %v7304_v42, %v4594_v20  ;;  %v4883_v9 = vsub.bf16 0, %v4819_v30 }
0x1003   : > { %5356 = vmatmul.mubr.bf16.gmra.mrb[136].mxu1 %v5004_v50  ;;  %v4911_v41 = vsel %vm4847_vm0, %v4879_v15, %v4815_v25  ;;  %v4943_v22 = vmul.bf16 1056980736, %v9959_v33  ;;  %v11003_v52 = vmul.bf16 1060454197, %v11002_v63  ;;  %v11005_v10 = vmul.bf16 1060454197, %v11004_v23 }
0x1004   : > { %5363 = vmatprep.mubr.bf16.mxu1 %v5009_v57  ;;  %v4975_v14 = vadd.bf16 1065369472, %v4911_v41  ;;  %v5008_v13 = vmul.bf16 %v4976_v2, %v4944_v32  ;;  %v4818_v51 = vsub.bf16 1065369472, %v4786_v46  ;;  %v4942_v47 = vmul.bf16 1056980736, %v11002_v63 }
0x1005   : > { %vm4846_vm1 = vcmp.lt.bf16.partialorder %v11003_v52, 0  ;;  %vm4851_vm2 = vcmp.lt.bf16.partialorder %v11005_v10, 0  ;;  %v4947_v33 = vmul.bf16 1056980736, %v11004_v23  ;;  %v11007_v4 = vmul.bf16 1060454197, %v11006_v34 }
0x1006   : > { %v4910_v11 = vsel %vm4846_vm1, %v4878_v7, %v4814_v43  ;;  %v5007_v6 = vmul.bf16 %v4975_v14, %v4943_v22  ;;  %v4915_v28 = vsel %vm4851_vm2, %v4883_v9, %v4819_v30  ;;  %v4882_v3 = vsub.bf16 0, %v4818_v51  ;;  %v11010_v14 = vld [vmem:[#allocation10_spill] sm:$0xff] }
0x1007   : > { %v4974_v1 = vadd.bf16 1065369472, %v4910_v11  ;;  %v4979_v29 = vadd.bf16 1065369472, %v4915_v28  ;;  %vm4850_vm3 = vcmp.lt.bf16.partialorder %v11007_v4, 0  ;;  %v11011_v32 = vld [vmem:[#allocation6_spill] sm:$0xff] }
0x1008   : > { %v4914_v35 = vsel %vm4850_vm3, %v4882_v3, %v4818_v51  ;;  %v4946_v54 = vmul.bf16 1056980736, %v11006_v34  ;;  %v11012_v34 = vld [vmem:[#allocation11_spill] sm:$0xff] }
0x1009   : > { %v5006_v12 = vmul.bf16 %v4974_v1, %v4942_v47  ;;  %v5011_v8 = vmul.bf16 %v4979_v29, %v4947_v33  ;;  %v4978_v59 = vadd.bf16 1065369472, %v4914_v35 }
0x100b   : > { %5364 = vmatmul.mubr.bf16.gmra.mrb[140].mxu1 %v5008_v13  ;;  %v5010_v60 = vmul.bf16 %v4978_v59, %v4946_v54 }
0x100c   : > { %5452 = vmatprep.mubr.bf16.mxu1 %v5007_v6 }
0x1013   : > { %5453 = vmatmul.mubr.bf16.vlgmr.msra.gmra.mrb[144].mxu1 %v5006_v12 }
0x1014   : > { %5460 = vmatprep.mubr.bf16.mxu1 %v5011_v8  ;;  %v11013_v8 = vld [vmem:[#allocation8_spill] sm:$0xff] }
0x101b   : > { %5461 = vmatmul.mubr.bf16.gmra.mrb[148].mxu1 %v5010_v60 }
0x1033   : > { %v6261_v24 = vpop.f32.mrb[112].mxu1  ;;  %v6325_v18 = vpop.f32.mrb[144].mxu0 }
0x1034   : > { %v6262_v40 = vpop.f32.mrb[113].mxu1  ;;  %v6326_v31 = vpop.f32.mrb[145].mxu0 }
0x1035   : > { %v6263_v16 = vadd.f32 %v6262_v40, %v6261_v24  ;;  %v6327_v38 = vadd.f32 %v6326_v31, %v6325_v18  ;;  %v6264_v48 = vpop.f32.mrb[114].mxu1  ;;  %v6328_v44 = vpop.f32.mrb[146].mxu0 }
0x1036   : > { %v6265_v17 = vpop.f32.mrb[115].mxu1  ;;  %v6329_v45 = vpop.f32.mrb[147].mxu0 }
0x1037   : > { %v5310_v21 = vadd.f32 %v6263_v16, %v10418_v0  ;;  %v6266_v27 = vadd.f32 %v6265_v17, %v6264_v48  ;;  %v6330_v19 = vadd.f32 %v6329_v45, %v6328_v44 }
0x1039   : > { %v5407_v36 = vadd.f32 %v6327_v38, %v5310_v21  ;;  %v5313_v62 = vadd.f32 %v6266_v27, %v10418_v0 }
0x103b   : > { %v5410_v55 = vadd.f32 %v6330_v19, %v5313_v62  ;;  %v10423_v37 = vadd.f32 %v5407_v36, %v11008_v56  ;;  %v11014_v36 = vld [vmem:[#allocation12_spill] sm:$0xff] }
0x103d   : > { %5487 = vadd.xlane.f32.xlu0 %v10423_v37  ;;  %v10427_v39 = vadd.f32 %v5410_v55, %v11009_v53  ;;  %v11015_v55 = vld [vmem:[#allocation9_spill] sm:$0xff] }
0x103f   : > { %5489 = vadd.xlane.f32.xlu1 %v10427_v39 }
0x1050   : > { %v6267_v61 = vpop.f32.mrb[116].mxu1  ;;  %v6331_v5 = vpop.f32.mrb[148].mxu0 }
0x1051   : > { %v6268_v58 = vpop.f32.mrb[117].mxu1  ;;  %v6332_v50 = vpop.f32.mrb[149].mxu0 }
0x1052   : > { %v6269_v25 = vadd.f32 %v6268_v58, %v6267_v61  ;;  %v6333_v43 = vadd.f32 %v6332_v50, %v6331_v5  ;;  %v6270_v57 = vpop.f32.mrb[118].mxu1  ;;  %v6334_v49 = vpop.f32.mrb[150].mxu0 }
0x1053   : > { %v6271_v20 = vpop.f32.mrb[119].mxu1  ;;  %v6335_v15 = vpop.f32.mrb[151].mxu0 }
0x1054   : > { %v5318_v30 = vadd.f32 %v6269_v25, %v10418_v0  ;;  %v6272_v42 = vadd.f32 %v6271_v20, %v6270_v57  ;;  %v6336_v26 = vadd.f32 %v6335_v15, %v6334_v49 }
0x1056   : > { %v5415_v2 = vadd.f32 %v6333_v43, %v5318_v30  ;;  %v5321_v41 = vadd.f32 %v6272_v42, %v10418_v0 }
0x1058   : > { %v5418_v7 = vadd.f32 %v6336_v26, %v5321_v41  ;;  %v10433_v46 = vadd.f32 %v5415_v2, %v11010_v14  ;;  %v11016_v14 = vld [vmem:[#allocation13_spill] sm:$0xff] }
0x105a   : > { %5491 = vadd.xlane.f32.xlu0 %v10433_v46  ;;  %v10437_v9 = vadd.f32 %v5418_v7, %v11011_v32 }
0x105c   : > { %5493 = vadd.xlane.f32.xlu1 %v10437_v9 }
0x106f   : > { %v6273_v22 = vpop.f32.mrb[120].mxu1 }
0x1070   : > { %v6337_v63 = vpop.f32.mrb[152].mxu0  ;;  %v6274_v52 = vpop.f32.mrb[121].mxu1 }
0x1071   : > { %v6275_v13 = vadd.f32 %v6274_v52, %v6273_v22  ;;  %v6338_v11 = vpop.f32.mrb[153].mxu0  ;;  %v6276_v23 = vpop.f32.mrb[122].mxu1 }
0x1072   : > { %v6339_v10 = vadd.f32 %v6338_v11, %v6337_v63  ;;  %v6340_v6 = vpop.f32.mrb[154].mxu0  ;;  %v6277_v51 = vpop.f32.mrb[123].mxu1 }
0x1073   : > { %v5326_v28 = vadd.f32 %v6275_v13, %v10418_v0  ;;  %v6278_v1 = vadd.f32 %v6277_v51, %v6276_v23  ;;  %v6341_v29 = vpop.f32.mrb[155].mxu0  ;;  %v11017_v13 = vld [vmem:[#allocation14_spill] sm:$0xff] }
0x1074   : > { %v6342_v3 = vadd.f32 %v6341_v29, %v6340_v6 }
0x1075   : > { %v5423_v47 = vadd.f32 %v6339_v10, %v5326_v28  ;;  %v5329_v33 = vadd.f32 %v6278_v1, %v10418_v0 }
0x1077   : > { %v5426_v12 = vadd.f32 %v6342_v3, %v5329_v33  ;;  %v10443_v4 = vadd.f32 %v5423_v47, %v11012_v34 }
0x1079   : > { %5495 = vadd.xlane.f32.xlu0 %v10443_v4  ;;  %v10447_v35 = vadd.f32 %v5426_v12, %v11013_v8  ;;  %v11018_v8 = vld [vmem:[#allocation16_spill] sm:$0xff] }
0x107b   : > { %5497 = vadd.xlane.f32.xlu1 %v10447_v35 }
0x1090   : > { %v6279_v59 = vpop.f32.mrb[124].mxu1  ;;  %v6343_v54 = vpop.f32.mrb[156].mxu0 }
0x1091   : > { %v6280_v60 = vpop.f32.mrb[125].mxu1  ;;  %v6344_v24 = vpop.f32.mrb[157].mxu0 }
0x1092   : > { %v6281_v18 = vadd.f32 %v6280_v60, %v6279_v59  ;;  %v6345_v40 = vadd.f32 %v6344_v24, %v6343_v54  ;;  %v6282_v31 = vpop.f32.mrb[126].mxu1  ;;  %v6346_v16 = vpop.f32.mrb[158].mxu0  ;;  %v11019_v54 = vld [vmem:[#allocation15_spill] sm:$0xff] }
0x1093   : > { %v6283_v38 = vpop.f32.mrb[127].mxu1  ;;  %v6347_v48 = vpop.f32.mrb[159].mxu0 }
0x1094   : > { %v5334_v44 = vadd.f32 %v6281_v18, %v10418_v0  ;;  %v6284_v17 = vadd.f32 %v6283_v38, %v6282_v31  ;;  %v6348_v45 = vadd.f32 %v6347_v48, %v6346_v16 }
0x1096   : > { %v5431_v21 = vadd.f32 %v6345_v40, %v5334_v44  ;;  %v5337_v27 = vadd.f32 %v6284_v17, %v10418_v0 }
0x1098   : > { %v5434_v19 = vadd.f32 %v6348_v45, %v5337_v27  ;;  %v10453_v62 = vadd.f32 %v5431_v21, %v11014_v36 }
0x109a   : > { %5499 = vadd.xlane.f32.xlu0 %v10453_v62  ;;  %v10457_v56 = vadd.f32 %v5434_v19, %v11015_v55 }
0x109c   : > { %5501 = vadd.xlane.f32.xlu1 %v10457_v56 }
0x10b5   : > { %v6285_v53 = vpop.f32.mrb[128].mxu1 }
0x10b6   : > { %v6349_v61 = vpop.f32.mrb[160].mxu0  ;;  %v6286_v5 = vpop.f32.mrb[129].mxu1 }
0x10b7   : > { %v6287_v58 = vadd.f32 %v6286_v5, %v6285_v53  ;;  %v6350_v50 = vpop.f32.mrb[161].mxu0  ;;  %v6288_v25 = vpop.f32.mrb[130].mxu1 }
0x10b8   : > { %v6351_v43 = vadd.f32 %v6350_v50, %v6349_v61  ;;  %v6352_v57 = vpop.f32.mrb[162].mxu0  ;;  %v6289_v49 = vpop.f32.mrb[131].mxu1 }
0x10b9   : > { %v5342_v20 = vadd.f32 %v6287_v58, %v10418_v0  ;;  %v6290_v15 = vadd.f32 %v6289_v49, %v6288_v25  ;;  %v6353_v30 = vpop.f32.mrb[163].mxu0  ;;  %v11020_v49 = vld [vmem:[#allocation18_spill] sm:$0xff] }
0x10ba   : > { %v6354_v42 = vadd.f32 %v6353_v30, %v6352_v57 }
0x10bb   : > { %v5439_v26 = vadd.f32 %v6351_v43, %v5342_v20  ;;  %v5345_v2 = vadd.f32 %v6290_v15, %v10418_v0 }
0x10bd   : > { %v5442_v41 = vadd.f32 %v6354_v42, %v5345_v2  ;;  %v10463_v32 = vadd.f32 %v5439_v26, %v11016_v14  ;;  %v11021_v42 = vld [vmem:[#allocation17_spill] sm:$0xff] }
0x10bf   : > { %v6291_v7 = vpop.f32.mrb[132].mxu1  ;;  %5503 = vadd.xlane.f32.xlu0 %v10463_v32  ;;  %v10467_v11 = vadd.f32 %v5442_v41, %v11017_v13 }
0x10c0   : > { %v6292_v22 = vpop.f32.mrb[133].mxu1 }
0x10c1   : > { %v6293_v63 = vadd.f32 %v6292_v22, %v6291_v7  ;;  %v6294_v52 = vpop.f32.mrb[134].mxu1  ;;  %5505 = vadd.xlane.f32.xlu1 %v10467_v11 }
0x10c2   : > { %v6295_v23 = vpop.f32.mrb[135].mxu1 }
0x10c3   : > { %v6296_v10 = vadd.f32 %v6295_v23, %v6294_v52  ;;  %v5350_v51 = vadd.f32 %v6293_v63, %v10418_v0 }
0x10c4   : > { %v6355_v6 = vpop.f32.mrb[164].mxu0 }
0x10c5   : > { %v6356_v28 = vpop.f32.mrb[165].mxu0  ;;  %v5353_v3 = vadd.f32 %v6296_v10, %v10418_v0 }
0x10c6   : > { %v6357_v1 = vadd.f32 %v6356_v28, %v6355_v6  ;;  %v6358_v29 = vpop.f32.mrb[166].mxu0  ;;  %v11022_v28 = vld [vmem:[#allocation20_spill] sm:$0xff] }
0x10c7   : > { %v6359_v47 = vpop.f32.mrb[167].mxu0 }
0x10c8   : > { %v5447_v33 = vadd.f32 %v6357_v1, %v5350_v51  ;;  %v6360_v12 = vadd.f32 %v6359_v47, %v6358_v29  ;;  %v11023_v47 = vld [vmem:[#allocation19_spill] sm:$0xff] }
0x10ca   : > { %v5450_v34 = vadd.f32 %v6360_v12, %v5353_v3  ;;  %v10473_v59 = vadd.f32 %v5447_v33, %v11018_v8  ;;  %v5488_v43 = vpop.xlane.xlu0 %5487 }
0x10cb   : > { %v5519_v2 = vmul.f32 0.0078125, %v5488_v43 }
0x10cc   : > { %5507 = vadd.xlane.f32.xlu0 %v10473_v59  ;;  %v10477_v60 = vadd.f32 %v5450_v34, %v11019_v54  ;;  %v5490_v15 = vpop.xlane.xlu1 %5489 }
0x10cd   : > { %v5520_v63 = vmul.f32 0.0078125, %v5490_v15  ;;  %v10493_v6 = vsub.f32 %v10423_v37, %v5519_v2 }
0x10ce   : > { %5509 = vadd.xlane.f32.xlu1 %v10477_v60 }
0x10cf   : > { %v10499_v29 = vsub.f32 %v10427_v39, %v5520_v63 }
0x10d1   : > { %v5552_v39 = vmul.f32 %v10499_v29, %v10499_v29 }
0x10d6   : > { %v6297_v24 = vpop.f32.mrb[136].mxu1 }
0x10d7   : > { %v6298_v18 = vpop.f32.mrb[137].mxu1 }
0x10d8   : > { %v6299_v40 = vadd.f32 %v6298_v18, %v6297_v24  ;;  %v6300_v31 = vpop.f32.mrb[138].mxu1 }
0x10d9   : > { %v6301_v16 = vpop.f32.mrb[139].mxu1 }
0x10da   : > { %v6302_v38 = vadd.f32 %v6301_v16, %v6300_v31  ;;  %v5358_v55 = vadd.f32 %v6299_v40, %v10418_v0 }
0x10dc   : > { %v5361_v58 = vadd.f32 %v6302_v38, %v10418_v0 }
0x10de   : > { %v6303_v48 = vpop.f32.mrb[140].mxu1 }
0x10df   : > { %v6304_v44 = vpop.f32.mrb[141].mxu1 }
0x10e0   : > { %v6305_v17 = vadd.f32 %v6304_v44, %v6303_v48  ;;  %v6306_v45 = vpop.f32.mrb[142].mxu1 }
0x10e1   : > { %v6307_v21 = vpop.f32.mrb[143].mxu1 }
0x10e2   : > { %v6308_v27 = vadd.f32 %v6307_v21, %v6306_v45  ;;  %v5366_v7 = vadd.f32 %v6305_v17, %v10418_v0 }
0x10e4   : > { %v5369_v13 = vadd.f32 %v6308_v27, %v10418_v0  ;;  %v5551_v0 = vmul.f32 %v10493_v6, %v10493_v6 }
0x10e6   : > { %v6361_v19 = vpop.f32.mrb[144].mxu1 }
0x10e7   : > { %v6362_v36 = vpop.f32.mrb[145].mxu1  ;;  %v5492_v3 = vpop.xlane.xlu0 %5491 }
0x10e8   : > { %v6363_v53 = vadd.f32 %v6362_v36, %v6361_v19  ;;  %v6364_v61 = vpop.f32.mrb[146].mxu1  ;;  %v5521_v12 = vmul.f32 0.0078125, %v5492_v3 }
0x10e9   : > { %v6365_v5 = vpop.f32.mrb[147].mxu1  ;;  %v5494_v34 = vpop.xlane.xlu1 %5493 }
0x10ea   : > { %v5455_v50 = vadd.f32 %v6363_v53, %v5358_v55  ;;  %v6366_v25 = vadd.f32 %v6365_v5, %v6364_v61  ;;  %v10509_v37 = vsub.f32 %v10433_v46, %v5521_v12  ;;  %v5522_v8 = vmul.f32 0.0078125, %v5494_v34 }
0x10ec   : > { %v5458_v57 = vadd.f32 %v6366_v25, %v5361_v58  ;;  %v10483_v20 = vadd.f32 %v5455_v50, %v11020_v49  ;;  %v10514_v54 = vsub.f32 %v10437_v9, %v5522_v8  ;;  %v5553_v24 = vmul.f32 %v10509_v37, %v10509_v37 }
0x10ee   : > { %v6367_v30 = vpop.f32.mrb[148].mxu1  ;;  %5511 = vadd.xlane.f32.xlu0 %v10483_v20  ;;  %v10487_v26 = vadd.f32 %v5458_v57, %v11021_v42  ;;  %v5554_v18 = vmul.f32 %v10514_v54, %v10514_v54 }
0x10ef   : > { %v6368_v41 = vpop.f32.mrb[149].mxu1 }
0x10f0   : > { %v6369_v14 = vadd.f32 %v6368_v41, %v6367_v30  ;;  %v6370_v22 = vpop.f32.mrb[150].mxu1  ;;  %5513 = vadd.xlane.f32.xlu1 %v10487_v26 }
0x10f1   : > { %v6371_v52 = vpop.f32.mrb[151].mxu1 }
0x10f2   : > { %v5463_v23 = vadd.f32 %v6369_v14, %v5366_v7  ;;  %v6372_v10 = vadd.f32 %v6371_v52, %v6370_v22 }
0x10f4   : > { %v5466_v51 = vadd.f32 %v6372_v10, %v5369_v13  ;;  %v10496_v1 = vadd.f32 %v5463_v23, %v11022_v28 }
0x10f6   : > { %5515 = vadd.xlane.f32.xlu0 %v10496_v1  ;;  %v10503_v33 = vadd.f32 %v5466_v51, %v11023_v47 }
0x10f8   : > { %5517 = vadd.xlane.f32.xlu1 %v10503_v33 }
0x10fa   : > { %5567 = vadd.xlane.f32.xlu0 %v5551_v0 }
0x10fc   : > { %5569 = vadd.xlane.f32.xlu1 %v5552_v39 }
0x10fe   : > { %5571 = vadd.xlane.f32.xlu0 %v5553_v24 }
0x1100   : > { %5573 = vadd.xlane.f32.xlu1 %v5554_v18 }
0x1106   : > { %v5496_v40 = vpop.xlane.xlu0 %5495 }
0x1107   : > { %v5523_v46 = vmul.f32 0.0078125, %v5496_v40 }
0x1108   : > { %v5498_v31 = vpop.xlane.xlu1 %5497 }
0x1109   : > { %v10521_v16 = vsub.f32 %v10443_v4, %v5523_v46  ;;  %v5524_v38 = vmul.f32 0.0078125, %v5498_v31  ;;  %v10583_v46 = vld [vmem:[%s10668_s12] ss:$0 sm:$0xff] }
0x110b   : > { %v10524_v48 = vsub.f32 %v10447_v35, %v5524_v38  ;;  %v5555_v9 = vmul.f32 %v10521_v16, %v10521_v16 }
0x110d   : > { %5575 = vadd.xlane.f32.xlu0 %v5555_v9  ;;  %v5556_v44 = vmul.f32 %v10524_v48, %v10524_v48 }
0x110f   : > { %5577 = vadd.xlane.f32.xlu1 %v5556_v44 }
0x1127   : > { %v5500_v17 = vpop.xlane.xlu0 %5499 }
0x1128   : > { %v5525_v45 = vmul.f32 0.0078125, %v5500_v17 }
0x1129   : > { %v5502_v21 = vpop.xlane.xlu1 %5501 }
0x112a   : > { %v10531_v27 = vsub.f32 %v10453_v62, %v5525_v45  ;;  %v5526_v4 = vmul.f32 0.0078125, %v5502_v21  ;;  %v10591_v45 = vld [vmem:[%s10669_s13] ss:$0 sm:$0xff] }
0x112c   : > { %v10534_v19 = vsub.f32 %v10457_v56, %v5526_v4  ;;  %v5557_v35 = vmul.f32 %v10531_v27, %v10531_v27 }
0x112e   : > { %5579 = vadd.xlane.f32.xlu0 %v5557_v35  ;;  %v5558_v36 = vmul.f32 %v10534_v19, %v10534_v19 }
0x1130   : > { %5581 = vadd.xlane.f32.xlu1 %v5558_v36 }
0x114c   : > { %v5504_v55 = vpop.xlane.xlu0 %5503 }
0x114d   : > { %v5527_v53 = vmul.f32 0.0078125, %v5504_v55 }
0x114e   : > { %v5506_v61 = vpop.xlane.xlu1 %5505 }
0x114f   : > { %v10541_v5 = vsub.f32 %v10463_v32, %v5527_v53  ;;  %v5528_v62 = vmul.f32 0.0078125, %v5506_v61 }
0x1151   : > { %v10544_v58 = vsub.f32 %v10467_v11, %v5528_v62  ;;  %v5559_v56 = vmul.f32 %v10541_v5, %v10541_v5 }
0x1153   : > { %5583 = vadd.xlane.f32.xlu0 %v5559_v56  ;;  %v5560_v50 = vmul.f32 %v10544_v58, %v10544_v58 }
0x1155   : > { %5585 = vadd.xlane.f32.xlu1 %v5560_v50 }
0x1159   : > { %v5508_v25 = vpop.xlane.xlu0 %5507 }
0x115a   : > { %v5529_v43 = vmul.f32 0.0078125, %v5508_v25 }
0x115b   : > { %v5510_v57 = vpop.xlane.xlu1 %5509 }
0x115c   : > { %v10551_v49 = vsub.f32 %v10473_v59, %v5529_v43  ;;  %v5530_v32 = vmul.f32 0.0078125, %v5510_v57 }
0x115e   : > { %v10554_v15 = vsub.f32 %v10477_v60, %v5530_v32  ;;  %v5561_v11 = vmul.f32 %v10551_v49, %v10551_v49 }
0x1160   : > { %5587 = vadd.xlane.f32.xlu0 %v5561_v11  ;;  %v5562_v30 = vmul.f32 %v10554_v15, %v10554_v15 }
0x1162   : > { %5589 = vadd.xlane.f32.xlu1 %v5562_v30 }
0x117b   : > { %v5512_v42 = vpop.xlane.xlu0 %5511 }
0x117c   : > { %v5531_v2 = vmul.f32 0.0078125, %v5512_v42 }
0x117d   : > { %v5514_v41 = vpop.xlane.xlu1 %5513 }
0x117e   : > { %v10561_v7 = vsub.f32 %v10483_v20, %v5531_v2  ;;  %v5532_v59 = vmul.f32 0.0078125, %v5514_v41 }
0x1180   : > { %v10564_v14 = vsub.f32 %v10487_v26, %v5532_v59  ;;  %v5563_v60 = vmul.f32 %v10561_v7, %v10561_v7 }
0x1182   : > { %5591 = vadd.xlane.f32.xlu0 %v5563_v60  ;;  %v5564_v22 = vmul.f32 %v10564_v14, %v10564_v14 }
0x1183   : > { %v5516_v63 = vpop.xlane.xlu0 %5515 }
0x1184   : > { %v5533_v52 = vmul.f32 0.0078125, %v5516_v63  ;;  %5593 = vadd.xlane.f32.xlu1 %v5564_v22 }
0x1185   : > { %v5518_v13 = vpop.xlane.xlu1 %5517 }
0x1186   : > { %v10571_v23 = vsub.f32 %v10496_v1, %v5533_v52  ;;  %v5534_v20 = vmul.f32 0.0078125, %v5518_v13 }
0x1187   : > { %v5568_v10 = vpop.xlane.xlu0 %5567 }
0x1188   : > { %v10574_v51 = vsub.f32 %v10503_v33, %v5534_v20  ;;  %v5565_v26 = vmul.f32 %v10571_v23, %v10571_v23  ;;  %v5599_v28 = vmul.f32 0.0078125, %v5568_v10 }
0x1189   : > { %v5570_v3 = vpop.xlane.xlu1 %5569 }
0x118a   : > { %5595 = vadd.xlane.f32.xlu0 %v5565_v26  ;;  %v5566_v47 = vmul.f32 %v10574_v51, %v10574_v51  ;;  %v5615_v0 = vadd.f32 1e-12, %v5599_v28  ;;  %v5600_v12 = vmul.f32 0.0078125, %v5570_v3 }
0x118b   : > { %v5572_v34 = vpop.xlane.xlu0 %5571 }
0x118c   : > { %5597 = vadd.xlane.f32.xlu1 %v5566_v47  ;;  %7305 = vrsqrt.f32 %v5615_v0  ;;  %v5616_v1 = vadd.f32 1e-12, %v5600_v12  ;;  %v5601_v39 = vmul.f32 0.0078125, %v5572_v34 }
0x118d   : > { %v5574_v8 = vpop.xlane.xlu1 %5573 }
0x118e   : > { %7307 = vrsqrt.f32 %v5616_v1  ;;  %v5617_v33 = vadd.f32 1e-12, %v5601_v39  ;;  %v5602_v24 = vmul.f32 0.0078125, %v5574_v8 }
0x1190   : > { %7309 = vrsqrt.f32 %v5617_v33  ;;  %v5618_v18 = vadd.f32 1e-12, %v5602_v24 }
0x1192   : > { %7311 = vrsqrt.f32 %v5618_v18 }
0x1196   : > { %v7306_v40 = vpop.eup %7305 }
0x1197   : > { %v5647_v31 = vmul.f32 %v7306_v40, %v10493_v6 }
0x1198   : > { %v7308_v38 = vpop.eup %7307 }
0x1199   : > { %v5669_v9 = vmul.f32 %v10583_v46, %v5647_v31  ;;  %v5648_v44 = vmul.f32 %v7308_v38, %v10499_v29 }
0x119a   : > { %v7310_v17 = vpop.eup %7309  ;;  %v5576_v50 = vpop.xlane.xlu0 %5575 }
0x119b   : > { %v5670_v21 = vmul.f32 %v10583_v46, %v5648_v44  ;;  %v5649_v4 = vmul.f32 %v7310_v17, %v10509_v37  ;;  %v5691_v36 = vadd.f32 %v10591_v45, %v5669_v9 }
0x119c   : > { %v7312_v35 = vpop.eup %7311  ;;  %v5578_v25 = vpop.xlane.xlu1 %5577 }
0x119d   : > { %v5692_v6 = vadd.f32 %v10591_v45, %v5670_v21  ;;  %v5671_v55 = vmul.f32 %v10583_v46, %v5649_v4  ;;  %v5650_v53 = vmul.f32 %v7312_v35, %v10514_v54  ;;  %v5603_v54 = vmul.f32 0.0078125, %v5576_v50 }
0x119e   : > { %v5604_v57 = vmul.f32 0.0078125, %v5578_v25 }
0x119f   : > { %v6041_v29 = vpack.c.bf16 %v5692_v6, %v5691_v36  ;;  %v5672_v37 = vmul.f32 %v10583_v46, %v5650_v53  ;;  %v5693_v61 = vadd.f32 %v10591_v45, %v5671_v55  ;;  %v5619_v43 = vadd.f32 1e-12, %v5603_v54 }
0x11a0   : > { %v5620_v32 = vadd.f32 1e-12, %v5604_v57 }
0x11a1   : > { %6042 = vst [vmem:[%s10604_s30] sm:$0xff] %v6041_v29   ;;  %v5694_v62 = vadd.f32 %v10591_v45, %v5672_v37  ;;  %7313 = vrsqrt.f32 %v5619_v43 }
0x11a2   : > { %7315 = vrsqrt.f32 %v5620_v32 }
0x11a3   : > { %v6046_v56 = vpack.c.bf16 %v5694_v62, %v5693_v61 }
0x11a5   : > { %6078 = vst [vmem:[%s10604_s30 + $0x8] sm:$0xff] %v6046_v56  }
0x11ab   : > { %v7314_v11 = vpop.eup %7313 }
0x11ac   : > { %v5651_v30 = vmul.f32 %v7314_v11, %v10521_v16  ;;  %v7316_v42 = vpop.eup %7315 }
0x11ad   : > { %v5652_v41 = vmul.f32 %v7316_v42, %v10524_v48 }
0x11ae   : > { %v5673_v2 = vmul.f32 %v10583_v46, %v5651_v30 }
0x11af   : > { %v5674_v59 = vmul.f32 %v10583_v46, %v5652_v41 }
0x11b0   : > { %v5695_v60 = vadd.f32 %v10591_v45, %v5673_v2 }
0x11b1   : > { %v5696_v22 = vadd.f32 %v10591_v45, %v5674_v59 }
0x11b3   : > { %v6051_v63 = vpack.c.bf16 %v5696_v22, %v5695_v60 }
0x11b5   : > { %6079 = vst [vmem:[%s10604_s30 + $0x10] sm:$0xff] %v6051_v63  }
0x11bb   : > { %v5580_v52 = vpop.xlane.xlu0 %5579 }
0x11bc   : > { %v5605_v13 = vmul.f32 0.0078125, %v5580_v52 }
0x11bd   : > { %v5582_v20 = vpop.xlane.xlu1 %5581 }
0x11be   : > { %v5621_v10 = vadd.f32 1e-12, %v5605_v13  ;;  %v5606_v26 = vmul.f32 0.0078125, %v5582_v20 }
0x11c0   : > { %7317 = vrsqrt.f32 %v5621_v10  ;;  %v5622_v16 = vadd.f32 1e-12, %v5606_v26 }
0x11c2   : > { %7319 = vrsqrt.f32 %v5622_v16 }
0x11ca   : > { %v7318_v28 = vpop.eup %7317 }
0x11cb   : > { %v5653_v48 = vmul.f32 %v7318_v28, %v10531_v27 }
0x11cc   : > { %v7320_v3 = vpop.eup %7319 }
0x11cd   : > { %v5675_v47 = vmul.f32 %v10583_v46, %v5653_v48  ;;  %v5654_v0 = vmul.f32 %v7320_v3, %v10534_v19 }
0x11cf   : > { %v5676_v12 = vmul.f32 %v10583_v46, %v5654_v0  ;;  %v5697_v34 = vadd.f32 %v10591_v45, %v5675_v47 }
0x11d1   : > { %v5698_v1 = vadd.f32 %v10591_v45, %v5676_v12 }
0x11d3   : > { %v6056_v39 = vpack.c.bf16 %v5698_v1, %v5697_v34 }
0x11d5   : > { %6080 = vst [vmem:[%s10604_s30 + $0x18] sm:$0xff] %v6056_v39  }
0x11e0   : > { %v5584_v8 = vpop.xlane.xlu0 %5583 }
0x11e1   : > { %v5607_v33 = vmul.f32 0.0078125, %v5584_v8 }
0x11e2   : > { %v5586_v24 = vpop.xlane.xlu1 %5585 }
0x11e3   : > { %v5623_v18 = vadd.f32 1e-12, %v5607_v33  ;;  %v5608_v40 = vmul.f32 0.0078125, %v5586_v24 }
0x11e5   : > { %7321 = vrsqrt.f32 %v5623_v18  ;;  %v5624_v27 = vadd.f32 1e-12, %v5608_v40 }
0x11e7   : > { %7323 = vrsqrt.f32 %v5624_v27 }
0x11ed   : > { %v5588_v31 = vpop.xlane.xlu0 %5587 }
0x11ee   : > { %v5609_v38 = vmul.f32 0.0078125, %v5588_v31 }
0x11ef   : > { %v5590_v9 = vpop.xlane.xlu1 %5589  ;;  %v7322_v17 = vpop.eup %7321 }
0x11f0   : > { %v5625_v19 = vadd.f32 1e-12, %v5609_v38  ;;  %v5610_v44 = vmul.f32 0.0078125, %v5590_v9  ;;  %v5655_v21 = vmul.f32 %v7322_v17, %v10541_v5 }
0x11f1   : > { %v7324_v35 = vpop.eup %7323 }
0x11f2   : > { %7325 = vrsqrt.f32 %v5625_v19  ;;  %v5626_v4 = vadd.f32 1e-12, %v5610_v44  ;;  %v5677_v36 = vmul.f32 %v10583_v46, %v5655_v21  ;;  %v5656_v6 = vmul.f32 %v7324_v35, %v10544_v58 }
0x11f4   : > { %7327 = vrsqrt.f32 %v5626_v4  ;;  %v5678_v55 = vmul.f32 %v10583_v46, %v5656_v6  ;;  %v5699_v53 = vadd.f32 %v10591_v45, %v5677_v36 }
0x11f6   : > { %v5700_v29 = vadd.f32 %v10591_v45, %v5678_v55 }
0x11f8   : > { %v6061_v37 = vpack.c.bf16 %v5700_v29, %v5699_v53 }
0x11fa   : > { %6081 = vst [vmem:[%s10604_s30 + $0x20] sm:$0xff] %v6061_v37  }
0x11fc   : > { %v7326_v61 = vpop.eup %7325 }
0x11fd   : > { %v5657_v5 = vmul.f32 %v7326_v61, %v10551_v49 }
0x11fe   : > { %v7328_v62 = vpop.eup %7327 }
0x11ff   : > { %v5679_v56 = vmul.f32 %v10583_v46, %v5657_v5  ;;  %v5658_v50 = vmul.f32 %v7328_v62, %v10554_v15 }
0x1201   : > { %v5680_v58 = vmul.f32 %v10583_v46, %v5658_v50  ;;  %v5701_v54 = vadd.f32 %v10591_v45, %v5679_v56 }
0x1203   : > { %v5702_v25 = vadd.f32 %v10591_v45, %v5680_v58 }
0x1205   : > { %v6066_v43 = vpack.c.bf16 %v5702_v25, %v5701_v54 }
0x1207   : > { %6082 = vst [vmem:[%s10604_s30 + $0x28] sm:$0xff] %v6066_v43  }
0x120f   : > { %v5592_v57 = vpop.xlane.xlu0 %5591 }
0x1210   : > { %v5611_v32 = vmul.f32 0.0078125, %v5592_v57 }
0x1211   : > { %v5594_v11 = vpop.xlane.xlu1 %5593 }
0x1212   : > { %v5627_v30 = vadd.f32 1e-12, %v5611_v32  ;;  %v5612_v42 = vmul.f32 0.0078125, %v5594_v11 }
0x1214   : > { %7329 = vrsqrt.f32 %v5627_v30  ;;  %v5628_v49 = vadd.f32 1e-12, %v5612_v42 }
0x1216   : > { %7331 = vrsqrt.f32 %v5628_v49 }
0x1217   : > { %v5596_v2 = vpop.xlane.xlu0 %5595 }
0x1218   : > { %v5613_v41 = vmul.f32 0.0078125, %v5596_v2 }
0x1219   : > { %v5598_v59 = vpop.xlane.xlu1 %5597 }
0x121a   : > { %v5629_v15 = vadd.f32 1e-12, %v5613_v41  ;;  %v5614_v60 = vmul.f32 0.0078125, %v5598_v59 }
0x121c   : > { %7333 = vrsqrt.f32 %v5629_v15  ;;  %v5630_v22 = vadd.f32 1e-12, %v5614_v60 }
0x121e   : > { %v7330_v63 = vpop.eup %7329  ;;  %7335 = vrsqrt.f32 %v5630_v22 }
0x121f   : > { %v5659_v52 = vmul.f32 %v7330_v63, %v10561_v7 }
0x1220   : > { %v7332_v13 = vpop.eup %7331 }
0x1221   : > { %v5681_v20 = vmul.f32 %v10583_v46, %v5659_v52  ;;  %v5660_v10 = vmul.f32 %v7332_v13, %v10564_v14 }
0x1223   : > { %v5682_v26 = vmul.f32 %v10583_v46, %v5660_v10  ;;  %v5703_v16 = vadd.f32 %v10591_v45, %v5681_v20 }
0x1225   : > { %v5704_v28 = vadd.f32 %v10591_v45, %v5682_v26 }
0x1226   : > { %v7334_v48 = vpop.eup %7333 }
0x1227   : > { %v6071_v3 = vpack.c.bf16 %v5704_v28, %v5703_v16  ;;  %v5661_v47 = vmul.f32 %v7334_v48, %v10571_v23 }
0x1228   : > { %v7336_v0 = vpop.eup %7335 }
0x1229   : > { %6083 = vst [vmem:[%s10604_s30 + $0x30] sm:$0xff] %v6071_v3   ;;  %v5683_v7 = vmul.f32 %v10583_v46, %v5661_v47  ;;  %v5662_v12 = vmul.f32 %v7336_v0, %v10574_v51 }
0x122b   : > { %v5684_v34 = vmul.f32 %v10583_v46, %v5662_v12  ;;  %v5705_v14 = vadd.f32 %v10591_v45, %v5683_v7 }
0x122d   : > { %v5706_v1 = vadd.f32 %v10591_v45, %v5684_v34 }
0x122f   : > { %v6076_v39 = vpack.c.bf16 %v5706_v1, %v5705_v14 }
0x1231   : > { %6084 = vst [vmem:[%s10604_s30 + $0x38] sm:$0xff] %v6076_v39  }
0x1232 PF: > { %s24_s29 = sadd.s32 1, %s7365_s29  }
0x1233   : > { %p21_p5 = scmp.ge.s32.totalorder %s24_s29, 6  }
0x1235   :  { %23 = sbr.rel (!%p21_p5) target bundleno = 1 (0x1), region = 109 }

</bundles_post_ra>
